<compile_context>
chip_gen: v5e
topology: v5e:2x2
jax: 0.10.0
libtpu: 0.0.40
codegen_flags: <defaults>
</compile_context>

<pallas_src>
import jax
import jax.numpy as jnp
from jax import lax
from jax.experimental import pallas as pl
from jax.experimental.pallas import tpu as pltpu

_BN_EPS = 1e-5
_LANES = 128


def _round_up(x, m):
    return (x + m - 1) // m * m


# ---------------------------------------------------------------------------
# Pallas kernel: implicit-GEMM conv + folded BN shift + activation
#                (+ optional fused 1x1 conv + tanh head)
# ---------------------------------------------------------------------------
def _make_conv_kernel(n_phases, taps, wp, m, act, fused):
    """taps: tuple of (phase_index, row_shift qy, col_shift qx).

    Each phase ref holds a row-major-flattened (Hp*Wp, Cin) padded image, so a
    tap's (qy, qx) spatial shift is a single contiguous row window of length m
    starting at qy*wp + qx (garbage spills only into padded columns that the
    wrapper slices off)."""

    def kernel(*refs):
        phase_refs = refs[:n_phases]
        w_ref = refs[n_phases]
        s_ref = refs[n_phases + 1]
        nxt = n_phases + 2
        if fused:
            w2_ref, s2_ref = refs[nxt], refs[nxt + 1]
            nxt += 2
        o_ref = refs[nxt]

        cpad = w_ref.shape[-1]
        acc = jnp.zeros((m, cpad), jnp.float32)
        for t, (p_i, qy, qx) in enumerate(taps):
            xs = phase_refs[p_i][0, pl.ds(qy * wp + qx, m), :]   # (m, Cin) bf16
            acc = acc + jnp.dot(xs, w_ref[t],
                                preferred_element_type=jnp.float32)
        y = acc + s_ref[...]                     # folded BN/bias shift (f32)
        if act == "relu":
            y = jnp.maximum(y, 0.0)
        elif act == "tanh":
            y = jnp.tanh(y)
        if fused:                                # fused final 1x1 conv + tanh
            y = jnp.dot(y.astype(w2_ref.dtype), w2_ref[...],
                        preferred_element_type=jnp.float32) + s2_ref[...]
            y = jnp.tanh(y)
        o_ref[0] = y.astype(o_ref.dtype)

    return kernel


def _conv_pallas(phases, wmat, shift, taps, *, hout, wp, act, out_dtype,
                 w2=None, s2=None):
    n, flat, cin = phases[0].shape
    m = hout * wp
    cpad = wmat.shape[-1]
    fused = w2 is not None
    kernel = _make_conv_kernel(len(phases), taps, wp, m, act, fused)

    in_specs = [pl.BlockSpec((1, flat, cin), lambda b: (b, 0, 0))
                for _ in phases]
    in_specs += [pl.BlockSpec(wmat.shape, lambda b: (0, 0, 0)),
                 pl.BlockSpec(shift.shape, lambda b: (0, 0))]
    args = list(phases) + [wmat, shift]
    if fused:
        in_specs += [pl.BlockSpec(w2.shape, lambda b: (0, 0)),
                     pl.BlockSpec(s2.shape, lambda b: (0, 0))]
        args += [w2, s2]

    return pl.pallas_call(
        kernel,
        out_shape=jax.ShapeDtypeStruct((n, m, cpad), out_dtype),
        grid=(n,),
        in_specs=in_specs,
        out_specs=pl.BlockSpec((1, m, cpad), lambda b: (b, 0, 0)),
        compiler_params=pltpu.CompilerParams(
            dimension_semantics=("parallel",),
            vmem_limit_bytes=32 * 1024 * 1024),
    )(*args)


# ---------------------------------------------------------------------------
# Wrapper-side layout plumbing (padding / dilation / phase split / BN folding)
# ---------------------------------------------------------------------------
def _fold_bn(w_hwio, bias, gamma, beta, rm, rv, *, cin_pad, cout_pad, cdt):
    """Fold BN scale into the conv weights, (bias + BN shift) into one shift.

    Returns w (k*k, cin_pad, cout_pad) in the MXU dtype and shift (1, cout_pad)
    in f32. Zero padding guarantees padded output lanes stay exactly 0."""
    scale = gamma / jnp.sqrt(rv + _BN_EPS)                       # (Cout,)
    k0, k1, cin, cout = w_hwio.shape
    w = (w_hwio * scale).reshape(k0 * k1, cin, cout)
    w = jnp.pad(w, ((0, 0), (0, cin_pad - cin), (0, cout_pad - cout)))
    shift = (beta + scale * (bias - rm)).reshape(1, cout)
    shift = jnp.pad(shift, ((0, 0), (0, cout_pad - cout)))
    return w.astype(cdt), shift.astype(jnp.float32)


def _enc_layer(x, p, cdt):
    """Conv2d(k=5, s=2, p=2) + folded BN + ReLU (Dropout2d = identity, eval)."""
    n, h, w, cin = x.shape                       # cin already padded (8 / 128)
    assert h % 2 == 0 and w % 2 == 0
    hout, wout = h // 2, w // 2
    wp, hp = wout + 2, hout + 3                  # phase width / height (+1 spare row)
    w_hwio = jnp.transpose(p["w"], (2, 3, 1, 0))                 # OIHW -> HWIO
    wmat, shift = _fold_bn(w_hwio, p["b"], p["gamma"], p["beta"], p["rm"],
                           p["rv"], cin_pad=cin, cout_pad=_LANES, cdt=cdt)
    xpad = jnp.pad(x, ((0, 0), (2, 2), (2, 2), (0, 0)))
    phases = []
    for py in range(2):
        for px in range(2):
            ph = xpad[:, py::2, px::2, :]                        # (n, hout+2, wout+2, cin)
            ph = jnp.pad(ph, ((0, 0), (0, 1), (0, 0), (0, 0)))   # spare zero row
            phases.append(ph.reshape(n, hp * wp, cin))
    taps = tuple(((dy % 2) * 2 + (dx % 2), dy // 2, dx // 2)
                 for dy in range(5) for dx in range(5))
    out = _conv_pallas(phases, wmat, shift, taps, hout=hout, wp=wp,
                       act="relu", out_dtype=cdt)
    return out.reshape(n, hout, wp, _LANES)[:, :, :wout, :]


def _dec_layer(x, p, cdt, final_p=None):
    """ConvTranspose2d(k=3, s=2, p=1, op=1) + folded BN + ReLU, optionally
    fused with the final Conv2d(1x1) + Tanh head."""
    n, h, w, cin = x.shape
    hout, wout = 2 * h, 2 * w
    wp, hp = wout + 2, hout + 3
    # torch ConvTranspose2d weight (Cin, Cout, k, k) -> spatially flipped HWIO.
    w_hwio = jnp.transpose(p["w"], (2, 3, 0, 1))[::-1, ::-1]
    wmat, shift = _fold_bn(w_hwio, p["b"], p["gamma"], p["beta"], p["rm"],
                           p["rv"], cin_pad=cin, cout_pad=_LANES, cdt=cdt)
    # Zero-dilate by the stride, pad (k-1-p, k-1-p+op) (+1 spare zero row) so a
    # stride-1 VALID conv with the flipped kernel reproduces the ConvTranspose.
    zero = jnp.array(0, x.dtype)
    xd = lax.pad(x, zero, ((0, 0, 0), (1, 3, 1), (1, 2, 1), (0, 0, 0)))
    phases = [xd.reshape(n, hp * wp, cin)]
    taps = tuple((0, dy, dx) for dy in range(3) for dx in range(3))

    w2 = s2 = None
    out_dtype = cdt
    if final_p is not None:
        cout_real = final_p["w"].shape[0]
        w2_full = jnp.transpose(final_p["w"][:, :, 0, 0])        # (Cin_1x1, 3)
        w2 = (jnp.zeros((_LANES, _LANES), jnp.float32)
              .at[:w2_full.shape[0], :cout_real].set(w2_full).astype(cdt))
        s2 = jnp.zeros((1, _LANES), jnp.float32).at[0, :cout_real].set(final_p["b"])
        out_dtype = jnp.float32

    out = _conv_pallas(phases, wmat, shift, taps, hout=hout, wp=wp,
                       act="relu", out_dtype=out_dtype, w2=w2, s2=s2)
    return out.reshape(n, hout, wp, _LANES)[:, :, :wout, :]


def basic_ag_forward(x_nchw, params, return_feat=False,
                     compute_dtype=jnp.bfloat16):
    """Inference forward pass of BasicAG. NCHW in / NCHW out (torch layout)."""
    n, c, _, _ = x_nchw.shape
    x = jnp.transpose(x_nchw, (0, 2, 3, 1))                      # -> NHWC
    cin0 = _round_up(c, 8)                    # lane/sublane-friendly first Cin
    x = jnp.pad(x, ((0, 0), (0, 0), (0, 0), (0, cin0 - c))).astype(compute_dtype)

    h = x
    # encoder: Conv5x5/s2 -> BN -> Dropout2d -> ReLU (Dropout2d = id in eval)
    # TODO(synk): training-mode Dropout2d (per-channel dropout RNG) not implemented.
    for p in params["encoder"]:
        h = _enc_layer(h, p, compute_dtype)
    feat = h
    # decoder: 3x [ConvTranspose3x3/s2 -> BN -> ReLU]; last one fuses 1x1+Tanh.
    dec = params["decoder"]
    for p in dec[:-1]:
        h = _dec_layer(h, p, compute_dtype)
    out = _dec_layer(h, dec[-1], compute_dtype, final_p=params["final"])
    out = out[..., :params["final"]["w"].shape[0]]               # un-pad channels
    out_nchw = jnp.transpose(out, (0, 3, 1, 2)).astype(jnp.float32)
    if return_feat:
        c_feat = params["encoder"][-1]["w"].shape[0]
        feat_nchw = jnp.transpose(feat[..., :c_feat], (0, 3, 1, 2)).astype(jnp.float32)
        return feat_nchw, out_nchw
    return out_nchw


# ---------------------------------------------------------------------------
# Pure-JAX reference (correctness check only; precision scoped locally)
# ---------------------------------------------------------------------------
def basic_ag_ref(x_nchw, params):
    hi = lax.Precision.HIGHEST
    x = jnp.transpose(x_nchw, (0, 2, 3, 1)).astype(jnp.float32)

    def bn(y, p):
        scale = p["gamma"] / jnp.sqrt(p["rv"] + _BN_EPS)
        return (y - p["rm"]) * scale + p["beta"]

    h = x
    for p in params["encoder"]:
        w_hwio = jnp.transpose(p["w"], (2, 3, 1, 0))
        h = lax.conv_general_dilated(
            h, w_hwio, (2, 2), ((2, 2), (2, 2)),
            dimension_numbers=("NHWC", "HWIO", "NHWC"), precision=hi)
        h = jnp.maximum(bn(h + p["b"], p), 0.0)
    for p in params["decoder"]:
        w_hwio = jnp.transpose(p["w"], (2, 3, 0, 1))[::-1, ::-1]
        h = lax.conv_general_dilated(
            h, w_hwio, (1, 1), ((1, 2), (1, 2)), lhs_dilation=(2, 2),
            dimension_numbers=("NHWC", "HWIO", "NHWC"), precision=hi)
        h = jnp.maximum(bn(h + p["b"], p), 0.0)
    pf = params["final"]
    w2d = pf["w"][:, :, 0, 0]                                    # (Cout, Cin)
    h = jnp.tanh(jnp.einsum("nhwc,oc->nhwo", h, w2d, precision=hi) + pf["b"])
    return jnp.transpose(h, (0, 3, 1, 2))


# ---------------------------------------------------------------------------
if __name__ == "__main__":
    ngf = 16
    n, c, hgt, wid = 2, 3, 16, 16            # spatial must be divisible by 8

    key = jax.random.PRNGKey(0)
    keys = jax.random.split(key, 9)

    def conv_p(k, cin, cout, ksz):
        ks = jax.random.split(k, 6)
        return dict(
            w=0.1 * jax.random.normal(ks[0], (cout, cin, ksz, ksz), jnp.float32),
            b=0.1 * jax.random.normal(ks[1], (cout,), jnp.float32),
            gamma=jax.random.uniform(ks[2], (cout,), jnp.float32, 0.5, 1.5),
            beta=0.1 * jax.random.normal(ks[3], (cout,), jnp.float32),
            rm=0.1 * jax.random.normal(ks[4], (cout,), jnp.float32),
            rv=jax.random.uniform(ks[5], (cout,), jnp.float32, 0.5, 1.5),
        )

    def convt_p(k, cin, cout, ksz):
        ks = jax.random.split(k, 6)
        return dict(
            w=0.1 * jax.random.normal(ks[0], (cin, cout, ksz, ksz), jnp.float32),
            b=0.1 * jax.random.normal(ks[1], (cout,), jnp.float32),
            gamma=jax.random.uniform(ks[2], (cout,), jnp.float32, 0.5, 1.5),
            beta=0.1 * jax.random.normal(ks[3], (cout,), jnp.float32),
            rm=0.1 * jax.random.normal(ks[4], (cout,), jnp.float32),
            rv=jax.random.uniform(ks[5], (cout,), jnp.float32, 0.5, 1.5),
        )

    x = jax.random.normal(keys[0], (n, c, hgt, wid), jnp.float32)
    params = {
        "encoder": [
            conv_p(keys[1], 3, ngf, 5),
            conv_p(keys[2], ngf, 2 * ngf, 5),
            conv_p(keys[3], 2 * ngf, 4 * ngf, 5),
        ],
        "decoder": [
            convt_p(keys[4], 4 * ngf, 2 * ngf, 3),
            convt_p(keys[5], 2 * ngf, ngf, 3),
            convt_p(keys[6], ngf, ngf, 3),
        ],
        "final": dict(
            w=0.1 * jax.random.normal(keys[7], (3, ngf, 1, 1), jnp.float32),
            b=0.1 * jax.random.normal(keys[8], (3,), jnp.float32),
        ),
    }

    forward = jax.jit(basic_ag_forward)
    out = jax.block_until_ready(forward(x, params))
    ref = jax.block_until_ready(basic_ag_ref(x, params))

    assert out.shape == (n, 3, hgt, wid)
    err = float(jnp.max(jnp.abs(out - ref)))
    # bf16 MXU operands + bf16 inter-layer activations vs. an f32 reference;
    # a real bug (wrong tap / BN fold / flip) would blow far past this bound.
    assert err < 5e-2, f"mismatch vs reference: max|diff|={err:.4f}"
    print("KERNEL_OK")
</pallas_src>

<mosaic_0001>
module attributes {stable_mosaic.version = 11 : i64} {
  func.func @kernel(%arg0: i32, %arg1: memref<1x110x8xbf16, #tpu.memory_space<vmem>>, %arg2: memref<1x110x8xbf16, #tpu.memory_space<vmem>>, %arg3: memref<1x110x8xbf16, #tpu.memory_space<vmem>>, %arg4: memref<1x110x8xbf16, #tpu.memory_space<vmem>>, %arg5: memref<25x8x128xbf16, #tpu.memory_space<vmem>>, %arg6: memref<1x128xf32, #tpu.memory_space<vmem>>, %arg7: memref<1x80x128xbf16, #tpu.memory_space<vmem>>) attributes {dimension_semantics = [#tpu.dimension_semantics<parallel>], iteration_bounds = array<i64: 2>, scalar_prefetch = 0 : i64, scratch_operands = 0 : i64, tpu.core_type = #tpu.core_type<tc>, window_params = [{transform_indices = @transform_0, window_bounds = array<i64: 1, 110, 8>}, {transform_indices = @transform_1, window_bounds = array<i64: 1, 110, 8>}, {transform_indices = @transform_2, window_bounds = array<i64: 1, 110, 8>}, {transform_indices = @transform_3, window_bounds = array<i64: 1, 110, 8>}, {pipeline_mode = #tpu.pipeline_mode<synchronous>, transform_indices = @transform_4, window_bounds = array<i64: 25, 8, 128>}, {pipeline_mode = #tpu.pipeline_mode<synchronous>, transform_indices = @transform_5, window_bounds = array<i64: 1, 128>}, {transform_indices = @transform_6, window_bounds = array<i64: 1, 80, 128>}]} {
    %cst = arith.constant 0.000000e+00 : f32
    %0 = vector.broadcast %cst : f32 to vector<80x128xf32>
    %c0 = arith.constant 0 : index
    %c0_0 = arith.constant 0 : index
    %c0_1 = arith.constant 0 : index
    %1 = vector.load %arg1[%c0, %c0_0, %c0_1] : memref<1x110x8xbf16, #tpu.memory_space<vmem>>, vector<1x80x8xbf16>
    %2 = vector.shape_cast %1 : vector<1x80x8xbf16> to vector<80x8xbf16>
    %c0_2 = arith.constant 0 : index
    %c0_3 = arith.constant 0 : index
    %c0_4 = arith.constant 0 : index
    %3 = vector.load %arg5[%c0_2, %c0_3, %c0_4] : memref<25x8x128xbf16, #tpu.memory_space<vmem>>, vector<1x8x128xbf16>
    %4 = vector.shape_cast %3 : vector<1x8x128xbf16> to vector<8x128xbf16>
    %cst_5 = arith.constant dense<0.000000e+00> : vector<80x128xf32>
    %5 = tpu.matmul %2, %4, %cst_5 {dimension_numbers = #tpu.dot_dimension_numbers<[1], [0], [0], [1], [0, 0, 1, 1], [], []>} : vector<80x8xbf16>, vector<8x128xbf16>, vector<80x128xf32> -> vector<80x128xf32>
    %6 = arith.addf %0, %5 : vector<80x128xf32>
    %c0_6 = arith.constant 0 : index
    %c0_7 = arith.constant 0 : index
    %c0_8 = arith.constant 0 : index
    %7 = vector.load %arg2[%c0_6, %c0_7, %c0_8] : memref<1x110x8xbf16, #tpu.memory_space<vmem>>, vector<1x80x8xbf16>
    %8 = vector.shape_cast %7 : vector<1x80x8xbf16> to vector<80x8xbf16>
    %c1 = arith.constant 1 : index
    %c0_9 = arith.constant 0 : index
    %c0_10 = arith.constant 0 : index
    %9 = vector.load %arg5[%c1, %c0_9, %c0_10] : memref<25x8x128xbf16, #tpu.memory_space<vmem>>, vector<1x8x128xbf16>
    %10 = vector.shape_cast %9 : vector<1x8x128xbf16> to vector<8x128xbf16>
    %cst_11 = arith.constant dense<0.000000e+00> : vector<80x128xf32>
    %11 = tpu.matmul %8, %10, %cst_11 {dimension_numbers = #tpu.dot_dimension_numbers<[1], [0], [0], [1], [0, 0, 1, 1], [], []>} : vector<80x8xbf16>, vector<8x128xbf16>, vector<80x128xf32> -> vector<80x128xf32>
    %12 = arith.addf %6, %11 : vector<80x128xf32>
    %c0_12 = arith.constant 0 : index
    %c1_13 = arith.constant 1 : index
    %c0_14 = arith.constant 0 : index
    %13 = vector.load %arg1[%c0_12, %c1_13, %c0_14] : memref<1x110x8xbf16, #tpu.memory_space<vmem>>, vector<1x80x8xbf16>
    %14 = vector.shape_cast %13 : vector<1x80x8xbf16> to vector<80x8xbf16>
    %c2 = arith.constant 2 : index
    %c0_15 = arith.constant 0 : index
    %c0_16 = arith.constant 0 : index
    %15 = vector.load %arg5[%c2, %c0_15, %c0_16] : memref<25x8x128xbf16, #tpu.memory_space<vmem>>, vector<1x8x128xbf16>
    %16 = vector.shape_cast %15 : vector<1x8x128xbf16> to vector<8x128xbf16>
    %cst_17 = arith.constant dense<0.000000e+00> : vector<80x128xf32>
    %17 = tpu.matmul %14, %16, %cst_17 {dimension_numbers = #tpu.dot_dimension_numbers<[1], [0], [0], [1], [0, 0, 1, 1], [], []>} : vector<80x8xbf16>, vector<8x128xbf16>, vector<80x128xf32> -> vector<80x128xf32>
    %18 = arith.addf %12, %17 : vector<80x128xf32>
    %c0_18 = arith.constant 0 : index
    %c1_19 = arith.constant 1 : index
    %c0_20 = arith.constant 0 : index
    %19 = vector.load %arg2[%c0_18, %c1_19, %c0_20] : memref<1x110x8xbf16, #tpu.memory_space<vmem>>, vector<1x80x8xbf16>
    %20 = vector.shape_cast %19 : vector<1x80x8xbf16> to vector<80x8xbf16>
    %c3 = arith.constant 3 : index
    %c0_21 = arith.constant 0 : index
    %c0_22 = arith.constant 0 : index
    %21 = vector.load %arg5[%c3, %c0_21, %c0_22] : memref<25x8x128xbf16, #tpu.memory_space<vmem>>, vector<1x8x128xbf16>
    %22 = vector.shape_cast %21 : vector<1x8x128xbf16> to vector<8x128xbf16>
    %cst_23 = arith.constant dense<0.000000e+00> : vector<80x128xf32>
    %23 = tpu.matmul %20, %22, %cst_23 {dimension_numbers = #tpu.dot_dimension_numbers<[1], [0], [0], [1], [0, 0, 1, 1], [], []>} : vector<80x8xbf16>, vector<8x128xbf16>, vector<80x128xf32> -> vector<80x128xf32>
    %24 = arith.addf %18, %23 : vector<80x128xf32>
    %c0_24 = arith.constant 0 : index
    %c2_25 = arith.constant 2 : index
    %c0_26 = arith.constant 0 : index
    %25 = vector.load %arg1[%c0_24, %c2_25, %c0_26] : memref<1x110x8xbf16, #tpu.memory_space<vmem>>, vector<1x80x8xbf16>
    %26 = vector.shape_cast %25 : vector<1x80x8xbf16> to vector<80x8xbf16>
    %c4 = arith.constant 4 : index
    %c0_27 = arith.constant 0 : index
    %c0_28 = arith.constant 0 : index
    %27 = vector.load %arg5[%c4, %c0_27, %c0_28] : memref<25x8x128xbf16, #tpu.memory_space<vmem>>, vector<1x8x128xbf16>
    %28 = vector.shape_cast %27 : vector<1x8x128xbf16> to vector<8x128xbf16>
    %cst_29 = arith.constant dense<0.000000e+00> : vector<80x128xf32>
    %29 = tpu.matmul %26, %28, %cst_29 {dimension_numbers = #tpu.dot_dimension_numbers<[1], [0], [0], [1], [0, 0, 1, 1], [], []>} : vector<80x8xbf16>, vector<8x128xbf16>, vector<80x128xf32> -> vector<80x128xf32>
    %30 = arith.addf %24, %29 : vector<80x128xf32>
    %c0_30 = arith.constant 0 : index
    %c0_31 = arith.constant 0 : index
    %c0_32 = arith.constant 0 : index
    %31 = vector.load %arg3[%c0_30, %c0_31, %c0_32] : memref<1x110x8xbf16, #tpu.memory_space<vmem>>, vector<1x80x8xbf16>
    %32 = vector.shape_cast %31 : vector<1x80x8xbf16> to vector<80x8xbf16>
    %c5 = arith.constant 5 : index
    %c0_33 = arith.constant 0 : index
    %c0_34 = arith.constant 0 : index
    %33 = vector.load %arg5[%c5, %c0_33, %c0_34] : memref<25x8x128xbf16, #tpu.memory_space<vmem>>, vector<1x8x128xbf16>
    %34 = vector.shape_cast %33 : vector<1x8x128xbf16> to vector<8x128xbf16>
    %cst_35 = arith.constant dense<0.000000e+00> : vector<80x128xf32>
    %35 = tpu.matmul %32, %34, %cst_35 {dimension_numbers = #tpu.dot_dimension_numbers<[1], [0], [0], [1], [0, 0, 1, 1], [], []>} : vector<80x8xbf16>, vector<8x128xbf16>, vector<80x128xf32> -> vector<80x128xf32>
    %36 = arith.addf %30, %35 : vector<80x128xf32>
    %c0_36 = arith.constant 0 : index
    %c0_37 = arith.constant 0 : index
    %c0_38 = arith.constant 0 : index
    %37 = vector.load %arg4[%c0_36, %c0_37, %c0_38] : memref<1x110x8xbf16, #tpu.memory_space<vmem>>, vector<1x80x8xbf16>
    %38 = vector.shape_cast %37 : vector<1x80x8xbf16> to vector<80x8xbf16>
    %c6 = arith.constant 6 : index
    %c0_39 = arith.constant 0 : index
    %c0_40 = arith.constant 0 : index
    %39 = vector.load %arg5[%c6, %c0_39, %c0_40] : memref<25x8x128xbf16, #tpu.memory_space<vmem>>, vector<1x8x128xbf16>
    %40 = vector.shape_cast %39 : vector<1x8x128xbf16> to vector<8x128xbf16>
    %cst_41 = arith.constant dense<0.000000e+00> : vector<80x128xf32>
    %41 = tpu.matmul %38, %40, %cst_41 {dimension_numbers = #tpu.dot_dimension_numbers<[1], [0], [0], [1], [0, 0, 1, 1], [], []>} : vector<80x8xbf16>, vector<8x128xbf16>, vector<80x128xf32> -> vector<80x128xf32>
    %42 = arith.addf %36, %41 : vector<80x128xf32>
    %c0_42 = arith.constant 0 : index
    %c1_43 = arith.constant 1 : index
    %c0_44 = arith.constant 0 : index
    %43 = vector.load %arg3[%c0_42, %c1_43, %c0_44] : memref<1x110x8xbf16, #tpu.memory_space<vmem>>, vector<1x80x8xbf16>
    %44 = vector.shape_cast %43 : vector<1x80x8xbf16> to vector<80x8xbf16>
    %c7 = arith.constant 7 : index
    %c0_45 = arith.constant 0 : index
    %c0_46 = arith.constant 0 : index
    %45 = vector.load %arg5[%c7, %c0_45, %c0_46] : memref<25x8x128xbf16, #tpu.memory_space<vmem>>, vector<1x8x128xbf16>
    %46 = vector.shape_cast %45 : vector<1x8x128xbf16> to vector<8x128xbf16>
    %cst_47 = arith.constant dense<0.000000e+00> : vector<80x128xf32>
    %47 = tpu.matmul %44, %46, %cst_47 {dimension_numbers = #tpu.dot_dimension_numbers<[1], [0], [0], [1], [0, 0, 1, 1], [], []>} : vector<80x8xbf16>, vector<8x128xbf16>, vector<80x128xf32> -> vector<80x128xf32>
    %48 = arith.addf %42, %47 : vector<80x128xf32>
    %c0_48 = arith.constant 0 : index
    %c1_49 = arith.constant 1 : index
    %c0_50 = arith.constant 0 : index
    %49 = vector.load %arg4[%c0_48, %c1_49, %c0_50] : memref<1x110x8xbf16, #tpu.memory_space<vmem>>, vector<1x80x8xbf16>
    %50 = vector.shape_cast %49 : vector<1x80x8xbf16> to vector<80x8xbf16>
    %c8 = arith.constant 8 : index
    %c0_51 = arith.constant 0 : index
    %c0_52 = arith.constant 0 : index
    %51 = vector.load %arg5[%c8, %c0_51, %c0_52] : memref<25x8x128xbf16, #tpu.memory_space<vmem>>, vector<1x8x128xbf16>
    %52 = vector.shape_cast %51 : vector<1x8x128xbf16> to vector<8x128xbf16>
    %cst_53 = arith.constant dense<0.000000e+00> : vector<80x128xf32>
    %53 = tpu.matmul %50, %52, %cst_53 {dimension_numbers = #tpu.dot_dimension_numbers<[1], [0], [0], [1], [0, 0, 1, 1], [], []>} : vector<80x8xbf16>, vector<8x128xbf16>, vector<80x128xf32> -> vector<80x128xf32>
    %54 = arith.addf %48, %53 : vector<80x128xf32>
    %c0_54 = arith.constant 0 : index
    %c2_55 = arith.constant 2 : index
    %c0_56 = arith.constant 0 : index
    %55 = vector.load %arg3[%c0_54, %c2_55, %c0_56] : memref<1x110x8xbf16, #tpu.memory_space<vmem>>, vector<1x80x8xbf16>
    %56 = vector.shape_cast %55 : vector<1x80x8xbf16> to vector<80x8xbf16>
    %c9 = arith.constant 9 : index
    %c0_57 = arith.constant 0 : index
    %c0_58 = arith.constant 0 : index
    %57 = vector.load %arg5[%c9, %c0_57, %c0_58] : memref<25x8x128xbf16, #tpu.memory_space<vmem>>, vector<1x8x128xbf16>
    %58 = vector.shape_cast %57 : vector<1x8x128xbf16> to vector<8x128xbf16>
    %cst_59 = arith.constant dense<0.000000e+00> : vector<80x128xf32>
    %59 = tpu.matmul %56, %58, %cst_59 {dimension_numbers = #tpu.dot_dimension_numbers<[1], [0], [0], [1], [0, 0, 1, 1], [], []>} : vector<80x8xbf16>, vector<8x128xbf16>, vector<80x128xf32> -> vector<80x128xf32>
    %60 = arith.addf %54, %59 : vector<80x128xf32>
    %c0_60 = arith.constant 0 : index
    %c10 = arith.constant 10 : index
    %c0_61 = arith.constant 0 : index
    %61 = vector.load %arg1[%c0_60, %c10, %c0_61] : memref<1x110x8xbf16, #tpu.memory_space<vmem>>, vector<1x80x8xbf16>
    %62 = vector.shape_cast %61 : vector<1x80x8xbf16> to vector<80x8xbf16>
    %c10_62 = arith.constant 10 : index
    %c0_63 = arith.constant 0 : index
    %c0_64 = arith.constant 0 : index
    %63 = vector.load %arg5[%c10_62, %c0_63, %c0_64] : memref<25x8x128xbf16, #tpu.memory_space<vmem>>, vector<1x8x128xbf16>
    %64 = vector.shape_cast %63 : vector<1x8x128xbf16> to vector<8x128xbf16>
    %cst_65 = arith.constant dense<0.000000e+00> : vector<80x128xf32>
    %65 = tpu.matmul %62, %64, %cst_65 {dimension_numbers = #tpu.dot_dimension_numbers<[1], [0], [0], [1], [0, 0, 1, 1], [], []>} : vector<80x8xbf16>, vector<8x128xbf16>, vector<80x128xf32> -> vector<80x128xf32>
    %66 = arith.addf %60, %65 : vector<80x128xf32>
    %c0_66 = arith.constant 0 : index
    %c10_67 = arith.constant 10 : index
    %c0_68 = arith.constant 0 : index
    %67 = vector.load %arg2[%c0_66, %c10_67, %c0_68] : memref<1x110x8xbf16, #tpu.memory_space<vmem>>, vector<1x80x8xbf16>
    %68 = vector.shape_cast %67 : vector<1x80x8xbf16> to vector<80x8xbf16>
    %c11 = arith.constant 11 : index
    %c0_69 = arith.constant 0 : index
    %c0_70 = arith.constant 0 : index
    %69 = vector.load %arg5[%c11, %c0_69, %c0_70] : memref<25x8x128xbf16, #tpu.memory_space<vmem>>, vector<1x8x128xbf16>
    %70 = vector.shape_cast %69 : vector<1x8x128xbf16> to vector<8x128xbf16>
    %cst_71 = arith.constant dense<0.000000e+00> : vector<80x128xf32>
    %71 = tpu.matmul %68, %70, %cst_71 {dimension_numbers = #tpu.dot_dimension_numbers<[1], [0], [0], [1], [0, 0, 1, 1], [], []>} : vector<80x8xbf16>, vector<8x128xbf16>, vector<80x128xf32> -> vector<80x128xf32>
    %72 = arith.addf %66, %71 : vector<80x128xf32>
    %c0_72 = arith.constant 0 : index
    %c11_73 = arith.constant 11 : index
    %c0_74 = arith.constant 0 : index
    %73 = vector.load %arg1[%c0_72, %c11_73, %c0_74] : memref<1x110x8xbf16, #tpu.memory_space<vmem>>, vector<1x80x8xbf16>
    %74 = vector.shape_cast %73 : vector<1x80x8xbf16> to vector<80x8xbf16>
    %c12 = arith.constant 12 : index
    %c0_75 = arith.constant 0 : index
    %c0_76 = arith.constant 0 : index
    %75 = vector.load %arg5[%c12, %c0_75, %c0_76] : memref<25x8x128xbf16, #tpu.memory_space<vmem>>, vector<1x8x128xbf16>
    %76 = vector.shape_cast %75 : vector<1x8x128xbf16> to vector<8x128xbf16>
    %cst_77 = arith.constant dense<0.000000e+00> : vector<80x128xf32>
    %77 = tpu.matmul %74, %76, %cst_77 {dimension_numbers = #tpu.dot_dimension_numbers<[1], [0], [0], [1], [0, 0, 1, 1], [], []>} : vector<80x8xbf16>, vector<8x128xbf16>, vector<80x128xf32> -> vector<80x128xf32>
    %78 = arith.addf %72, %77 : vector<80x128xf32>
    %c0_78 = arith.constant 0 : index
    %c11_79 = arith.constant 11 : index
    %c0_80 = arith.constant 0 : index
    %79 = vector.load %arg2[%c0_78, %c11_79, %c0_80] : memref<1x110x8xbf16, #tpu.memory_space<vmem>>, vector<1x80x8xbf16>
    %80 = vector.shape_cast %79 : vector<1x80x8xbf16> to vector<80x8xbf16>
    %c13 = arith.constant 13 : index
    %c0_81 = arith.constant 0 : index
    %c0_82 = arith.constant 0 : index
    %81 = vector.load %arg5[%c13, %c0_81, %c0_82] : memref<25x8x128xbf16, #tpu.memory_space<vmem>>, vector<1x8x128xbf16>
    %82 = vector.shape_cast %81 : vector<1x8x128xbf16> to vector<8x128xbf16>
    %cst_83 = arith.constant dense<0.000000e+00> : vector<80x128xf32>
    %83 = tpu.matmul %80, %82, %cst_83 {dimension_numbers = #tpu.dot_dimension_numbers<[1], [0], [0], [1], [0, 0, 1, 1], [], []>} : vector<80x8xbf16>, vector<8x128xbf16>, vector<80x128xf32> -> vector<80x128xf32>
    %84 = arith.addf %78, %83 : vector<80x128xf32>
    %c0_84 = arith.constant 0 : index
    %c12_85 = arith.constant 12 : index
    %c0_86 = arith.constant 0 : index
    %85 = vector.load %arg1[%c0_84, %c12_85, %c0_86] : memref<1x110x8xbf16, #tpu.memory_space<vmem>>, vector<1x80x8xbf16>
    %86 = vector.shape_cast %85 : vector<1x80x8xbf16> to vector<80x8xbf16>
    %c14 = arith.constant 14 : index
    %c0_87 = arith.constant 0 : index
    %c0_88 = arith.constant 0 : index
    %87 = vector.load %arg5[%c14, %c0_87, %c0_88] : memref<25x8x128xbf16, #tpu.memory_space<vmem>>, vector<1x8x128xbf16>
    %88 = vector.shape_cast %87 : vector<1x8x128xbf16> to vector<8x128xbf16>
    %cst_89 = arith.constant dense<0.000000e+00> : vector<80x128xf32>
    %89 = tpu.matmul %86, %88, %cst_89 {dimension_numbers = #tpu.dot_dimension_numbers<[1], [0], [0], [1], [0, 0, 1, 1], [], []>} : vector<80x8xbf16>, vector<8x128xbf16>, vector<80x128xf32> -> vector<80x128xf32>
    %90 = arith.addf %84, %89 : vector<80x128xf32>
    %c0_90 = arith.constant 0 : index
    %c10_91 = arith.constant 10 : index
    %c0_92 = arith.constant 0 : index
    %91 = vector.load %arg3[%c0_90, %c10_91, %c0_92] : memref<1x110x8xbf16, #tpu.memory_space<vmem>>, vector<1x80x8xbf16>
    %92 = vector.shape_cast %91 : vector<1x80x8xbf16> to vector<80x8xbf16>
    %c15 = arith.constant 15 : index
    %c0_93 = arith.constant 0 : index
    %c0_94 = arith.constant 0 : index
    %93 = vector.load %arg5[%c15, %c0_93, %c0_94] : memref<25x8x128xbf16, #tpu.memory_space<vmem>>, vector<1x8x128xbf16>
    %94 = vector.shape_cast %93 : vector<1x8x128xbf16> to vector<8x128xbf16>
    %cst_95 = arith.constant dense<0.000000e+00> : vector<80x128xf32>
    %95 = tpu.matmul %92, %94, %cst_95 {dimension_numbers = #tpu.dot_dimension_numbers<[1], [0], [0], [1], [0, 0, 1, 1], [], []>} : vector<80x8xbf16>, vector<8x128xbf16>, vector<80x128xf32> -> vector<80x128xf32>
    %96 = arith.addf %90, %95 : vector<80x128xf32>
    %c0_96 = arith.constant 0 : index
    %c10_97 = arith.constant 10 : index
    %c0_98 = arith.constant 0 : index
    %97 = vector.load %arg4[%c0_96, %c10_97, %c0_98] : memref<1x110x8xbf16, #tpu.memory_space<vmem>>, vector<1x80x8xbf16>
    %98 = vector.shape_cast %97 : vector<1x80x8xbf16> to vector<80x8xbf16>
    %c16 = arith.constant 16 : index
    %c0_99 = arith.constant 0 : index
    %c0_100 = arith.constant 0 : index
    %99 = vector.load %arg5[%c16, %c0_99, %c0_100] : memref<25x8x128xbf16, #tpu.memory_space<vmem>>, vector<1x8x128xbf16>
    %100 = vector.shape_cast %99 : vector<1x8x128xbf16> to vector<8x128xbf16>
    %cst_101 = arith.constant dense<0.000000e+00> : vector<80x128xf32>
    %101 = tpu.matmul %98, %100, %cst_101 {dimension_numbers = #tpu.dot_dimension_numbers<[1], [0], [0], [1], [0, 0, 1, 1], [], []>} : vector<80x8xbf16>, vector<8x128xbf16>, vector<80x128xf32> -> vector<80x128xf32>
    %102 = arith.addf %96, %101 : vector<80x128xf32>
    %c0_102 = arith.constant 0 : index
    %c11_103 = arith.constant 11 : index
    %c0_104 = arith.constant 0 : index
    %103 = vector.load %arg3[%c0_102, %c11_103, %c0_104] : memref<1x110x8xbf16, #tpu.memory_space<vmem>>, vector<1x80x8xbf16>
    %104 = vector.shape_cast %103 : vector<1x80x8xbf16> to vector<80x8xbf16>
    %c17 = arith.constant 17 : index
    %c0_105 = arith.constant 0 : index
    %c0_106 = arith.constant 0 : index
    %105 = vector.load %arg5[%c17, %c0_105, %c0_106] : memref<25x8x128xbf16, #tpu.memory_space<vmem>>, vector<1x8x128xbf16>
    %106 = vector.shape_cast %105 : vector<1x8x128xbf16> to vector<8x128xbf16>
    %cst_107 = arith.constant dense<0.000000e+00> : vector<80x128xf32>
    %107 = tpu.matmul %104, %106, %cst_107 {dimension_numbers = #tpu.dot_dimension_numbers<[1], [0], [0], [1], [0, 0, 1, 1], [], []>} : vector<80x8xbf16>, vector<8x128xbf16>, vector<80x128xf32> -> vector<80x128xf32>
    %108 = arith.addf %102, %107 : vector<80x128xf32>
    %c0_108 = arith.constant 0 : index
    %c11_109 = arith.constant 11 : index
    %c0_110 = arith.constant 0 : index
    %109 = vector.load %arg4[%c0_108, %c11_109, %c0_110] : memref<1x110x8xbf16, #tpu.memory_space<vmem>>, vector<1x80x8xbf16>
    %110 = vector.shape_cast %109 : vector<1x80x8xbf16> to vector<80x8xbf16>
    %c18 = arith.constant 18 : index
    %c0_111 = arith.constant 0 : index
    %c0_112 = arith.constant 0 : index
    %111 = vector.load %arg5[%c18, %c0_111, %c0_112] : memref<25x8x128xbf16, #tpu.memory_space<vmem>>, vector<1x8x128xbf16>
    %112 = vector.shape_cast %111 : vector<1x8x128xbf16> to vector<8x128xbf16>
    %cst_113 = arith.constant dense<0.000000e+00> : vector<80x128xf32>
    %113 = tpu.matmul %110, %112, %cst_113 {dimension_numbers = #tpu.dot_dimension_numbers<[1], [0], [0], [1], [0, 0, 1, 1], [], []>} : vector<80x8xbf16>, vector<8x128xbf16>, vector<80x128xf32> -> vector<80x128xf32>
    %114 = arith.addf %108, %113 : vector<80x128xf32>
    %c0_114 = arith.constant 0 : index
    %c12_115 = arith.constant 12 : index
    %c0_116 = arith.constant 0 : index
    %115 = vector.load %arg3[%c0_114, %c12_115, %c0_116] : memref<1x110x8xbf16, #tpu.memory_space<vmem>>, vector<1x80x8xbf16>
    %116 = vector.shape_cast %115 : vector<1x80x8xbf16> to vector<80x8xbf16>
    %c19 = arith.constant 19 : index
    %c0_117 = arith.constant 0 : index
    %c0_118 = arith.constant 0 : index
    %117 = vector.load %arg5[%c19, %c0_117, %c0_118] : memref<25x8x128xbf16, #tpu.memory_space<vmem>>, vector<1x8x128xbf16>
    %118 = vector.shape_cast %117 : vector<1x8x128xbf16> to vector<8x128xbf16>
    %cst_119 = arith.constant dense<0.000000e+00> : vector<80x128xf32>
    %119 = tpu.matmul %116, %118, %cst_119 {dimension_numbers = #tpu.dot_dimension_numbers<[1], [0], [0], [1], [0, 0, 1, 1], [], []>} : vector<80x8xbf16>, vector<8x128xbf16>, vector<80x128xf32> -> vector<80x128xf32>
    %120 = arith.addf %114, %119 : vector<80x128xf32>
    %c0_120 = arith.constant 0 : index
    %c20 = arith.constant 20 : index
    %c0_121 = arith.constant 0 : index
    %121 = vector.load %arg1[%c0_120, %c20, %c0_121] : memref<1x110x8xbf16, #tpu.memory_space<vmem>>, vector<1x80x8xbf16>
    %122 = vector.shape_cast %121 : vector<1x80x8xbf16> to vector<80x8xbf16>
    %c20_122 = arith.constant 20 : index
    %c0_123 = arith.constant 0 : index
    %c0_124 = arith.constant 0 : index
    %123 = vector.load %arg5[%c20_122, %c0_123, %c0_124] : memref<25x8x128xbf16, #tpu.memory_space<vmem>>, vector<1x8x128xbf16>
    %124 = vector.shape_cast %123 : vector<1x8x128xbf16> to vector<8x128xbf16>
    %cst_125 = arith.constant dense<0.000000e+00> : vector<80x128xf32>
    %125 = tpu.matmul %122, %124, %cst_125 {dimension_numbers = #tpu.dot_dimension_numbers<[1], [0], [0], [1], [0, 0, 1, 1], [], []>} : vector<80x8xbf16>, vector<8x128xbf16>, vector<80x128xf32> -> vector<80x128xf32>
    %126 = arith.addf %120, %125 : vector<80x128xf32>
    %c0_126 = arith.constant 0 : index
    %c20_127 = arith.constant 20 : index
    %c0_128 = arith.constant 0 : index
    %127 = vector.load %arg2[%c0_126, %c20_127, %c0_128] : memref<1x110x8xbf16, #tpu.memory_space<vmem>>, vector<1x80x8xbf16>
    %128 = vector.shape_cast %127 : vector<1x80x8xbf16> to vector<80x8xbf16>
    %c21 = arith.constant 21 : index
    %c0_129 = arith.constant 0 : index
    %c0_130 = arith.constant 0 : index
    %129 = vector.load %arg5[%c21, %c0_129, %c0_130] : memref<25x8x128xbf16, #tpu.memory_space<vmem>>, vector<1x8x128xbf16>
    %130 = vector.shape_cast %129 : vector<1x8x128xbf16> to vector<8x128xbf16>
    %cst_131 = arith.constant dense<0.000000e+00> : vector<80x128xf32>
    %131 = tpu.matmul %128, %130, %cst_131 {dimension_numbers = #tpu.dot_dimension_numbers<[1], [0], [0], [1], [0, 0, 1, 1], [], []>} : vector<80x8xbf16>, vector<8x128xbf16>, vector<80x128xf32> -> vector<80x128xf32>
    %132 = arith.addf %126, %131 : vector<80x128xf32>
    %c0_132 = arith.constant 0 : index
    %c21_133 = arith.constant 21 : index
    %c0_134 = arith.constant 0 : index
    %133 = vector.load %arg1[%c0_132, %c21_133, %c0_134] : memref<1x110x8xbf16, #tpu.memory_space<vmem>>, vector<1x80x8xbf16>
    %134 = vector.shape_cast %133 : vector<1x80x8xbf16> to vector<80x8xbf16>
    %c22 = arith.constant 22 : index
    %c0_135 = arith.constant 0 : index
    %c0_136 = arith.constant 0 : index
    %135 = vector.load %arg5[%c22, %c0_135, %c0_136] : memref<25x8x128xbf16, #tpu.memory_space<vmem>>, vector<1x8x128xbf16>
    %136 = vector.shape_cast %135 : vector<1x8x128xbf16> to vector<8x128xbf16>
    %cst_137 = arith.constant dense<0.000000e+00> : vector<80x128xf32>
    %137 = tpu.matmul %134, %136, %cst_137 {dimension_numbers = #tpu.dot_dimension_numbers<[1], [0], [0], [1], [0, 0, 1, 1], [], []>} : vector<80x8xbf16>, vector<8x128xbf16>, vector<80x128xf32> -> vector<80x128xf32>
    %138 = arith.addf %132, %137 : vector<80x128xf32>
    %c0_138 = arith.constant 0 : index
    %c21_139 = arith.constant 21 : index
    %c0_140 = arith.constant 0 : index
    %139 = vector.load %arg2[%c0_138, %c21_139, %c0_140] : memref<1x110x8xbf16, #tpu.memory_space<vmem>>, vector<1x80x8xbf16>
    %140 = vector.shape_cast %139 : vector<1x80x8xbf16> to vector<80x8xbf16>
    %c23 = arith.constant 23 : index
    %c0_141 = arith.constant 0 : index
    %c0_142 = arith.constant 0 : index
    %141 = vector.load %arg5[%c23, %c0_141, %c0_142] : memref<25x8x128xbf16, #tpu.memory_space<vmem>>, vector<1x8x128xbf16>
    %142 = vector.shape_cast %141 : vector<1x8x128xbf16> to vector<8x128xbf16>
    %cst_143 = arith.constant dense<0.000000e+00> : vector<80x128xf32>
    %143 = tpu.matmul %140, %142, %cst_143 {dimension_numbers = #tpu.dot_dimension_numbers<[1], [0], [0], [1], [0, 0, 1, 1], [], []>} : vector<80x8xbf16>, vector<8x128xbf16>, vector<80x128xf32> -> vector<80x128xf32>
    %144 = arith.addf %138, %143 : vector<80x128xf32>
    %c0_144 = arith.constant 0 : index
    %c22_145 = arith.constant 22 : index
    %c0_146 = arith.constant 0 : index
    %145 = vector.load %arg1[%c0_144, %c22_145, %c0_146] : memref<1x110x8xbf16, #tpu.memory_space<vmem>>, vector<1x80x8xbf16>
    %146 = vector.shape_cast %145 : vector<1x80x8xbf16> to vector<80x8xbf16>
    %c24 = arith.constant 24 : index
    %c0_147 = arith.constant 0 : index
    %c0_148 = arith.constant 0 : index
    %147 = vector.load %arg5[%c24, %c0_147, %c0_148] : memref<25x8x128xbf16, #tpu.memory_space<vmem>>, vector<1x8x128xbf16>
    %148 = vector.shape_cast %147 : vector<1x8x128xbf16> to vector<8x128xbf16>
    %cst_149 = arith.constant dense<0.000000e+00> : vector<80x128xf32>
    %149 = tpu.matmul %146, %148, %cst_149 {dimension_numbers = #tpu.dot_dimension_numbers<[1], [0], [0], [1], [0, 0, 1, 1], [], []>} : vector<80x8xbf16>, vector<8x128xbf16>, vector<80x128xf32> -> vector<80x128xf32>
    %150 = arith.addf %144, %149 : vector<80x128xf32>
    %c0_150 = arith.constant 0 : index
    %c0_151 = arith.constant 0 : index
    %151 = vector.load %arg6[%c0_150, %c0_151] : memref<1x128xf32, #tpu.memory_space<vmem>>, vector<1x128xf32>
    %152 = vector.broadcast %151 : vector<1x128xf32> to vector<80x128xf32>
    %153 = arith.addf %150, %152 : vector<80x128xf32>
    %cst_152 = arith.constant 0.000000e+00 : f32
    %154 = vector.broadcast %cst_152 : f32 to vector<80x128xf32>
    %155 = arith.maximumf %153, %154 : vector<80x128xf32>
    %156 = arith.truncf %155 : vector<80x128xf32> to vector<80x128xbf16>
    %c0_153 = arith.constant 0 : index
    %c0_154 = arith.constant 0 : index
    %c0_155 = arith.constant 0 : index
    %157 = vector.load %arg7[%c0_153, %c0_154, %c0_155] : memref<1x80x128xbf16, #tpu.memory_space<vmem>>, vector<1x80x128xbf16>
    %158 = vector.shape_cast %157 : vector<1x80x128xbf16> to vector<80x128xbf16>
    %159 = vector.shape_cast %156 : vector<80x128xbf16> to vector<1x80x128xbf16>
    tpu.vector_store %arg7[%c0_153, %c0_154, %c0_155], %159 {strides = array<i32>} : memref<1x80x128xbf16, #tpu.memory_space<vmem>>, vector<1x80x128xbf16>,
    return
  }
  func.func @transform_0(%arg0: i32) -> (i32, i32, i32) {
    %c0_i32 = arith.constant 0 : i32
    %c0_i32_0 = arith.constant 0 : i32
    %c0_i32_1 = arith.constant 0 : i32
    return %arg0, %c0_i32, %c0_i32_0 : i32, i32, i32
  }
  func.func @transform_1(%arg0: i32) -> (i32, i32, i32) {
    %c0_i32 = arith.constant 0 : i32
    %c0_i32_0 = arith.constant 0 : i32
    %c0_i32_1 = arith.constant 0 : i32
    return %arg0, %c0_i32, %c0_i32_0 : i32, i32, i32
  }
  func.func @transform_2(%arg0: i32) -> (i32, i32, i32) {
    %c0_i32 = arith.constant 0 : i32
    %c0_i32_0 = arith.constant 0 : i32
    %c0_i32_1 = arith.constant 0 : i32
    return %arg0, %c0_i32, %c0_i32_0 : i32, i32, i32
  }
  func.func @transform_3(%arg0: i32) -> (i32, i32, i32) {
    %c0_i32 = arith.constant 0 : i32
    %c0_i32_0 = arith.constant 0 : i32
    %c0_i32_1 = arith.constant 0 : i32
    return %arg0, %c0_i32, %c0_i32_0 : i32, i32, i32
  }
  func.func @transform_4(%arg0: i32) -> (i32, i32, i32) {
    %c0_i32 = arith.constant 0 : i32
    %c0_i32_0 = arith.constant 0 : i32
    %c0_i32_1 = arith.constant 0 : i32
    %c0_i32_2 = arith.constant 0 : i32
    return %c0_i32, %c0_i32_0, %c0_i32_1 : i32, i32, i32
  }
  func.func @transform_5(%arg0: i32) -> (i32, i32) {
    %c0_i32 = arith.constant 0 : i32
    %c0_i32_0 = arith.constant 0 : i32
    %c0_i32_1 = arith.constant 0 : i32
    return %c0_i32, %c0_i32_0 : i32, i32
  }
  func.func @transform_6(%arg0: i32) -> (i32, i32, i32) {
    %c0_i32 = arith.constant 0 : i32
    %c0_i32_0 = arith.constant 0 : i32
    %c0_i32_1 = arith.constant 0 : i32
    return %arg0, %c0_i32, %c0_i32_0 : i32, i32, i32
  }
}

module attributes {stable_mosaic.version = 11 : i64} {
  func.func @kernel(%arg0: i32, %arg1: memref<1x42x128xbf16, #tpu.memory_space<vmem>>, %arg2: memref<1x42x128xbf16, #tpu.memory_space<vmem>>, %arg3: memref<1x42x128xbf16, #tpu.memory_space<vmem>>, %arg4: memref<1x42x128xbf16, #tpu.memory_space<vmem>>, %arg5: memref<25x128x128xbf16, #tpu.memory_space<vmem>>, %arg6: memref<1x128xf32, #tpu.memory_space<vmem>>, %arg7: memref<1x24x128xbf16, #tpu.memory_space<vmem>>) attributes {dimension_semantics = [#tpu.dimension_semantics<parallel>], iteration_bounds = array<i64: 2>, scalar_prefetch = 0 : i64, scratch_operands = 0 : i64, tpu.core_type = #tpu.core_type<tc>, window_params = [{transform_indices = @transform_0, window_bounds = array<i64: 1, 42, 128>}, {transform_indices = @transform_1, window_bounds = array<i64: 1, 42, 128>}, {transform_indices = @transform_2, window_bounds = array<i64: 1, 42, 128>}, {transform_indices = @transform_3, window_bounds = array<i64: 1, 42, 128>}, {pipeline_mode = #tpu.pipeline_mode<synchronous>, transform_indices = @transform_4, window_bounds = array<i64: 25, 128, 128>}, {pipeline_mode = #tpu.pipeline_mode<synchronous>, transform_indices = @transform_5, window_bounds = array<i64: 1, 128>}, {transform_indices = @transform_6, window_bounds = array<i64: 1, 24, 128>}]} {
    %cst = arith.constant 0.000000e+00 : f32
    %0 = vector.broadcast %cst : f32 to vector<24x128xf32>
    %c0 = arith.constant 0 : index
    %c0_0 = arith.constant 0 : index
    %c0_1 = arith.constant 0 : index
    %1 = vector.load %arg1[%c0, %c0_0, %c0_1] : memref<1x42x128xbf16, #tpu.memory_space<vmem>>, vector<1x24x128xbf16>
    %2 = vector.shape_cast %1 : vector<1x24x128xbf16> to vector<24x128xbf16>
    %c0_2 = arith.constant 0 : index
    %c0_3 = arith.constant 0 : index
    %c0_4 = arith.constant 0 : index
    %3 = vector.load %arg5[%c0_2, %c0_3, %c0_4] : memref<25x128x128xbf16, #tpu.memory_space<vmem>>, vector<1x128x128xbf16>
    %4 = vector.shape_cast %3 : vector<1x128x128xbf16> to vector<128x128xbf16>
    %cst_5 = arith.constant dense<0.000000e+00> : vector<24x128xf32>
    %5 = tpu.matmul %2, %4, %cst_5 {dimension_numbers = #tpu.dot_dimension_numbers<[1], [0], [0], [1], [0, 0, 1, 1], [], []>} : vector<24x128xbf16>, vector<128x128xbf16>, vector<24x128xf32> -> vector<24x128xf32>
    %6 = arith.addf %0, %5 : vector<24x128xf32>
    %c0_6 = arith.constant 0 : index
    %c0_7 = arith.constant 0 : index
    %c0_8 = arith.constant 0 : index
    %7 = vector.load %arg2[%c0_6, %c0_7, %c0_8] : memref<1x42x128xbf16, #tpu.memory_space<vmem>>, vector<1x24x128xbf16>
    %8 = vector.shape_cast %7 : vector<1x24x128xbf16> to vector<24x128xbf16>
    %c1 = arith.constant 1 : index
    %c0_9 = arith.constant 0 : index
    %c0_10 = arith.constant 0 : index
    %9 = vector.load %arg5[%c1, %c0_9, %c0_10] : memref<25x128x128xbf16, #tpu.memory_space<vmem>>, vector<1x128x128xbf16>
    %10 = vector.shape_cast %9 : vector<1x128x128xbf16> to vector<128x128xbf16>
    %cst_11 = arith.constant dense<0.000000e+00> : vector<24x128xf32>
    %11 = tpu.matmul %8, %10, %cst_11 {dimension_numbers = #tpu.dot_dimension_numbers<[1], [0], [0], [1], [0, 0, 1, 1], [], []>} : vector<24x128xbf16>, vector<128x128xbf16>, vector<24x128xf32> -> vector<24x128xf32>
    %12 = arith.addf %6, %11 : vector<24x128xf32>
    %c0_12 = arith.constant 0 : index
    %c1_13 = arith.constant 1 : index
    %c0_14 = arith.constant 0 : index
    %13 = vector.load %arg1[%c0_12, %c1_13, %c0_14] : memref<1x42x128xbf16, #tpu.memory_space<vmem>>, vector<1x24x128xbf16>
    %14 = vector.shape_cast %13 : vector<1x24x128xbf16> to vector<24x128xbf16>
    %c2 = arith.constant 2 : index
    %c0_15 = arith.constant 0 : index
    %c0_16 = arith.constant 0 : index
    %15 = vector.load %arg5[%c2, %c0_15, %c0_16] : memref<25x128x128xbf16, #tpu.memory_space<vmem>>, vector<1x128x128xbf16>
    %16 = vector.shape_cast %15 : vector<1x128x128xbf16> to vector<128x128xbf16>
    %cst_17 = arith.constant dense<0.000000e+00> : vector<24x128xf32>
    %17 = tpu.matmul %14, %16, %cst_17 {dimension_numbers = #tpu.dot_dimension_numbers<[1], [0], [0], [1], [0, 0, 1, 1], [], []>} : vector<24x128xbf16>, vector<128x128xbf16>, vector<24x128xf32> -> vector<24x128xf32>
    %18 = arith.addf %12, %17 : vector<24x128xf32>
    %c0_18 = arith.constant 0 : index
    %c1_19 = arith.constant 1 : index
    %c0_20 = arith.constant 0 : index
    %19 = vector.load %arg2[%c0_18, %c1_19, %c0_20] : memref<1x42x128xbf16, #tpu.memory_space<vmem>>, vector<1x24x128xbf16>
    %20 = vector.shape_cast %19 : vector<1x24x128xbf16> to vector<24x128xbf16>
    %c3 = arith.constant 3 : index
    %c0_21 = arith.constant 0 : index
    %c0_22 = arith.constant 0 : index
    %21 = vector.load %arg5[%c3, %c0_21, %c0_22] : memref<25x128x128xbf16, #tpu.memory_space<vmem>>, vector<1x128x128xbf16>
    %22 = vector.shape_cast %21 : vector<1x128x128xbf16> to vector<128x128xbf16>
    %cst_23 = arith.constant dense<0.000000e+00> : vector<24x128xf32>
    %23 = tpu.matmul %20, %22, %cst_23 {dimension_numbers = #tpu.dot_dimension_numbers<[1], [0], [0], [1], [0, 0, 1, 1], [], []>} : vector<24x128xbf16>, vector<128x128xbf16>, vector<24x128xf32> -> vector<24x128xf32>
    %24 = arith.addf %18, %23 : vector<24x128xf32>
    %c0_24 = arith.constant 0 : index
    %c2_25 = arith.constant 2 : index
    %c0_26 = arith.constant 0 : index
    %25 = vector.load %arg1[%c0_24, %c2_25, %c0_26] : memref<1x42x128xbf16, #tpu.memory_space<vmem>>, vector<1x24x128xbf16>
    %26 = vector.shape_cast %25 : vector<1x24x128xbf16> to vector<24x128xbf16>
    %c4 = arith.constant 4 : index
    %c0_27 = arith.constant 0 : index
    %c0_28 = arith.constant 0 : index
    %27 = vector.load %arg5[%c4, %c0_27, %c0_28] : memref<25x128x128xbf16, #tpu.memory_space<vmem>>, vector<1x128x128xbf16>
    %28 = vector.shape_cast %27 : vector<1x128x128xbf16> to vector<128x128xbf16>
    %cst_29 = arith.constant dense<0.000000e+00> : vector<24x128xf32>
    %29 = tpu.matmul %26, %28, %cst_29 {dimension_numbers = #tpu.dot_dimension_numbers<[1], [0], [0], [1], [0, 0, 1, 1], [], []>} : vector<24x128xbf16>, vector<128x128xbf16>, vector<24x128xf32> -> vector<24x128xf32>
    %30 = arith.addf %24, %29 : vector<24x128xf32>
    %c0_30 = arith.constant 0 : index
    %c0_31 = arith.constant 0 : index
    %c0_32 = arith.constant 0 : index
    %31 = vector.load %arg3[%c0_30, %c0_31, %c0_32] : memref<1x42x128xbf16, #tpu.memory_space<vmem>>, vector<1x24x128xbf16>
    %32 = vector.shape_cast %31 : vector<1x24x128xbf16> to vector<24x128xbf16>
    %c5 = arith.constant 5 : index
    %c0_33 = arith.constant 0 : index
    %c0_34 = arith.constant 0 : index
    %33 = vector.load %arg5[%c5, %c0_33, %c0_34] : memref<25x128x128xbf16, #tpu.memory_space<vmem>>, vector<1x128x128xbf16>
    %34 = vector.shape_cast %33 : vector<1x128x128xbf16> to vector<128x128xbf16>
    %cst_35 = arith.constant dense<0.000000e+00> : vector<24x128xf32>
    %35 = tpu.matmul %32, %34, %cst_35 {dimension_numbers = #tpu.dot_dimension_numbers<[1], [0], [0], [1], [0, 0, 1, 1], [], []>} : vector<24x128xbf16>, vector<128x128xbf16>, vector<24x128xf32> -> vector<24x128xf32>
    %36 = arith.addf %30, %35 : vector<24x128xf32>
    %c0_36 = arith.constant 0 : index
    %c0_37 = arith.constant 0 : index
    %c0_38 = arith.constant 0 : index
    %37 = vector.load %arg4[%c0_36, %c0_37, %c0_38] : memref<1x42x128xbf16, #tpu.memory_space<vmem>>, vector<1x24x128xbf16>
    %38 = vector.shape_cast %37 : vector<1x24x128xbf16> to vector<24x128xbf16>
    %c6 = arith.constant 6 : index
    %c0_39 = arith.constant 0 : index
    %c0_40 = arith.constant 0 : index
    %39 = vector.load %arg5[%c6, %c0_39, %c0_40] : memref<25x128x128xbf16, #tpu.memory_space<vmem>>, vector<1x128x128xbf16>
    %40 = vector.shape_cast %39 : vector<1x128x128xbf16> to vector<128x128xbf16>
    %cst_41 = arith.constant dense<0.000000e+00> : vector<24x128xf32>
    %41 = tpu.matmul %38, %40, %cst_41 {dimension_numbers = #tpu.dot_dimension_numbers<[1], [0], [0], [1], [0, 0, 1, 1], [], []>} : vector<24x128xbf16>, vector<128x128xbf16>, vector<24x128xf32> -> vector<24x128xf32>
    %42 = arith.addf %36, %41 : vector<24x128xf32>
    %c0_42 = arith.constant 0 : index
    %c1_43 = arith.constant 1 : index
    %c0_44 = arith.constant 0 : index
    %43 = vector.load %arg3[%c0_42, %c1_43, %c0_44] : memref<1x42x128xbf16, #tpu.memory_space<vmem>>, vector<1x24x128xbf16>
    %44 = vector.shape_cast %43 : vector<1x24x128xbf16> to vector<24x128xbf16>
    %c7 = arith.constant 7 : index
    %c0_45 = arith.constant 0 : index
    %c0_46 = arith.constant 0 : index
    %45 = vector.load %arg5[%c7, %c0_45, %c0_46] : memref<25x128x128xbf16, #tpu.memory_space<vmem>>, vector<1x128x128xbf16>
    %46 = vector.shape_cast %45 : vector<1x128x128xbf16> to vector<128x128xbf16>
    %cst_47 = arith.constant dense<0.000000e+00> : vector<24x128xf32>
    %47 = tpu.matmul %44, %46, %cst_47 {dimension_numbers = #tpu.dot_dimension_numbers<[1], [0], [0], [1], [0, 0, 1, 1], [], []>} : vector<24x128xbf16>, vector<128x128xbf16>, vector<24x128xf32> -> vector<24x128xf32>
    %48 = arith.addf %42, %47 : vector<24x128xf32>
    %c0_48 = arith.constant 0 : index
    %c1_49 = arith.constant 1 : index
    %c0_50 = arith.constant 0 : index
    %49 = vector.load %arg4[%c0_48, %c1_49, %c0_50] : memref<1x42x128xbf16, #tpu.memory_space<vmem>>, vector<1x24x128xbf16>
    %50 = vector.shape_cast %49 : vector<1x24x128xbf16> to vector<24x128xbf16>
    %c8 = arith.constant 8 : index
    %c0_51 = arith.constant 0 : index
    %c0_52 = arith.constant 0 : index
    %51 = vector.load %arg5[%c8, %c0_51, %c0_52] : memref<25x128x128xbf16, #tpu.memory_space<vmem>>, vector<1x128x128xbf16>
    %52 = vector.shape_cast %51 : vector<1x128x128xbf16> to vector<128x128xbf16>
    %cst_53 = arith.constant dense<0.000000e+00> : vector<24x128xf32>
    %53 = tpu.matmul %50, %52, %cst_53 {dimension_numbers = #tpu.dot_dimension_numbers<[1], [0], [0], [1], [0, 0, 1, 1], [], []>} : vector<24x128xbf16>, vector<128x128xbf16>, vector<24x128xf32> -> vector<24x128xf32>
    %54 = arith.addf %48, %53 : vector<24x128xf32>
    %c0_54 = arith.constant 0 : index
    %c2_55 = arith.constant 2 : index
    %c0_56 = arith.constant 0 : index
    %55 = vector.load %arg3[%c0_54, %c2_55, %c0_56] : memref<1x42x128xbf16, #tpu.memory_space<vmem>>, vector<1x24x128xbf16>
    %56 = vector.shape_cast %55 : vector<1x24x128xbf16> to vector<24x128xbf16>
    %c9 = arith.constant 9 : index
    %c0_57 = arith.constant 0 : index
    %c0_58 = arith.constant 0 : index
    %57 = vector.load %arg5[%c9, %c0_57, %c0_58] : memref<25x128x128xbf16, #tpu.memory_space<vmem>>, vector<1x128x128xbf16>
    %58 = vector.shape_cast %57 : vector<1x128x128xbf16> to vector<128x128xbf16>
    %cst_59 = arith.constant dense<0.000000e+00> : vector<24x128xf32>
    %59 = tpu.matmul %56, %58, %cst_59 {dimension_numbers = #tpu.dot_dimension_numbers<[1], [0], [0], [1], [0, 0, 1, 1], [], []>} : vector<24x128xbf16>, vector<128x128xbf16>, vector<24x128xf32> -> vector<24x128xf32>
    %60 = arith.addf %54, %59 : vector<24x128xf32>
    %c0_60 = arith.constant 0 : index
    %c6_61 = arith.constant 6 : index
    %c0_62 = arith.constant 0 : index
    %61 = vector.load %arg1[%c0_60, %c6_61, %c0_62] : memref<1x42x128xbf16, #tpu.memory_space<vmem>>, vector<1x24x128xbf16>
    %62 = vector.shape_cast %61 : vector<1x24x128xbf16> to vector<24x128xbf16>
    %c10 = arith.constant 10 : index
    %c0_63 = arith.constant 0 : index
    %c0_64 = arith.constant 0 : index
    %63 = vector.load %arg5[%c10, %c0_63, %c0_64] : memref<25x128x128xbf16, #tpu.memory_space<vmem>>, vector<1x128x128xbf16>
    %64 = vector.shape_cast %63 : vector<1x128x128xbf16> to vector<128x128xbf16>
    %cst_65 = arith.constant dense<0.000000e+00> : vector<24x128xf32>
    %65 = tpu.matmul %62, %64, %cst_65 {dimension_numbers = #tpu.dot_dimension_numbers<[1], [0], [0], [1], [0, 0, 1, 1], [], []>} : vector<24x128xbf16>, vector<128x128xbf16>, vector<24x128xf32> -> vector<24x128xf32>
    %66 = arith.addf %60, %65 : vector<24x128xf32>
    %c0_66 = arith.constant 0 : index
    %c6_67 = arith.constant 6 : index
    %c0_68 = arith.constant 0 : index
    %67 = vector.load %arg2[%c0_66, %c6_67, %c0_68] : memref<1x42x128xbf16, #tpu.memory_space<vmem>>, vector<1x24x128xbf16>
    %68 = vector.shape_cast %67 : vector<1x24x128xbf16> to vector<24x128xbf16>
    %c11 = arith.constant 11 : index
    %c0_69 = arith.constant 0 : index
    %c0_70 = arith.constant 0 : index
    %69 = vector.load %arg5[%c11, %c0_69, %c0_70] : memref<25x128x128xbf16, #tpu.memory_space<vmem>>, vector<1x128x128xbf16>
    %70 = vector.shape_cast %69 : vector<1x128x128xbf16> to vector<128x128xbf16>
    %cst_71 = arith.constant dense<0.000000e+00> : vector<24x128xf32>
    %71 = tpu.matmul %68, %70, %cst_71 {dimension_numbers = #tpu.dot_dimension_numbers<[1], [0], [0], [1], [0, 0, 1, 1], [], []>} : vector<24x128xbf16>, vector<128x128xbf16>, vector<24x128xf32> -> vector<24x128xf32>
    %72 = arith.addf %66, %71 : vector<24x128xf32>
    %c0_72 = arith.constant 0 : index
    %c7_73 = arith.constant 7 : index
    %c0_74 = arith.constant 0 : index
    %73 = vector.load %arg1[%c0_72, %c7_73, %c0_74] : memref<1x42x128xbf16, #tpu.memory_space<vmem>>, vector<1x24x128xbf16>
    %74 = vector.shape_cast %73 : vector<1x24x128xbf16> to vector<24x128xbf16>
    %c12 = arith.constant 12 : index
    %c0_75 = arith.constant 0 : index
    %c0_76 = arith.constant 0 : index
    %75 = vector.load %arg5[%c12, %c0_75, %c0_76] : memref<25x128x128xbf16, #tpu.memory_space<vmem>>, vector<1x128x128xbf16>
    %76 = vector.shape_cast %75 : vector<1x128x128xbf16> to vector<128x128xbf16>
    %cst_77 = arith.constant dense<0.000000e+00> : vector<24x128xf32>
    %77 = tpu.matmul %74, %76, %cst_77 {dimension_numbers = #tpu.dot_dimension_numbers<[1], [0], [0], [1], [0, 0, 1, 1], [], []>} : vector<24x128xbf16>, vector<128x128xbf16>, vector<24x128xf32> -> vector<24x128xf32>
    %78 = arith.addf %72, %77 : vector<24x128xf32>
    %c0_78 = arith.constant 0 : index
    %c7_79 = arith.constant 7 : index
    %c0_80 = arith.constant 0 : index
    %79 = vector.load %arg2[%c0_78, %c7_79, %c0_80] : memref<1x42x128xbf16, #tpu.memory_space<vmem>>, vector<1x24x128xbf16>
    %80 = vector.shape_cast %79 : vector<1x24x128xbf16> to vector<24x128xbf16>
    %c13 = arith.constant 13 : index
    %c0_81 = arith.constant 0 : index
    %c0_82 = arith.constant 0 : index
    %81 = vector.load %arg5[%c13, %c0_81, %c0_82] : memref<25x128x128xbf16, #tpu.memory_space<vmem>>, vector<1x128x128xbf16>
    %82 = vector.shape_cast %81 : vector<1x128x128xbf16> to vector<128x128xbf16>
    %cst_83 = arith.constant dense<0.000000e+00> : vector<24x128xf32>
    %83 = tpu.matmul %80, %82, %cst_83 {dimension_numbers = #tpu.dot_dimension_numbers<[1], [0], [0], [1], [0, 0, 1, 1], [], []>} : vector<24x128xbf16>, vector<128x128xbf16>, vector<24x128xf32> -> vector<24x128xf32>
    %84 = arith.addf %78, %83 : vector<24x128xf32>
    %c0_84 = arith.constant 0 : index
    %c8_85 = arith.constant 8 : index
    %c0_86 = arith.constant 0 : index
    %85 = vector.load %arg1[%c0_84, %c8_85, %c0_86] : memref<1x42x128xbf16, #tpu.memory_space<vmem>>, vector<1x24x128xbf16>
    %86 = vector.shape_cast %85 : vector<1x24x128xbf16> to vector<24x128xbf16>
    %c14 = arith.constant 14 : index
    %c0_87 = arith.constant 0 : index
    %c0_88 = arith.constant 0 : index
    %87 = vector.load %arg5[%c14, %c0_87, %c0_88] : memref<25x128x128xbf16, #tpu.memory_space<vmem>>, vector<1x128x128xbf16>
    %88 = vector.shape_cast %87 : vector<1x128x128xbf16> to vector<128x128xbf16>
    %cst_89 = arith.constant dense<0.000000e+00> : vector<24x128xf32>
    %89 = tpu.matmul %86, %88, %cst_89 {dimension_numbers = #tpu.dot_dimension_numbers<[1], [0], [0], [1], [0, 0, 1, 1], [], []>} : vector<24x128xbf16>, vector<128x128xbf16>, vector<24x128xf32> -> vector<24x128xf32>
    %90 = arith.addf %84, %89 : vector<24x128xf32>
    %c0_90 = arith.constant 0 : index
    %c6_91 = arith.constant 6 : index
    %c0_92 = arith.constant 0 : index
    %91 = vector.load %arg3[%c0_90, %c6_91, %c0_92] : memref<1x42x128xbf16, #tpu.memory_space<vmem>>, vector<1x24x128xbf16>
    %92 = vector.shape_cast %91 : vector<1x24x128xbf16> to vector<24x128xbf16>
    %c15 = arith.constant 15 : index
    %c0_93 = arith.constant 0 : index
    %c0_94 = arith.constant 0 : index
    %93 = vector.load %arg5[%c15, %c0_93, %c0_94] : memref<25x128x128xbf16, #tpu.memory_space<vmem>>, vector<1x128x128xbf16>
    %94 = vector.shape_cast %93 : vector<1x128x128xbf16> to vector<128x128xbf16>
    %cst_95 = arith.constant dense<0.000000e+00> : vector<24x128xf32>
    %95 = tpu.matmul %92, %94, %cst_95 {dimension_numbers = #tpu.dot_dimension_numbers<[1], [0], [0], [1], [0, 0, 1, 1], [], []>} : vector<24x128xbf16>, vector<128x128xbf16>, vector<24x128xf32> -> vector<24x128xf32>
    %96 = arith.addf %90, %95 : vector<24x128xf32>
    %c0_96 = arith.constant 0 : index
    %c6_97 = arith.constant 6 : index
    %c0_98 = arith.constant 0 : index
    %97 = vector.load %arg4[%c0_96, %c6_97, %c0_98] : memref<1x42x128xbf16, #tpu.memory_space<vmem>>, vector<1x24x128xbf16>
    %98 = vector.shape_cast %97 : vector<1x24x128xbf16> to vector<24x128xbf16>
    %c16 = arith.constant 16 : index
    %c0_99 = arith.constant 0 : index
    %c0_100 = arith.constant 0 : index
    %99 = vector.load %arg5[%c16, %c0_99, %c0_100] : memref<25x128x128xbf16, #tpu.memory_space<vmem>>, vector<1x128x128xbf16>
    %100 = vector.shape_cast %99 : vector<1x128x128xbf16> to vector<128x128xbf16>
    %cst_101 = arith.constant dense<0.000000e+00> : vector<24x128xf32>
    %101 = tpu.matmul %98, %100, %cst_101 {dimension_numbers = #tpu.dot_dimension_numbers<[1], [0], [0], [1], [0, 0, 1, 1], [], []>} : vector<24x128xbf16>, vector<128x128xbf16>, vector<24x128xf32> -> vector<24x128xf32>
    %102 = arith.addf %96, %101 : vector<24x128xf32>
    %c0_102 = arith.constant 0 : index
    %c7_103 = arith.constant 7 : index
    %c0_104 = arith.constant 0 : index
    %103 = vector.load %arg3[%c0_102, %c7_103, %c0_104] : memref<1x42x128xbf16, #tpu.memory_space<vmem>>, vector<1x24x128xbf16>
    %104 = vector.shape_cast %103 : vector<1x24x128xbf16> to vector<24x128xbf16>
    %c17 = arith.constant 17 : index
    %c0_105 = arith.constant 0 : index
    %c0_106 = arith.constant 0 : index
    %105 = vector.load %arg5[%c17, %c0_105, %c0_106] : memref<25x128x128xbf16, #tpu.memory_space<vmem>>, vector<1x128x128xbf16>
    %106 = vector.shape_cast %105 : vector<1x128x128xbf16> to vector<128x128xbf16>
    %cst_107 = arith.constant dense<0.000000e+00> : vector<24x128xf32>
    %107 = tpu.matmul %104, %106, %cst_107 {dimension_numbers = #tpu.dot_dimension_numbers<[1], [0], [0], [1], [0, 0, 1, 1], [], []>} : vector<24x128xbf16>, vector<128x128xbf16>, vector<24x128xf32> -> vector<24x128xf32>
    %108 = arith.addf %102, %107 : vector<24x128xf32>
    %c0_108 = arith.constant 0 : index
    %c7_109 = arith.constant 7 : index
    %c0_110 = arith.constant 0 : index
    %109 = vector.load %arg4[%c0_108, %c7_109, %c0_110] : memref<1x42x128xbf16, #tpu.memory_space<vmem>>, vector<1x24x128xbf16>
    %110 = vector.shape_cast %109 : vector<1x24x128xbf16> to vector<24x128xbf16>
    %c18 = arith.constant 18 : index
    %c0_111 = arith.constant 0 : index
    %c0_112 = arith.constant 0 : index
    %111 = vector.load %arg5[%c18, %c0_111, %c0_112] : memref<25x128x128xbf16, #tpu.memory_space<vmem>>, vector<1x128x128xbf16>
    %112 = vector.shape_cast %111 : vector<1x128x128xbf16> to vector<128x128xbf16>
    %cst_113 = arith.constant dense<0.000000e+00> : vector<24x128xf32>
    %113 = tpu.matmul %110, %112, %cst_113 {dimension_numbers = #tpu.dot_dimension_numbers<[1], [0], [0], [1], [0, 0, 1, 1], [], []>} : vector<24x128xbf16>, vector<128x128xbf16>, vector<24x128xf32> -> vector<24x128xf32>
    %114 = arith.addf %108, %113 : vector<24x128xf32>
    %c0_114 = arith.constant 0 : index
    %c8_115 = arith.constant 8 : index
    %c0_116 = arith.constant 0 : index
    %115 = vector.load %arg3[%c0_114, %c8_115, %c0_116] : memref<1x42x128xbf16, #tpu.memory_space<vmem>>, vector<1x24x128xbf16>
    %116 = vector.shape_cast %115 : vector<1x24x128xbf16> to vector<24x128xbf16>
    %c19 = arith.constant 19 : index
    %c0_117 = arith.constant 0 : index
    %c0_118 = arith.constant 0 : index
    %117 = vector.load %arg5[%c19, %c0_117, %c0_118] : memref<25x128x128xbf16, #tpu.memory_space<vmem>>, vector<1x128x128xbf16>
    %118 = vector.shape_cast %117 : vector<1x128x128xbf16> to vector<128x128xbf16>
    %cst_119 = arith.constant dense<0.000000e+00> : vector<24x128xf32>
    %119 = tpu.matmul %116, %118, %cst_119 {dimension_numbers = #tpu.dot_dimension_numbers<[1], [0], [0], [1], [0, 0, 1, 1], [], []>} : vector<24x128xbf16>, vector<128x128xbf16>, vector<24x128xf32> -> vector<24x128xf32>
    %120 = arith.addf %114, %119 : vector<24x128xf32>
    %c0_120 = arith.constant 0 : index
    %c12_121 = arith.constant 12 : index
    %c0_122 = arith.constant 0 : index
    %121 = vector.load %arg1[%c0_120, %c12_121, %c0_122] : memref<1x42x128xbf16, #tpu.memory_space<vmem>>, vector<1x24x128xbf16>
    %122 = vector.shape_cast %121 : vector<1x24x128xbf16> to vector<24x128xbf16>
    %c20 = arith.constant 20 : index
    %c0_123 = arith.constant 0 : index
    %c0_124 = arith.constant 0 : index
    %123 = vector.load %arg5[%c20, %c0_123, %c0_124] : memref<25x128x128xbf16, #tpu.memory_space<vmem>>, vector<1x128x128xbf16>
    %124 = vector.shape_cast %123 : vector<1x128x128xbf16> to vector<128x128xbf16>
    %cst_125 = arith.constant dense<0.000000e+00> : vector<24x128xf32>
    %125 = tpu.matmul %122, %124, %cst_125 {dimension_numbers = #tpu.dot_dimension_numbers<[1], [0], [0], [1], [0, 0, 1, 1], [], []>} : vector<24x128xbf16>, vector<128x128xbf16>, vector<24x128xf32> -> vector<24x128xf32>
    %126 = arith.addf %120, %125 : vector<24x128xf32>
    %c0_126 = arith.constant 0 : index
    %c12_127 = arith.constant 12 : index
    %c0_128 = arith.constant 0 : index
    %127 = vector.load %arg2[%c0_126, %c12_127, %c0_128] : memref<1x42x128xbf16, #tpu.memory_space<vmem>>, vector<1x24x128xbf16>
    %128 = vector.shape_cast %127 : vector<1x24x128xbf16> to vector<24x128xbf16>
    %c21 = arith.constant 21 : index
    %c0_129 = arith.constant 0 : index
    %c0_130 = arith.constant 0 : index
    %129 = vector.load %arg5[%c21, %c0_129, %c0_130] : memref<25x128x128xbf16, #tpu.memory_space<vmem>>, vector<1x128x128xbf16>
    %130 = vector.shape_cast %129 : vector<1x128x128xbf16> to vector<128x128xbf16>
    %cst_131 = arith.constant dense<0.000000e+00> : vector<24x128xf32>
    %131 = tpu.matmul %128, %130, %cst_131 {dimension_numbers = #tpu.dot_dimension_numbers<[1], [0], [0], [1], [0, 0, 1, 1], [], []>} : vector<24x128xbf16>, vector<128x128xbf16>, vector<24x128xf32> -> vector<24x128xf32>
    %132 = arith.addf %126, %131 : vector<24x128xf32>
    %c0_132 = arith.constant 0 : index
    %c13_133 = arith.constant 13 : index
    %c0_134 = arith.constant 0 : index
    %133 = vector.load %arg1[%c0_132, %c13_133, %c0_134] : memref<1x42x128xbf16, #tpu.memory_space<vmem>>, vector<1x24x128xbf16>
    %134 = vector.shape_cast %133 : vector<1x24x128xbf16> to vector<24x128xbf16>
    %c22 = arith.constant 22 : index
    %c0_135 = arith.constant 0 : index
    %c0_136 = arith.constant 0 : index
    %135 = vector.load %arg5[%c22, %c0_135, %c0_136] : memref<25x128x128xbf16, #tpu.memory_space<vmem>>, vector<1x128x128xbf16>
    %136 = vector.shape_cast %135 : vector<1x128x128xbf16> to vector<128x128xbf16>
    %cst_137 = arith.constant dense<0.000000e+00> : vector<24x128xf32>
    %137 = tpu.matmul %134, %136, %cst_137 {dimension_numbers = #tpu.dot_dimension_numbers<[1], [0], [0], [1], [0, 0, 1, 1], [], []>} : vector<24x128xbf16>, vector<128x128xbf16>, vector<24x128xf32> -> vector<24x128xf32>
    %138 = arith.addf %132, %137 : vector<24x128xf32>
    %c0_138 = arith.constant 0 : index
    %c13_139 = arith.constant 13 : index
    %c0_140 = arith.constant 0 : index
    %139 = vector.load %arg2[%c0_138, %c13_139, %c0_140] : memref<1x42x128xbf16, #tpu.memory_space<vmem>>, vector<1x24x128xbf16>
    %140 = vector.shape_cast %139 : vector<1x24x128xbf16> to vector<24x128xbf16>
    %c23 = arith.constant 23 : index
    %c0_141 = arith.constant 0 : index
    %c0_142 = arith.constant 0 : index
    %141 = vector.load %arg5[%c23, %c0_141, %c0_142] : memref<25x128x128xbf16, #tpu.memory_space<vmem>>, vector<1x128x128xbf16>
    %142 = vector.shape_cast %141 : vector<1x128x128xbf16> to vector<128x128xbf16>
    %cst_143 = arith.constant dense<0.000000e+00> : vector<24x128xf32>
    %143 = tpu.matmul %140, %142, %cst_143 {dimension_numbers = #tpu.dot_dimension_numbers<[1], [0], [0], [1], [0, 0, 1, 1], [], []>} : vector<24x128xbf16>, vector<128x128xbf16>, vector<24x128xf32> -> vector<24x128xf32>
    %144 = arith.addf %138, %143 : vector<24x128xf32>
    %c0_144 = arith.constant 0 : index
    %c14_145 = arith.constant 14 : index
    %c0_146 = arith.constant 0 : index
    %145 = vector.load %arg1[%c0_144, %c14_145, %c0_146] : memref<1x42x128xbf16, #tpu.memory_space<vmem>>, vector<1x24x128xbf16>
    %146 = vector.shape_cast %145 : vector<1x24x128xbf16> to vector<24x128xbf16>
    %c24 = arith.constant 24 : index
    %c0_147 = arith.constant 0 : index
    %c0_148 = arith.constant 0 : index
    %147 = vector.load %arg5[%c24, %c0_147, %c0_148] : memref<25x128x128xbf16, #tpu.memory_space<vmem>>, vector<1x128x128xbf16>
    %148 = vector.shape_cast %147 : vector<1x128x128xbf16> to vector<128x128xbf16>
    %cst_149 = arith.constant dense<0.000000e+00> : vector<24x128xf32>
    %149 = tpu.matmul %146, %148, %cst_149 {dimension_numbers = #tpu.dot_dimension_numbers<[1], [0], [0], [1], [0, 0, 1, 1], [], []>} : vector<24x128xbf16>, vector<128x128xbf16>, vector<24x128xf32> -> vector<24x128xf32>
    %150 = arith.addf %144, %149 : vector<24x128xf32>
    %c0_150 = arith.constant 0 : index
    %c0_151 = arith.constant 0 : index
    %151 = vector.load %arg6[%c0_150, %c0_151] : memref<1x128xf32, #tpu.memory_space<vmem>>, vector<1x128xf32>
    %152 = vector.broadcast %151 : vector<1x128xf32> to vector<24x128xf32>
    %153 = arith.addf %150, %152 : vector<24x128xf32>
    %cst_152 = arith.constant 0.000000e+00 : f32
    %154 = vector.broadcast %cst_152 : f32 to vector<24x128xf32>
    %155 = arith.maximumf %153, %154 : vector<24x128xf32>
    %156 = arith.truncf %155 : vector<24x128xf32> to vector<24x128xbf16>
    %c0_153 = arith.constant 0 : index
    %c0_154 = arith.constant 0 : index
    %c0_155 = arith.constant 0 : index
    %157 = vector.load %arg7[%c0_153, %c0_154, %c0_155] : memref<1x24x128xbf16, #tpu.memory_space<vmem>>, vector<1x24x128xbf16>
    %158 = vector.shape_cast %157 : vector<1x24x128xbf16> to vector<24x128xbf16>
    %159 = vector.shape_cast %156 : vector<24x128xbf16> to vector<1x24x128xbf16>
    tpu.vector_store %arg7[%c0_153, %c0_154, %c0_155], %159 {strides = array<i32>} : memref<1x24x128xbf16, #tpu.memory_space<vmem>>, vector<1x24x128xbf16>,
    return
  }
  func.func @transform_0(%arg0: i32) -> (i32, i32, i32) {
    %c0_i32 = arith.constant 0 : i32
    %c0_i32_0 = arith.constant 0 : i32
    %c0_i32_1 = arith.constant 0 : i32
    return %arg0, %c0_i32, %c0_i32_0 : i32, i32, i32
  }
  func.func @transform_1(%arg0: i32) -> (i32, i32, i32) {
    %c0_i32 = arith.constant 0 : i32
    %c0_i32_0 = arith.constant 0 : i32
    %c0_i32_1 = arith.constant 0 : i32
    return %arg0, %c0_i32, %c0_i32_0 : i32, i32, i32
  }
  func.func @transform_2(%arg0: i32) -> (i32, i32, i32) {
    %c0_i32 = arith.constant 0 : i32
    %c0_i32_0 = arith.constant 0 : i32
    %c0_i32_1 = arith.constant 0 : i32
    return %arg0, %c0_i32, %c0_i32_0 : i32, i32, i32
  }
  func.func @transform_3(%arg0: i32) -> (i32, i32, i32) {
    %c0_i32 = arith.constant 0 : i32
    %c0_i32_0 = arith.constant 0 : i32
    %c0_i32_1 = arith.constant 0 : i32
    return %arg0, %c0_i32, %c0_i32_0 : i32, i32, i32
  }
  func.func @transform_4(%arg0: i32) -> (i32, i32, i32) {
    %c0_i32 = arith.constant 0 : i32
    %c0_i32_0 = arith.constant 0 : i32
    %c0_i32_1 = arith.constant 0 : i32
    %c0_i32_2 = arith.constant 0 : i32
    return %c0_i32, %c0_i32_0, %c0_i32_1 : i32, i32, i32
  }
  func.func @transform_5(%arg0: i32) -> (i32, i32) {
    %c0_i32 = arith.constant 0 : i32
    %c0_i32_0 = arith.constant 0 : i32
    %c0_i32_1 = arith.constant 0 : i32
    return %c0_i32, %c0_i32_0 : i32, i32
  }
  func.func @transform_6(%arg0: i32) -> (i32, i32, i32) {
    %c0_i32 = arith.constant 0 : i32
    %c0_i32_0 = arith.constant 0 : i32
    %c0_i32_1 = arith.constant 0 : i32
    return %arg0, %c0_i32, %c0_i32_0 : i32, i32, i32
  }
}

module attributes {stable_mosaic.version = 11 : i64} {
  func.func @kernel(%arg0: i32, %arg1: memref<1x20x128xbf16, #tpu.memory_space<vmem>>, %arg2: memref<1x20x128xbf16, #tpu.memory_space<vmem>>, %arg3: memref<1x20x128xbf16, #tpu.memory_space<vmem>>, %arg4: memref<1x20x128xbf16, #tpu.memory_space<vmem>>, %arg5: memref<25x128x128xbf16, #tpu.memory_space<vmem>>, %arg6: memref<1x128xf32, #tpu.memory_space<vmem>>, %arg7: memref<1x8x128xbf16, #tpu.memory_space<vmem>>) attributes {dimension_semantics = [#tpu.dimension_semantics<parallel>], iteration_bounds = array<i64: 2>, scalar_prefetch = 0 : i64, scratch_operands = 0 : i64, tpu.core_type = #tpu.core_type<tc>, window_params = [{transform_indices = @transform_0, window_bounds = array<i64: 1, 20, 128>}, {transform_indices = @transform_1, window_bounds = array<i64: 1, 20, 128>}, {transform_indices = @transform_2, window_bounds = array<i64: 1, 20, 128>}, {transform_indices = @transform_3, window_bounds = array<i64: 1, 20, 128>}, {pipeline_mode = #tpu.pipeline_mode<synchronous>, transform_indices = @transform_4, window_bounds = array<i64: 25, 128, 128>}, {pipeline_mode = #tpu.pipeline_mode<synchronous>, transform_indices = @transform_5, window_bounds = array<i64: 1, 128>}, {transform_indices = @transform_6, window_bounds = array<i64: 1, 8, 128>}]} {
    %cst = arith.constant 0.000000e+00 : f32
    %0 = vector.broadcast %cst : f32 to vector<8x128xf32>
    %c0 = arith.constant 0 : index
    %c0_0 = arith.constant 0 : index
    %c0_1 = arith.constant 0 : index
    %1 = vector.load %arg1[%c0, %c0_0, %c0_1] : memref<1x20x128xbf16, #tpu.memory_space<vmem>>, vector<1x8x128xbf16>
    %2 = vector.shape_cast %1 : vector<1x8x128xbf16> to vector<8x128xbf16>
    %c0_2 = arith.constant 0 : index
    %c0_3 = arith.constant 0 : index
    %c0_4 = arith.constant 0 : index
    %3 = vector.load %arg5[%c0_2, %c0_3, %c0_4] : memref<25x128x128xbf16, #tpu.memory_space<vmem>>, vector<1x128x128xbf16>
    %4 = vector.shape_cast %3 : vector<1x128x128xbf16> to vector<128x128xbf16>
    %cst_5 = arith.constant dense<0.000000e+00> : vector<8x128xf32>
    %5 = tpu.matmul %2, %4, %cst_5 {dimension_numbers = #tpu.dot_dimension_numbers<[1], [0], [0], [1], [0, 0, 1, 1], [], []>} : vector<8x128xbf16>, vector<128x128xbf16>, vector<8x128xf32> -> vector<8x128xf32>
    %6 = arith.addf %0, %5 : vector<8x128xf32>
    %c0_6 = arith.constant 0 : index
    %c0_7 = arith.constant 0 : index
    %c0_8 = arith.constant 0 : index
    %7 = vector.load %arg2[%c0_6, %c0_7, %c0_8] : memref<1x20x128xbf16, #tpu.memory_space<vmem>>, vector<1x8x128xbf16>
    %8 = vector.shape_cast %7 : vector<1x8x128xbf16> to vector<8x128xbf16>
    %c1 = arith.constant 1 : index
    %c0_9 = arith.constant 0 : index
    %c0_10 = arith.constant 0 : index
    %9 = vector.load %arg5[%c1, %c0_9, %c0_10] : memref<25x128x128xbf16, #tpu.memory_space<vmem>>, vector<1x128x128xbf16>
    %10 = vector.shape_cast %9 : vector<1x128x128xbf16> to vector<128x128xbf16>
    %cst_11 = arith.constant dense<0.000000e+00> : vector<8x128xf32>
    %11 = tpu.matmul %8, %10, %cst_11 {dimension_numbers = #tpu.dot_dimension_numbers<[1], [0], [0], [1], [0, 0, 1, 1], [], []>} : vector<8x128xbf16>, vector<128x128xbf16>, vector<8x128xf32> -> vector<8x128xf32>
    %12 = arith.addf %6, %11 : vector<8x128xf32>
    %c0_12 = arith.constant 0 : index
    %c1_13 = arith.constant 1 : index
    %c0_14 = arith.constant 0 : index
    %13 = vector.load %arg1[%c0_12, %c1_13, %c0_14] : memref<1x20x128xbf16, #tpu.memory_space<vmem>>, vector<1x8x128xbf16>
    %14 = vector.shape_cast %13 : vector<1x8x128xbf16> to vector<8x128xbf16>
    %c2 = arith.constant 2 : index
    %c0_15 = arith.constant 0 : index
    %c0_16 = arith.constant 0 : index
    %15 = vector.load %arg5[%c2, %c0_15, %c0_16] : memref<25x128x128xbf16, #tpu.memory_space<vmem>>, vector<1x128x128xbf16>
    %16 = vector.shape_cast %15 : vector<1x128x128xbf16> to vector<128x128xbf16>
    %cst_17 = arith.constant dense<0.000000e+00> : vector<8x128xf32>
    %17 = tpu.matmul %14, %16, %cst_17 {dimension_numbers = #tpu.dot_dimension_numbers<[1], [0], [0], [1], [0, 0, 1, 1], [], []>} : vector<8x128xbf16>, vector<128x128xbf16>, vector<8x128xf32> -> vector<8x128xf32>
    %18 = arith.addf %12, %17 : vector<8x128xf32>
    %c0_18 = arith.constant 0 : index
    %c1_19 = arith.constant 1 : index
    %c0_20 = arith.constant 0 : index
    %19 = vector.load %arg2[%c0_18, %c1_19, %c0_20] : memref<1x20x128xbf16, #tpu.memory_space<vmem>>, vector<1x8x128xbf16>
    %20 = vector.shape_cast %19 : vector<1x8x128xbf16> to vector<8x128xbf16>
    %c3 = arith.constant 3 : index
    %c0_21 = arith.constant 0 : index
    %c0_22 = arith.constant 0 : index
    %21 = vector.load %arg5[%c3, %c0_21, %c0_22] : memref<25x128x128xbf16, #tpu.memory_space<vmem>>, vector<1x128x128xbf16>
    %22 = vector.shape_cast %21 : vector<1x128x128xbf16> to vector<128x128xbf16>
    %cst_23 = arith.constant dense<0.000000e+00> : vector<8x128xf32>
    %23 = tpu.matmul %20, %22, %cst_23 {dimension_numbers = #tpu.dot_dimension_numbers<[1], [0], [0], [1], [0, 0, 1, 1], [], []>} : vector<8x128xbf16>, vector<128x128xbf16>, vector<8x128xf32> -> vector<8x128xf32>
    %24 = arith.addf %18, %23 : vector<8x128xf32>
    %c0_24 = arith.constant 0 : index
    %c2_25 = arith.constant 2 : index
    %c0_26 = arith.constant 0 : index
    %25 = vector.load %arg1[%c0_24, %c2_25, %c0_26] : memref<1x20x128xbf16, #tpu.memory_space<vmem>>, vector<1x8x128xbf16>
    %26 = vector.shape_cast %25 : vector<1x8x128xbf16> to vector<8x128xbf16>
    %c4 = arith.constant 4 : index
    %c0_27 = arith.constant 0 : index
    %c0_28 = arith.constant 0 : index
    %27 = vector.load %arg5[%c4, %c0_27, %c0_28] : memref<25x128x128xbf16, #tpu.memory_space<vmem>>, vector<1x128x128xbf16>
    %28 = vector.shape_cast %27 : vector<1x128x128xbf16> to vector<128x128xbf16>
    %cst_29 = arith.constant dense<0.000000e+00> : vector<8x128xf32>
    %29 = tpu.matmul %26, %28, %cst_29 {dimension_numbers = #tpu.dot_dimension_numbers<[1], [0], [0], [1], [0, 0, 1, 1], [], []>} : vector<8x128xbf16>, vector<128x128xbf16>, vector<8x128xf32> -> vector<8x128xf32>
    %30 = arith.addf %24, %29 : vector<8x128xf32>
    %c0_30 = arith.constant 0 : index
    %c0_31 = arith.constant 0 : index
    %c0_32 = arith.constant 0 : index
    %31 = vector.load %arg3[%c0_30, %c0_31, %c0_32] : memref<1x20x128xbf16, #tpu.memory_space<vmem>>, vector<1x8x128xbf16>
    %32 = vector.shape_cast %31 : vector<1x8x128xbf16> to vector<8x128xbf16>
    %c5 = arith.constant 5 : index
    %c0_33 = arith.constant 0 : index
    %c0_34 = arith.constant 0 : index
    %33 = vector.load %arg5[%c5, %c0_33, %c0_34] : memref<25x128x128xbf16, #tpu.memory_space<vmem>>, vector<1x128x128xbf16>
    %34 = vector.shape_cast %33 : vector<1x128x128xbf16> to vector<128x128xbf16>
    %cst_35 = arith.constant dense<0.000000e+00> : vector<8x128xf32>
    %35 = tpu.matmul %32, %34, %cst_35 {dimension_numbers = #tpu.dot_dimension_numbers<[1], [0], [0], [1], [0, 0, 1, 1], [], []>} : vector<8x128xbf16>, vector<128x128xbf16>, vector<8x128xf32> -> vector<8x128xf32>
    %36 = arith.addf %30, %35 : vector<8x128xf32>
    %c0_36 = arith.constant 0 : index
    %c0_37 = arith.constant 0 : index
    %c0_38 = arith.constant 0 : index
    %37 = vector.load %arg4[%c0_36, %c0_37, %c0_38] : memref<1x20x128xbf16, #tpu.memory_space<vmem>>, vector<1x8x128xbf16>
    %38 = vector.shape_cast %37 : vector<1x8x128xbf16> to vector<8x128xbf16>
    %c6 = arith.constant 6 : index
    %c0_39 = arith.constant 0 : index
    %c0_40 = arith.constant 0 : index
    %39 = vector.load %arg5[%c6, %c0_39, %c0_40] : memref<25x128x128xbf16, #tpu.memory_space<vmem>>, vector<1x128x128xbf16>
    %40 = vector.shape_cast %39 : vector<1x128x128xbf16> to vector<128x128xbf16>
    %cst_41 = arith.constant dense<0.000000e+00> : vector<8x128xf32>
    %41 = tpu.matmul %38, %40, %cst_41 {dimension_numbers = #tpu.dot_dimension_numbers<[1], [0], [0], [1], [0, 0, 1, 1], [], []>} : vector<8x128xbf16>, vector<128x128xbf16>, vector<8x128xf32> -> vector<8x128xf32>
    %42 = arith.addf %36, %41 : vector<8x128xf32>
    %c0_42 = arith.constant 0 : index
    %c1_43 = arith.constant 1 : index
    %c0_44 = arith.constant 0 : index
    %43 = vector.load %arg3[%c0_42, %c1_43, %c0_44] : memref<1x20x128xbf16, #tpu.memory_space<vmem>>, vector<1x8x128xbf16>
    %44 = vector.shape_cast %43 : vector<1x8x128xbf16> to vector<8x128xbf16>
    %c7 = arith.constant 7 : index
    %c0_45 = arith.constant 0 : index
    %c0_46 = arith.constant 0 : index
    %45 = vector.load %arg5[%c7, %c0_45, %c0_46] : memref<25x128x128xbf16, #tpu.memory_space<vmem>>, vector<1x128x128xbf16>
    %46 = vector.shape_cast %45 : vector<1x128x128xbf16> to vector<128x128xbf16>
    %cst_47 = arith.constant dense<0.000000e+00> : vector<8x128xf32>
    %47 = tpu.matmul %44, %46, %cst_47 {dimension_numbers = #tpu.dot_dimension_numbers<[1], [0], [0], [1], [0, 0, 1, 1], [], []>} : vector<8x128xbf16>, vector<128x128xbf16>, vector<8x128xf32> -> vector<8x128xf32>
    %48 = arith.addf %42, %47 : vector<8x128xf32>
    %c0_48 = arith.constant 0 : index
    %c1_49 = arith.constant 1 : index
    %c0_50 = arith.constant 0 : index
    %49 = vector.load %arg4[%c0_48, %c1_49, %c0_50] : memref<1x20x128xbf16, #tpu.memory_space<vmem>>, vector<1x8x128xbf16>
    %50 = vector.shape_cast %49 : vector<1x8x128xbf16> to vector<8x128xbf16>
    %c8 = arith.constant 8 : index
    %c0_51 = arith.constant 0 : index
    %c0_52 = arith.constant 0 : index
    %51 = vector.load %arg5[%c8, %c0_51, %c0_52] : memref<25x128x128xbf16, #tpu.memory_space<vmem>>, vector<1x128x128xbf16>
    %52 = vector.shape_cast %51 : vector<1x128x128xbf16> to vector<128x128xbf16>
    %cst_53 = arith.constant dense<0.000000e+00> : vector<8x128xf32>
    %53 = tpu.matmul %50, %52, %cst_53 {dimension_numbers = #tpu.dot_dimension_numbers<[1], [0], [0], [1], [0, 0, 1, 1], [], []>} : vector<8x128xbf16>, vector<128x128xbf16>, vector<8x128xf32> -> vector<8x128xf32>
    %54 = arith.addf %48, %53 : vector<8x128xf32>
    %c0_54 = arith.constant 0 : index
    %c2_55 = arith.constant 2 : index
    %c0_56 = arith.constant 0 : index
    %55 = vector.load %arg3[%c0_54, %c2_55, %c0_56] : memref<1x20x128xbf16, #tpu.memory_space<vmem>>, vector<1x8x128xbf16>
    %56 = vector.shape_cast %55 : vector<1x8x128xbf16> to vector<8x128xbf16>
    %c9 = arith.constant 9 : index
    %c0_57 = arith.constant 0 : index
    %c0_58 = arith.constant 0 : index
    %57 = vector.load %arg5[%c9, %c0_57, %c0_58] : memref<25x128x128xbf16, #tpu.memory_space<vmem>>, vector<1x128x128xbf16>
    %58 = vector.shape_cast %57 : vector<1x128x128xbf16> to vector<128x128xbf16>
    %cst_59 = arith.constant dense<0.000000e+00> : vector<8x128xf32>
    %59 = tpu.matmul %56, %58, %cst_59 {dimension_numbers = #tpu.dot_dimension_numbers<[1], [0], [0], [1], [0, 0, 1, 1], [], []>} : vector<8x128xbf16>, vector<128x128xbf16>, vector<8x128xf32> -> vector<8x128xf32>
    %60 = arith.addf %54, %59 : vector<8x128xf32>
    %c0_60 = arith.constant 0 : index
    %c4_61 = arith.constant 4 : index
    %c0_62 = arith.constant 0 : index
    %61 = vector.load %arg1[%c0_60, %c4_61, %c0_62] : memref<1x20x128xbf16, #tpu.memory_space<vmem>>, vector<1x8x128xbf16>
    %62 = vector.shape_cast %61 : vector<1x8x128xbf16> to vector<8x128xbf16>
    %c10 = arith.constant 10 : index
    %c0_63 = arith.constant 0 : index
    %c0_64 = arith.constant 0 : index
    %63 = vector.load %arg5[%c10, %c0_63, %c0_64] : memref<25x128x128xbf16, #tpu.memory_space<vmem>>, vector<1x128x128xbf16>
    %64 = vector.shape_cast %63 : vector<1x128x128xbf16> to vector<128x128xbf16>
    %cst_65 = arith.constant dense<0.000000e+00> : vector<8x128xf32>
    %65 = tpu.matmul %62, %64, %cst_65 {dimension_numbers = #tpu.dot_dimension_numbers<[1], [0], [0], [1], [0, 0, 1, 1], [], []>} : vector<8x128xbf16>, vector<128x128xbf16>, vector<8x128xf32> -> vector<8x128xf32>
    %66 = arith.addf %60, %65 : vector<8x128xf32>
    %c0_66 = arith.constant 0 : index
    %c4_67 = arith.constant 4 : index
    %c0_68 = arith.constant 0 : index
    %67 = vector.load %arg2[%c0_66, %c4_67, %c0_68] : memref<1x20x128xbf16, #tpu.memory_space<vmem>>, vector<1x8x128xbf16>
    %68 = vector.shape_cast %67 : vector<1x8x128xbf16> to vector<8x128xbf16>
    %c11 = arith.constant 11 : index
    %c0_69 = arith.constant 0 : index
    %c0_70 = arith.constant 0 : index
    %69 = vector.load %arg5[%c11, %c0_69, %c0_70] : memref<25x128x128xbf16, #tpu.memory_space<vmem>>, vector<1x128x128xbf16>
    %70 = vector.shape_cast %69 : vector<1x128x128xbf16> to vector<128x128xbf16>
    %cst_71 = arith.constant dense<0.000000e+00> : vector<8x128xf32>
    %71 = tpu.matmul %68, %70, %cst_71 {dimension_numbers = #tpu.dot_dimension_numbers<[1], [0], [0], [1], [0, 0, 1, 1], [], []>} : vector<8x128xbf16>, vector<128x128xbf16>, vector<8x128xf32> -> vector<8x128xf32>
    %72 = arith.addf %66, %71 : vector<8x128xf32>
    %c0_72 = arith.constant 0 : index
    %c5_73 = arith.constant 5 : index
    %c0_74 = arith.constant 0 : index
    %73 = vector.load %arg1[%c0_72, %c5_73, %c0_74] : memref<1x20x128xbf16, #tpu.memory_space<vmem>>, vector<1x8x128xbf16>
    %74 = vector.shape_cast %73 : vector<1x8x128xbf16> to vector<8x128xbf16>
    %c12 = arith.constant 12 : index
    %c0_75 = arith.constant 0 : index
    %c0_76 = arith.constant 0 : index
    %75 = vector.load %arg5[%c12, %c0_75, %c0_76] : memref<25x128x128xbf16, #tpu.memory_space<vmem>>, vector<1x128x128xbf16>
    %76 = vector.shape_cast %75 : vector<1x128x128xbf16> to vector<128x128xbf16>
    %cst_77 = arith.constant dense<0.000000e+00> : vector<8x128xf32>
    %77 = tpu.matmul %74, %76, %cst_77 {dimension_numbers = #tpu.dot_dimension_numbers<[1], [0], [0], [1], [0, 0, 1, 1], [], []>} : vector<8x128xbf16>, vector<128x128xbf16>, vector<8x128xf32> -> vector<8x128xf32>
    %78 = arith.addf %72, %77 : vector<8x128xf32>
    %c0_78 = arith.constant 0 : index
    %c5_79 = arith.constant 5 : index
    %c0_80 = arith.constant 0 : index
    %79 = vector.load %arg2[%c0_78, %c5_79, %c0_80] : memref<1x20x128xbf16, #tpu.memory_space<vmem>>, vector<1x8x128xbf16>
    %80 = vector.shape_cast %79 : vector<1x8x128xbf16> to vector<8x128xbf16>
    %c13 = arith.constant 13 : index
    %c0_81 = arith.constant 0 : index
    %c0_82 = arith.constant 0 : index
    %81 = vector.load %arg5[%c13, %c0_81, %c0_82] : memref<25x128x128xbf16, #tpu.memory_space<vmem>>, vector<1x128x128xbf16>
    %82 = vector.shape_cast %81 : vector<1x128x128xbf16> to vector<128x128xbf16>
    %cst_83 = arith.constant dense<0.000000e+00> : vector<8x128xf32>
    %83 = tpu.matmul %80, %82, %cst_83 {dimension_numbers = #tpu.dot_dimension_numbers<[1], [0], [0], [1], [0, 0, 1, 1], [], []>} : vector<8x128xbf16>, vector<128x128xbf16>, vector<8x128xf32> -> vector<8x128xf32>
    %84 = arith.addf %78, %83 : vector<8x128xf32>
    %c0_84 = arith.constant 0 : index
    %c6_85 = arith.constant 6 : index
    %c0_86 = arith.constant 0 : index
    %85 = vector.load %arg1[%c0_84, %c6_85, %c0_86] : memref<1x20x128xbf16, #tpu.memory_space<vmem>>, vector<1x8x128xbf16>
    %86 = vector.shape_cast %85 : vector<1x8x128xbf16> to vector<8x128xbf16>
    %c14 = arith.constant 14 : index
    %c0_87 = arith.constant 0 : index
    %c0_88 = arith.constant 0 : index
    %87 = vector.load %arg5[%c14, %c0_87, %c0_88] : memref<25x128x128xbf16, #tpu.memory_space<vmem>>, vector<1x128x128xbf16>
    %88 = vector.shape_cast %87 : vector<1x128x128xbf16> to vector<128x128xbf16>
    %cst_89 = arith.constant dense<0.000000e+00> : vector<8x128xf32>
    %89 = tpu.matmul %86, %88, %cst_89 {dimension_numbers = #tpu.dot_dimension_numbers<[1], [0], [0], [1], [0, 0, 1, 1], [], []>} : vector<8x128xbf16>, vector<128x128xbf16>, vector<8x128xf32> -> vector<8x128xf32>
    %90 = arith.addf %84, %89 : vector<8x128xf32>
    %c0_90 = arith.constant 0 : index
    %c4_91 = arith.constant 4 : index
    %c0_92 = arith.constant 0 : index
    %91 = vector.load %arg3[%c0_90, %c4_91, %c0_92] : memref<1x20x128xbf16, #tpu.memory_space<vmem>>, vector<1x8x128xbf16>
    %92 = vector.shape_cast %91 : vector<1x8x128xbf16> to vector<8x128xbf16>
    %c15 = arith.constant 15 : index
    %c0_93 = arith.constant 0 : index
    %c0_94 = arith.constant 0 : index
    %93 = vector.load %arg5[%c15, %c0_93, %c0_94] : memref<25x128x128xbf16, #tpu.memory_space<vmem>>, vector<1x128x128xbf16>
    %94 = vector.shape_cast %93 : vector<1x128x128xbf16> to vector<128x128xbf16>
    %cst_95 = arith.constant dense<0.000000e+00> : vector<8x128xf32>
    %95 = tpu.matmul %92, %94, %cst_95 {dimension_numbers = #tpu.dot_dimension_numbers<[1], [0], [0], [1], [0, 0, 1, 1], [], []>} : vector<8x128xbf16>, vector<128x128xbf16>, vector<8x128xf32> -> vector<8x128xf32>
    %96 = arith.addf %90, %95 : vector<8x128xf32>
    %c0_96 = arith.constant 0 : index
    %c4_97 = arith.constant 4 : index
    %c0_98 = arith.constant 0 : index
    %97 = vector.load %arg4[%c0_96, %c4_97, %c0_98] : memref<1x20x128xbf16, #tpu.memory_space<vmem>>, vector<1x8x128xbf16>
    %98 = vector.shape_cast %97 : vector<1x8x128xbf16> to vector<8x128xbf16>
    %c16 = arith.constant 16 : index
    %c0_99 = arith.constant 0 : index
    %c0_100 = arith.constant 0 : index
    %99 = vector.load %arg5[%c16, %c0_99, %c0_100] : memref<25x128x128xbf16, #tpu.memory_space<vmem>>, vector<1x128x128xbf16>
    %100 = vector.shape_cast %99 : vector<1x128x128xbf16> to vector<128x128xbf16>
    %cst_101 = arith.constant dense<0.000000e+00> : vector<8x128xf32>
    %101 = tpu.matmul %98, %100, %cst_101 {dimension_numbers = #tpu.dot_dimension_numbers<[1], [0], [0], [1], [0, 0, 1, 1], [], []>} : vector<8x128xbf16>, vector<128x128xbf16>, vector<8x128xf32> -> vector<8x128xf32>
    %102 = arith.addf %96, %101 : vector<8x128xf32>
    %c0_102 = arith.constant 0 : index
    %c5_103 = arith.constant 5 : index
    %c0_104 = arith.constant 0 : index
    %103 = vector.load %arg3[%c0_102, %c5_103, %c0_104] : memref<1x20x128xbf16, #tpu.memory_space<vmem>>, vector<1x8x128xbf16>
    %104 = vector.shape_cast %103 : vector<1x8x128xbf16> to vector<8x128xbf16>
    %c17 = arith.constant 17 : index
    %c0_105 = arith.constant 0 : index
    %c0_106 = arith.constant 0 : index
    %105 = vector.load %arg5[%c17, %c0_105, %c0_106] : memref<25x128x128xbf16, #tpu.memory_space<vmem>>, vector<1x128x128xbf16>
    %106 = vector.shape_cast %105 : vector<1x128x128xbf16> to vector<128x128xbf16>
    %cst_107 = arith.constant dense<0.000000e+00> : vector<8x128xf32>
    %107 = tpu.matmul %104, %106, %cst_107 {dimension_numbers = #tpu.dot_dimension_numbers<[1], [0], [0], [1], [0, 0, 1, 1], [], []>} : vector<8x128xbf16>, vector<128x128xbf16>, vector<8x128xf32> -> vector<8x128xf32>
    %108 = arith.addf %102, %107 : vector<8x128xf32>
    %c0_108 = arith.constant 0 : index
    %c5_109 = arith.constant 5 : index
    %c0_110 = arith.constant 0 : index
    %109 = vector.load %arg4[%c0_108, %c5_109, %c0_110] : memref<1x20x128xbf16, #tpu.memory_space<vmem>>, vector<1x8x128xbf16>
    %110 = vector.shape_cast %109 : vector<1x8x128xbf16> to vector<8x128xbf16>
    %c18 = arith.constant 18 : index
    %c0_111 = arith.constant 0 : index
    %c0_112 = arith.constant 0 : index
    %111 = vector.load %arg5[%c18, %c0_111, %c0_112] : memref<25x128x128xbf16, #tpu.memory_space<vmem>>, vector<1x128x128xbf16>
    %112 = vector.shape_cast %111 : vector<1x128x128xbf16> to vector<128x128xbf16>
    %cst_113 = arith.constant dense<0.000000e+00> : vector<8x128xf32>
    %113 = tpu.matmul %110, %112, %cst_113 {dimension_numbers = #tpu.dot_dimension_numbers<[1], [0], [0], [1], [0, 0, 1, 1], [], []>} : vector<8x128xbf16>, vector<128x128xbf16>, vector<8x128xf32> -> vector<8x128xf32>
    %114 = arith.addf %108, %113 : vector<8x128xf32>
    %c0_114 = arith.constant 0 : index
    %c6_115 = arith.constant 6 : index
    %c0_116 = arith.constant 0 : index
    %115 = vector.load %arg3[%c0_114, %c6_115, %c0_116] : memref<1x20x128xbf16, #tpu.memory_space<vmem>>, vector<1x8x128xbf16>
    %116 = vector.shape_cast %115 : vector<1x8x128xbf16> to vector<8x128xbf16>
    %c19 = arith.constant 19 : index
    %c0_117 = arith.constant 0 : index
    %c0_118 = arith.constant 0 : index
    %117 = vector.load %arg5[%c19, %c0_117, %c0_118] : memref<25x128x128xbf16, #tpu.memory_space<vmem>>, vector<1x128x128xbf16>
    %118 = vector.shape_cast %117 : vector<1x128x128xbf16> to vector<128x128xbf16>
    %cst_119 = arith.constant dense<0.000000e+00> : vector<8x128xf32>
    %119 = tpu.matmul %116, %118, %cst_119 {dimension_numbers = #tpu.dot_dimension_numbers<[1], [0], [0], [1], [0, 0, 1, 1], [], []>} : vector<8x128xbf16>, vector<128x128xbf16>, vector<8x128xf32> -> vector<8x128xf32>
    %120 = arith.addf %114, %119 : vector<8x128xf32>
    %c0_120 = arith.constant 0 : index
    %c8_121 = arith.constant 8 : index
    %c0_122 = arith.constant 0 : index
    %121 = vector.load %arg1[%c0_120, %c8_121, %c0_122] : memref<1x20x128xbf16, #tpu.memory_space<vmem>>, vector<1x8x128xbf16>
    %122 = vector.shape_cast %121 : vector<1x8x128xbf16> to vector<8x128xbf16>
    %c20 = arith.constant 20 : index
    %c0_123 = arith.constant 0 : index
    %c0_124 = arith.constant 0 : index
    %123 = vector.load %arg5[%c20, %c0_123, %c0_124] : memref<25x128x128xbf16, #tpu.memory_space<vmem>>, vector<1x128x128xbf16>
    %124 = vector.shape_cast %123 : vector<1x128x128xbf16> to vector<128x128xbf16>
    %cst_125 = arith.constant dense<0.000000e+00> : vector<8x128xf32>
    %125 = tpu.matmul %122, %124, %cst_125 {dimension_numbers = #tpu.dot_dimension_numbers<[1], [0], [0], [1], [0, 0, 1, 1], [], []>} : vector<8x128xbf16>, vector<128x128xbf16>, vector<8x128xf32> -> vector<8x128xf32>
    %126 = arith.addf %120, %125 : vector<8x128xf32>
    %c0_126 = arith.constant 0 : index
    %c8_127 = arith.constant 8 : index
    %c0_128 = arith.constant 0 : index
    %127 = vector.load %arg2[%c0_126, %c8_127, %c0_128] : memref<1x20x128xbf16, #tpu.memory_space<vmem>>, vector<1x8x128xbf16>
    %128 = vector.shape_cast %127 : vector<1x8x128xbf16> to vector<8x128xbf16>
    %c21 = arith.constant 21 : index
    %c0_129 = arith.constant 0 : index
    %c0_130 = arith.constant 0 : index
    %129 = vector.load %arg5[%c21, %c0_129, %c0_130] : memref<25x128x128xbf16, #tpu.memory_space<vmem>>, vector<1x128x128xbf16>
    %130 = vector.shape_cast %129 : vector<1x128x128xbf16> to vector<128x128xbf16>
    %cst_131 = arith.constant dense<0.000000e+00> : vector<8x128xf32>
    %131 = tpu.matmul %128, %130, %cst_131 {dimension_numbers = #tpu.dot_dimension_numbers<[1], [0], [0], [1], [0, 0, 1, 1], [], []>} : vector<8x128xbf16>, vector<128x128xbf16>, vector<8x128xf32> -> vector<8x128xf32>
    %132 = arith.addf %126, %131 : vector<8x128xf32>
    %c0_132 = arith.constant 0 : index
    %c9_133 = arith.constant 9 : index
    %c0_134 = arith.constant 0 : index
    %133 = vector.load %arg1[%c0_132, %c9_133, %c0_134] : memref<1x20x128xbf16, #tpu.memory_space<vmem>>, vector<1x8x128xbf16>
    %134 = vector.shape_cast %133 : vector<1x8x128xbf16> to vector<8x128xbf16>
    %c22 = arith.constant 22 : index
    %c0_135 = arith.constant 0 : index
    %c0_136 = arith.constant 0 : index
    %135 = vector.load %arg5[%c22, %c0_135, %c0_136] : memref<25x128x128xbf16, #tpu.memory_space<vmem>>, vector<1x128x128xbf16>
    %136 = vector.shape_cast %135 : vector<1x128x128xbf16> to vector<128x128xbf16>
    %cst_137 = arith.constant dense<0.000000e+00> : vector<8x128xf32>
    %137 = tpu.matmul %134, %136, %cst_137 {dimension_numbers = #tpu.dot_dimension_numbers<[1], [0], [0], [1], [0, 0, 1, 1], [], []>} : vector<8x128xbf16>, vector<128x128xbf16>, vector<8x128xf32> -> vector<8x128xf32>
    %138 = arith.addf %132, %137 : vector<8x128xf32>
    %c0_138 = arith.constant 0 : index
    %c9_139 = arith.constant 9 : index
    %c0_140 = arith.constant 0 : index
    %139 = vector.load %arg2[%c0_138, %c9_139, %c0_140] : memref<1x20x128xbf16, #tpu.memory_space<vmem>>, vector<1x8x128xbf16>
    %140 = vector.shape_cast %139 : vector<1x8x128xbf16> to vector<8x128xbf16>
    %c23 = arith.constant 23 : index
    %c0_141 = arith.constant 0 : index
    %c0_142 = arith.constant 0 : index
    %141 = vector.load %arg5[%c23, %c0_141, %c0_142] : memref<25x128x128xbf16, #tpu.memory_space<vmem>>, vector<1x128x128xbf16>
    %142 = vector.shape_cast %141 : vector<1x128x128xbf16> to vector<128x128xbf16>
    %cst_143 = arith.constant dense<0.000000e+00> : vector<8x128xf32>
    %143 = tpu.matmul %140, %142, %cst_143 {dimension_numbers = #tpu.dot_dimension_numbers<[1], [0], [0], [1], [0, 0, 1, 1], [], []>} : vector<8x128xbf16>, vector<128x128xbf16>, vector<8x128xf32> -> vector<8x128xf32>
    %144 = arith.addf %138, %143 : vector<8x128xf32>
    %c0_144 = arith.constant 0 : index
    %c10_145 = arith.constant 10 : index
    %c0_146 = arith.constant 0 : index
    %145 = vector.load %arg1[%c0_144, %c10_145, %c0_146] : memref<1x20x128xbf16, #tpu.memory_space<vmem>>, vector<1x8x128xbf16>
    %146 = vector.shape_cast %145 : vector<1x8x128xbf16> to vector<8x128xbf16>
    %c24 = arith.constant 24 : index
    %c0_147 = arith.constant 0 : index
    %c0_148 = arith.constant 0 : index
    %147 = vector.load %arg5[%c24, %c0_147, %c0_148] : memref<25x128x128xbf16, #tpu.memory_space<vmem>>, vector<1x128x128xbf16>
    %148 = vector.shape_cast %147 : vector<1x128x128xbf16> to vector<128x128xbf16>
    %cst_149 = arith.constant dense<0.000000e+00> : vector<8x128xf32>
    %149 = tpu.matmul %146, %148, %cst_149 {dimension_numbers = #tpu.dot_dimension_numbers<[1], [0], [0], [1], [0, 0, 1, 1], [], []>} : vector<8x128xbf16>, vector<128x128xbf16>, vector<8x128xf32> -> vector<8x128xf32>
    %150 = arith.addf %144, %149 : vector<8x128xf32>
    %c0_150 = arith.constant 0 : index
    %c0_151 = arith.constant 0 : index
    %151 = vector.load %arg6[%c0_150, %c0_151] : memref<1x128xf32, #tpu.memory_space<vmem>>, vector<1x128xf32>
    %152 = vector.broadcast %151 : vector<1x128xf32> to vector<8x128xf32>
    %153 = arith.addf %150, %152 : vector<8x128xf32>
    %cst_152 = arith.constant 0.000000e+00 : f32
    %154 = vector.broadcast %cst_152 : f32 to vector<8x128xf32>
    %155 = arith.maximumf %153, %154 : vector<8x128xf32>
    %156 = arith.truncf %155 : vector<8x128xf32> to vector<8x128xbf16>
    %c0_153 = arith.constant 0 : index
    %c0_154 = arith.constant 0 : index
    %c0_155 = arith.constant 0 : index
    %157 = vector.load %arg7[%c0_153, %c0_154, %c0_155] : memref<1x8x128xbf16, #tpu.memory_space<vmem>>, vector<1x8x128xbf16>
    %158 = vector.shape_cast %157 : vector<1x8x128xbf16> to vector<8x128xbf16>
    %159 = vector.shape_cast %156 : vector<8x128xbf16> to vector<1x8x128xbf16>
    tpu.vector_store %arg7[%c0_153, %c0_154, %c0_155], %159 {strides = array<i32>} : memref<1x8x128xbf16, #tpu.memory_space<vmem>>, vector<1x8x128xbf16>,
    return
  }
  func.func @transform_0(%arg0: i32) -> (i32, i32, i32) {
    %c0_i32 = arith.constant 0 : i32
    %c0_i32_0 = arith.constant 0 : i32
    %c0_i32_1 = arith.constant 0 : i32
    return %arg0, %c0_i32, %c0_i32_0 : i32, i32, i32
  }
  func.func @transform_1(%arg0: i32) -> (i32, i32, i32) {
    %c0_i32 = arith.constant 0 : i32
    %c0_i32_0 = arith.constant 0 : i32
    %c0_i32_1 = arith.constant 0 : i32
    return %arg0, %c0_i32, %c0_i32_0 : i32, i32, i32
  }
  func.func @transform_2(%arg0: i32) -> (i32, i32, i32) {
    %c0_i32 = arith.constant 0 : i32
    %c0_i32_0 = arith.constant 0 : i32
    %c0_i32_1 = arith.constant 0 : i32
    return %arg0, %c0_i32, %c0_i32_0 : i32, i32, i32
  }
  func.func @transform_3(%arg0: i32) -> (i32, i32, i32) {
    %c0_i32 = arith.constant 0 : i32
    %c0_i32_0 = arith.constant 0 : i32
    %c0_i32_1 = arith.constant 0 : i32
    return %arg0, %c0_i32, %c0_i32_0 : i32, i32, i32
  }
  func.func @transform_4(%arg0: i32) -> (i32, i32, i32) {
    %c0_i32 = arith.constant 0 : i32
    %c0_i32_0 = arith.constant 0 : i32
    %c0_i32_1 = arith.constant 0 : i32
    %c0_i32_2 = arith.constant 0 : i32
    return %c0_i32, %c0_i32_0, %c0_i32_1 : i32, i32, i32
  }
  func.func @transform_5(%arg0: i32) -> (i32, i32) {
    %c0_i32 = arith.constant 0 : i32
    %c0_i32_0 = arith.constant 0 : i32
    %c0_i32_1 = arith.constant 0 : i32
    return %c0_i32, %c0_i32_0 : i32, i32
  }
  func.func @transform_6(%arg0: i32) -> (i32, i32, i32) {
    %c0_i32 = arith.constant 0 : i32
    %c0_i32_0 = arith.constant 0 : i32
    %c0_i32_1 = arith.constant 0 : i32
    return %arg0, %c0_i32, %c0_i32_0 : i32, i32, i32
  }
}

module attributes {stable_mosaic.version = 11 : i64} {
  func.func @kernel(%arg0: i32, %arg1: memref<1x42x128xbf16, #tpu.memory_space<vmem>>, %arg2: memref<9x128x128xbf16, #tpu.memory_space<vmem>>, %arg3: memref<1x128xf32, #tpu.memory_space<vmem>>, %arg4: memref<1x24x128xbf16, #tpu.memory_space<vmem>>) attributes {dimension_semantics = [#tpu.dimension_semantics<parallel>], iteration_bounds = array<i64: 2>, scalar_prefetch = 0 : i64, scratch_operands = 0 : i64, tpu.core_type = #tpu.core_type<tc>, window_params = [{transform_indices = @transform_0, window_bounds = array<i64: 1, 42, 128>}, {pipeline_mode = #tpu.pipeline_mode<synchronous>, transform_indices = @transform_1, window_bounds = array<i64: 9, 128, 128>}, {pipeline_mode = #tpu.pipeline_mode<synchronous>, transform_indices = @transform_2, window_bounds = array<i64: 1, 128>}, {transform_indices = @transform_3, window_bounds = array<i64: 1, 24, 128>}]} {
    %cst = arith.constant 0.000000e+00 : f32
    %0 = vector.broadcast %cst : f32 to vector<24x128xf32>
    %c0 = arith.constant 0 : index
    %c0_0 = arith.constant 0 : index
    %c0_1 = arith.constant 0 : index
    %1 = vector.load %arg1[%c0, %c0_0, %c0_1] : memref<1x42x128xbf16, #tpu.memory_space<vmem>>, vector<1x24x128xbf16>
    %2 = vector.shape_cast %1 : vector<1x24x128xbf16> to vector<24x128xbf16>
    %c0_2 = arith.constant 0 : index
    %c0_3 = arith.constant 0 : index
    %c0_4 = arith.constant 0 : index
    %3 = vector.load %arg2[%c0_2, %c0_3, %c0_4] : memref<9x128x128xbf16, #tpu.memory_space<vmem>>, vector<1x128x128xbf16>
    %4 = vector.shape_cast %3 : vector<1x128x128xbf16> to vector<128x128xbf16>
    %cst_5 = arith.constant dense<0.000000e+00> : vector<24x128xf32>
    %5 = tpu.matmul %2, %4, %cst_5 {dimension_numbers = #tpu.dot_dimension_numbers<[1], [0], [0], [1], [0, 0, 1, 1], [], []>} : vector<24x128xbf16>, vector<128x128xbf16>, vector<24x128xf32> -> vector<24x128xf32>
    %6 = arith.addf %0, %5 : vector<24x128xf32>
    %c0_6 = arith.constant 0 : index
    %c1 = arith.constant 1 : index
    %c0_7 = arith.constant 0 : index
    %7 = vector.load %arg1[%c0_6, %c1, %c0_7] : memref<1x42x128xbf16, #tpu.memory_space<vmem>>, vector<1x24x128xbf16>
    %8 = vector.shape_cast %7 : vector<1x24x128xbf16> to vector<24x128xbf16>
    %c1_8 = arith.constant 1 : index
    %c0_9 = arith.constant 0 : index
    %c0_10 = arith.constant 0 : index
    %9 = vector.load %arg2[%c1_8, %c0_9, %c0_10] : memref<9x128x128xbf16, #tpu.memory_space<vmem>>, vector<1x128x128xbf16>
    %10 = vector.shape_cast %9 : vector<1x128x128xbf16> to vector<128x128xbf16>
    %cst_11 = arith.constant dense<0.000000e+00> : vector<24x128xf32>
    %11 = tpu.matmul %8, %10, %cst_11 {dimension_numbers = #tpu.dot_dimension_numbers<[1], [0], [0], [1], [0, 0, 1, 1], [], []>} : vector<24x128xbf16>, vector<128x128xbf16>, vector<24x128xf32> -> vector<24x128xf32>
    %12 = arith.addf %6, %11 : vector<24x128xf32>
    %c0_12 = arith.constant 0 : index
    %c2 = arith.constant 2 : index
    %c0_13 = arith.constant 0 : index
    %13 = vector.load %arg1[%c0_12, %c2, %c0_13] : memref<1x42x128xbf16, #tpu.memory_space<vmem>>, vector<1x24x128xbf16>
    %14 = vector.shape_cast %13 : vector<1x24x128xbf16> to vector<24x128xbf16>
    %c2_14 = arith.constant 2 : index
    %c0_15 = arith.constant 0 : index
    %c0_16 = arith.constant 0 : index
    %15 = vector.load %arg2[%c2_14, %c0_15, %c0_16] : memref<9x128x128xbf16, #tpu.memory_space<vmem>>, vector<1x128x128xbf16>
    %16 = vector.shape_cast %15 : vector<1x128x128xbf16> to vector<128x128xbf16>
    %cst_17 = arith.constant dense<0.000000e+00> : vector<24x128xf32>
    %17 = tpu.matmul %14, %16, %cst_17 {dimension_numbers = #tpu.dot_dimension_numbers<[1], [0], [0], [1], [0, 0, 1, 1], [], []>} : vector<24x128xbf16>, vector<128x128xbf16>, vector<24x128xf32> -> vector<24x128xf32>
    %18 = arith.addf %12, %17 : vector<24x128xf32>
    %c0_18 = arith.constant 0 : index
    %c6 = arith.constant 6 : index
    %c0_19 = arith.constant 0 : index
    %19 = vector.load %arg1[%c0_18, %c6, %c0_19] : memref<1x42x128xbf16, #tpu.memory_space<vmem>>, vector<1x24x128xbf16>
    %20 = vector.shape_cast %19 : vector<1x24x128xbf16> to vector<24x128xbf16>
    %c3 = arith.constant 3 : index
    %c0_20 = arith.constant 0 : index
    %c0_21 = arith.constant 0 : index
    %21 = vector.load %arg2[%c3, %c0_20, %c0_21] : memref<9x128x128xbf16, #tpu.memory_space<vmem>>, vector<1x128x128xbf16>
    %22 = vector.shape_cast %21 : vector<1x128x128xbf16> to vector<128x128xbf16>
    %cst_22 = arith.constant dense<0.000000e+00> : vector<24x128xf32>
    %23 = tpu.matmul %20, %22, %cst_22 {dimension_numbers = #tpu.dot_dimension_numbers<[1], [0], [0], [1], [0, 0, 1, 1], [], []>} : vector<24x128xbf16>, vector<128x128xbf16>, vector<24x128xf32> -> vector<24x128xf32>
    %24 = arith.addf %18, %23 : vector<24x128xf32>
    %c0_23 = arith.constant 0 : index
    %c7 = arith.constant 7 : index
    %c0_24 = arith.constant 0 : index
    %25 = vector.load %arg1[%c0_23, %c7, %c0_24] : memref<1x42x128xbf16, #tpu.memory_space<vmem>>, vector<1x24x128xbf16>
    %26 = vector.shape_cast %25 : vector<1x24x128xbf16> to vector<24x128xbf16>
    %c4 = arith.constant 4 : index
    %c0_25 = arith.constant 0 : index
    %c0_26 = arith.constant 0 : index
    %27 = vector.load %arg2[%c4, %c0_25, %c0_26] : memref<9x128x128xbf16, #tpu.memory_space<vmem>>, vector<1x128x128xbf16>
    %28 = vector.shape_cast %27 : vector<1x128x128xbf16> to vector<128x128xbf16>
    %cst_27 = arith.constant dense<0.000000e+00> : vector<24x128xf32>
    %29 = tpu.matmul %26, %28, %cst_27 {dimension_numbers = #tpu.dot_dimension_numbers<[1], [0], [0], [1], [0, 0, 1, 1], [], []>} : vector<24x128xbf16>, vector<128x128xbf16>, vector<24x128xf32> -> vector<24x128xf32>
    %30 = arith.addf %24, %29 : vector<24x128xf32>
    %c0_28 = arith.constant 0 : index
    %c8 = arith.constant 8 : index
    %c0_29 = arith.constant 0 : index
    %31 = vector.load %arg1[%c0_28, %c8, %c0_29] : memref<1x42x128xbf16, #tpu.memory_space<vmem>>, vector<1x24x128xbf16>
    %32 = vector.shape_cast %31 : vector<1x24x128xbf16> to vector<24x128xbf16>
    %c5 = arith.constant 5 : index
    %c0_30 = arith.constant 0 : index
    %c0_31 = arith.constant 0 : index
    %33 = vector.load %arg2[%c5, %c0_30, %c0_31] : memref<9x128x128xbf16, #tpu.memory_space<vmem>>, vector<1x128x128xbf16>
    %34 = vector.shape_cast %33 : vector<1x128x128xbf16> to vector<128x128xbf16>
    %cst_32 = arith.constant dense<0.000000e+00> : vector<24x128xf32>
    %35 = tpu.matmul %32, %34, %cst_32 {dimension_numbers = #tpu.dot_dimension_numbers<[1], [0], [0], [1], [0, 0, 1, 1], [], []>} : vector<24x128xbf16>, vector<128x128xbf16>, vector<24x128xf32> -> vector<24x128xf32>
    %36 = arith.addf %30, %35 : vector<24x128xf32>
    %c0_33 = arith.constant 0 : index
    %c12 = arith.constant 12 : index
    %c0_34 = arith.constant 0 : index
    %37 = vector.load %arg1[%c0_33, %c12, %c0_34] : memref<1x42x128xbf16, #tpu.memory_space<vmem>>, vector<1x24x128xbf16>
    %38 = vector.shape_cast %37 : vector<1x24x128xbf16> to vector<24x128xbf16>
    %c6_35 = arith.constant 6 : index
    %c0_36 = arith.constant 0 : index
    %c0_37 = arith.constant 0 : index
    %39 = vector.load %arg2[%c6_35, %c0_36, %c0_37] : memref<9x128x128xbf16, #tpu.memory_space<vmem>>, vector<1x128x128xbf16>
    %40 = vector.shape_cast %39 : vector<1x128x128xbf16> to vector<128x128xbf16>
    %cst_38 = arith.constant dense<0.000000e+00> : vector<24x128xf32>
    %41 = tpu.matmul %38, %40, %cst_38 {dimension_numbers = #tpu.dot_dimension_numbers<[1], [0], [0], [1], [0, 0, 1, 1], [], []>} : vector<24x128xbf16>, vector<128x128xbf16>, vector<24x128xf32> -> vector<24x128xf32>
    %42 = arith.addf %36, %41 : vector<24x128xf32>
    %c0_39 = arith.constant 0 : index
    %c13 = arith.constant 13 : index
    %c0_40 = arith.constant 0 : index
    %43 = vector.load %arg1[%c0_39, %c13, %c0_40] : memref<1x42x128xbf16, #tpu.memory_space<vmem>>, vector<1x24x128xbf16>
    %44 = vector.shape_cast %43 : vector<1x24x128xbf16> to vector<24x128xbf16>
    %c7_41 = arith.constant 7 : index
    %c0_42 = arith.constant 0 : index
    %c0_43 = arith.constant 0 : index
    %45 = vector.load %arg2[%c7_41, %c0_42, %c0_43] : memref<9x128x128xbf16, #tpu.memory_space<vmem>>, vector<1x128x128xbf16>
    %46 = vector.shape_cast %45 : vector<1x128x128xbf16> to vector<128x128xbf16>
    %cst_44 = arith.constant dense<0.000000e+00> : vector<24x128xf32>
    %47 = tpu.matmul %44, %46, %cst_44 {dimension_numbers = #tpu.dot_dimension_numbers<[1], [0], [0], [1], [0, 0, 1, 1], [], []>} : vector<24x128xbf16>, vector<128x128xbf16>, vector<24x128xf32> -> vector<24x128xf32>
    %48 = arith.addf %42, %47 : vector<24x128xf32>
    %c0_45 = arith.constant 0 : index
    %c14 = arith.constant 14 : index
    %c0_46 = arith.constant 0 : index
    %49 = vector.load %arg1[%c0_45, %c14, %c0_46] : memref<1x42x128xbf16, #tpu.memory_space<vmem>>, vector<1x24x128xbf16>
    %50 = vector.shape_cast %49 : vector<1x24x128xbf16> to vector<24x128xbf16>
    %c8_47 = arith.constant 8 : index
    %c0_48 = arith.constant 0 : index
    %c0_49 = arith.constant 0 : index
    %51 = vector.load %arg2[%c8_47, %c0_48, %c0_49] : memref<9x128x128xbf16, #tpu.memory_space<vmem>>, vector<1x128x128xbf16>
    %52 = vector.shape_cast %51 : vector<1x128x128xbf16> to vector<128x128xbf16>
    %cst_50 = arith.constant dense<0.000000e+00> : vector<24x128xf32>
    %53 = tpu.matmul %50, %52, %cst_50 {dimension_numbers = #tpu.dot_dimension_numbers<[1], [0], [0], [1], [0, 0, 1, 1], [], []>} : vector<24x128xbf16>, vector<128x128xbf16>, vector<24x128xf32> -> vector<24x128xf32>
    %54 = arith.addf %48, %53 : vector<24x128xf32>
    %c0_51 = arith.constant 0 : index
    %c0_52 = arith.constant 0 : index
    %55 = vector.load %arg3[%c0_51, %c0_52] : memref<1x128xf32, #tpu.memory_space<vmem>>, vector<1x128xf32>
    %56 = vector.broadcast %55 : vector<1x128xf32> to vector<24x128xf32>
    %57 = arith.addf %54, %56 : vector<24x128xf32>
    %cst_53 = arith.constant 0.000000e+00 : f32
    %58 = vector.broadcast %cst_53 : f32 to vector<24x128xf32>
    %59 = arith.maximumf %57, %58 : vector<24x128xf32>
    %60 = arith.truncf %59 : vector<24x128xf32> to vector<24x128xbf16>
    %c0_54 = arith.constant 0 : index
    %c0_55 = arith.constant 0 : index
    %c0_56 = arith.constant 0 : index
    %61 = vector.load %arg4[%c0_54, %c0_55, %c0_56] : memref<1x24x128xbf16, #tpu.memory_space<vmem>>, vector<1x24x128xbf16>
    %62 = vector.shape_cast %61 : vector<1x24x128xbf16> to vector<24x128xbf16>
    %63 = vector.shape_cast %60 : vector<24x128xbf16> to vector<1x24x128xbf16>
    tpu.vector_store %arg4[%c0_54, %c0_55, %c0_56], %63 {strides = array<i32>} : memref<1x24x128xbf16, #tpu.memory_space<vmem>>, vector<1x24x128xbf16>,
    return
  }
  func.func @transform_0(%arg0: i32) -> (i32, i32, i32) {
    %c0_i32 = arith.constant 0 : i32
    %c0_i32_0 = arith.constant 0 : i32
    %c0_i32_1 = arith.constant 0 : i32
    return %arg0, %c0_i32, %c0_i32_0 : i32, i32, i32
  }
  func.func @transform_1(%arg0: i32) -> (i32, i32, i32) {
    %c0_i32 = arith.constant 0 : i32
    %c0_i32_0 = arith.constant 0 : i32
    %c0_i32_1 = arith.constant 0 : i32
    %c0_i32_2 = arith.constant 0 : i32
    return %c0_i32, %c0_i32_0, %c0_i32_1 : i32, i32, i32
  }
  func.func @transform_2(%arg0: i32) -> (i32, i32) {
    %c0_i32 = arith.constant 0 : i32
    %c0_i32_0 = arith.constant 0 : i32
    %c0_i32_1 = arith.constant 0 : i32
    return %c0_i32, %c0_i32_0 : i32, i32
  }
  func.func @transform_3(%arg0: i32) -> (i32, i32, i32) {
    %c0_i32 = arith.constant 0 : i32
    %c0_i32_0 = arith.constant 0 : i32
    %c0_i32_1 = arith.constant 0 : i32
    return %arg0, %c0_i32, %c0_i32_0 : i32, i32, i32
  }
}

module attributes {stable_mosaic.version = 11 : i64} {
  func.func @kernel(%arg0: i32, %arg1: memref<1x110x128xbf16, #tpu.memory_space<vmem>>, %arg2: memref<9x128x128xbf16, #tpu.memory_space<vmem>>, %arg3: memref<1x128xf32, #tpu.memory_space<vmem>>, %arg4: memref<1x80x128xbf16, #tpu.memory_space<vmem>>) attributes {dimension_semantics = [#tpu.dimension_semantics<parallel>], iteration_bounds = array<i64: 2>, scalar_prefetch = 0 : i64, scratch_operands = 0 : i64, tpu.core_type = #tpu.core_type<tc>, window_params = [{transform_indices = @transform_0, window_bounds = array<i64: 1, 110, 128>}, {pipeline_mode = #tpu.pipeline_mode<synchronous>, transform_indices = @transform_1, window_bounds = array<i64: 9, 128, 128>}, {pipeline_mode = #tpu.pipeline_mode<synchronous>, transform_indices = @transform_2, window_bounds = array<i64: 1, 128>}, {transform_indices = @transform_3, window_bounds = array<i64: 1, 80, 128>}]} {
    %cst = arith.constant 0.000000e+00 : f32
    %0 = vector.broadcast %cst : f32 to vector<80x128xf32>
    %c0 = arith.constant 0 : index
    %c0_0 = arith.constant 0 : index
    %c0_1 = arith.constant 0 : index
    %1 = vector.load %arg1[%c0, %c0_0, %c0_1] : memref<1x110x128xbf16, #tpu.memory_space<vmem>>, vector<1x80x128xbf16>
    %2 = vector.shape_cast %1 : vector<1x80x128xbf16> to vector<80x128xbf16>
    %c0_2 = arith.constant 0 : index
    %c0_3 = arith.constant 0 : index
    %c0_4 = arith.constant 0 : index
    %3 = vector.load %arg2[%c0_2, %c0_3, %c0_4] : memref<9x128x128xbf16, #tpu.memory_space<vmem>>, vector<1x128x128xbf16>
    %4 = vector.shape_cast %3 : vector<1x128x128xbf16> to vector<128x128xbf16>
    %cst_5 = arith.constant dense<0.000000e+00> : vector<80x128xf32>
    %5 = tpu.matmul %2, %4, %cst_5 {dimension_numbers = #tpu.dot_dimension_numbers<[1], [0], [0], [1], [0, 0, 1, 1], [], []>} : vector<80x128xbf16>, vector<128x128xbf16>, vector<80x128xf32> -> vector<80x128xf32>
    %6 = arith.addf %0, %5 : vector<80x128xf32>
    %c0_6 = arith.constant 0 : index
    %c1 = arith.constant 1 : index
    %c0_7 = arith.constant 0 : index
    %7 = vector.load %arg1[%c0_6, %c1, %c0_7] : memref<1x110x128xbf16, #tpu.memory_space<vmem>>, vector<1x80x128xbf16>
    %8 = vector.shape_cast %7 : vector<1x80x128xbf16> to vector<80x128xbf16>
    %c1_8 = arith.constant 1 : index
    %c0_9 = arith.constant 0 : index
    %c0_10 = arith.constant 0 : index
    %9 = vector.load %arg2[%c1_8, %c0_9, %c0_10] : memref<9x128x128xbf16, #tpu.memory_space<vmem>>, vector<1x128x128xbf16>
    %10 = vector.shape_cast %9 : vector<1x128x128xbf16> to vector<128x128xbf16>
    %cst_11 = arith.constant dense<0.000000e+00> : vector<80x128xf32>
    %11 = tpu.matmul %8, %10, %cst_11 {dimension_numbers = #tpu.dot_dimension_numbers<[1], [0], [0], [1], [0, 0, 1, 1], [], []>} : vector<80x128xbf16>, vector<128x128xbf16>, vector<80x128xf32> -> vector<80x128xf32>
    %12 = arith.addf %6, %11 : vector<80x128xf32>
    %c0_12 = arith.constant 0 : index
    %c2 = arith.constant 2 : index
    %c0_13 = arith.constant 0 : index
    %13 = vector.load %arg1[%c0_12, %c2, %c0_13] : memref<1x110x128xbf16, #tpu.memory_space<vmem>>, vector<1x80x128xbf16>
    %14 = vector.shape_cast %13 : vector<1x80x128xbf16> to vector<80x128xbf16>
    %c2_14 = arith.constant 2 : index
    %c0_15 = arith.constant 0 : index
    %c0_16 = arith.constant 0 : index
    %15 = vector.load %arg2[%c2_14, %c0_15, %c0_16] : memref<9x128x128xbf16, #tpu.memory_space<vmem>>, vector<1x128x128xbf16>
    %16 = vector.shape_cast %15 : vector<1x128x128xbf16> to vector<128x128xbf16>
    %cst_17 = arith.constant dense<0.000000e+00> : vector<80x128xf32>
    %17 = tpu.matmul %14, %16, %cst_17 {dimension_numbers = #tpu.dot_dimension_numbers<[1], [0], [0], [1], [0, 0, 1, 1], [], []>} : vector<80x128xbf16>, vector<128x128xbf16>, vector<80x128xf32> -> vector<80x128xf32>
    %18 = arith.addf %12, %17 : vector<80x128xf32>
    %c0_18 = arith.constant 0 : index
    %c10 = arith.constant 10 : index
    %c0_19 = arith.constant 0 : index
    %19 = vector.load %arg1[%c0_18, %c10, %c0_19] : memref<1x110x128xbf16, #tpu.memory_space<vmem>>, vector<1x80x128xbf16>
    %20 = vector.shape_cast %19 : vector<1x80x128xbf16> to vector<80x128xbf16>
    %c3 = arith.constant 3 : index
    %c0_20 = arith.constant 0 : index
    %c0_21 = arith.constant 0 : index
    %21 = vector.load %arg2[%c3, %c0_20, %c0_21] : memref<9x128x128xbf16, #tpu.memory_space<vmem>>, vector<1x128x128xbf16>
    %22 = vector.shape_cast %21 : vector<1x128x128xbf16> to vector<128x128xbf16>
    %cst_22 = arith.constant dense<0.000000e+00> : vector<80x128xf32>
    %23 = tpu.matmul %20, %22, %cst_22 {dimension_numbers = #tpu.dot_dimension_numbers<[1], [0], [0], [1], [0, 0, 1, 1], [], []>} : vector<80x128xbf16>, vector<128x128xbf16>, vector<80x128xf32> -> vector<80x128xf32>
    %24 = arith.addf %18, %23 : vector<80x128xf32>
    %c0_23 = arith.constant 0 : index
    %c11 = arith.constant 11 : index
    %c0_24 = arith.constant 0 : index
    %25 = vector.load %arg1[%c0_23, %c11, %c0_24] : memref<1x110x128xbf16, #tpu.memory_space<vmem>>, vector<1x80x128xbf16>
    %26 = vector.shape_cast %25 : vector<1x80x128xbf16> to vector<80x128xbf16>
    %c4 = arith.constant 4 : index
    %c0_25 = arith.constant 0 : index
    %c0_26 = arith.constant 0 : index
    %27 = vector.load %arg2[%c4, %c0_25, %c0_26] : memref<9x128x128xbf16, #tpu.memory_space<vmem>>, vector<1x128x128xbf16>
    %28 = vector.shape_cast %27 : vector<1x128x128xbf16> to vector<128x128xbf16>
    %cst_27 = arith.constant dense<0.000000e+00> : vector<80x128xf32>
    %29 = tpu.matmul %26, %28, %cst_27 {dimension_numbers = #tpu.dot_dimension_numbers<[1], [0], [0], [1], [0, 0, 1, 1], [], []>} : vector<80x128xbf16>, vector<128x128xbf16>, vector<80x128xf32> -> vector<80x128xf32>
    %30 = arith.addf %24, %29 : vector<80x128xf32>
    %c0_28 = arith.constant 0 : index
    %c12 = arith.constant 12 : index
    %c0_29 = arith.constant 0 : index
    %31 = vector.load %arg1[%c0_28, %c12, %c0_29] : memref<1x110x128xbf16, #tpu.memory_space<vmem>>, vector<1x80x128xbf16>
    %32 = vector.shape_cast %31 : vector<1x80x128xbf16> to vector<80x128xbf16>
    %c5 = arith.constant 5 : index
    %c0_30 = arith.constant 0 : index
    %c0_31 = arith.constant 0 : index
    %33 = vector.load %arg2[%c5, %c0_30, %c0_31] : memref<9x128x128xbf16, #tpu.memory_space<vmem>>, vector<1x128x128xbf16>
    %34 = vector.shape_cast %33 : vector<1x128x128xbf16> to vector<128x128xbf16>
    %cst_32 = arith.constant dense<0.000000e+00> : vector<80x128xf32>
    %35 = tpu.matmul %32, %34, %cst_32 {dimension_numbers = #tpu.dot_dimension_numbers<[1], [0], [0], [1], [0, 0, 1, 1], [], []>} : vector<80x128xbf16>, vector<128x128xbf16>, vector<80x128xf32> -> vector<80x128xf32>
    %36 = arith.addf %30, %35 : vector<80x128xf32>
    %c0_33 = arith.constant 0 : index
    %c20 = arith.constant 20 : index
    %c0_34 = arith.constant 0 : index
    %37 = vector.load %arg1[%c0_33, %c20, %c0_34] : memref<1x110x128xbf16, #tpu.memory_space<vmem>>, vector<1x80x128xbf16>
    %38 = vector.shape_cast %37 : vector<1x80x128xbf16> to vector<80x128xbf16>
    %c6 = arith.constant 6 : index
    %c0_35 = arith.constant 0 : index
    %c0_36 = arith.constant 0 : index
    %39 = vector.load %arg2[%c6, %c0_35, %c0_36] : memref<9x128x128xbf16, #tpu.memory_space<vmem>>, vector<1x128x128xbf16>
    %40 = vector.shape_cast %39 : vector<1x128x128xbf16> to vector<128x128xbf16>
    %cst_37 = arith.constant dense<0.000000e+00> : vector<80x128xf32>
    %41 = tpu.matmul %38, %40, %cst_37 {dimension_numbers = #tpu.dot_dimension_numbers<[1], [0], [0], [1], [0, 0, 1, 1], [], []>} : vector<80x128xbf16>, vector<128x128xbf16>, vector<80x128xf32> -> vector<80x128xf32>
    %42 = arith.addf %36, %41 : vector<80x128xf32>
    %c0_38 = arith.constant 0 : index
    %c21 = arith.constant 21 : index
    %c0_39 = arith.constant 0 : index
    %43 = vector.load %arg1[%c0_38, %c21, %c0_39] : memref<1x110x128xbf16, #tpu.memory_space<vmem>>, vector<1x80x128xbf16>
    %44 = vector.shape_cast %43 : vector<1x80x128xbf16> to vector<80x128xbf16>
    %c7 = arith.constant 7 : index
    %c0_40 = arith.constant 0 : index
    %c0_41 = arith.constant 0 : index
    %45 = vector.load %arg2[%c7, %c0_40, %c0_41] : memref<9x128x128xbf16, #tpu.memory_space<vmem>>, vector<1x128x128xbf16>
    %46 = vector.shape_cast %45 : vector<1x128x128xbf16> to vector<128x128xbf16>
    %cst_42 = arith.constant dense<0.000000e+00> : vector<80x128xf32>
    %47 = tpu.matmul %44, %46, %cst_42 {dimension_numbers = #tpu.dot_dimension_numbers<[1], [0], [0], [1], [0, 0, 1, 1], [], []>} : vector<80x128xbf16>, vector<128x128xbf16>, vector<80x128xf32> -> vector<80x128xf32>
    %48 = arith.addf %42, %47 : vector<80x128xf32>
    %c0_43 = arith.constant 0 : index
    %c22 = arith.constant 22 : index
    %c0_44 = arith.constant 0 : index
    %49 = vector.load %arg1[%c0_43, %c22, %c0_44] : memref<1x110x128xbf16, #tpu.memory_space<vmem>>, vector<1x80x128xbf16>
    %50 = vector.shape_cast %49 : vector<1x80x128xbf16> to vector<80x128xbf16>
    %c8 = arith.constant 8 : index
    %c0_45 = arith.constant 0 : index
    %c0_46 = arith.constant 0 : index
    %51 = vector.load %arg2[%c8, %c0_45, %c0_46] : memref<9x128x128xbf16, #tpu.memory_space<vmem>>, vector<1x128x128xbf16>
    %52 = vector.shape_cast %51 : vector<1x128x128xbf16> to vector<128x128xbf16>
    %cst_47 = arith.constant dense<0.000000e+00> : vector<80x128xf32>
    %53 = tpu.matmul %50, %52, %cst_47 {dimension_numbers = #tpu.dot_dimension_numbers<[1], [0], [0], [1], [0, 0, 1, 1], [], []>} : vector<80x128xbf16>, vector<128x128xbf16>, vector<80x128xf32> -> vector<80x128xf32>
    %54 = arith.addf %48, %53 : vector<80x128xf32>
    %c0_48 = arith.constant 0 : index
    %c0_49 = arith.constant 0 : index
    %55 = vector.load %arg3[%c0_48, %c0_49] : memref<1x128xf32, #tpu.memory_space<vmem>>, vector<1x128xf32>
    %56 = vector.broadcast %55 : vector<1x128xf32> to vector<80x128xf32>
    %57 = arith.addf %54, %56 : vector<80x128xf32>
    %cst_50 = arith.constant 0.000000e+00 : f32
    %58 = vector.broadcast %cst_50 : f32 to vector<80x128xf32>
    %59 = arith.maximumf %57, %58 : vector<80x128xf32>
    %60 = arith.truncf %59 : vector<80x128xf32> to vector<80x128xbf16>
    %c0_51 = arith.constant 0 : index
    %c0_52 = arith.constant 0 : index
    %c0_53 = arith.constant 0 : index
    %61 = vector.load %arg4[%c0_51, %c0_52, %c0_53] : memref<1x80x128xbf16, #tpu.memory_space<vmem>>, vector<1x80x128xbf16>
    %62 = vector.shape_cast %61 : vector<1x80x128xbf16> to vector<80x128xbf16>
    %63 = vector.shape_cast %60 : vector<80x128xbf16> to vector<1x80x128xbf16>
    tpu.vector_store %arg4[%c0_51, %c0_52, %c0_53], %63 {strides = array<i32>} : memref<1x80x128xbf16, #tpu.memory_space<vmem>>, vector<1x80x128xbf16>,
    return
  }
  func.func @transform_0(%arg0: i32) -> (i32, i32, i32) {
    %c0_i32 = arith.constant 0 : i32
    %c0_i32_0 = arith.constant 0 : i32
    %c0_i32_1 = arith.constant 0 : i32
    return %arg0, %c0_i32, %c0_i32_0 : i32, i32, i32
  }
  func.func @transform_1(%arg0: i32) -> (i32, i32, i32) {
    %c0_i32 = arith.constant 0 : i32
    %c0_i32_0 = arith.constant 0 : i32
    %c0_i32_1 = arith.constant 0 : i32
    %c0_i32_2 = arith.constant 0 : i32
    return %c0_i32, %c0_i32_0, %c0_i32_1 : i32, i32, i32
  }
  func.func @transform_2(%arg0: i32) -> (i32, i32) {
    %c0_i32 = arith.constant 0 : i32
    %c0_i32_0 = arith.constant 0 : i32
    %c0_i32_1 = arith.constant 0 : i32
    return %c0_i32, %c0_i32_0 : i32, i32
  }
  func.func @transform_3(%arg0: i32) -> (i32, i32, i32) {
    %c0_i32 = arith.constant 0 : i32
    %c0_i32_0 = arith.constant 0 : i32
    %c0_i32_1 = arith.constant 0 : i32
    return %arg0, %c0_i32, %c0_i32_0 : i32, i32, i32
  }
}

module attributes {stable_mosaic.version = 11 : i64} {
  func.func @kernel(%arg0: i32, %arg1: memref<1x342x128xbf16, #tpu.memory_space<vmem>>, %arg2: memref<9x128x128xbf16, #tpu.memory_space<vmem>>, %arg3: memref<1x128xf32, #tpu.memory_space<vmem>>, %arg4: memref<128x128xbf16, #tpu.memory_space<vmem>>, %arg5: memref<1x128xf32, #tpu.memory_space<vmem>>, %arg6: memref<1x288x128xf32, #tpu.memory_space<vmem>>) attributes {dimension_semantics = [#tpu.dimension_semantics<parallel>], iteration_bounds = array<i64: 2>, scalar_prefetch = 0 : i64, scratch_operands = 0 : i64, tpu.core_type = #tpu.core_type<tc>, window_params = [{transform_indices = @transform_0, window_bounds = array<i64: 1, 342, 128>}, {pipeline_mode = #tpu.pipeline_mode<synchronous>, transform_indices = @transform_1, window_bounds = array<i64: 9, 128, 128>}, {pipeline_mode = #tpu.pipeline_mode<synchronous>, transform_indices = @transform_2, window_bounds = array<i64: 1, 128>}, {pipeline_mode = #tpu.pipeline_mode<synchronous>, transform_indices = @transform_3, window_bounds = array<i64: 128, 128>}, {pipeline_mode = #tpu.pipeline_mode<synchronous>, transform_indices = @transform_4, window_bounds = array<i64: 1, 128>}, {transform_indices = @transform_5, window_bounds = array<i64: 1, 288, 128>}]} {
    %cst = arith.constant 0.000000e+00 : f32
    %0 = vector.broadcast %cst : f32 to vector<288x128xf32>
    %c0 = arith.constant 0 : index
    %c0_0 = arith.constant 0 : index
    %c0_1 = arith.constant 0 : index
    %1 = vector.load %arg1[%c0, %c0_0, %c0_1] : memref<1x342x128xbf16, #tpu.memory_space<vmem>>, vector<1x288x128xbf16>
    %2 = vector.shape_cast %1 : vector<1x288x128xbf16> to vector<288x128xbf16>
    %c0_2 = arith.constant 0 : index
    %c0_3 = arith.constant 0 : index
    %c0_4 = arith.constant 0 : index
    %3 = vector.load %arg2[%c0_2, %c0_3, %c0_4] : memref<9x128x128xbf16, #tpu.memory_space<vmem>>, vector<1x128x128xbf16>
    %4 = vector.shape_cast %3 : vector<1x128x128xbf16> to vector<128x128xbf16>
    %cst_5 = arith.constant dense<0.000000e+00> : vector<288x128xf32>
    %5 = tpu.matmul %2, %4, %cst_5 {dimension_numbers = #tpu.dot_dimension_numbers<[1], [0], [0], [1], [0, 0, 1, 1], [], []>} : vector<288x128xbf16>, vector<128x128xbf16>, vector<288x128xf32> -> vector<288x128xf32>
    %6 = arith.addf %0, %5 : vector<288x128xf32>
    %c0_6 = arith.constant 0 : index
    %c1 = arith.constant 1 : index
    %c0_7 = arith.constant 0 : index
    %7 = vector.load %arg1[%c0_6, %c1, %c0_7] : memref<1x342x128xbf16, #tpu.memory_space<vmem>>, vector<1x288x128xbf16>
    %8 = vector.shape_cast %7 : vector<1x288x128xbf16> to vector<288x128xbf16>
    %c1_8 = arith.constant 1 : index
    %c0_9 = arith.constant 0 : index
    %c0_10 = arith.constant 0 : index
    %9 = vector.load %arg2[%c1_8, %c0_9, %c0_10] : memref<9x128x128xbf16, #tpu.memory_space<vmem>>, vector<1x128x128xbf16>
    %10 = vector.shape_cast %9 : vector<1x128x128xbf16> to vector<128x128xbf16>
    %cst_11 = arith.constant dense<0.000000e+00> : vector<288x128xf32>
    %11 = tpu.matmul %8, %10, %cst_11 {dimension_numbers = #tpu.dot_dimension_numbers<[1], [0], [0], [1], [0, 0, 1, 1], [], []>} : vector<288x128xbf16>, vector<128x128xbf16>, vector<288x128xf32> -> vector<288x128xf32>
    %12 = arith.addf %6, %11 : vector<288x128xf32>
    %c0_12 = arith.constant 0 : index
    %c2 = arith.constant 2 : index
    %c0_13 = arith.constant 0 : index
    %13 = vector.load %arg1[%c0_12, %c2, %c0_13] : memref<1x342x128xbf16, #tpu.memory_space<vmem>>, vector<1x288x128xbf16>
    %14 = vector.shape_cast %13 : vector<1x288x128xbf16> to vector<288x128xbf16>
    %c2_14 = arith.constant 2 : index
    %c0_15 = arith.constant 0 : index
    %c0_16 = arith.constant 0 : index
    %15 = vector.load %arg2[%c2_14, %c0_15, %c0_16] : memref<9x128x128xbf16, #tpu.memory_space<vmem>>, vector<1x128x128xbf16>
    %16 = vector.shape_cast %15 : vector<1x128x128xbf16> to vector<128x128xbf16>
    %cst_17 = arith.constant dense<0.000000e+00> : vector<288x128xf32>
    %17 = tpu.matmul %14, %16, %cst_17 {dimension_numbers = #tpu.dot_dimension_numbers<[1], [0], [0], [1], [0, 0, 1, 1], [], []>} : vector<288x128xbf16>, vector<128x128xbf16>, vector<288x128xf32> -> vector<288x128xf32>
    %18 = arith.addf %12, %17 : vector<288x128xf32>
    %c0_18 = arith.constant 0 : index
    %c18 = arith.constant 18 : index
    %c0_19 = arith.constant 0 : index
    %19 = vector.load %arg1[%c0_18, %c18, %c0_19] : memref<1x342x128xbf16, #tpu.memory_space<vmem>>, vector<1x288x128xbf16>
    %20 = vector.shape_cast %19 : vector<1x288x128xbf16> to vector<288x128xbf16>
    %c3 = arith.constant 3 : index
    %c0_20 = arith.constant 0 : index
    %c0_21 = arith.constant 0 : index
    %21 = vector.load %arg2[%c3, %c0_20, %c0_21] : memref<9x128x128xbf16, #tpu.memory_space<vmem>>, vector<1x128x128xbf16>
    %22 = vector.shape_cast %21 : vector<1x128x128xbf16> to vector<128x128xbf16>
    %cst_22 = arith.constant dense<0.000000e+00> : vector<288x128xf32>
    %23 = tpu.matmul %20, %22, %cst_22 {dimension_numbers = #tpu.dot_dimension_numbers<[1], [0], [0], [1], [0, 0, 1, 1], [], []>} : vector<288x128xbf16>, vector<128x128xbf16>, vector<288x128xf32> -> vector<288x128xf32>
    %24 = arith.addf %18, %23 : vector<288x128xf32>
    %c0_23 = arith.constant 0 : index
    %c19 = arith.constant 19 : index
    %c0_24 = arith.constant 0 : index
    %25 = vector.load %arg1[%c0_23, %c19, %c0_24] : memref<1x342x128xbf16, #tpu.memory_space<vmem>>, vector<1x288x128xbf16>
    %26 = vector.shape_cast %25 : vector<1x288x128xbf16> to vector<288x128xbf16>
    %c4 = arith.constant 4 : index
    %c0_25 = arith.constant 0 : index
    %c0_26 = arith.constant 0 : index
    %27 = vector.load %arg2[%c4, %c0_25, %c0_26] : memref<9x128x128xbf16, #tpu.memory_space<vmem>>, vector<1x128x128xbf16>
    %28 = vector.shape_cast %27 : vector<1x128x128xbf16> to vector<128x128xbf16>
    %cst_27 = arith.constant dense<0.000000e+00> : vector<288x128xf32>
    %29 = tpu.matmul %26, %28, %cst_27 {dimension_numbers = #tpu.dot_dimension_numbers<[1], [0], [0], [1], [0, 0, 1, 1], [], []>} : vector<288x128xbf16>, vector<128x128xbf16>, vector<288x128xf32> -> vector<288x128xf32>
    %30 = arith.addf %24, %29 : vector<288x128xf32>
    %c0_28 = arith.constant 0 : index
    %c20 = arith.constant 20 : index
    %c0_29 = arith.constant 0 : index
    %31 = vector.load %arg1[%c0_28, %c20, %c0_29] : memref<1x342x128xbf16, #tpu.memory_space<vmem>>, vector<1x288x128xbf16>
    %32 = vector.shape_cast %31 : vector<1x288x128xbf16> to vector<288x128xbf16>
    %c5 = arith.constant 5 : index
    %c0_30 = arith.constant 0 : index
    %c0_31 = arith.constant 0 : index
    %33 = vector.load %arg2[%c5, %c0_30, %c0_31] : memref<9x128x128xbf16, #tpu.memory_space<vmem>>, vector<1x128x128xbf16>
    %34 = vector.shape_cast %33 : vector<1x128x128xbf16> to vector<128x128xbf16>
    %cst_32 = arith.constant dense<0.000000e+00> : vector<288x128xf32>
    %35 = tpu.matmul %32, %34, %cst_32 {dimension_numbers = #tpu.dot_dimension_numbers<[1], [0], [0], [1], [0, 0, 1, 1], [], []>} : vector<288x128xbf16>, vector<128x128xbf16>, vector<288x128xf32> -> vector<288x128xf32>
    %36 = arith.addf %30, %35 : vector<288x128xf32>
    %c0_33 = arith.constant 0 : index
    %c36 = arith.constant 36 : index
    %c0_34 = arith.constant 0 : index
    %37 = vector.load %arg1[%c0_33, %c36, %c0_34] : memref<1x342x128xbf16, #tpu.memory_space<vmem>>, vector<1x288x128xbf16>
    %38 = vector.shape_cast %37 : vector<1x288x128xbf16> to vector<288x128xbf16>
    %c6 = arith.constant 6 : index
    %c0_35 = arith.constant 0 : index
    %c0_36 = arith.constant 0 : index
    %39 = vector.load %arg2[%c6, %c0_35, %c0_36] : memref<9x128x128xbf16, #tpu.memory_space<vmem>>, vector<1x128x128xbf16>
    %40 = vector.shape_cast %39 : vector<1x128x128xbf16> to vector<128x128xbf16>
    %cst_37 = arith.constant dense<0.000000e+00> : vector<288x128xf32>
    %41 = tpu.matmul %38, %40, %cst_37 {dimension_numbers = #tpu.dot_dimension_numbers<[1], [0], [0], [1], [0, 0, 1, 1], [], []>} : vector<288x128xbf16>, vector<128x128xbf16>, vector<288x128xf32> -> vector<288x128xf32>
    %42 = arith.addf %36, %41 : vector<288x128xf32>
    %c0_38 = arith.constant 0 : index
    %c37 = arith.constant 37 : index
    %c0_39 = arith.constant 0 : index
    %43 = vector.load %arg1[%c0_38, %c37, %c0_39] : memref<1x342x128xbf16, #tpu.memory_space<vmem>>, vector<1x288x128xbf16>
    %44 = vector.shape_cast %43 : vector<1x288x128xbf16> to vector<288x128xbf16>
    %c7 = arith.constant 7 : index
    %c0_40 = arith.constant 0 : index
    %c0_41 = arith.constant 0 : index
    %45 = vector.load %arg2[%c7, %c0_40, %c0_41] : memref<9x128x128xbf16, #tpu.memory_space<vmem>>, vector<1x128x128xbf16>
    %46 = vector.shape_cast %45 : vector<1x128x128xbf16> to vector<128x128xbf16>
    %cst_42 = arith.constant dense<0.000000e+00> : vector<288x128xf32>
    %47 = tpu.matmul %44, %46, %cst_42 {dimension_numbers = #tpu.dot_dimension_numbers<[1], [0], [0], [1], [0, 0, 1, 1], [], []>} : vector<288x128xbf16>, vector<128x128xbf16>, vector<288x128xf32> -> vector<288x128xf32>
    %48 = arith.addf %42, %47 : vector<288x128xf32>
    %c0_43 = arith.constant 0 : index
    %c38 = arith.constant 38 : index
    %c0_44 = arith.constant 0 : index
    %49 = vector.load %arg1[%c0_43, %c38, %c0_44] : memref<1x342x128xbf16, #tpu.memory_space<vmem>>, vector<1x288x128xbf16>
    %50 = vector.shape_cast %49 : vector<1x288x128xbf16> to vector<288x128xbf16>
    %c8 = arith.constant 8 : index
    %c0_45 = arith.constant 0 : index
    %c0_46 = arith.constant 0 : index
    %51 = vector.load %arg2[%c8, %c0_45, %c0_46] : memref<9x128x128xbf16, #tpu.memory_space<vmem>>, vector<1x128x128xbf16>
    %52 = vector.shape_cast %51 : vector<1x128x128xbf16> to vector<128x128xbf16>
    %cst_47 = arith.constant dense<0.000000e+00> : vector<288x128xf32>
    %53 = tpu.matmul %50, %52, %cst_47 {dimension_numbers = #tpu.dot_dimension_numbers<[1], [0], [0], [1], [0, 0, 1, 1], [], []>} : vector<288x128xbf16>, vector<128x128xbf16>, vector<288x128xf32> -> vector<288x128xf32>
    %54 = arith.addf %48, %53 : vector<288x128xf32>
    %c0_48 = arith.constant 0 : index
    %c0_49 = arith.constant 0 : index
    %55 = vector.load %arg3[%c0_48, %c0_49] : memref<1x128xf32, #tpu.memory_space<vmem>>, vector<1x128xf32>
    %56 = vector.broadcast %55 : vector<1x128xf32> to vector<288x128xf32>
    %57 = arith.addf %54, %56 : vector<288x128xf32>
    %cst_50 = arith.constant 0.000000e+00 : f32
    %58 = vector.broadcast %cst_50 : f32 to vector<288x128xf32>
    %59 = arith.maximumf %57, %58 : vector<288x128xf32>
    %60 = arith.truncf %59 : vector<288x128xf32> to vector<288x128xbf16>
    %c0_51 = arith.constant 0 : index
    %c0_52 = arith.constant 0 : index
    %61 = vector.load %arg4[%c0_51, %c0_52] : memref<128x128xbf16, #tpu.memory_space<vmem>>, vector<128x128xbf16>
    %cst_53 = arith.constant dense<0.000000e+00> : vector<288x128xf32>
    %62 = tpu.matmul %60, %61, %cst_53 {dimension_numbers = #tpu.dot_dimension_numbers<[1], [0], [0], [1], [0, 0, 1, 1], [], []>} : vector<288x128xbf16>, vector<128x128xbf16>, vector<288x128xf32> -> vector<288x128xf32>
    %c0_54 = arith.constant 0 : index
    %c0_55 = arith.constant 0 : index
    %63 = vector.load %arg5[%c0_54, %c0_55] : memref<1x128xf32, #tpu.memory_space<vmem>>, vector<1x128xf32>
    %64 = vector.broadcast %63 : vector<1x128xf32> to vector<288x128xf32>
    %65 = arith.addf %62, %64 : vector<288x128xf32>
    %66 = math.tanh %65 : vector<288x128xf32>
    %c0_56 = arith.constant 0 : index
    %c0_57 = arith.constant 0 : index
    %c0_58 = arith.constant 0 : index
    %67 = vector.load %arg6[%c0_56, %c0_57, %c0_58] : memref<1x288x128xf32, #tpu.memory_space<vmem>>, vector<1x288x128xf32>
    %68 = vector.shape_cast %67 : vector<1x288x128xf32> to vector<288x128xf32>
    %69 = vector.shape_cast %66 : vector<288x128xf32> to vector<1x288x128xf32>
    tpu.vector_store %arg6[%c0_56, %c0_57, %c0_58], %69 {strides = array<i32>} : memref<1x288x128xf32, #tpu.memory_space<vmem>>, vector<1x288x128xf32>,
    return
  }
  func.func @transform_0(%arg0: i32) -> (i32, i32, i32) {
    %c0_i32 = arith.constant 0 : i32
    %c0_i32_0 = arith.constant 0 : i32
    %c0_i32_1 = arith.constant 0 : i32
    return %arg0, %c0_i32, %c0_i32_0 : i32, i32, i32
  }
  func.func @transform_1(%arg0: i32) -> (i32, i32, i32) {
    %c0_i32 = arith.constant 0 : i32
    %c0_i32_0 = arith.constant 0 : i32
    %c0_i32_1 = arith.constant 0 : i32
    %c0_i32_2 = arith.constant 0 : i32
    return %c0_i32, %c0_i32_0, %c0_i32_1 : i32, i32, i32
  }
  func.func @transform_2(%arg0: i32) -> (i32, i32) {
    %c0_i32 = arith.constant 0 : i32
    %c0_i32_0 = arith.constant 0 : i32
    %c0_i32_1 = arith.constant 0 : i32
    return %c0_i32, %c0_i32_0 : i32, i32
  }
  func.func @transform_3(%arg0: i32) -> (i32, i32) {
    %c0_i32 = arith.constant 0 : i32
    %c0_i32_0 = arith.constant 0 : i32
    %c0_i32_1 = arith.constant 0 : i32
    return %c0_i32, %c0_i32_0 : i32, i32
  }
  func.func @transform_4(%arg0: i32) -> (i32, i32) {
    %c0_i32 = arith.constant 0 : i32
    %c0_i32_0 = arith.constant 0 : i32
    %c0_i32_1 = arith.constant 0 : i32
    return %c0_i32, %c0_i32_0 : i32, i32
  }
  func.func @transform_5(%arg0: i32) -> (i32, i32, i32) {
    %c0_i32 = arith.constant 0 : i32
    %c0_i32_0 = arith.constant 0 : i32
    %c0_i32_1 = arith.constant 0 : i32
    return %arg0, %c0_i32, %c0_i32_0 : i32, i32, i32
  }
}

</mosaic_0001>

<bundles_post_ra>
// kernel: basic_ag_forward.6
= control target key start
LH: loop header
LB: loop body
LE: loop exit
PB: predicated region body
PF: predicated region fallthrough
CT: control target
= control target key end

     0   :  { %s3810_s21 = smov 0   ;;  %s4810_s0 = inlined_call_operand.vmem [shape: bf16[2,110,8], index: 0, kind: input, shape index: {}]   ;;  %s4811_s1 = inlined_call_operand.vmem [shape: bf16[2,110,8], index: 1, kind: input, shape index: {}]   ;;  %s4812_s2 = inlined_call_operand.vmem [shape: bf16[2,110,8], index: 2, kind: input, shape index: {}]   ;;  %s4813_s3 = inlined_call_operand.vmem [shape: bf16[2,110,8], index: 3, kind: input, shape index: {}]   ;;  %s4814_s4 = inlined_call_operand.vmem [shape: bf16[25,8,128], index: 4, kind: input, shape index: {}]   ;;  %s4815_s5 = inlined_call_operand.vmem [shape: f32[1,128], index: 5, kind: input, shape index: {}]   ;;  %s4816_s6 = inlined_call_operand.vmem [shape: bf16[2,80,128], index: 6, kind: output, shape index: {}]  }
   0x1 LB: > { %s3224_s22 = sadd.s32 4294967295, %s3773_s21   ;;  %p3228_p0 = scmp.ge.s32.totalorder %s3773_s21, 1  ;;  %s3773_s21 = sphi %s3810_s21, %s16_s21  }
   0x2   : > { %p242_p1 = scmp.lt.s32.totalorder %s3773_s21, 3 }
   0x4   : > { %p243_p2 = pnand %p3228_p0, %p242_p1 }
   0x5   : > { %p287_p3 = scmp.lt.s32.totalorder (!%p243_p2), %s3224_s22, 1 }
   0x6   : > { %246 = sbr.rel (%p243_p2) target bundleno = 668 (0x29c), region = 44 }
   0xb   : > { %v3234_v0 = vld [vmem:[%s4814_s4 + $0x4] sm:$0xf]  ;;  %vm377_vm0 = vcmask 1043456   ;;  %v3285_v2 = vld [vmem:[%s4814_s4 + $0x8] sm:$0xf]  ;;  %s4818_s22 = smov (!%p287_p3, %s3224_s22), 1 }
   0xc   : > { %v379_v1 = vsel %vm377_vm0, %v3234_v0, 0  ;;  %v323_v3 = vld [vmem:[%s4814_s4] sm:$0xf]  ;;  %v594_v4 = vsel %vm377_vm0, %v3285_v2, 0  ;;  %v3307_v6 = vld [vmem:[%s4814_s4 + $0xc] sm:$0xf] }
   0xd   : > { %3753 = vmatpush.bf16.msra.mxu1 %v379_v1  ;;  %3754 = vmatpush.bf16.msra.mxu2 %v379_v1  ;;  %v456_v5 = vsel %vm377_vm0, %v323_v3, 0  ;;  %v741_v7 = vsel %vm377_vm0, %v3307_v6, 0  ;;  %v3333_v8 = vld [vmem:[%s4814_s4 + $0x10] sm:$0xf]  ;;  %s3840_s9 = smul.u32 56, %s4818_s22  ;;  %vm361_vm1 = vcmask 64512  }
   0xe   : > { %3755 = vmatpush.bf16.msra.mxu3 %v379_v1  ;;  %388 = vmatpush.bf16.msra.mxu0 %v379_v1  ;;  %v821_v9 = vsel %vm377_vm0, %v3333_v8, 0  ;;  %v3365_v15 = vld [vmem:[%s4814_s4 + $0x18] sm:$0xf]  ;;  %v3391_v21 = vld [vmem:[%s4814_s4 + $0x1c] sm:$0xf]  ;;  %vm793_vm3 = vcmask 1046528  }
   0xf   : > { %s3847_s12 = scalar_lea.vmem %s4811_s1, %s3840_s9  ;;  %s3865_s17 = scalar_lea.vmem %s4810_s0, %s3840_s9  ;;  %v1019_v18 = vsel %vm377_vm0, %v3365_v15, 0  ;;  %v3339_v22 = vld [vmem:[%s4814_s4 + $0x14] sm:$0xf]  ;;  %v1166_v23 = vsel %vm377_vm0, %v3391_v21, 0  ;;  %v3413_v29 = vld [vmem:[%s4814_s4 + $0x20] sm:$0xf] }
  0x10   : > { %v3651_v10 = vld [vmem:[%s3847_s12 + $0x8] sm:$0xff]  ;;  %v3652_v11 = vld [vmem:[%s3847_s12 + $0x10] sm:$0xff]  ;;  %v3654_v12 = vld [vmem:[%s3847_s12 + $0x20] sm:$0xff]  ;;  %v920_v24 = vsel %vm377_vm0, %v3339_v22, 0  ;;  %v1313_v30 = vsel %vm377_vm0, %v3413_v29, 0  ;;  %s3933_s28 = scalar_lea.vmem %s4813_s3, %s3840_s9  ;;  %s3942_s7 = scalar_lea.vmem %s4812_s2, %s3840_s9  ;;  %vm1915_vm5 = vcmask 1045504  }
  0x11   : > { %603 = vmatpush.bf16.msrb.mxu2 %v594_v4  ;;  %465 = vmatpush.bf16.msrb.mxu1 %v456_v5  ;;  %v3650_v13 = vld [vmem:[%s3847_s12] sm:$0xff]  ;;  %v3660_v16 = vld [vmem:[%s3847_s12 + $0x8] sm:$0xff]  ;;  %vm533_vm2 = vsmask.f32 7424  ;;  %v3653_v36 = vld [vmem:[%s3847_s12 + $0x18] sm:$0xff]  ;;  %vm3015_vm7 = vcmask 1044480  }
  0x12   : > { %750 = vmatpush.bf16.msrb.mxu3 %v741_v7  ;;  %830 = vmatpush.bf16.msrb.mxu0 %v821_v9  ;;  %v3659_v14 = vld [vmem:[%s3847_s12] sm:$0xff]  ;;  %v689_v27 = vshll.u32 %v3660_v16, 16  ;;  %v3655_v31 = vld [vmem:[%s3865_s17 + $0x8] sm:$0xff]  ;;  %v3661_v42 = vld [vmem:[%s3847_s12 + $0x10] sm:$0xff]  ;;  %v693_v46 = vshrl.u32 %v3660_v16, 16 }
  0x13   : > { %3256 = vmatmul.msk.bf16.vlgmr.msra.gmra.mxu1 %vm361_vm1, %v3651_v10  ;;  %3257 = vmatmul.msk.bf16.vlgmr.msra.gmra.mxu2 %vm361_vm1, %v3652_v11  ;;  %v684_v17 = vshll.u32 %v3659_v14, 16  ;;  %v3743_v19 = vld [vmem:[%s3865_s17] sm:$0xf0]  ;;  %v3744_v20 = vld [vmem:[%s3865_s17] sm:$0xe]  ;;  %v682_v25 = vshrl.u32 %v3659_v14, 16 }
  0x14   : > { %3259 = vmatmul.msk.bf16.vlgmr.msra.gmra.mxu3 %vm361_vm1, %v3654_v12  ;;  %3255 = vmatmul.msk.bf16.vlgmr.msra.gmra.mxu0 %vm361_vm1, %v3650_v13  ;;  %v3745_v28 = vor.u32 %v3744_v20, %v3743_v19  ;;  %v691_v33 = vrot.slane %v689_v27, 1  ;;  %v795_v35 = vrot.slane %v3655_v31, 1  ;;  %v3645_v37 = vld [vmem:[%s3865_s17] sm:$0xff]  ;;  %v542_v45 = vshll.u32 %v3655_v31, 16  ;;  %v3656_v48 = vld [vmem:[%s3865_s17 + $0x10] sm:$0xff]  ;;  %v3646_v54 = vld [vmem:[%s3865_s17 + $0x8] sm:$0xff] }
  0x15   : > { %1028 = vmatpush.bf16.msra.mxu2 %v1019_v18  ;;  %v686_v26 = vrot.slane %v684_v17, 1  ;;  %929 = vmatpush.bf16.msra.mxu1 %v920_v24  ;;  %v3711_v39 = vld [vmem:[%s3865_s17] sm:$0xff]   ;;  %v697_v47 = vshll.u32 %v3661_v42, 16  ;;  %v797_v53 = vrot.slane %v3656_v48, 1  ;;  %v3662_v58 = vld [vmem:[%s3847_s12 + $0x18] sm:$0xff]  ;;  %v546_v59 = vshrl.u32 %v3655_v31, 16 }
  0x16   : > { %1175 = vmatpush.bf16.msra.mxu3 %v1166_v23  ;;  %1322 = vmatpush.bf16.msra.mxu0 %v1313_v30  ;;  %v794_v34 = vrot.slane %v3745_v28, 1  ;;  %v537_v41 = vshll.u32 %v3711_v39, 16  ;;  %v535_v43 = vshrl.u32 %v3711_v39, 16  ;;  %v544_v50 = vrot.slane %v542_v45, 1  ;;  %v3657_v63 = vld [vmem:[%s3865_s17 + $0x18] sm:$0xff]  ;;  %v3647_v5 = vld [vmem:[%s3865_s17 + $0x10] sm:$0xff] }
  0x17   : > { %v687_v32 = vor.u32 %v686_v26, %v682_v25  ;;  %v695_v51 = vor.u32 %v693_v46, %v691_v33  ;;  %v699_v52 = vrot.slane %v697_v47, 1  ;;  %v798_v57 = vsel %vm793_vm3, %v795_v35, %v797_v53  ;;  %v3663_v9 = vld [vmem:[%s3847_s12 + $0x20] sm:$0xff]  ;;  %v650_v20 = vld [vmem:[%s3847_s12 + $0x28] sm:$0x1]  ;;  %v3648_v21 = vld [vmem:[%s3865_s17 + $0x18] sm:$0xff] }
  0x18   : > { %v796_v40 = vsel %vm793_vm3, %v794_v34, %v795_v35  ;;  %v539_v44 = vrot.slane %v537_v41, 1  ;;  %v550_v60 = vshll.u32 %v3656_v48, 16  ;;  %v701_v61 = vshrl.u32 %v3661_v42, 16  ;;  %v3915_v14 = vld [vmem:[%s3865_s17 + $0x20] sm:$0xff]  ;;  %v502_v26 = vld [vmem:[%s3865_s17 + $0x28] sm:$0x1] }
  0x19   : > { %v692_v38 = vsel %vm533_vm2, %v687_v32, %v691_v33  ;;  %v700_v56 = vsel %vm533_vm2, %v695_v51, %v699_v52  ;;  %v705_v62 = vshll.u32 %v3662_v58, 16  ;;  %v548_v0 = vor.u32 %v546_v59, %v544_v50  ;;  %v3649_v39 = vld [vmem:[%s3865_s17 + $0x20] sm:$0xff]  ;;  %v3445_v45 = vld [vmem:[%s4814_s4 + $0x28] sm:$0xf]  ;;  %v3467_v46 = vld [vmem:[%s4814_s4 + $0x2c] sm:$0xf] }
  0x1a   : > { %v540_v49 = vor.u32 %v539_v44, %v535_v43  ;;  %v552_v1 = vrot.slane %v550_v60, 1  ;;  %v703_v2 = vor.u32 %v701_v61, %v699_v52  ;;  %v799_v4 = vrot.slane %v3657_v63, 1  ;;  %v3678_v43 = vld [vmem:[%s3933_s28] sm:$0xff]  ;;  %v3493_v52 = vld [vmem:[%s4814_s4 + $0x30] sm:$0xf] }
  0x1b   : > { %v707_v3 = vrot.slane %v705_v62, 1  ;;  %v554_v10 = vshrl.u32 %v3656_v48, 16  ;;  %v558_v11 = vshll.u32 %v3657_v63, 16  ;;  %v709_v12 = vshrl.u32 %v3662_v58, 16  ;;  %v3715_v44 = vld [vmem:[%s3942_s7] sm:$0xff]   ;;  %v3961_v48 = vld [vmem:[%s3942_s7 + $0x8] sm:$0xff] }
  0x1c   : > { %v545_v55 = vsel %vm533_vm2, %v540_v49, %v544_v50  ;;  %v553_v6 = vsel %vm533_vm2, %v548_v0, %v552_v1  ;;  %v800_v8 = vsel %vm793_vm3, %v797_v53, %v799_v4  ;;  %v713_v13 = vshll.u32 %v3663_v9, 16  ;;  %v3439_v47 = vld [vmem:[%s4814_s4 + $0x24] sm:$0xf] }
  0x1d   : > { %v708_v7 = vsel %vm533_vm2, %v703_v2, %v707_v3  ;;  %v556_v15 = vor.u32 %v554_v10, %v552_v1  ;;  %v560_v16 = vrot.slane %v558_v11, 1  ;;  %v711_v17 = vor.u32 %v709_v12, %v707_v3  ;;  %v3982_v11 = vld [vmem:[%s3942_s7 + $0x10] sm:$0xff] }
  0x1e   : > { %v715_v18 = vrot.slane %v713_v13, 1  ;;  %v801_v19 = vrot.slane %v3915_v14, 1  ;;  %v674_v25 = vunpack.c.l.b16 %v650_v20  ;;  %v526_v28 = vunpack.c.l.b16 %v502_v26  ;;  %v3680_v12 = vld [vmem:[%s3933_s28 + $0x10] sm:$0xff]  ;;  %v3681_v26 = vld [vmem:[%s3933_s28 + $0x18] sm:$0xff] }
  0x1f   : > { %v561_v22 = vsel %vm533_vm2, %v556_v15, %v560_v16  ;;  %v562_v29 = vshrl.u32 %v3657_v63, 16  ;;  %v566_v30 = vshll.u32 %v3915_v14, 16  ;;  %v717_v31 = vshrl.u32 %v3663_v9, 16 }
  0x20   : > { %v716_v23 = vsel %vm533_vm2, %v711_v17, %v715_v18  ;;  %v802_v24 = vsel %vm793_vm3, %v799_v4, %v801_v19  ;;  %v680_v27 = vpack.c.b16 %v674_v25, %v674_v25  ;;  %v532_v33 = vpack.c.b16 %v526_v28, %v526_v28  ;;  %v3996_v25 = vld [vmem:[%s3942_s7 + $0x18] sm:$0xff] }
  0x21   : > { %v564_v34 = vor.u32 %v562_v29, %v560_v16  ;;  %v568_v35 = vrot.slane %v566_v30, 1  ;;  %v1506_v49 = vsel %vm377_vm0, %v3445_v45, 0  ;;  %v1620_v50 = vsel %vm377_vm0, %v3467_v46, 0 }
  0x22   : > { %v721_v32 = vshll.u32 %v680_v27, 16  ;;  %v1392_v51 = vsel %vm377_vm0, %v3439_v47, 0  ;;  %v1109_v53 = vshll.u32 %v3715_v44, 16  ;;  %v574_v58 = vshll.u32 %v532_v33, 16 }
  0x23   : > { %3258 = vmatmul.msk.bf16.gmra.mxu2 %vm361_vm1, %v3653_v36  ;;  %3280 = vmatmul.msk.bf16.vlgmr.msrb.gmra.mxu1 %vm361_vm1, %v3645_v37  ;;  %v719_v36 = vor.u32 %v717_v31, %v715_v18  ;;  %v1107_v59 = vshrl.u32 %v3715_v44, 16  ;;  %v1114_v60 = vshll.u32 %v3961_v48, 16  ;;  %v1254_v62 = vshrl.u32 %v3678_v43, 16 }
  0x24   : > { %3328 = vmatmul.msk.bf16.vlgmr.msrb.gmra.mxu3 %vm361_vm1, %v692_v38  ;;  %3334 = vmatmul.msk.bf16.vlgmr.msrb.gmra.mxu0 %vm361_vm1, %v796_v40  ;;  %v723_v37 = vrot.slane %v721_v32, 1  ;;  %v803_v38 = vrot.slane %v532_v33, 1  ;;  %v569_v40 = vsel %vm533_vm2, %v564_v34, %v568_v35  ;;  %v1111_v61 = vrot.slane %v1109_v53, 1 }
  0x25   : > { %1629 = vmatpush.bf16.msrb.mxu3 %v1620_v50  ;;  %1401 = vmatpush.bf16.msrb.mxu1 %v1392_v51  ;;  %v576_v2 = vrot.slane %v574_v58, 1  ;;  %v1116_v4 = vrot.slane %v1114_v60, 1  ;;  %v1118_v13 = vshrl.u32 %v3961_v48, 16  ;;  %v1269_v16 = vshll.u32 %v3680_v12, 16  ;;  %v1222_v58 = vld [vmem:[%s3933_s28 + $0x28] sm:$0x1] }
  0x26   : > { %v724_v41 = vsel %vm533_vm2, %v719_v36, %v723_v37  ;;  %v804_v42 = vsel %vm793_vm3, %v801_v19, %v803_v38  ;;  %v1112_v3 = vor.u32 %v1111_v61, %v1107_v59  ;;  %v1126_v27 = vshrl.u32 %v3982_v11, 16  ;;  %v3670_v36 = vld [vmem:[%s3933_s28 + $0x8] sm:$0xff]  ;;  %v3667_v59 = vld [vmem:[%s3942_s7 + $0x18] sm:$0xff]  ;;  %v3671_v60 = vld [vmem:[%s3933_s28 + $0x10] sm:$0xff] }
  0x27   : > { %v1120_v17 = vor.u32 %v1118_v13, %v1116_v4  ;;  %v1271_v20 = vrot.slane %v1269_v16, 1  ;;  %v1130_v28 = vshll.u32 %v3996_v25, 16  ;;  %v1273_v29 = vshrl.u32 %v3680_v12, 16 }
  0x28   : > { %v1117_v9 = vsel %vm533_vm2, %v1112_v3, %v1116_v4  ;;  %v1277_v30 = vshll.u32 %v3681_v26, 16  ;;  %v1134_v47 = vshrl.u32 %v3996_v25, 16  ;;  %v1281_v50 = vshrl.u32 %v3681_v26, 16 }
  0x29   : > { %v1132_v32 = vrot.slane %v1130_v28, 1  ;;  %v1275_v33 = vor.u32 %v1273_v29, %v1271_v20  ;;  %v1246_v4 = vunpack.c.l.b16 %v1222_v58  ;;  %v3672_v28 = vld [vmem:[%s3933_s28 + $0x18] sm:$0xff]  ;;  %vm1672_vm4 = vsmask.f32 6400 }
  0x2a   : > { %v1279_v34 = vrot.slane %v1277_v30, 1  ;;  %vm2772_vm6 = vsmask.f32 5376 }
  0x33   : > { %3281 = vmatmul.msk.bf16.gmra.mxu1 %vm361_vm1, %v3646_v54  ;;  %3302 = vmatmul.msk.bf16.vlgmr.msrb.gmra.mxu2 %vm361_vm1, %v545_v55  ;;  %v3679_v54 = vld [vmem:[%s3933_s28 + $0x8] sm:$0xff]  ;;  %v1256_v55 = vshll.u32 %v3678_v43, 16 }
  0x34   : > { %3329 = vmatmul.msk.bf16.gmra.mxu3 %vm361_vm1, %v700_v56  ;;  %3335 = vmatmul.msk.bf16.gmra.mxu0 %vm361_vm1, %v798_v57  ;;  %v1742_v56 = vsel %vm377_vm0, %v3493_v52, 0  ;;  %v570_v57 = vshrl.u32 %v3915_v14, 16  ;;  %v1261_v0 = vshll.u32 %v3679_v54, 16  ;;  %v1122_v14 = vshll.u32 %v3982_v11, 16 }
  0x35   : > { %1515 = vmatpush.bf16.msrb.mxu2 %v1506_v49  ;;  %1751 = vmatpush.bf16.msrb.mxu0 %v1742_v56  ;;  %v1258_v63 = vrot.slane %v1256_v55, 1  ;;  %v1265_v15 = vshrl.u32 %v3679_v54, 16  ;;  %v1136_v52 = vor.u32 %v1134_v47, %v1132_v32  ;;  %v1283_v54 = vor.u32 %v1281_v50, %v1279_v34  ;;  %v1075_v56 = vld [vmem:[%s3942_s7 + $0x28] sm:$0x1]  ;;  %v3470_v50 = vld [vmem:[%s3847_s12 + $0x4] sm:$0xe] }
  0x36   : > { %v572_v1 = vor.u32 %v570_v57, %v568_v35  ;;  %v1124_v18 = vrot.slane %v1122_v14, 1  ;;  %v3666_v35 = vld [vmem:[%s3942_s7 + $0x10] sm:$0xff] }
  0x38   : > { %v1128_v31 = vor.u32 %v1126_v27, %v1124_v18  ;;  %v3668_v27 = vld [vmem:[%s3942_s7 + $0x20] sm:$0xff] }
  0x3a   : > { %v1133_v38 = vsel %vm533_vm2, %v1128_v31, %v1132_v32 }
  0x43   : > { %3282 = vmatmul.msk.bf16.gmra.mxu1 %vm361_vm1, %v3647_v5  ;;  %3303 = vmatmul.msk.bf16.gmra.mxu2 %vm361_vm1, %v553_v6  ;;  %v1259_v5 = vor.u32 %v1258_v63, %v1254_v62  ;;  %v1263_v6 = vrot.slane %v1261_v0, 1  ;;  %v1099_v63 = vunpack.c.l.b16 %v1075_v56 }
  0x44   : > { %3330 = vmatmul.msk.bf16.gmra.mxu3 %vm361_vm1, %v708_v7  ;;  %3336 = vmatmul.msk.bf16.gmra.mxu0 %vm361_vm1, %v800_v8  ;;  %v3664_v7 = vld [vmem:[%s3942_s7] sm:$0xff]  ;;  %v577_v8 = vsel %vm533_vm2, %v572_v1, %v576_v2 }
  0x45   : > { %v1264_v10 = vsel %vm533_vm2, %v1259_v5, %v1263_v6  ;;  %v1267_v19 = vor.u32 %v1265_v15, %v1263_v6  ;;  %v4039_v5 = vpack.c.b16 %v1099_v63, %v1099_v63  ;;  %v1252_v6 = vpack.c.b16 %v1246_v4, %v1246_v4 }
  0x47   : > { %v1146_v12 = vshll.u32 %v4039_v5, 16  ;;  %v1293_v16 = vshll.u32 %v1252_v6, 16 }
  0x53   : > { %3283 = vmatmul.msk.bf16.gmra.mxu1 %vm361_vm1, %v3648_v21  ;;  %3304 = vmatmul.msk.bf16.gmra.mxu2 %vm361_vm1, %v561_v22  ;;  %v3665_v21 = vld [vmem:[%s3942_s7 + $0x8] sm:$0xff]  ;;  %v3669_v22 = vld [vmem:[%s3933_s28] sm:$0xff] }
  0x54   : > { %3331 = vmatmul.msk.bf16.gmra.mxu3 %vm361_vm1, %v716_v23  ;;  %3337 = vmatmul.msk.bf16.gmra.mxu0 %vm361_vm1, %v802_v24  ;;  %v1125_v23 = vsel %vm533_vm2, %v1120_v17, %v1124_v18  ;;  %v1272_v24 = vsel %vm533_vm2, %v1267_v19, %v1271_v20  ;;  %v1438_v17 = vld [vmem:[%s3865_s17 + $0x4] sm:$0xe]  ;;  %v4051_v18 = vld [vmem:[%s3865_s17 + $0x8] sm:$0xf] }
  0x55   : > { %v1462_v19 = vunpack.c.l.b16 %v1438_v17  ;;  %v1463_v20 = vunpack.c.l.b16 %v4051_v18  ;;  %v1366_v17 = vrot.slane %v3961_v48, 1 }
  0x57   : > { %v4060_v31 = vpack.c.b16 %v1463_v20, %v1462_v19 }
  0x59   : > { %v1677_v47 = vshll.u32 %v4060_v31, 16 }
  0x63   : > { %3284 = vmatmul.msk.bf16.gmra.mxu1 %vm361_vm1, %v3649_v39  ;;  %3305 = vmatmul.msk.bf16.gmra.mxu2 %vm361_vm1, %v569_v40  ;;  %v1280_v40 = vsel %vm533_vm2, %v1275_v33, %v1279_v34 }
  0x64   : > { %3332 = vmatmul.msk.bf16.gmra.mxu3 %vm361_vm1, %v724_v41  ;;  %3338 = vmatmul.msk.bf16.gmra.mxu0 %vm361_vm1, %v804_v42  ;;  %v4012_v41 = vld [vmem:[%s3942_s7 + $0x20] sm:$0xff] }
  0x65   : > { %v3682_v42 = vld [vmem:[%s3933_s28 + $0x20] sm:$0xff]  ;;  %v1138_v49 = vshll.u32 %v4012_v41, 16 }
  0x66   : > { %v1285_v51 = vshll.u32 %v3682_v42, 16  ;;  %v1289_v15 = vshrl.u32 %v3682_v42, 16 }
  0x67   : > { %v1140_v53 = vrot.slane %v1138_v49, 1 }
  0x68   : > { %v1287_v55 = vrot.slane %v1285_v51, 1  ;;  %v3687_v51 = vld [vmem:[%s3847_s12 + $0x4] sm:$0xf0] }
  0x69   : > { %v1141_v1 = vsel %vm533_vm2, %v1136_v52, %v1140_v53 }
  0x6a   : > { %v1288_v3 = vsel %vm533_vm2, %v1283_v54, %v1287_v55 }
  0x73   : > { %3306 = vmatmul.msk.bf16.gmra.mxu2 %vm361_vm1, %v577_v8  ;;  %3360 = vmatmul.msk.bf16.vlgmr.msra.gmra.mxu1 %vm361_vm1, %v3664_v7 }
  0x74   : > { %3408 = vmatmul.msk.bf16.vlgmr.msra.gmra.mxu3 %vm361_vm1, %v1117_v9  ;;  %3434 = vmatmul.msk.bf16.vlgmr.msra.gmra.mxu0 %vm361_vm1, %v1264_v10  ;;  %v1142_v10 = vshrl.u32 %v4012_v41, 16 }
  0x83   : > { %3361 = vmatmul.msk.bf16.gmra.mxu1 %vm361_vm1, %v3665_v21  ;;  %3386 = vmatmul.msk.bf16.vlgmr.msra.gmra.mxu2 %vm361_vm1, %v3669_v22  ;;  %v1144_v21 = vor.u32 %v1142_v10, %v1140_v53  ;;  %v1148_v22 = vrot.slane %v1146_v12, 1  ;;  %v3533_v12 = vld [vmem:[%s4814_s4 + $0x40] sm:$0xf] }
  0x84   : > { %3409 = vmatmul.msk.bf16.gmra.mxu3 %vm361_vm1, %v1125_v23  ;;  %3435 = vmatmul.msk.bf16.gmra.mxu0 %vm361_vm1, %v1272_v24  ;;  %v1291_v23 = vor.u32 %v1289_v15, %v1287_v55  ;;  %v1295_v24 = vrot.slane %v1293_v16, 1  ;;  %v2171_v16 = vsel %vm377_vm0, %v3533_v12, 0 }
  0x85   : > { %v1149_v33 = vsel %vm533_vm2, %v1144_v21, %v1148_v22  ;;  %2180 = vmatpush.bf16.msra.mxu0 %v2171_v16  ;;  %v4150_v16 = vld [vmem:[%s3865_s17 + $0x1c] sm:$0xff] }
  0x90   : > { %v4003_v37 = vpop.f32.mrf.mxu1 }
  0x91   : > { %v390_v39 = vpop.f32.mrf.mxu0 }
  0x93   : > { %3362 = vmatmul.msk.bf16.gmra.mxu1 %vm361_vm1, %v3666_v35  ;;  %3387 = vmatmul.msk.bf16.gmra.mxu2 %vm361_vm1, %v3670_v36  ;;  %v1296_v35 = vsel %vm533_vm2, %v1291_v23, %v1295_v24  ;;  %v4070_v36 = vld [vmem:[%s3865_s17 + $0xc] sm:$0xff] }
  0x94   : > { %3410 = vmatmul.msk.bf16.gmra.mxu3 %vm361_vm1, %v1133_v38  ;;  %3436 = vmatmul.msk.bf16.gmra.mxu0 %vm361_vm1, %v1280_v40  ;;  %v3746_v38 = vld [vmem:[%s3942_s7] sm:$0xf0]  ;;  %v3747_v40 = vld [vmem:[%s3942_s7] sm:$0xe]  ;;  %v1682_v52 = vshrl.u32 %v4070_v36, 16  ;;  %v1685_v53 = vshll.u32 %v4070_v36, 16 }
  0x96   : > { %v4015_v43 = vpop.f32.mrf.mxu2  ;;  %v1687_v10 = vrot.slane %v1685_v53, 2  ;;  %v4135_v53 = vld [vmem:[%s3847_s12 + $0x14] sm:$0xff] }
  0x97   : > { %v4017_v44 = vpop.f32.mrf.mxu3 }
  0x98   : > { %v4019_v45 = vpop.f32.mrf.mxu1 }
  0x99   : > { %v392_v46 = vpop.f32.mrf.mxu0 }
  0x9e   : > { %v4024_v57 = vpop.f32.mrf.mxu2 }
  0x9f   : > { %v4029_v61 = vpop.f32.mrf.mxu3 }
  0xa0   : > { %v467_v62 = vpop.f32.mrf.mxu1 }
  0xa1   : > { %v468_v0 = vadd.f32 %v467_v62, %v390_v39  ;;  %v4032_v2 = vpop.f32.mrf.mxu0  ;;  %v3511_v39 = vld [vmem:[%s4814_s4 + $0x3c] sm:$0xf]  ;;  %v4095_v62 = vor.u32 %v3687_v51, %v3470_v50 }
  0xa2   : > { %v2057_v49 = vsel %vm377_vm0, %v3511_v39, 0 }
  0xa3   : > { %3363 = vmatmul.msk.bf16.gmra.mxu1 %vm361_vm1, %v3667_v59  ;;  %3388 = vmatmul.msk.bf16.gmra.mxu2 %vm361_vm1, %v3671_v60  ;;  %v3748_v59 = vor.u32 %v3747_v40, %v3746_v38  ;;  %v4093_v60 = vld [vmem:[%s3847_s12 + $0xc] sm:$0xff]  ;;  %v1593_v19 = vrot.slane %v4095_v62, 1  ;;  %v4121_v40 = vld [vmem:[%s3865_s17 + $0x14] sm:$0xff] }
  0xa4   : > { %3411 = vmatmul.msk.bf16.gmra.mxu3 %vm361_vm1, %v1141_v1  ;;  %3437 = vmatmul.msk.bf16.gmra.mxu0 %vm361_vm1, %v1288_v3  ;;  %v1679_v1 = vrot.slane %v1677_v47, 2  ;;  %v1594_v21 = vrot.slane %v4093_v60, 1 }
  0xa5   : > { %2066 = vmatpush.bf16.msra.mxu3 %v2057_v49 }
  0xa6   : > { %v4041_v7 = vpop.f32.mrf.mxu2  ;;  %v1595_v48 = vsel %vm793_vm3, %v1593_v19, %v1594_v21 }
  0xa7   : > { %v752_v8 = vpop.f32.mrf.mxu3 }
  0xa8   : > { %v469_v9 = vpop.f32.mrf.mxu1 }
  0xa9   : > { %v4045_v13 = vadd.f32 %v469_v9, %v392_v46  ;;  %v4047_v14 = vpop.f32.mrf.mxu0  ;;  %v1674_v46 = vshrl.u32 %v4060_v31, 16  ;;  %v1684_v9 = vrot.slane %v1682_v52, 1 }
  0xab   : > { %v1676_v63 = vrot.slane %v1674_v46, 1  ;;  %v1688_v23 = vor.u32 %v1687_v10, %v1684_v9 }
  0xad   : > { %v1680_v22 = vor.u32 %v1679_v1, %v1676_v63  ;;  %v1596_v63 = vrot.slane %v4135_v53, 1 }
  0xae   : > { %v4054_v26 = vpop.f32.mrf.mxu2 }
  0xaf   : > { %v754_v29 = vpop.f32.mrf.mxu3  ;;  %v1689_v39 = vsel %vm1672_vm4, %v1680_v22, %v1688_v23 }
  0xb0   : > { %v472_v30 = vpop.f32.mrf.mxu1 }
  0xb1   : > { %v4063_v32 = vadd.f32 %v472_v30, %v4003_v37  ;;  %v4066_v34 = vpop.f32.mrf.mxu0  ;;  %v3505_v37 = vld [vmem:[%s4814_s4 + $0x38] sm:$0xf] }
  0xb2   : > { %v1943_v42 = vsel %vm377_vm0, %v3505_v37, 0 }
  0xb3   : > { %3364 = vmatmul.msk.bf16.gmra.mxu1 %vm361_vm1, %v3668_v27  ;;  %3389 = vmatmul.msk.bf16.gmra.mxu2 %vm361_vm1, %v3672_v28  ;;  %v3673_v28 = vld [vmem:[%s3933_s28 + $0x20] sm:$0xff] }
  0xb4   : > { %3412 = vmatmul.msk.bf16.gmra.mxu3 %vm361_vm1, %v1149_v33  ;;  %3438 = vmatmul.msk.bf16.gmra.mxu0 %vm361_vm1, %v1296_v35 }
  0xb5   : > { %1952 = vmatpush.bf16.msra.mxu2 %v1943_v42 }
  0xb6   : > { %v605_v54 = vpop.f32.mrf.mxu2 }
  0xb7   : > { %v630_v55 = vadd.f32 %v605_v54, %v468_v0  ;;  %v757_v56 = vpop.f32.mrf.mxu3  ;;  %v3499_v0 = vld [vmem:[%s4814_s4 + $0x34] sm:$0xf] }
  0xb8   : > { %v474_v58 = vpop.f32.mrf.mxu1  ;;  %v1863_v15 = vsel %vm377_vm0, %v3499_v0, 0 }
  0xb9   : > { %v777_v3 = vadd.f32 %v752_v8, %v630_v55  ;;  %v475_v4 = vadd.f32 %v474_v58, %v4019_v45  ;;  %v4098_v6 = vpop.f32.mrf.mxu0  ;;  %1872 = vmatpush.bf16.msra.mxu1 %v1863_v15  ;;  %v1365_v8 = vrot.slane %v3748_v59, 1  ;;  %v1368_v58 = vrot.slane %v3982_v11, 1 }
  0xba   : > { %v1479_v59 = vrot.slane %v4060_v31, 1  ;;  %v1597_v11 = vsel %vm793_vm3, %v1594_v21, %v1596_v63 }
  0xbb   : > { %v4109_v45 = vadd.f32 %v4032_v2, %v777_v3  ;;  %v1367_v2 = vsel %vm793_vm3, %v1365_v8, %v1366_v17  ;;  %v1369_v10 = vsel %vm793_vm3, %v1366_v17, %v1368_v58  ;;  %v1703_v8 = vshll.u32 %v4150_v16, 16 }
  0xbe   : > { %v607_v24 = vpop.f32.mrf.mxu2 }
  0xbf   : > { %v631_v27 = vadd.f32 %v607_v24, %v4045_v13  ;;  %v759_v30 = vpop.f32.mrf.mxu3 }
  0xc0   : > { %v477_v33 = vpop.f32.mrf.mxu1 }
  0xc1   : > { %v778_v35 = vadd.f32 %v754_v29, %v631_v27  ;;  %v478_v38 = vadd.f32 %v477_v33, %v4015_v43  ;;  %v842_v37 = vpop.f32.mrf.mxu0  ;;  %v1691_v43 = vshrl.u32 %v4121_v40, 16  ;;  %v1694_v29 = vshll.u32 %v4121_v40, 16 }
  0xc3   : > { %3390 = vmatmul.msk.bf16.gmra.mxu2 %vm361_vm1, %v3673_v28  ;;  %3440 = vmatmul.msk.bf16.vlgmr.msrb.gmra.mxu1 %vm361_vm1, %v1367_v2  ;;  %v4126_v13 = vadd.f32 %v4047_v14, %v778_v35  ;;  %v1693_v14 = vrot.slane %v1691_v43, 1  ;;  %v1696_v54 = vrot.slane %v1694_v29, 2  ;;  %v4163_v28 = vld [vmem:[%s3847_s12 + $0x1c] sm:$0xff]  ;;  %v1370_v2 = vrot.slane %v3996_v25, 1 }
  0xc4   : > { %3488 = vmatmul.msk.bf16.vlgmr.msrb.gmra.mxu3 %vm361_vm1, %v1595_v48  ;;  %3494 = vmatmul.msk.bf16.vlgmr.msrb.gmra.mxu0 %vm361_vm1, %v1689_v39  ;;  %v1482_v35 = vrot.slane %v4121_v40, 1  ;;  %v1598_v48 = vrot.slane %v4163_v28, 1 }
  0xc6   : > { %v610_v42 = vpop.f32.mrf.mxu2 }
  0xc7   : > { %v632_v46 = vadd.f32 %v610_v42, %v4063_v32  ;;  %v762_v47 = vpop.f32.mrf.mxu3  ;;  %v1480_v32 = vrot.slane %v4070_v36, 1 }
  0xc8   : > { %v479_v49 = vpop.f32.mrf.mxu1 }
  0xc9   : > { %v779_v50 = vadd.f32 %v757_v56, %v632_v46  ;;  %v480_v51 = vadd.f32 %v479_v49, %v4024_v57  ;;  %v844_v52 = vpop.f32.mrf.mxu0  ;;  %v1697_v56 = vor.u32 %v1696_v54, %v1693_v14  ;;  %v1481_v0 = vsel %vm793_vm3, %v1479_v59, %v1480_v32 }
  0xca   : > { %v1483_v46 = vsel %vm793_vm3, %v1480_v32, %v1482_v35 }
  0xcb   : > { %v4138_v55 = vadd.f32 %v4066_v34, %v779_v50  ;;  %v1698_v31 = vsel %vm1672_vm4, %v1688_v23, %v1697_v56  ;;  %v4175_v50 = vld [vmem:[%s3865_s17 + $0x24] sm:$0xff] }
  0xcc   : > { %v1709_v14 = vshrl.u32 %v4175_v50, 16  ;;  %v1712_v54 = vshll.u32 %v4175_v50, 16 }
  0xce   : > { %v612_v1 = vpop.f32.mrf.mxu2 }
  0xcf   : > { %v633_v57 = vadd.f32 %v612_v1, %v475_v4  ;;  %v764_v3 = vpop.f32.mrf.mxu3 }
  0xd0   : > { %v482_v9 = vpop.f32.mrf.mxu1 }
  0xd1   : > { %v780_v34 = vadd.f32 %v759_v30, %v633_v57  ;;  %v483_v12 = vadd.f32 %v482_v9, %v4041_v7  ;;  %v847_v15 = vpop.f32.mrf.mxu0  ;;  %v1700_v7 = vshrl.u32 %v4150_v16, 16  ;;  %v1705_v30 = vrot.slane %v1703_v8, 2  ;;  %v1666_v9 = vld [vmem:[%s3865_s17 + $0x2c] sm:$0x3] }
  0xd3   : > { %3441 = vmatmul.msk.bf16.gmra.mxu1 %vm361_vm1, %v1369_v10  ;;  %3462 = vmatmul.msk.bf16.vlgmr.msrb.gmra.mxu2 %vm361_vm1, %v1481_v0  ;;  %v4155_v4 = vadd.f32 %v4098_v6, %v780_v34  ;;  %v1702_v6 = vrot.slane %v1700_v7, 1  ;;  %v1372_v0 = vrot.slane %v4012_v41, 1  ;;  %v1484_v34 = vrot.slane %v4150_v16, 1 }
  0xd4   : > { %3489 = vmatmul.msk.bf16.gmra.mxu3 %vm361_vm1, %v1597_v11  ;;  %3495 = vmatmul.msk.bf16.gmra.mxu0 %vm361_vm1, %v1698_v31  ;;  %v1670_v31 = vunpack.c.l.b16 %v1666_v9 }
  0xd6   : > { %v615_v17 = vpop.f32.mrf.mxu2 }
  0xd7   : > { %v634_v19 = vadd.f32 %v615_v17, %v478_v38  ;;  %v767_v21 = vpop.f32.mrf.mxu3  ;;  %v1706_v38 = vor.u32 %v1705_v30, %v1702_v6 }
  0xd8   : > { %v484_v22 = vpop.f32.mrf.mxu1 }
  0xd9   : > { %v781_v23 = vadd.f32 %v762_v47, %v634_v19  ;;  %v485_v24 = vadd.f32 %v484_v22, %v4054_v26  ;;  %v849_v27 = vpop.f32.mrf.mxu0  ;;  %v1371_v26 = vsel %vm793_vm3, %v1368_v58, %v1370_v2  ;;  %v1707_v25 = vsel %vm1672_vm4, %v1697_v56, %v1706_v38  ;;  %v4186_v56 = vld [vmem:[%s3847_s12 + $0x24] sm:$0xff] }
  0xda   : > { %v1600_v11 = vrot.slane %v4186_v56, 1  ;;  %v1485_v22 = vsel %vm793_vm3, %v1482_v35, %v1484_v34 }
  0xdb   : > { %v4165_v33 = vadd.f32 %v842_v37, %v781_v23  ;;  %v1599_v37 = vsel %vm793_vm3, %v1596_v63, %v1598_v48 }
  0xde   : > { %v617_v39 = vpop.f32.mrf.mxu2 }
  0xdf   : > { %v635_v43 = vadd.f32 %v617_v39, %v480_v51  ;;  %v769_v29 = vpop.f32.mrf.mxu3  ;;  %v1562_v39 = vld [vmem:[%s3847_s12 + $0x2c] sm:$0x1] }
  0xe0   : > { %v487_v42 = vpop.f32.mrf.mxu1 }
  0xe1   : > { %v782_v47 = vadd.f32 %v764_v3, %v635_v43  ;;  %v852_v49 = vpop.f32.mrf.mxu0  ;;  %v1711_v3 = vrot.slane %v1709_v14, 1  ;;  %v4206_v43 = vpack.c.b16 %v1670_v31, %v1670_v31 }
  0xe3   : > { %3442 = vmatmul.msk.bf16.gmra.mxu1 %vm361_vm1, %v1371_v26  ;;  %3463 = vmatmul.msk.bf16.gmra.mxu2 %vm361_vm1, %v1483_v46  ;;  %v4179_v51 = vadd.f32 %v844_v52, %v782_v47  ;;  %v1714_v52 = vrot.slane %v1712_v54, 2  ;;  %v1718_v35 = vshrl.u32 %v4206_v43, 16 }
  0xe4   : > { %3490 = vmatmul.msk.bf16.gmra.mxu3 %vm361_vm1, %v1599_v37  ;;  %3496 = vmatmul.msk.bf16.gmra.mxu0 %vm361_vm1, %v1707_v25 }
  0xe5   : > { %v1720_v14 = vrot.slane %v1718_v35, 1  ;;  %v3696_v35 = vld [vmem:[%s3933_s28 + $0x4] sm:$0xf0] }
  0xe6   : > { %v620_v58 = vpop.f32.mrf.mxu2 }
  0xe7   : > { %v636_v59 = vadd.f32 %v620_v58, %v483_v12  ;;  %v772_v32 = vpop.f32.mrf.mxu3  ;;  %v1715_v12 = vor.u32 %v1714_v52, %v1711_v3 }
  0xe8   : > { %v489_v63 = vpop.f32.mrf.mxu1 }
  0xe9   : > { %v783_v1 = vadd.f32 %v767_v21, %v636_v59  ;;  %v4188_v57 = vpop.f32.mrf.mxu0  ;;  %v1373_v21 = vsel %vm793_vm3, %v1370_v2, %v1372_v0  ;;  %v1716_v30 = vsel %vm1672_vm4, %v1706_v38, %v1715_v12  ;;  %v1586_v2 = vunpack.c.l.b16 %v1562_v39 }
  0xea   : > { %v490_v59 = vadd.f32 %v489_v63, %v4029_v61 }
  0xeb   : > { %v4191_v10 = vadd.f32 %v847_v15, %v783_v1  ;;  %v1601_v15 = vsel %vm793_vm3, %v1598_v48, %v1600_v11  ;;  %v1721_v48 = vshll.u32 %v4206_v43, 16  ;;  %v1592_v47 = vpack.c.b16 %v1586_v2, %v1586_v2 }
  0xed   : > { %v1723_v54 = vrot.slane %v1721_v48, 2  ;;  %v1602_v1 = vrot.slane %v1592_v47, 1 }
  0xee   : > { %v622_v7 = vpop.f32.mrf.mxu2 }
  0xef   : > { %v637_v8 = vadd.f32 %v622_v7, %v485_v24  ;;  %v774_v17 = vpop.f32.mrf.mxu3  ;;  %v1603_v61 = vsel %vm793_vm3, %v1600_v11, %v1602_v1  ;;  %v3565_v11 = vld [vmem:[%s4814_s4 + $0x48] sm:$0xf] }
  0xf0   : > { %v931_v19 = vpop.f32.mrf.mxu1 }
  0xf1   : > { %v784_v23 = vadd.f32 %v769_v29, %v637_v8  ;;  %v4200_v41 = vadd.f32 %v931_v19, %v4109_v45  ;;  %v4202_v6 = vpop.f32.mrf.mxu0  ;;  %v488_v45 = vadd.f32 %v487_v42, %v4017_v44  ;;  %v1374_v44 = vrot.slane %v4039_v5, 1  ;;  %v1448_v5 = vld [vmem:[%s3865_s17 + $0x2c] sm:$0x1] }
  0xf2   : > { %v1486_v42 = vrot.slane %v4175_v50, 1 }
  0xf3   : > { %3443 = vmatmul.msk.bf16.gmra.mxu1 %vm361_vm1, %v1373_v21  ;;  %3464 = vmatmul.msk.bf16.gmra.mxu2 %vm361_vm1, %v1485_v22  ;;  %v4210_v24 = vadd.f32 %v849_v27, %v784_v23  ;;  %v1375_v31 = vsel %vm793_vm3, %v1372_v0, %v1374_v44  ;;  %v1989_v21 = vld [vmem:[%s3942_s7 + $0x4] sm:$0xe]  ;;  %v4243_v22 = vld [vmem:[%s3942_s7 + $0x8] sm:$0xf]  ;;  %v1472_v0 = vunpack.c.l.b16 %v1448_v5  ;;  %v1806_v23 = vshll.u32 %v4093_v60, 16 }
  0xf4   : > { %3491 = vmatmul.msk.bf16.gmra.mxu3 %vm361_vm1, %v1601_v15  ;;  %3497 = vmatmul.msk.bf16.gmra.mxu0 %vm361_vm1, %v1716_v30  ;;  %v1803_v15 = vshrl.u32 %v4093_v60, 16  ;;  %v2013_v39 = vunpack.c.l.b16 %v1989_v21  ;;  %v2014_v2 = vunpack.c.l.b16 %v4243_v22 }
  0xf5   : > { %v1478_v60 = vpack.c.b16 %v1472_v0, %v1472_v0 }
  0xf6   : > { %v625_v38 = vpop.f32.mrf.mxu2 }
  0xf7   : > { %v638_v29 = vadd.f32 %v625_v38, %v488_v45  ;;  %v1177_v26 = vpop.f32.mrf.mxu3  ;;  %v3536_v45 = vld [vmem:[%s3933_s28 + $0x4] sm:$0xe] }
  0xf8   : > { %v933_v46 = vpop.f32.mrf.mxu1 }
  0xf9   : > { %v785_v37 = vadd.f32 %v772_v32, %v638_v29  ;;  %v4218_v27 = vadd.f32 %v933_v46, %v4126_v13  ;;  %v4220_v25 = vpop.f32.mrf.mxu0  ;;  %v1724_v32 = vor.u32 %v1723_v54, %v1720_v14  ;;  %v1808_v14 = vrot.slane %v1806_v23, 2  ;;  %v4269_v54 = vld [vmem:[%s3942_s7 + $0xc] sm:$0xff] }
  0xfb   : > { %v4222_v58 = vadd.f32 %v852_v49, %v785_v37  ;;  %v1487_v49 = vsel %vm793_vm3, %v1484_v34, %v1486_v42  ;;  %v1725_v19 = vsel %vm1672_vm4, %v1715_v12, %v1724_v32  ;;  %v1795_v34 = vshrl.u32 %v4095_v62, 16  ;;  %v3571_v12 = vld [vmem:[%s4814_s4 + $0x4c] sm:$0xf] }
  0xfc   : > { %v2492_v30 = vsel %vm377_vm0, %v3571_v12, 0  ;;  %v1805_v37 = vrot.slane %v1803_v15, 1  ;;  %v4276_v32 = vpack.c.b16 %v2014_v2, %v2013_v39 }
  0xfd   : > { %2501 = vmatpush.bf16.msrb.mxu3 %v2492_v30  ;;  %v1797_v46 = vrot.slane %v1795_v34, 1 }
  0xfe   : > { %v627_v3 = vpop.f32.mrf.mxu2 }
  0xff   : > { %v639_v13 = vadd.f32 %v627_v3, %v490_v59  ;;  %v4227_v52 = vpop.f32.mrf.mxu3  ;;  %v4279_v3 = vld [vmem:[%s3933_s28 + $0xc] sm:$0xff] }
 0x100   : > { %v936_v9 = vpop.f32.mrf.mxu1  ;;  %v2145_v0 = vrot.slane %v4279_v3, 1 }
 0x101   : > { %v786_v7 = vadd.f32 %v774_v17, %v639_v13  ;;  %v4235_v8 = vadd.f32 %v936_v9, %v4138_v55  ;;  %v4238_v63 = vpop.f32.mrf.mxu0  ;;  %v1798_v55 = vshll.u32 %v4095_v62, 16  ;;  %v2413_v62 = vsel %vm377_vm0, %v3565_v11, 0  ;;  %v3559_v13 = vld [vmem:[%s4814_s4 + $0x44] sm:$0xf] }
 0x102   : > { %2422 = vmatpush.bf16.msrb.mxu2 %v2413_v62 }
 0x103   : > { %3444 = vmatmul.msk.bf16.gmra.mxu1 %vm361_vm1, %v1375_v31  ;;  %3465 = vmatmul.msk.bf16.gmra.mxu2 %vm361_vm1, %v1487_v49  ;;  %v4256_v17 = vadd.f32 %v4188_v57, %v786_v7  ;;  %v1800_v47 = vrot.slane %v1798_v55, 2  ;;  %v1488_v49 = vrot.slane %v1478_v60, 1  ;;  %v1809_v7 = vor.u32 %v1808_v14, %v1805_v37 }
 0x104   : > { %3492 = vmatmul.msk.bf16.gmra.mxu3 %vm361_vm1, %v1603_v61  ;;  %3498 = vmatmul.msk.bf16.gmra.mxu0 %vm361_vm1, %v1725_v19  ;;  %v2030_v61 = vrot.slane %v4276_v32, 1  ;;  %v2031_v19 = vrot.slane %v4269_v54, 1 }
 0x105   : > { %v1801_v5 = vor.u32 %v1800_v47, %v1797_v46 }
 0x106   : > { %v1030_v57 = vpop.f32.mrf.mxu2  ;;  %v2032_v30 = vsel %vm793_vm3, %v2030_v61, %v2031_v19 }
 0x107   : > { %v1055_v48 = vadd.f32 %v1030_v57, %v4200_v41  ;;  %v1182_v38 = vpop.f32.mrf.mxu3  ;;  %v4281_v41 = vor.u32 %v3696_v35, %v3536_v45  ;;  %v1810_v15 = vsel %vm1672_vm4, %v1801_v5, %v1809_v7  ;;  %v1909_v57 = vld [vmem:[%s3865_s17 + $0x4] sm:$0xc] }
 0x108   : > { %v938_v29 = vpop.f32.mrf.mxu1 }
 0x109   : > { %v1202_v44 = vadd.f32 %v1177_v26, %v1055_v48  ;;  %v959_v59 = vadd.f32 %v938_v29, %v4155_v4  ;;  %v4272_v1 = vpop.f32.mrf.mxu0  ;;  %v3577_v26 = vld [vmem:[%s4814_s4 + $0x50] sm:$0xf]  ;;  %v2292_v4 = vsel %vm377_vm0, %v3559_v13, 0  ;;  %v2144_v21 = vrot.slane %v4281_v41, 1  ;;  %v4322_v13 = vld [vmem:[%s3942_s7 + $0x14] sm:$0xff] }
 0x10a   : > { %v2606_v9 = vsel %vm377_vm0, %v3577_v26, 0  ;;  %2301 = vmatpush.bf16.msrb.mxu1 %v2292_v4 }
 0x10b   : > { %2615 = vmatpush.bf16.msrb.mxu0 %v2606_v9  ;;  %v4292_v31 = vadd.f32 %v4202_v6, %v1202_v44  ;;  %v1489_v6 = vsel %vm793_vm3, %v1486_v42, %v1488_v49  ;;  %v2146_v45 = vsel %vm793_vm3, %v2144_v21, %v2145_v0  ;;  %v1812_v42 = vshrl.u32 %v4135_v53, 16 }
 0x10c   : > { %v1917_v9 = vrot.slane %v4070_v36, 2  ;;  %v2033_v49 = vrot.slane %v4322_v13, 1 }
 0x10d   : > { %v1814_v46 = vrot.slane %v1812_v42, 1  ;;  %v4352_v42 = vld [vmem:[%s3933_s28 + $0x1c] sm:$0xff] }
 0x10e   : > { %v1032_v34 = vpop.f32.mrf.mxu2 }
 0x10f   : > { %v1056_v55 = vadd.f32 %v1032_v34, %v4218_v27  ;;  %v1184_v11 = vpop.f32.mrf.mxu3 }
 0x110   : > { %v941_v12 = vpop.f32.mrf.mxu1 }
 0x111   : > { %v1203_v23 = vadd.f32 %v4227_v52, %v1056_v55  ;;  %v960_v62 = vadd.f32 %v941_v12, %v4165_v33  ;;  %v1334_v39 = vpop.f32.mrf.mxu0  ;;  %v1815_v33 = vshll.u32 %v4135_v53, 16  ;;  %v1913_v52 = vunpack.c.l.b16 %v1909_v57  ;;  %v4325_v53 = vld [vmem:[%s3933_s28 + $0x14] sm:$0xff] }
 0x112   : > { %v2147_v18 = vrot.slane %v4325_v53, 1  ;;  %v2034_v55 = vsel %vm793_vm3, %v2031_v19, %v2033_v49 }
 0x113   : > { %3466 = vmatmul.msk.bf16.gmra.mxu2 %vm361_vm1, %v1489_v6  ;;  %3500 = vmatmul.msk.bf16.vlgmr.msra.gmra.mxu1 %vm361_vm1, %v1810_v15  ;;  %v4311_v27 = vadd.f32 %v4220_v25, %v1203_v23  ;;  %v1817_v47 = vrot.slane %v1815_v33, 2  ;;  %v1914_v25 = vpack.c.b16 %v1463_v20, %v1913_v52 }
 0x114   : > { %3528 = vmatmul.msk.bf16.vlgmr.msra.gmra.mxu3 %vm361_vm1, %v2032_v30  ;;  %3554 = vmatmul.msk.bf16.vlgmr.msra.gmra.mxu0 %vm361_vm1, %v2146_v45  ;;  %v2148_v36 = vsel %vm793_vm3, %v2145_v0, %v2147_v18 }
 0x115   : > { %v1818_v4 = vor.u32 %v1817_v47, %v1814_v46 }
 0x116   : > { %v1035_v35 = vpop.f32.mrf.mxu2 }
 0x117   : > { %v1057_v48 = vadd.f32 %v1035_v35, %v4235_v8  ;;  %v1187_v60 = vpop.f32.mrf.mxu3  ;;  %v1916_v8 = vrot.slane %v1914_v25, 2  ;;  %v1819_v61 = vsel %vm1672_vm4, %v1809_v7, %v1818_v4  ;;  %v1821_v7 = vshrl.u32 %v4163_v28, 16 }
 0x118   : > { %v943_v29 = vpop.f32.mrf.mxu1 }
 0x119   : > { %v1204_v37 = vadd.f32 %v1182_v38, %v1057_v48  ;;  %v961_v14 = vadd.f32 %v943_v29, %v4179_v51  ;;  %v1336_v44 = vpop.f32.mrf.mxu0  ;;  %v1918_v21 = vsel %vm1915_vm5, %v1916_v8, %v1917_v9  ;;  %v1823_v15 = vrot.slane %v1821_v7, 1 }
 0x11a   : > { %v1921_v7 = vrot.slane %v4150_v16, 2 }
 0x11b   : > { %v4328_v26 = vadd.f32 %v4238_v63, %v1204_v37 }
 0x11e   : > { %v1037_v20 = vpop.f32.mrf.mxu2 }
 0x11f   : > { %v1058_v38 = vadd.f32 %v1037_v20, %v959_v59  ;;  %v1189_v51 = vpop.f32.mrf.mxu3 }
 0x120   : > { %v946_v5 = vpop.f32.mrf.mxu1 }
 0x121   : > { %v1205_v34 = vadd.f32 %v1184_v11, %v1058_v38  ;;  %v962_v63 = vadd.f32 %v946_v5, %v4191_v10  ;;  %v1339_v12 = vpop.f32.mrf.mxu0  ;;  %v1824_v10 = vshll.u32 %v4163_v28, 16  ;;  %v1919_v28 = vrot.slane %v4121_v40, 2 }
 0x123   : > { %3501 = vmatmul.msk.bf16.gmra.mxu1 %vm361_vm1, %v1819_v61  ;;  %3506 = vmatmul.msk.bf16.vlgmr.msra.gmra.mxu2 %vm361_vm1, %v1918_v21  ;;  %v4341_v59 = vadd.f32 %v4272_v1, %v1205_v34  ;;  %v1826_v23 = vrot.slane %v1824_v10, 2  ;;  %v4349_v1 = vld [vmem:[%s3942_s7 + $0x1c] sm:$0xff]  ;;  %v1920_v47 = vsel %vm1915_vm5, %v1917_v9, %v1919_v28  ;;  %v4376_v21 = vld [vmem:[%s3942_s7 + $0x24] sm:$0xff]  ;;  %v1788_v34 = vld [vmem:[%s3847_s12 + $0x2c] sm:$0x3] }
 0x124   : > { %3529 = vmatmul.msk.bf16.gmra.mxu3 %vm361_vm1, %v2034_v55  ;;  %3555 = vmatmul.msk.bf16.gmra.mxu0 %vm361_vm1, %v2148_v36  ;;  %v2035_v35 = vrot.slane %v4349_v1, 1  ;;  %v4380_v55 = vld [vmem:[%s3933_s28 + $0x24] sm:$0xff]  ;;  %v2037_v10 = vrot.slane %v4376_v21, 1 }
 0x125   : > { %v1827_v52 = vor.u32 %v1826_v23, %v1823_v15  ;;  %v1922_v23 = vsel %vm1915_vm5, %v1919_v28, %v1921_v7 }
 0x126   : > { %v1040_v19 = vpop.f32.mrf.mxu2  ;;  %v2038_v16 = vsel %vm793_vm3, %v2035_v35, %v2037_v10 }
 0x127   : > { %v1059_v11 = vadd.f32 %v1040_v19, %v960_v62  ;;  %v1192_v0 = vpop.f32.mrf.mxu3  ;;  %v2149_v62 = vrot.slane %v4352_v42, 1  ;;  %v2151_v19 = vrot.slane %v4380_v55, 1 }
 0x128   : > { %v948_v6 = vpop.f32.mrf.mxu1 }
 0x129   : > { %v1206_v30 = vadd.f32 %v1187_v60, %v1059_v11  ;;  %v963_v57 = vadd.f32 %v948_v6, %v4210_v24  ;;  %v1341_v45 = vpop.f32.mrf.mxu0  ;;  %v1828_v24 = vsel %vm1672_vm4, %v1818_v4, %v1827_v52  ;;  %v2150_v40 = vsel %vm793_vm3, %v2147_v18, %v2149_v62 }
 0x12a   : > { %v1830_v4 = vshrl.u32 %v4186_v56, 16 }
 0x12b   : > { %v4354_v33 = vadd.f32 %v1334_v39, %v1206_v30  ;;  %v2036_v39 = vsel %vm793_vm3, %v2033_v49, %v2035_v35 }
 0x12c   : > { %v1832_v38 = vrot.slane %v1830_v4, 1 }
 0x12e   : > { %v1042_v48 = vpop.f32.mrf.mxu2 }
 0x12f   : > { %v1060_v29 = vadd.f32 %v1042_v48, %v961_v14  ;;  %v1194_v46 = vpop.f32.mrf.mxu3 }
 0x130   : > { %v951_v60 = vpop.f32.mrf.mxu1 }
 0x131   : > { %v1207_v25 = vadd.f32 %v1189_v51, %v1060_v29  ;;  %v964_v37 = vadd.f32 %v951_v60, %v4222_v58  ;;  %v1344_v8 = vpop.f32.mrf.mxu0  ;;  %v1833_v58 = vshll.u32 %v4186_v56, 16  ;;  %v2152_v60 = vsel %vm793_vm3, %v2149_v62, %v2151_v19 }
 0x133   : > { %3502 = vmatmul.msk.bf16.gmra.mxu1 %vm361_vm1, %v1828_v24  ;;  %3507 = vmatmul.msk.bf16.gmra.mxu2 %vm361_vm1, %v1920_v47  ;;  %v4366_v14 = vadd.f32 %v1336_v44, %v1207_v25  ;;  %v1835_v51 = vrot.slane %v1833_v58, 2  ;;  %v1999_v24 = vld [vmem:[%s3942_s7 + $0x2c] sm:$0x1] }
 0x134   : > { %3530 = vmatmul.msk.bf16.gmra.mxu3 %vm361_vm1, %v2036_v39  ;;  %3556 = vmatmul.msk.bf16.gmra.mxu0 %vm361_vm1, %v2150_v40  ;;  %v2113_v47 = vld [vmem:[%s3933_s28 + $0x2c] sm:$0x1] }
 0x135   : > { %v1836_v56 = vor.u32 %v1835_v51, %v1832_v38  ;;  %v2137_v35 = vunpack.c.l.b16 %v2113_v47 }
 0x136   : > { %v1045_v9 = vpop.f32.mrf.mxu2 }
 0x137   : > { %v1061_v49 = vadd.f32 %v1045_v9, %v962_v63  ;;  %v1197_v18 = vpop.f32.mrf.mxu3  ;;  %v1792_v63 = vunpack.c.l.b16 %v1788_v34  ;;  %v1837_v15 = vsel %vm1672_vm4, %v1827_v52, %v1836_v56 }
 0x138   : > { %v953_v20 = vpop.f32.mrf.mxu1 }
 0x139   : > { %v1208_v5 = vadd.f32 %v1192_v0, %v1061_v49  ;;  %v965_v61 = vadd.f32 %v953_v20, %v4256_v17  ;;  %v4373_v44 = vpop.f32.mrf.mxu0  ;;  %v2143_v20 = vpack.c.b16 %v2137_v35, %v2137_v35 }
 0x13b   : > { %v4382_v36 = vadd.f32 %v1339_v12, %v1208_v5  ;;  %v1793_v12 = vpack.c.b16 %v1792_v63, %v1792_v63  ;;  %v1923_v5 = vrot.slane %v4175_v50, 2  ;;  %v2153_v34 = vrot.slane %v2143_v20, 1 }
 0x13c   : > { %v2241_v50 = vshrl.u32 %v4322_v13, 16 }
 0x13d   : > { %v1839_v52 = vshrl.u32 %v1793_v12, 16  ;;  %v1842_v28 = vshll.u32 %v1793_v12, 16 }
 0x13e   : > { %v1047_v17 = vpop.f32.mrf.mxu2 }
 0x13f   : > { %v1062_v11 = vadd.f32 %v1047_v17, %v963_v57  ;;  %v1199_v0 = vpop.f32.mrf.mxu3  ;;  %v1841_v40 = vrot.slane %v1839_v52, 1  ;;  %v1844_v4 = vrot.slane %v1842_v28, 2 }
 0x140   : > { %v1403_v6 = vpop.f32.mrf.mxu1 }
 0x141   : > { %v1209_v30 = vadd.f32 %v1194_v46, %v1062_v11  ;;  %v4390_v48 = vadd.f32 %v1403_v6, %v4292_v31  ;;  %v4393_v29 = vpop.f32.mrf.mxu0  ;;  %v2023_v31 = vunpack.c.l.b16 %v1999_v24  ;;  %v1845_v51 = vor.u32 %v1844_v4, %v1841_v40 }
 0x142   : > { %v2235_v24 = vshll.u32 %v4269_v54, 16 }
 0x143   : > { %3503 = vmatmul.msk.bf16.gmra.mxu1 %vm361_vm1, %v1837_v15  ;;  %3508 = vmatmul.msk.bf16.gmra.mxu2 %vm361_vm1, %v1922_v23  ;;  %v4400_v57 = vadd.f32 %v1341_v45, %v1209_v30  ;;  %v2029_v49 = vpack.c.b16 %v2023_v31, %v2023_v31  ;;  %v1846_v11 = vsel %vm1672_vm4, %v1836_v56, %v1845_v51  ;;  %v2224_v56 = vshrl.u32 %v4276_v32, 16 }
 0x144   : > { %3531 = vmatmul.msk.bf16.gmra.mxu3 %vm361_vm1, %v2038_v16  ;;  %3557 = vmatmul.msk.bf16.gmra.mxu0 %vm361_vm1, %v2152_v60  ;;  %v2154_v30 = vsel %vm793_vm3, %v2151_v19, %v2153_v34  ;;  %v2538_v16 = vld [vmem:[%s3865_s17 + $0x8] sm:$0xc]  ;;  %v4428_v60 = vld [vmem:[%s3865_s17 + $0xc] sm:$0xf]  ;;  %v4457_v34 = vld [vmem:[%s3865_s17 + $0x10] sm:$0xff] }
 0x145   : > { %v2562_v28 = vunpack.c.l.b16 %v2538_v16  ;;  %v2563_v31 = vunpack.c.l.b16 %v4428_v60 }
 0x146   : > { %v1050_v46 = vpop.f32.mrf.mxu2 }
 0x147   : > { %v1063_v25 = vadd.f32 %v1050_v46, %v964_v37  ;;  %v1631_v39 = vpop.f32.mrf.mxu3  ;;  %v2039_v37 = vrot.slane %v2029_v49, 1 }
 0x148   : > { %v1405_v62 = vpop.f32.mrf.mxu1 }
 0x149   : > { %v1210_v58 = vadd.f32 %v1197_v18, %v1063_v25  ;;  %v4405_v9 = vadd.f32 %v1405_v62, %v4311_v27  ;;  %v4407_v45 = vpop.f32.mrf.mxu0  ;;  %v2040_v23 = vsel %vm793_vm3, %v2037_v10, %v2039_v37  ;;  %v3631_v10 = vld [vmem:[%s4814_s4 + $0x5c] sm:$0xf]  ;;  %v2226_v62 = vrot.slane %v2224_v56, 1 }
 0x14a   : > { %v2963_v47 = vsel %vm377_vm0, %v3631_v10, 0 }
 0x14b   : > { %v4409_v38 = vadd.f32 %v1344_v8, %v1210_v58  ;;  %v1924_v8 = vsel %vm1915_vm5, %v1921_v7, %v1923_v5  ;;  %v2227_v7 = vshll.u32 %v4276_v32, 16  ;;  %2972 = vmatpush.bf16.msra.mxu3 %v2963_v47  ;;  %v2237_v58 = vrot.slane %v2235_v24, 2 }
 0x14c   : > { %v2356_v47 = vshll.u32 %v4279_v3, 16 }
 0x14d   : > { %v2229_v40 = vrot.slane %v2227_v7, 2 }
 0x14e   : > { %v1052_v63 = vpop.f32.mrf.mxu2 }
 0x14f   : > { %v1064_v17 = vadd.f32 %v1052_v63, %v965_v61  ;;  %v4412_v18 = vpop.f32.mrf.mxu3  ;;  %v2459_v61 = vld [vmem:[%s3942_s7 + $0x4] sm:$0xc]  ;;  %v4461_v63 = vpack.c.b16 %v2563_v31, %v2562_v28 }
 0x150   : > { %v1408_v27 = vpop.f32.mrf.mxu1  ;;  %v2463_v52 = vunpack.c.l.b16 %v2459_v61 }
 0x151   : > { %v1211_v6 = vadd.f32 %v1199_v0, %v1064_v17  ;;  %v4419_v15 = vadd.f32 %v1408_v27, %v4328_v26  ;;  %v4422_v12 = vpop.f32.mrf.mxu0  ;;  %v3625_v26 = vld [vmem:[%s4814_s4 + $0x58] sm:$0xf]  ;;  %v2232_v0 = vshrl.u32 %v4269_v54, 16  ;;  %v2230_v27 = vor.u32 %v2229_v40, %v2226_v62 }
 0x152   : > { %v2842_v32 = vsel %vm377_vm0, %v3625_v26, 0  ;;  %v2464_v37 = vpack.c.b16 %v2014_v2, %v2463_v52  ;;  %v1925_v2 = vrot.slane %v4206_v43, 2 }
 0x153   : > { %3504 = vmatmul.msk.bf16.gmra.mxu1 %vm361_vm1, %v1846_v11  ;;  %3509 = vmatmul.msk.bf16.gmra.mxu2 %vm361_vm1, %v1924_v8  ;;  %v4441_v19 = vadd.f32 %v4373_v44, %v1211_v6  ;;  %v2234_v4 = vrot.slane %v2232_v0, 1  ;;  %v2466_v6 = vrot.slane %v4269_v54, 2 }
 0x154   : > { %3532 = vmatmul.msk.bf16.gmra.mxu3 %vm361_vm1, %v2040_v23  ;;  %3558 = vmatmul.msk.bf16.gmra.mxu0 %vm361_vm1, %v2154_v30  ;;  %v2465_v8 = vrot.slane %v2464_v37, 2  ;;  %v2579_v23 = vrot.slane %v4461_v63, 2  ;;  %v2580_v30 = vrot.slane %v4457_v34, 2 }
 0x155   : > { %2851 = vmatpush.bf16.msra.mxu2 %v2842_v32  ;;  %v2238_v11 = vor.u32 %v2237_v58, %v2234_v4  ;;  %v2353_v32 = vshrl.u32 %v4279_v3, 16  ;;  %v2358_v58 = vrot.slane %v2356_v47, 2  ;;  %v4530_v47 = vld [vmem:[%s3865_s17 + $0x20] sm:$0xff] }
 0x156   : > { %v1517_v44 = vpop.f32.mrf.mxu2  ;;  %v2467_v54 = vsel %vm1915_vm5, %v2465_v8, %v2466_v6  ;;  %v2581_v24 = vsel %vm1915_vm5, %v2579_v23, %v2580_v30 }
 0x157   : > { %v1542_v35 = vadd.f32 %v1517_v44, %v4390_v48  ;;  %v1636_v46 = vpop.f32.mrf.mxu3  ;;  %v3599_v48 = vld [vmem:[%s4814_s4 + $0x54] sm:$0xf]  ;;  %v2239_v43 = vsel %vm1672_vm4, %v2230_v27, %v2238_v11  ;;  %v2355_v4 = vrot.slane %v2353_v32, 1 }
 0x158   : > { %v1410_v25 = vpop.f32.mrf.mxu1 }
 0x159   : > { %v1656_v49 = vadd.f32 %v1631_v39, %v1542_v35  ;;  %v1431_v20 = vadd.f32 %v1410_v25, %v4341_v59  ;;  %v4452_v51 = vpop.f32.mrf.mxu0  ;;  %v3637_v39 = vld [vmem:[%s4814_s4 + $0x60] sm:$0xf]  ;;  %v2720_v59 = vsel %vm377_vm0, %v3599_v48, 0  ;;  %v2243_v35 = vrot.slane %v2241_v50, 1  ;;  %v4505_v48 = vld [vmem:[%s3865_s17 + $0x18] sm:$0xff] }
 0x15a   : > { %v3043_v17 = vsel %vm377_vm0, %v3637_v39, 0  ;;  %2729 = vmatpush.bf16.msra.mxu1 %v2720_v59 }
 0x15b   : > { %3052 = vmatpush.bf16.msra.mxu0 %v3043_v17  ;;  %v4472_v22 = vadd.f32 %v4393_v29, %v1656_v49  ;;  %v1926_v29 = vsel %vm1915_vm5, %v1923_v5, %v1925_v2  ;;  %v2468_v17 = vrot.slane %v4322_v13, 2  ;;  %v2582_v2 = vrot.slane %v4505_v48, 2 }
 0x15e   : > { %v1519_v61 = vpop.f32.mrf.mxu2 }
 0x15f   : > { %v1543_v16 = vadd.f32 %v1519_v61, %v4405_v9  ;;  %v1638_v56 = vpop.f32.mrf.mxu3  ;;  %v2244_v9 = vshll.u32 %v4322_v13, 16 }
 0x160   : > { %v1413_v7 = vpop.f32.mrf.mxu1 }
 0x161   : > { %v1657_v26 = vadd.f32 %v4412_v18, %v1543_v16  ;;  %v1432_v10 = vadd.f32 %v1413_v7, %v4354_v33  ;;  %v4486_v0 = vpop.f32.mrf.mxu0  ;;  %v2345_v33 = vshrl.u32 %v4281_v41, 16  ;;  %v2348_v18 = vshll.u32 %v4281_v41, 16 }
 0x163   : > { %3510 = vmatmul.msk.bf16.gmra.mxu2 %vm361_vm1, %v1926_v29  ;;  %3560 = vmatmul.msk.bf16.vlgmr.msrb.gmra.mxu1 %vm361_vm1, %v2239_v43  ;;  %v4494_v5 = vadd.f32 %v4407_v45, %v1657_v26  ;;  %v2246_v45 = vrot.slane %v2244_v9, 2  ;;  %v2347_v62 = vrot.slane %v2345_v33, 1  ;;  %v2350_v40 = vrot.slane %v2348_v18, 2 }
 0x164   : > { %3572 = vmatmul.msk.bf16.vlgmr.msrb.gmra.mxu3 %vm361_vm1, %v2467_v54  ;;  %3594 = vmatmul.msk.bf16.vlgmr.msrb.gmra.mxu0 %vm361_vm1, %v2581_v24  ;;  %v2583_v43 = vsel %vm1915_vm5, %v2580_v30, %v2582_v2 }
 0x165   : > { %v2247_v39 = vor.u32 %v2246_v45, %v2243_v35  ;;  %v2351_v59 = vor.u32 %v2350_v40, %v2347_v62  ;;  %v2470_v35 = vrot.slane %v4349_v1, 2 }
 0x166   : > { %v1522_v52 = vpop.f32.mrf.mxu2 }
 0x167   : > { %v1544_v28 = vadd.f32 %v1522_v52, %v4419_v15  ;;  %v1641_v44 = vpop.f32.mrf.mxu3  ;;  %v2359_v15 = vor.u32 %v2358_v58, %v2355_v4 }
 0x168   : > { %v1415_v25 = vpop.f32.mrf.mxu1 }
 0x169   : > { %v1658_v49 = vadd.f32 %v1636_v46, %v1544_v28  ;;  %v1433_v41 = vadd.f32 %v1415_v25, %v4366_v14  ;;  %v1765_v37 = vpop.f32.mrf.mxu0  ;;  %v2248_v46 = vsel %vm1672_vm4, %v2238_v11, %v2247_v39  ;;  %v2360_v14 = vsel %vm1672_vm4, %v2351_v59, %v2359_v15 }
 0x16a   : > { %v2253_v11 = vshll.u32 %v4349_v1, 16 }
 0x16b   : > { %v4508_v3 = vadd.f32 %v4422_v12, %v1658_v49  ;;  %v2469_v12 = vsel %vm1915_vm5, %v2466_v6, %v2468_v17  ;;  %v2365_v6 = vshll.u32 %v4325_v53, 16 }
 0x16d   : > { %v2367_v9 = vrot.slane %v2365_v6, 2  ;;  %v2472_v6 = vrot.slane %v4376_v21, 2 }
 0x16e   : > { %v1524_v27 = vpop.f32.mrf.mxu2 }
 0x16f   : > { %v1545_v8 = vadd.f32 %v1524_v27, %v1431_v20  ;;  %v1643_v23 = vpop.f32.mrf.mxu3  ;;  %v2250_v20 = vshrl.u32 %v4349_v1, 16 }
 0x170   : > { %v1418_v61 = vpop.f32.mrf.mxu1 }
 0x171   : > { %v1659_v16 = vadd.f32 %v1638_v56, %v1545_v8  ;;  %v1434_v7 = vadd.f32 %v1418_v61, %v4382_v36  ;;  %v1768_v29 = vpop.f32.mrf.mxu0  ;;  %v2362_v36 = vshrl.u32 %v4325_v53, 16  ;;  %v2252_v24 = vrot.slane %v2250_v20, 1  ;;  %v4559_v20 = vld [vmem:[%s3865_s17 + $0x28] sm:$0xff] }
 0x173   : > { %3561 = vmatmul.msk.bf16.gmra.mxu1 %vm361_vm1, %v2248_v46  ;;  %3566 = vmatmul.msk.bf16.vlgmr.msrb.gmra.mxu2 %vm361_vm1, %v2360_v14  ;;  %v4520_v13 = vadd.f32 %v4452_v51, %v1659_v16  ;;  %v2255_v51 = vrot.slane %v2253_v11, 2  ;;  %v2364_v50 = vrot.slane %v2362_v36, 1 }
 0x174   : > { %3573 = vmatmul.msk.bf16.gmra.mxu3 %vm361_vm1, %v2469_v12  ;;  %3595 = vmatmul.msk.bf16.gmra.mxu0 %vm361_vm1, %v2583_v43  ;;  %v2217_v43 = vld [vmem:[%s3942_s7 + $0x2c] sm:$0x3] }
 0x175   : > { %v2256_v53 = vor.u32 %v2255_v51, %v2252_v24  ;;  %v2368_v28 = vor.u32 %v2367_v9, %v2364_v50 }
 0x176   : > { %v1527_v30 = vpop.f32.mrf.mxu2 }
 0x177   : > { %v1546_v56 = vadd.f32 %v1527_v30, %v1432_v10  ;;  %v1646_v26 = vpop.f32.mrf.mxu3  ;;  %v2584_v10 = vrot.slane %v4530_v47, 2  ;;  %v2586_v30 = vrot.slane %v4559_v20, 2 }
 0x178   : > { %v1420_v54 = vpop.f32.mrf.mxu1 }
 0x179   : > { %v1660_v33 = vadd.f32 %v1641_v44, %v1546_v56  ;;  %v1435_v18 = vadd.f32 %v1420_v54, %v4400_v57  ;;  %v1770_v32 = vpop.f32.mrf.mxu0  ;;  %v2257_v44 = vsel %vm1672_vm4, %v2247_v39, %v2256_v53  ;;  %v2369_v57 = vsel %vm1672_vm4, %v2359_v15, %v2368_v28 }
 0x17a   : > { %v2585_v59 = vsel %vm1915_vm5, %v2582_v2, %v2584_v10  ;;  %v2262_v39 = vshll.u32 %v4376_v21, 16  ;;  %v2374_v15 = vshll.u32 %v4352_v42, 16 }
 0x17b   : > { %v4533_v52 = vadd.f32 %v4486_v0, %v1660_v33  ;;  %v2471_v0 = vsel %vm1915_vm5, %v2468_v17, %v2470_v35  ;;  %v2473_v33 = vsel %vm1915_vm5, %v2470_v35, %v2472_v6  ;;  %v2383_v35 = vshll.u32 %v4380_v55, 16 }
 0x17c   : > { %v2376_v46 = vrot.slane %v2374_v15, 2 }
 0x17e   : > { %v1529_v45 = vpop.f32.mrf.mxu2 }
 0x17f   : > { %v1547_v25 = vadd.f32 %v1529_v45, %v1433_v41  ;;  %v1648_v62 = vpop.f32.mrf.mxu3  ;;  %v2259_v41 = vshrl.u32 %v4376_v21, 16  ;;  %v2587_v21 = vsel %vm1915_vm5, %v2584_v10, %v2586_v30 }
 0x180   : > { %v1423_v40 = vpop.f32.mrf.mxu1 }
 0x181   : > { %v1661_v4 = vadd.f32 %v1643_v23, %v1547_v25  ;;  %v1436_v58 = vadd.f32 %v1423_v40, %v4409_v38  ;;  %v4541_v49 = vpop.f32.mrf.mxu0  ;;  %v2371_v38 = vshrl.u32 %v4352_v42, 16  ;;  %v2264_v23 = vrot.slane %v2262_v39, 2  ;;  %v2548_v25 = vld [vmem:[%s3865_s17 + $0x30] sm:$0x3] }
 0x183   : > { %3562 = vmatmul.msk.bf16.gmra.mxu1 %vm361_vm1, %v2257_v44  ;;  %3567 = vmatmul.msk.bf16.gmra.mxu2 %vm361_vm1, %v2369_v57  ;;  %v4546_v1 = vadd.f32 %v1765_v37, %v1661_v4  ;;  %v2261_v37 = vrot.slane %v2259_v41, 1  ;;  %v2373_v61 = vrot.slane %v2371_v38, 1  ;;  %v2338_v41 = vld [vmem:[%s3933_s28 + $0x2c] sm:$0x3]  ;;  %s3757_s28 = smul.u32 40, %s4818_s22 }
 0x184   : > { %3574 = vmatmul.msk.bf16.gmra.mxu3 %vm361_vm1, %v2471_v0  ;;  %3596 = vmatmul.msk.bf16.gmra.mxu0 %vm361_vm1, %v2585_v59  ;;  %v2385_v59 = vrot.slane %v2383_v35, 2 }
 0x185   : > { %v2265_v42 = vor.u32 %v2264_v23, %v2261_v37  ;;  %v2377_v36 = vor.u32 %v2376_v46, %v2373_v61  ;;  %s4785_s27 = scalar_lea.vmem %s4816_s6, %s3757_s28 }
 0x186   : > { %v1532_v17 = vpop.f32.mrf.mxu2 }
 0x187   : > { %v1548_v2 = vadd.f32 %v1532_v17, %v1434_v7  ;;  %v1651_v27 = vpop.f32.mrf.mxu3  ;;  %v2221_v7 = vunpack.c.l.b16 %v2217_v43  ;;  %v2378_v51 = vsel %vm1672_vm4, %v2368_v28, %v2377_v36  ;;  %v2342_v17 = vunpack.c.l.b16 %v2338_v41  ;;  %v3602_v43 = vld [vmem:[%s3847_s12 + $0x8] sm:$0xc] }
 0x188   : > { %v1425_v8 = vpop.f32.mrf.mxu1 }
 0x189   : > { %v1662_v14 = vadd.f32 %v1646_v26, %v1548_v2  ;;  %v1437_v16 = vadd.f32 %v1425_v8, %v4441_v19  ;;  %v4555_v12 = vpop.f32.mrf.mxu0  ;;  %v2266_v19 = vsel %vm1672_vm4, %v2256_v53, %v2265_v42  ;;  %v2222_v50 = vpack.c.b16 %v2221_v7, %v2221_v7 }
 0x18b   : > { %v4561_v11 = vadd.f32 %v1768_v29, %v1662_v14  ;;  %v2268_v53 = vshrl.u32 %v2222_v50, 16  ;;  %v2271_v28 = vshll.u32 %v2222_v50, 16  ;;  %v2474_v37 = vrot.slane %v2222_v50, 2 }
 0x18d   : > { %v2270_v4 = vrot.slane %v2268_v53, 1  ;;  %v2273_v0 = vrot.slane %v2271_v28, 2 }
 0x18e   : > { %v1534_v56 = vpop.f32.mrf.mxu2 }
 0x18f   : > { %v1549_v54 = vadd.f32 %v1534_v56, %v1435_v18  ;;  %v1653_v26 = vpop.f32.mrf.mxu3 }
 0x190   : > { %v1874_v24 = vpop.f32.mrf.mxu1 }
 0x191   : > { %v1663_v9 = vadd.f32 %v1648_v62, %v1549_v54  ;;  %v4568_v29 = vadd.f32 %v1874_v24, %v4472_v22  ;;  %v4571_v45 = vpop.f32.mrf.mxu0  ;;  %v2380_v22 = vshrl.u32 %v4380_v55, 16  ;;  %v2572_v62 = vunpack.c.l.b16 %v2548_v25 }
 0x193   : > { %3563 = vmatmul.msk.bf16.gmra.mxu1 %vm361_vm1, %v2266_v19  ;;  %3568 = vmatmul.msk.bf16.gmra.mxu2 %vm361_vm1, %v2378_v51  ;;  %v4577_v18 = vadd.f32 %v1770_v32, %v1663_v9  ;;  %v2382_v32 = vrot.slane %v2380_v22, 1  ;;  %v2578_v55 = vpack.c.b16 %v2572_v62, %v2572_v62  ;;  %v2475_v19 = vsel %vm1915_vm5, %v2472_v6, %v2474_v37 }
 0x194   : > { %3575 = vmatmul.msk.bf16.gmra.mxu3 %vm361_vm1, %v2473_v33  ;;  %3597 = vmatmul.msk.bf16.gmra.mxu0 %vm361_vm1, %v2587_v21  ;;  %v3009_v33 = vld [vmem:[%s3865_s17 + $0x8] sm:$0x8] }
 0x195   : > { %v2386_v8 = vor.u32 %v2385_v59, %v2382_v32  ;;  %v2588_v23 = vrot.slane %v2578_v55, 2  ;;  %v3013_v25 = vunpack.c.l.b16 %v3009_v33 }
 0x196   : > { %v1537_v10 = vpop.f32.mrf.mxu2 }
 0x197   : > { %v1550_v40 = vadd.f32 %v1537_v10, %v1436_v58  ;;  %v2068_v44 = vpop.f32.mrf.mxu3  ;;  %v2274_v58 = vor.u32 %v2273_v0, %v2270_v4  ;;  %v2387_v54 = vsel %vm1672_vm4, %v2377_v36, %v2386_v8  ;;  %v2589_v50 = vsel %vm1915_vm5, %v2586_v30, %v2588_v23 }
 0x198   : > { %v1876_v57 = vpop.f32.mrf.mxu1  ;;  %v3014_v41 = vpack.c.b16 %v2563_v31, %v3013_v25 }
 0x199   : > { %v1664_v39 = vadd.f32 %v1651_v27, %v1550_v40  ;;  %v4585_v38 = vadd.f32 %v1876_v57, %v4494_v5  ;;  %v4587_v15 = vpop.f32.mrf.mxu0  ;;  %v2343_v27 = vpack.c.b16 %v2342_v17, %v2342_v17  ;;  %v3705_v5 = vld [vmem:[%s3847_s12 + $0x8] sm:$0xf0]  ;;  %v2275_v56 = vsel %vm1672_vm4, %v2265_v42, %v2274_v58 }
 0x19a   : > { %v3603_v9 = vor.u32 %v3705_v5, %v3602_v43  ;;  %v3016_v23 = vrot.slane %v3014_v41, 3 }
 0x19b   : > { %v4590_v2 = vadd.f32 %v4541_v49, %v1664_v39  ;;  %v2389_v42 = vshrl.u32 %v2343_v27, 16 }
 0x19c   : > { %v2895_v6 = vshrl.u32 %v3603_v9, 16  ;;  %v2693_v55 = vrot.slane %v3603_v9, 2 }
 0x19d   : > { %v2391_v35 = vrot.slane %v2389_v42, 1 }
 0x19e   : > { %v1539_v61 = vpop.f32.mrf.mxu2  ;;  %v2897_v10 = vrot.slane %v2895_v6, 2 }
 0x19f   : > { %v1551_v46 = vadd.f32 %v1539_v61, %v1437_v16  ;;  %v2070_v14 = vpop.f32.mrf.mxu3  ;;  %v4604_v16 = vld [vmem:[%s3847_s12 + $0x10] sm:$0xff] }
 0x1a0   : > { %v1879_v7 = vpop.f32.mrf.mxu1  ;;  %v2903_v30 = vshrl.u32 %v4604_v16, 16  ;;  %v2906_v21 = vshll.u32 %v4604_v16, 16  ;;  %v2694_v17 = vrot.slane %v4604_v16, 2 }
 0x1a1   : > { %v1665_v24 = vadd.f32 %v1653_v26, %v1551_v46  ;;  %v4597_v49 = vadd.f32 %v1879_v7, %v4508_v3  ;;  %v4600_v51 = vpop.f32.mrf.mxu0  ;;  %v2392_v3 = vshll.u32 %v2343_v27, 16  ;;  %v2898_v26 = vshll.u32 %v3603_v9, 16 }
 0x1a2   : > { %v2905_v57 = vrot.slane %v2903_v30, 2  ;;  %v2908_v59 = vrot.slane %v2906_v21, 3  ;;  %v2695_v46 = vsel %vm1915_vm5, %v2693_v55, %v2694_v17 }
 0x1a3   : > { %3564 = vmatmul.msk.bf16.gmra.mxu1 %vm361_vm1, %v2275_v56  ;;  %3569 = vmatmul.msk.bf16.gmra.mxu2 %vm361_vm1, %v2387_v54  ;;  %v4610_v36 = vadd.f32 %v4555_v12, %v1665_v24  ;;  %v2394_v12 = vrot.slane %v2392_v3, 2  ;;  %v2900_v40 = vrot.slane %v2898_v26, 3  ;;  %v2785_v24 = vshll.u32 %v4457_v34, 16 }
 0x1a4   : > { %3576 = vmatmul.msk.bf16.gmra.mxu3 %vm361_vm1, %v2475_v19  ;;  %3598 = vmatmul.msk.bf16.gmra.mxu0 %vm361_vm1, %v2589_v50  ;;  %v2909_v37 = vor.u32 %v2908_v59, %v2905_v57 }
 0x1a5   : > { %v2901_v58 = vor.u32 %v2900_v40, %v2897_v10  ;;  %v2787_v26 = vrot.slane %v2785_v24, 3 }
 0x1a6   : > { %v1954_v53 = vpop.f32.mrf.mxu2 }
 0x1a7   : > { %v1979_v28 = vadd.f32 %v1954_v53, %v4568_v29  ;;  %v2073_v22 = vpop.f32.mrf.mxu3  ;;  %v2395_v29 = vor.u32 %v2394_v12, %v2391_v35  ;;  %v2910_v5 = vsel %vm2772_vm6, %v2901_v58, %v2909_v37  ;;  %v3019_v12 = vrot.slane %v4505_v48, 3  ;;  %v4666_v58 = vld [vmem:[%s3847_s12 + $0x20] sm:$0xff] }
 0x1a8   : > { %v1881_v62 = vpop.f32.mrf.mxu1 }
 0x1a9   : > { %v2093_v4 = vadd.f32 %v2068_v44, %v1979_v28  ;;  %v1902_v0 = vadd.f32 %v1881_v62, %v4520_v13  ;;  %v4618_v32 = vpop.f32.mrf.mxu0  ;;  %v3017_v44 = vrot.slane %v4457_v34, 3 }
 0x1ab   : > { %v4623_v39 = vadd.f32 %v4571_v45, %v2093_v4  ;;  %v2396_v45 = vsel %vm1672_vm4, %v2386_v8, %v2395_v29  ;;  %v3018_v56 = vsel %vm3015_vm7, %v3016_v23, %v3017_v44  ;;  %v2774_v8 = vshrl.u32 %v4461_v63, 16 }
 0x1ac   : > { %v3020_v55 = vsel %vm3015_vm7, %v3017_v44, %v3019_v12  ;;  %v2924_v23 = vshll.u32 %v4666_v58, 16 }
 0x1ad   : > { %v2776_v42 = vrot.slane %v2774_v8, 2 }
 0x1ae   : > { %v1956_v13 = vpop.f32.mrf.mxu2 }
 0x1af   : > { %v1980_v61 = vadd.f32 %v1956_v13, %v4585_v38  ;;  %v2075_v60 = vpop.f32.mrf.mxu3  ;;  %v4638_v38 = vld [vmem:[%s3847_s12 + $0x18] sm:$0xff] }
 0x1b0   : > { %v1884_v31 = vpop.f32.mrf.mxu1  ;;  %v2912_v19 = vshrl.u32 %v4638_v38, 16  ;;  %v2915_v50 = vshll.u32 %v4638_v38, 16  ;;  %v2696_v28 = vrot.slane %v4638_v38, 2  ;;  %v2698_v38 = vrot.slane %v4666_v58, 2 }
 0x1b1   : > { %v2094_v27 = vadd.f32 %v2070_v14, %v1980_v61  ;;  %v1903_v43 = vadd.f32 %v1884_v31, %v4533_v52  ;;  %v4632_v7 = vpop.f32.mrf.mxu0  ;;  %v2777_v52 = vshll.u32 %v4461_v63, 16  ;;  %v2782_v14 = vshrl.u32 %v4457_v34, 16 }
 0x1b2   : > { %v2914_v34 = vrot.slane %v2912_v19, 2  ;;  %v2917_v25 = vrot.slane %v2915_v50, 3 }
 0x1b3   : > { %3570 = vmatmul.msk.bf16.gmra.mxu2 %vm361_vm1, %v2396_v45  ;;  %3620 = vmatmul.msk.bf16.vlgmr.msra.gmra.mxu1 %vm361_vm1, %v2695_v46  ;;  %v4641_v54 = vadd.f32 %v4587_v15, %v2094_v27  ;;  %v2779_v3 = vrot.slane %v2777_v52, 3  ;;  %v2784_v6 = vrot.slane %v2782_v14, 2 }
 0x1b4   : > { %3632 = vmatmul.msk.bf16.vlgmr.msra.gmra.mxu3 %vm361_vm1, %v2910_v5  ;;  %3638 = vmatmul.msk.bf16.vlgmr.msra.gmra.mxu0 %vm361_vm1, %v3018_v56  ;;  %v2926_v56 = vrot.slane %v2924_v23, 3 }
 0x1b5   : > { %v2780_v35 = vor.u32 %v2779_v3, %v2776_v42  ;;  %v2788_v62 = vor.u32 %v2787_v26, %v2784_v6  ;;  %v4691_v3 = vld [vmem:[%s3847_s12 + $0x28] sm:$0xff]  ;;  %v2800_v26 = vshrl.u32 %v4530_v47, 16 }
 0x1b6   : > { %v1959_v16 = vpop.f32.mrf.mxu2 }
 0x1b7   : > { %v1981_v15 = vadd.f32 %v1959_v16, %v4597_v49  ;;  %v2078_v9 = vpop.f32.mrf.mxu3  ;;  %v2918_v49 = vor.u32 %v2917_v25, %v2914_v34  ;;  %v2789_v4 = vsel %vm2772_vm6, %v2780_v35, %v2788_v62  ;;  %v2699_v16 = vsel %vm1915_vm5, %v2696_v28, %v2698_v38 }
 0x1b8   : > { %v1886_v33 = vpop.f32.mrf.mxu1 }
 0x1b9   : > { %v2095_v63 = vadd.f32 %v2073_v22, %v1981_v15  ;;  %v1904_v30 = vadd.f32 %v1886_v33, %v4546_v1  ;;  %v2194_v21 = vpop.f32.mrf.mxu0  ;;  %v2697_v1 = vsel %vm1915_vm5, %v2694_v17, %v2696_v28  ;;  %v2919_v41 = vsel %vm2772_vm6, %v2909_v37, %v2918_v49 }
 0x1ba   : > { %v2791_v17 = vshrl.u32 %v4505_v48, 16  ;;  %v2921_v37 = vshrl.u32 %v4666_v58, 16 }
 0x1bb   : > { %v4654_v53 = vadd.f32 %v4600_v51, %v2095_v63  ;;  %v2930_v63 = vshrl.u32 %v4691_v3, 16 }
 0x1bc   : > { %v2793_v31 = vrot.slane %v2791_v17, 2  ;;  %v2923_v5 = vrot.slane %v2921_v37, 2 }
 0x1be   : > { %v1961_v10 = vpop.f32.mrf.mxu2  ;;  %v2927_v52 = vor.u32 %v2926_v56, %v2923_v5  ;;  %v2812_v5 = vshll.u32 %v4559_v20, 16 }
 0x1bf   : > { %v1982_v40 = vadd.f32 %v1961_v10, %v1902_v0  ;;  %v2080_v57 = vpop.f32.mrf.mxu3 }
 0x1c0   : > { %v1889_v22 = vpop.f32.mrf.mxu1 }
 0x1c1   : > { %v2096_v59 = vadd.f32 %v2075_v60, %v1982_v40  ;;  %v1905_v51 = vadd.f32 %v1889_v22, %v4561_v11  ;;  %v2197_v29 = vpop.f32.mrf.mxu0  ;;  %v2794_v11 = vshll.u32 %v4505_v48, 16 }
 0x1c3   : > { %3621 = vmatmul.msk.bf16.gmra.mxu1 %vm361_vm1, %v2697_v1  ;;  %3626 = vmatmul.msk.bf16.vlgmr.msra.gmra.mxu2 %vm361_vm1, %v2789_v4  ;;  %v4669_v0 = vadd.f32 %v4618_v32, %v2096_v59  ;;  %v2796_v45 = vrot.slane %v2794_v11, 3  ;;  %v2700_v1 = vrot.slane %v4691_v3, 2 }
 0x1c4   : > { %3633 = vmatmul.msk.bf16.gmra.mxu3 %vm361_vm1, %v2919_v41  ;;  %3639 = vmatmul.msk.bf16.gmra.mxu0 %vm361_vm1, %v3020_v55 }
 0x1c5   : > { %v2797_v8 = vor.u32 %v2796_v45, %v2793_v31  ;;  %v2701_v37 = vsel %vm1915_vm5, %v2698_v38, %v2700_v1 }
 0x1c6   : > { %v1964_v44 = vpop.f32.mrf.mxu2 }
 0x1c7   : > { %v1983_v13 = vadd.f32 %v1964_v44, %v1903_v43  ;;  %v2083_v61 = vpop.f32.mrf.mxu3  ;;  %v3021_v43 = vrot.slane %v4530_v47, 3 }
 0x1c8   : > { %v1891_v60 = vpop.f32.mrf.mxu1 }
 0x1c9   : > { %v2097_v32 = vadd.f32 %v2078_v9, %v1983_v13  ;;  %v1906_v46 = vadd.f32 %v1891_v60, %v4577_v18  ;;  %v2199_v27 = vpop.f32.mrf.mxu0  ;;  %v2798_v18 = vsel %vm2772_vm6, %v2788_v62, %v2797_v8  ;;  %v3022_v42 = vsel %vm3015_vm7, %v3019_v12, %v3021_v43 }
 0x1ca   : > { %v2802_v62 = vrot.slane %v2800_v26, 2 }
 0x1cb   : > { %v4679_v48 = vadd.f32 %v4632_v7, %v2097_v32  ;;  %v2928_v7 = vsel %vm2772_vm6, %v2918_v49, %v2927_v52  ;;  %v2932_v49 = vrot.slane %v2930_v63, 2 }
 0x1ce   : > { %v1966_v14 = vpop.f32.mrf.mxu2 }
 0x1cf   : > { %v1984_v24 = vadd.f32 %v1966_v14, %v1904_v30  ;;  %v2085_v19 = vpop.f32.mrf.mxu3  ;;  %v2933_v30 = vshll.u32 %v4691_v3, 16 }
 0x1d0   : > { %v1894_v50 = vpop.f32.mrf.mxu1 }
 0x1d1   : > { %v2098_v15 = vadd.f32 %v2080_v57, %v1984_v24  ;;  %v1907_v9 = vadd.f32 %v1894_v50, %v4590_v2  ;;  %v4687_v33 = vpop.f32.mrf.mxu0  ;;  %v2803_v2 = vshll.u32 %v4530_v47, 16  ;;  %v2935_v12 = vrot.slane %v2933_v30, 3  ;;  %v2888_v47 = vld [vmem:[%s3847_s12 + $0x30] sm:$0x7] }
 0x1d2   : > { %v2892_v41 = vunpack.c.l.b16 %v2888_v47  ;;  %v2814_v50 = vrot.slane %v2812_v5, 3 }
 0x1d3   : > { %3622 = vmatmul.msk.bf16.gmra.mxu1 %vm361_vm1, %v2699_v16  ;;  %3627 = vmatmul.msk.bf16.gmra.mxu2 %vm361_vm1, %v2798_v18  ;;  %v4695_v6 = vadd.f32 %v2194_v21, %v2098_v15  ;;  %v2805_v21 = vrot.slane %v2803_v2, 3  ;;  %v2936_v59 = vor.u32 %v2935_v12, %v2932_v49 }
 0x1d4   : > { %3634 = vmatmul.msk.bf16.gmra.mxu3 %vm361_vm1, %v2928_v7  ;;  %3640 = vmatmul.msk.bf16.gmra.mxu0 %vm361_vm1, %v3022_v42  ;;  %v2893_v31 = vpack.c.b16 %v2892_v41, %v2892_v41 }
 0x1d5   : > { %v2806_v4 = vor.u32 %v2805_v21, %v2802_v62 }
 0x1d6   : > { %v1969_v34 = vpop.f32.mrf.mxu2  ;;  %v2939_v56 = vshrl.u32 %v2893_v31, 16  ;;  %v2942_v38 = vshll.u32 %v2893_v31, 16 }
 0x1d7   : > { %v1985_v25 = vadd.f32 %v1969_v34, %v1905_v51  ;;  %v2088_v28 = vpop.f32.mrf.mxu3  ;;  %v3023_v51 = vrot.slane %v4559_v20, 3 }
 0x1d8   : > { %v1896_v35 = vpop.f32.mrf.mxu1  ;;  %v2941_v7 = vrot.slane %v2939_v56, 2  ;;  %v2944_v42 = vrot.slane %v2942_v38, 3 }
 0x1d9   : > { %v2099_v10 = vadd.f32 %v2083_v61, %v1985_v25  ;;  %v1908_v40 = vadd.f32 %v1896_v35, %v4610_v36  ;;  %v4704_v57 = vpop.f32.mrf.mxu0  ;;  %v2807_v36 = vsel %vm2772_vm6, %v2797_v8, %v2806_v4  ;;  %v2662_v61 = vld [vmem:[%s3847_s12 + $0x30] sm:$0x3]  ;;  %v3024_v60 = vsel %vm3015_vm7, %v3021_v43, %v3023_v51 }
 0x1da   : > { %v2686_v32 = vunpack.c.l.b16 %v2662_v61  ;;  %v2945_v63 = vor.u32 %v2944_v42, %v2941_v7 }
 0x1db   : > { %v4707_v22 = vadd.f32 %v2197_v29, %v2099_v10  ;;  %v2937_v29 = vsel %vm2772_vm6, %v2927_v52, %v2936_v59 }
 0x1dc   : > { %v2946_v49 = vsel %vm2772_vm6, %v2936_v59, %v2945_v63 }
 0x1de   : > { %v1971_v55 = vpop.f32.mrf.mxu2 }
 0x1df   : > { %v1986_v58 = vadd.f32 %v1971_v55, %v1906_v46  ;;  %v2090_v17 = vpop.f32.mrf.mxu3  ;;  %v2809_v46 = vshrl.u32 %v4559_v20, 16 }
 0x1e0   : > { %v2303_v11 = vpop.f32.mrf.mxu1 }
 0x1e1   : > { %v2100_v23 = vadd.f32 %v2085_v19, %v1986_v58  ;;  %v2328_v44 = vadd.f32 %v2303_v11, %v4623_v39  ;;  %v2617_v13 = vpop.f32.mrf.mxu0  ;;  %v2766_v39 = vld [vmem:[%s3865_s17 + $0x30] sm:$0x7]  ;;  %v2692_v19 = vpack.c.b16 %v2686_v32, %v2686_v32 }
 0x1e2   : > { %v2770_v14 = vunpack.c.l.b16 %v2766_v39 }
 0x1e3   : > { %3623 = vmatmul.msk.bf16.gmra.mxu1 %vm361_vm1, %v2701_v37  ;;  %3628 = vmatmul.msk.bf16.gmra.mxu2 %vm361_vm1, %v2807_v36  ;;  %v4719_v45 = vadd.f32 %v2199_v27, %v2100_v23  ;;  %v2811_v27 = vrot.slane %v2809_v46, 2  ;;  %v2702_v26 = vrot.slane %v2692_v19, 2 }
 0x1e4   : > { %3635 = vmatmul.msk.bf16.gmra.mxu3 %vm361_vm1, %v2937_v29  ;;  %3641 = vmatmul.msk.bf16.gmra.mxu0 %vm361_vm1, %v3024_v60  ;;  %v2771_v20 = vpack.c.b16 %v2770_v14, %v2770_v14 }
 0x1e5   : > { %v2815_v2 = vor.u32 %v2814_v50, %v2811_v27  ;;  %v2703_v62 = vsel %vm1915_vm5, %v2700_v1, %v2702_v26 }
 0x1e6   : > { %v1974_v8 = vpop.f32.mrf.mxu2  ;;  %v2821_v47 = vshll.u32 %v2771_v20, 16 }
 0x1e7   : > { %v1987_v52 = vadd.f32 %v1974_v8, %v1907_v9  ;;  %v2503_v43 = vpop.f32.mrf.mxu3  ;;  %v3025_v9 = vrot.slane %v2771_v20, 3 }
 0x1e8   : > { %v2305_v24 = vpop.f32.mrf.mxu1  ;;  %v2823_v55 = vrot.slane %v2821_v47, 3 }
 0x1e9   : > { %v2101_v16 = vadd.f32 %v2088_v28, %v1987_v52  ;;  %v2329_v18 = vadd.f32 %v2305_v24, %v4641_v54  ;;  %v2619_v15 = vpop.f32.mrf.mxu0  ;;  %v2816_v28 = vsel %vm2772_vm6, %v2806_v4, %v2815_v2 }
 0x1eb   : > { %v4728_v3 = vadd.f32 %v4687_v33, %v2101_v16  ;;  %v3026_v33 = vsel %vm3015_vm7, %v3023_v51, %v3025_v9 }
 0x1ee   : > { %v1976_v30 = vpop.f32.mrf.mxu2 }
 0x1ef   : > { %v1988_v34 = vadd.f32 %v1976_v30, %v1908_v40  ;;  %v2505_v25 = vpop.f32.mrf.mxu3  ;;  %v2818_v40 = vshrl.u32 %v2771_v20, 16 }
 0x1f0   : > { %v2308_v35 = vpop.f32.mrf.mxu1 }
 0x1f1   : > { %v2102_v54 = vadd.f32 %v2090_v17, %v1988_v34  ;;  %v2330_v21 = vadd.f32 %v2308_v35, %v4654_v53  ;;  %v2622_v12 = vpop.f32.mrf.mxu0  ;;  %v2820_v41 = vrot.slane %v2818_v40, 2 }
 0x1f3   : > { %3624 = vmatmul.msk.bf16.gmra.mxu1 %vm361_vm1, %v2703_v62  ;;  %3629 = vmatmul.msk.bf16.gmra.mxu2 %vm361_vm1, %v2816_v28  ;;  %v4738_v10 = vadd.f32 %v4704_v57, %v2102_v54  ;;  %v2824_v57 = vor.u32 %v2823_v55, %v2820_v41 }
 0x1f4   : > { %3636 = vmatmul.msk.bf16.gmra.mxu3 %vm361_vm1, %v2946_v49  ;;  %3642 = vmatmul.msk.bf16.gmra.mxu0 %vm361_vm1, %v3026_v33 }
 0x1f5   : > { %v2825_v61 = vsel %vm2772_vm6, %v2815_v2, %v2824_v57 }
 0x1f6   : > { %v2424_v1 = vpop.f32.mrf.mxu2 }
 0x1f7   : > { %v2449_v53 = vadd.f32 %v2424_v1, %v2328_v44  ;;  %v2508_v4 = vpop.f32.mrf.mxu3 }
 0x1f8   : > { %v2310_v59 = vpop.f32.mrf.mxu1 }
 0x1f9   : > { %v2528_v51 = vadd.f32 %v2503_v43, %v2449_v53  ;;  %v2331_v58 = vadd.f32 %v2310_v59, %v4669_v0  ;;  %v2624_v17 = vpop.f32.mrf.mxu0 }
 0x1fb   : > { %v4743_v11 = vadd.f32 %v2617_v13, %v2528_v51 }
 0x1fe   : > { %v2426_v37 = vpop.f32.mrf.mxu2 }
 0x1ff   : > { %v2450_v36 = vadd.f32 %v2426_v37, %v2329_v18  ;;  %v2510_v29 = vpop.f32.mrf.mxu3 }
 0x200   : > { %v2313_v23 = vpop.f32.mrf.mxu1 }
 0x201   : > { %v2529_v60 = vadd.f32 %v2505_v25, %v2450_v36  ;;  %v2332_v44 = vadd.f32 %v2313_v23, %v4679_v48  ;;  %v2627_v31 = vpop.f32.mrf.mxu0 }
 0x203   : > { %3630 = vmatmul.msk.bf16.gmra.mxu2 %vm361_vm1, %v2825_v61  ;;  %v4748_v32 = vadd.f32 %v2619_v15, %v2529_v60 }
 0x206   : > { %v2429_v46 = vpop.f32.mrf.mxu2 }
 0x207   : > { %v2451_v0 = vadd.f32 %v2429_v46, %v2330_v21  ;;  %v2513_v5 = vpop.f32.mrf.mxu3 }
 0x208   : > { %v2315_v13 = vpop.f32.mrf.mxu1 }
 0x209   : > { %v2530_v39 = vadd.f32 %v2508_v4, %v2451_v0  ;;  %v2333_v56 = vadd.f32 %v2315_v13, %v4695_v6  ;;  %v2629_v38 = vpop.f32.mrf.mxu0 }
 0x20b   : > { %v4751_v8 = vadd.f32 %v2622_v12, %v2530_v39 }
 0x20e   : > { %v2431_v52 = vpop.f32.mrf.mxu2 }
 0x20f   : > { %v2452_v43 = vadd.f32 %v2431_v52, %v2331_v58  ;;  %v2515_v14 = vpop.f32.mrf.mxu3 }
 0x210   : > { %v2318_v24 = vpop.f32.mrf.mxu1 }
 0x211   : > { %v2531_v48 = vadd.f32 %v2510_v29, %v2452_v43  ;;  %v2334_v19 = vadd.f32 %v2318_v24, %v4707_v22  ;;  %v2632_v27 = vpop.f32.mrf.mxu0  ;;  %v4776_v43 = vld [vmem:[%s4815_s5] ss:$0 sm:$0xff] }
 0x213   : > { %v4754_v50 = vadd.f32 %v2624_v17, %v2531_v48 }
 0x216   : > { %v2434_v16 = vpop.f32.mrf.mxu2 }
 0x217   : > { %v2453_v18 = vadd.f32 %v2434_v16, %v2332_v44  ;;  %v2518_v15 = vpop.f32.mrf.mxu3 }
 0x218   : > { %v2320_v7 = vpop.f32.mrf.mxu1 }
 0x219   : > { %v2532_v42 = vadd.f32 %v2513_v5, %v2453_v18  ;;  %v2335_v6 = vadd.f32 %v2320_v7, %v4719_v45  ;;  %v2634_v20 = vpop.f32.mrf.mxu0 }
 0x21b   : > { %v4757_v26 = vadd.f32 %v2627_v31, %v2532_v42 }
 0x21e   : > { %v2436_v2 = vpop.f32.mrf.mxu2 }
 0x21f   : > { %v2454_v63 = vadd.f32 %v2436_v2, %v2333_v56  ;;  %v2520_v9 = vpop.f32.mrf.mxu3 }
 0x220   : > { %v2323_v30 = vpop.f32.mrf.mxu1 }
 0x221   : > { %v2533_v34 = vadd.f32 %v2515_v14, %v2454_v63  ;;  %v2336_v22 = vadd.f32 %v2323_v30, %v4728_v3  ;;  %v2637_v35 = vpop.f32.mrf.mxu0 }
 0x223   : > { %v4760_v25 = vadd.f32 %v2629_v38, %v2533_v34 }
 0x226   : > { %v2439_v62 = vpop.f32.mrf.mxu2 }
 0x227   : > { %v2455_v28 = vadd.f32 %v2439_v62, %v2334_v19  ;;  %v2523_v54 = vpop.f32.mrf.mxu3 }
 0x228   : > { %v2325_v21 = vpop.f32.mrf.mxu1 }
 0x229   : > { %v2534_v49 = vadd.f32 %v2518_v15, %v2455_v28  ;;  %v2337_v45 = vadd.f32 %v2325_v21, %v4738_v10  ;;  %v2639_v40 = vpop.f32.mrf.mxu0 }
 0x22b   : > { %v4763_v12 = vadd.f32 %v2632_v27, %v2534_v49 }
 0x22e   : > { %v2441_v33 = vpop.f32.mrf.mxu2 }
 0x22f   : > { %v2456_v47 = vadd.f32 %v2441_v33, %v2335_v6  ;;  %v2525_v1 = vpop.f32.mrf.mxu3 }
 0x230   : > { %v2731_v53 = vpop.f32.mrf.mxu1 }
 0x231   : > { %v2535_v4 = vadd.f32 %v2520_v9, %v2456_v47  ;;  %v3054_v51 = vpop.f32.mrf.mxu0  ;;  %v2756_v44 = vadd.f32 %v2731_v53, %v4743_v11 }
 0x233   : > { %v4765_v59 = vadd.f32 %v2634_v20, %v2535_v4 }
 0x236   : > { %v2444_v3 = vpop.f32.mrf.mxu2 }
 0x237   : > { %v2457_v41 = vadd.f32 %v2444_v3, %v2336_v22  ;;  %v2974_v55 = vpop.f32.mrf.mxu3 }
 0x238   : > { %v2733_v17 = vpop.f32.mrf.mxu1 }
 0x239   : > { %v2536_v58 = vadd.f32 %v2523_v54, %v2457_v41  ;;  %v3056_v23 = vpop.f32.mrf.mxu0  ;;  %v2757_v39 = vadd.f32 %v2733_v17, %v4748_v32 }
 0x23b   : > { %v4767_v57 = vadd.f32 %v2637_v35, %v2536_v58 }
 0x23e   : > { %v2446_v37 = vpop.f32.mrf.mxu2 }
 0x23f   : > { %v2458_v10 = vadd.f32 %v2446_v37, %v2337_v45  ;;  %v2976_v36 = vpop.f32.mrf.mxu3 }
 0x240   : > { %v2736_v60 = vpop.f32.mrf.mxu1 }
 0x241   : > { %v2537_v29 = vadd.f32 %v2525_v1, %v2458_v10  ;;  %v3059_v13 = vpop.f32.mrf.mxu0  ;;  %v2758_v27 = vadd.f32 %v2736_v60, %v4751_v8 }
 0x243   : > { %v4769_v61 = vadd.f32 %v2639_v40, %v2537_v29 }
 0x246   : > { %v2853_v31 = vpop.f32.mrf.mxu2 }
 0x247   : > { %v2878_v46 = vadd.f32 %v2853_v31, %v2756_v44  ;;  %v2979_v0 = vpop.f32.mrf.mxu3 }
 0x248   : > { %v2738_v56 = vpop.f32.mrf.mxu1 }
 0x249   : > { %v2999_v5 = vadd.f32 %v2974_v55, %v2878_v46  ;;  %v3061_v18 = vpop.f32.mrf.mxu0  ;;  %v2759_v63 = vadd.f32 %v2738_v56, %v4754_v50 }
 0x24b   : > { %v3079_v52 = vadd.f32 %v3054_v51, %v2999_v5 }
 0x24d   : > { %v3093_v48 = vadd.f32 %v4776_v43, %v3079_v52 }
 0x24e   : > { %v2855_v38 = vpop.f32.mrf.mxu2 }
 0x24f   : > { %v2879_v14 = vadd.f32 %v2855_v38, %v2757_v39  ;;  %v2981_v19 = vpop.f32.mrf.mxu3  ;;  %v3103_v15 = vmax.f32 %v3093_v48, 0.0 }
 0x250   : > { %v2741_v6 = vpop.f32.mrf.mxu1 }
 0x251   : > { %v3000_v24 = vadd.f32 %v2976_v36, %v2879_v14  ;;  %v3064_v22 = vpop.f32.mrf.mxu0  ;;  %v2760_v21 = vadd.f32 %v2741_v6, %v4757_v26 }
 0x253   : > { %v3080_v11 = vadd.f32 %v3056_v23, %v3000_v24 }
 0x255   : > { %v3094_v16 = vadd.f32 %v4776_v43, %v3080_v11 }
 0x256   : > { %v2858_v32 = vpop.f32.mrf.mxu2 }
 0x257   : > { %v3104_v7 = vmax.f32 %v3094_v16, 0.0  ;;  %v2880_v42 = vadd.f32 %v2858_v32, %v2758_v27  ;;  %v2984_v9 = vpop.f32.mrf.mxu3 }
 0x258   : > { %v2743_v62 = vpop.f32.mrf.mxu1 }
 0x259   : > { %v3721_v20 = vpack.c.bf16 %v3104_v7, %v3103_v15  ;;  %v3001_v2 = vadd.f32 %v2979_v0, %v2880_v42  ;;  %v3066_v53 = vpop.f32.mrf.mxu0  ;;  %v2761_v41 = vadd.f32 %v2743_v62, %v4760_v25 }
 0x25b   : > { %3722 = vst [vmem:[%s4785_s27] sm:$0xff] %v3721_v20   ;;  %v3081_v30 = vadd.f32 %v3059_v13, %v3001_v2 }
 0x25d   : > { %v3095_v28 = vadd.f32 %v4776_v43, %v3081_v30 }
 0x25e   : > { %v2860_v8 = vpop.f32.mrf.mxu2 }
 0x25f   : > { %v2881_v34 = vadd.f32 %v2860_v8, %v2759_v63  ;;  %v3105_v33 = vmax.f32 %v3095_v28, 0.0  ;;  %v2986_v50 = vpop.f32.mrf.mxu3 }
 0x260   : > { %v2746_v3 = vpop.f32.mrf.mxu1 }
 0x261   : > { %v3002_v35 = vadd.f32 %v2981_v19, %v2881_v34  ;;  %v3069_v36 = vpop.f32.mrf.mxu0  ;;  %v2762_v29 = vadd.f32 %v2746_v3, %v4763_v12 }
 0x263   : > { %v3082_v54 = vadd.f32 %v3061_v18, %v3002_v35 }
 0x265   : > { %v3096_v49 = vadd.f32 %v4776_v43, %v3082_v54 }
 0x266   : > { %v2863_v45 = vpop.f32.mrf.mxu2 }
 0x267   : > { %v3106_v40 = vmax.f32 %v3096_v49, 0.0  ;;  %v2882_v47 = vadd.f32 %v2863_v45, %v2760_v21  ;;  %v2989_v26 = vpop.f32.mrf.mxu3 }
 0x268   : > { %v2748_v60 = vpop.f32.mrf.mxu1 }
 0x269   : > { %v3726_v1 = vpack.c.bf16 %v3106_v40, %v3105_v33  ;;  %v3003_v4 = vadd.f32 %v2984_v9, %v2882_v47  ;;  %v2763_v39 = vadd.f32 %v2748_v60, %v4765_v59  ;;  %v3071_v56 = vpop.f32.mrf.mxu0 }
 0x26b   : > { %3749 = vst [vmem:[%s4785_s27 + $0x8] sm:$0xff] %v3726_v1   ;;  %v3083_v51 = vadd.f32 %v3064_v22, %v3003_v4 }
 0x26d   : > { %v3097_v37 = vadd.f32 %v4776_v43, %v3083_v51 }
 0x26e   : > { %v2865_v55 = vpop.f32.mrf.mxu2 }
 0x26f   : > { %v2883_v58 = vadd.f32 %v2865_v55, %v2761_v41  ;;  %v3107_v31 = vmax.f32 %v3097_v37, 0.0  ;;  %v2991_v13 = vpop.f32.mrf.mxu3 }
 0x270   : > { %v2751_v24 = vpop.f32.mrf.mxu1 }
 0x271   : > { %v3004_v17 = vadd.f32 %v2986_v50, %v2883_v58  ;;  %v2764_v19 = vadd.f32 %v2751_v24, %v4767_v57  ;;  %v3074_v59 = vpop.f32.mrf.mxu0 }
 0x273   : > { %v3084_v10 = vadd.f32 %v3066_v53, %v3004_v17 }
 0x275   : > { %v3098_v23 = vadd.f32 %v4776_v43, %v3084_v10 }
 0x276   : > { %v2868_v44 = vpop.f32.mrf.mxu2 }
 0x277   : > { %v3108_v46 = vmax.f32 %v3098_v23, 0.0  ;;  %v2884_v0 = vadd.f32 %v2868_v44, %v2762_v29  ;;  %v2994_v16 = vpop.f32.mrf.mxu3 }
 0x278   : > { %v2753_v20 = vpop.f32.mrf.mxu1 }
 0x279   : > { %v3731_v25 = vpack.c.bf16 %v3108_v46, %v3107_v31  ;;  %v3005_v5 = vadd.f32 %v2989_v26, %v2884_v0  ;;  %v2765_v63 = vadd.f32 %v2753_v20, %v4769_v61  ;;  %v3076_v22 = vpop.f32.mrf.mxu0 }
 0x27b   : > { %3750 = vst [vmem:[%s4785_s27 + $0x10] sm:$0xff] %v3731_v25   ;;  %v3085_v52 = vadd.f32 %v3069_v36, %v3005_v5 }
 0x27d   : > { %v3099_v48 = vadd.f32 %v4776_v43, %v3085_v52 }
 0x27e   : > { %v2870_v38 = vpop.f32.mrf.mxu2 }
 0x27f   : > { %v2885_v14 = vadd.f32 %v2870_v38, %v2763_v39  ;;  %v3109_v18 = vmax.f32 %v3099_v48, 0.0  ;;  %v2996_v30 = vpop.f32.mrf.mxu3 }
 0x281   : > { %v3006_v12 = vadd.f32 %v2991_v13, %v2885_v14 }
 0x283   : > { %v3086_v11 = vadd.f32 %v3071_v56, %v3006_v12 }
 0x285   : > { %v3100_v27 = vadd.f32 %v4776_v43, %v3086_v11 }
 0x286   : > { %v2873_v32 = vpop.f32.mrf.mxu2 }
 0x287   : > { %v3110_v15 = vmax.f32 %v3100_v27, 0.0  ;;  %v2886_v7 = vadd.f32 %v2873_v32, %v2764_v19 }
 0x289   : > { %v3736_v42 = vpack.c.bf16 %v3110_v15, %v3109_v18  ;;  %v3007_v6 = vadd.f32 %v2994_v16, %v2886_v7 }
 0x28b   : > { %3751 = vst [vmem:[%s4785_s27 + $0x18] sm:$0xff] %v3736_v42   ;;  %v3087_v2 = vadd.f32 %v3074_v59, %v3007_v6 }
 0x28d   : > { %v3101_v8 = vadd.f32 %v4776_v43, %v3087_v2 }
 0x28e   : > { %v2875_v9 = vpop.f32.mrf.mxu2 }
 0x28f   : > { %v2887_v57 = vadd.f32 %v2875_v9, %v2765_v63  ;;  %v3111_v28 = vmax.f32 %v3101_v8, 0.0 }
 0x291   : > { %v3008_v34 = vadd.f32 %v2996_v30, %v2887_v57 }
 0x293   : > { %v3088_v35 = vadd.f32 %v3076_v22, %v3008_v34 }
 0x295   : > { %v3102_v62 = vadd.f32 %v4776_v43, %v3088_v35 }
 0x297   : > { %v3112_v54 = vmax.f32 %v3102_v62, 0.0 }
 0x299   : > { %v3741_v21 = vpack.c.bf16 %v3112_v54, %v3111_v28 }
 0x29b   : > { %3752 = vst [vmem:[%s4785_s27 + $0x20] sm:$0xff] %v3741_v21  }
 0x29c PF: > { %s16_s21 = sadd.s32 1, %s3773_s21  }
 0x29d   : > { %p13_p4 = scmp.ge.s32.totalorder %s16_s21, 4  }
 0x29f   :  { %15 = sbr.rel (!%p13_p4) target bundleno = 1 (0x1), region = 107 }

// kernel: basic_ag_forward.7
= control target key start
LH: loop header
LB: loop body
LE: loop exit
PB: predicated region body
PF: predicated region fallthrough
CT: control target
= control target key end

     0   :  { %s4522_s21 = smov 0   ;;  %s5409_s0 = inlined_call_operand.vmem [shape: bf16[2,42,128], index: 0, kind: input, shape index: {}]   ;;  %s5410_s1 = inlined_call_operand.vmem [shape: bf16[2,42,128], index: 1, kind: input, shape index: {}]   ;;  %s5411_s2 = inlined_call_operand.vmem [shape: bf16[2,42,128], index: 2, kind: input, shape index: {}]   ;;  %s5412_s3 = inlined_call_operand.vmem [shape: bf16[2,42,128], index: 3, kind: input, shape index: {}]   ;;  %s5413_s4 = inlined_call_operand.vmem [shape: bf16[25,128,128], index: 4, kind: input, shape index: {}]   ;;  %s5414_s5 = inlined_call_operand.vmem [shape: f32[1,128], index: 5, kind: input, shape index: {}]   ;;  %s5415_s6 = inlined_call_operand.vmem [shape: bf16[2,24,128], index: 6, kind: output, shape index: {}]  }
   0x1 LB: > { %s3007_s22 = sadd.s32 4294967295, %s4485_s21   ;;  %p3011_p0 = scmp.ge.s32.totalorder %s4485_s21, 1  ;;  %s4485_s21 = sphi %s4522_s21, %s16_s21  }
   0x2   : > { %p242_p1 = scmp.lt.s32.totalorder %s4485_s21, 3 }
   0x4   : > { %p243_p2 = pnand %p3011_p0, %p242_p1 }
   0x5   : > { %p287_p3 = scmp.lt.s32.totalorder (!%p243_p2), %s3007_s22, 1 }
   0x6   : > { %246 = sbr.rel (%p243_p2) target bundleno = 378 (0x17a), region = 44 }
   0xb   : > { %v4240_v0 = vld [vmem:[%s5413_s4 + $0x78] sm:$0xff]  ;;  %v4239_v4 = vld [vmem:[%s5413_s4 + $0x70] sm:$0xff]  ;;  %s5417_s22 = smov (!%p287_p3, %s3007_s22), 1  ;;  %v4238_v8 = vld [vmem:[%s5413_s4 + $0x68] sm:$0xff]  ;;  %vm534_vm0 = vsmask.f32 7424 }
   0xc   : > { %v4231_v1 = vld [vmem:[%s5413_s4 + $0x38] sm:$0xff]  ;;  %409 = vmatpush.bf16.msra.mxu0 %v4240_v0  ;;  %v4230_v5 = vld [vmem:[%s5413_s4 + $0x30] sm:$0xff]  ;;  %s4557_s15 = smul.u32 24, %s5417_s22  ;;  %v4229_v9 = vld [vmem:[%s5413_s4 + $0x28] sm:$0xff]  ;;  %vm759_vm1 = vcmask 1046528   ;;  %vm1386_vm2 = vcmask 1044480  }
   0xd   : > { %v4248_v2 = vld [vmem:[%s5413_s4 + $0xb8] sm:$0xff]  ;;  %485 = vmatpush.bf16.msra.mxu1 %v4231_v1  ;;  %v4247_v6 = vld [vmem:[%s5413_s4 + $0xb0] sm:$0xff]  ;;  %v4246_v10 = vld [vmem:[%s5413_s4 + $0xa8] sm:$0xff]  ;;  %vm1581_vm3 = vsmask.f32 4352  ;;  %vm2406_vm4 = vcmask 1045504  }
   0xe   : > { %v4256_v3 = vld [vmem:[%s5413_s4 + $0xf8] sm:$0xff]  ;;  %600 = vmatpush.bf16.msra.mxu2 %v4248_v2  ;;  %v4255_v7 = vld [vmem:[%s5413_s4 + $0xf0] sm:$0xff]  ;;  %v4254_v11 = vld [vmem:[%s5413_s4 + $0xe8] sm:$0xff]  ;;  %s4575_s28 = scalar_lea.vmem %s5409_s0, %s4557_s15  ;;  %s4587_s11 = scalar_lea.vmem %s5410_s1, %s4557_s15  ;;  %vm2607_vm5 = vsmask.f32 5376 }
   0xf   : > { %717 = vmatpush.bf16.msra.mxu3 %v4256_v3  ;;  %v4237_v12 = vld [vmem:[%s5413_s4 + $0x60] sm:$0xff]  ;;  %v505_v16 = vld [vmem:[%s4575_s28 + $0x8] sm:$0xf]  ;;  %v506_v17 = vld [vmem:[%s4575_s28 + $0xc] sm:$0x1]  ;;  %s4717_s24 = scalar_lea.vmem %s5411_s2, %s4557_s15  ;;  %s4804_s8 = scalar_lea.vmem %s5412_s3, %s4557_s15 }
  0x10   : > { %410 = vmatpush.bf16.msra.mxu0 %v4239_v4  ;;  %v4228_v13 = vld [vmem:[%s5413_s4 + $0x20] sm:$0xff]  ;;  %v623_v18 = vld [vmem:[%s4587_s11 + $0x8] sm:$0xf]  ;;  %v4236_v19 = vld [vmem:[%s5413_s4 + $0x58] sm:$0xff]  ;;  %v4614_v25 = vunpack.c.l.b16 %v505_v16  ;;  %v531_v26 = vunpack.c.l.b16 %v506_v17  ;;  %s4469_s15 = smul.u32 12, %s5417_s22 }
  0x11   : > { %486 = vmatpush.bf16.msra.mxu1 %v4230_v5  ;;  %v4245_v14 = vld [vmem:[%s5413_s4 + $0xa0] sm:$0xff]  ;;  %v4227_v20 = vld [vmem:[%s5413_s4 + $0x18] sm:$0xff]  ;;  %v624_v21 = vld [vmem:[%s4587_s11 + $0xc] sm:$0x1]  ;;  %v4616_v27 = vunpack.c.l.b16 %v623_v18 }
  0x12   : > { %601 = vmatpush.bf16.msra.mxu2 %v4247_v6  ;;  %v4253_v15 = vld [vmem:[%s5413_s4 + $0xe0] sm:$0xff]  ;;  %v4244_v22 = vld [vmem:[%s5413_s4 + $0x98] sm:$0xff]  ;;  %v649_v28 = vunpack.c.l.b16 %v624_v21  ;;  %v4235_v30 = vld [vmem:[%s5413_s4 + $0x50] sm:$0xff]  ;;  %v4633_v35 = vpack.c.b16 %v531_v26, %v4614_v25 }
  0x13   : > { %718 = vmatpush.bf16.msra.mxu3 %v4255_v7  ;;  %v4252_v23 = vld [vmem:[%s5413_s4 + $0xd8] sm:$0xff]  ;;  %v4612_v24 = vld [vmem:[%s4575_s28] sm:$0xff]   ;;  %v4226_v31 = vld [vmem:[%s5413_s4 + $0x10] sm:$0xff] }
  0x14   : > { %411 = vmatpush.bf16.msra.mxu0 %v4238_v8  ;;  %v4433_v29 = vld [vmem:[%s4587_s11] sm:$0xff]   ;;  %v538_v32 = vshll.u32 %v4612_v24, 16  ;;  %v4243_v33 = vld [vmem:[%s5413_s4 + $0x90] sm:$0xff]  ;;  %v4636_v36 = vpack.c.b16 %v649_v28, %v4616_v27  ;;  %v4234_v38 = vld [vmem:[%s5413_s4 + $0x48] sm:$0xff]  ;;  %v536_v40 = vshrl.u32 %v4612_v24, 16  ;;  %v543_v44 = vshll.u32 %v4633_v35, 16 }
  0x15   : > { %487 = vmatpush.bf16.msra.mxu1 %v4229_v9  ;;  %v4251_v34 = vld [vmem:[%s5413_s4 + $0xd0] sm:$0xff]  ;;  %v655_v37 = vshll.u32 %v4433_v29, 16  ;;  %v4225_v39 = vld [vmem:[%s5413_s4 + $0x8] sm:$0xff]  ;;  %v653_v45 = vshrl.u32 %v4433_v29, 16  ;;  %v4233_v48 = vld [vmem:[%s5413_s4 + $0x40] sm:$0xff] }
  0x16   : > { %602 = vmatpush.bf16.msra.mxu2 %v4246_v10  ;;  %v540_v41 = vrot.slane %v538_v32, 1  ;;  %v4242_v42 = vld [vmem:[%s5413_s4 + $0x88] sm:$0xff]  ;;  %v660_v47 = vshll.u32 %v4636_v36, 16  ;;  %v4224_v49 = vld [vmem:[%s5413_s4] sm:$0xff]  ;;  %v545_v53 = vrot.slane %v543_v44, 1  ;;  %v4264_v56 = vld [vmem:[%s5413_s4 + $0x138] sm:$0xff] }
  0x17   : > { %719 = vmatpush.bf16.msra.mxu3 %v4254_v11  ;;  %v4250_v43 = vld [vmem:[%s5413_s4 + $0xc8] sm:$0xff]  ;;  %v657_v46 = vrot.slane %v655_v37, 1  ;;  %v4241_v50 = vld [vmem:[%s5413_s4 + $0x80] sm:$0xff]  ;;  %v4273_v57 = vld [vmem:[%s5413_s4 + $0x178] sm:$0xff] }
  0x18   : > { %412 = vmatpush.bf16.msra.mxu0 %v4237_v12  ;;  %v4249_v51 = vld [vmem:[%s5413_s4 + $0xc0] sm:$0xff]  ;;  %v541_v52 = vor.u32 %v540_v41, %v536_v40  ;;  %v662_v55 = vrot.slane %v660_v47, 1  ;;  %v4282_v61 = vld [vmem:[%s5413_s4 + $0x1b8] sm:$0xff]  ;;  %v4263_v0 = vld [vmem:[%s5413_s4 + $0x130] sm:$0xff] }
  0x19   : > { %488 = vmatpush.bf16.msra.mxu1 %v4228_v13  ;;  %v658_v54 = vor.u32 %v657_v46, %v653_v45  ;;  %v4232_v58 = vld [vmem:[%s4587_s11] sm:$0xff]  ;;  %v4290_v63 = vld [vmem:[%s5413_s4 + $0x1f8] sm:$0xff]  ;;  %v4272_v1 = vld [vmem:[%s5413_s4 + $0x170] sm:$0xff] }
  0x1a   : > { %603 = vmatpush.bf16.msra.mxu2 %v4245_v14  ;;  %v4223_v59 = vld [vmem:[%s4575_s28] sm:$0xff]  ;;  %v546_v60 = vsel %vm534_vm0, %v541_v52, %v545_v53  ;;  %v4281_v2 = vld [vmem:[%s5413_s4 + $0x1b0] sm:$0xff]  ;;  %v4262_v4 = vld [vmem:[%s5413_s4 + $0x128] sm:$0xff]  ;;  %v547_v14 = vshrl.u32 %v4633_v35, 16 }
  0x1b   : > { %720 = vmatpush.bf16.msra.mxu3 %v4253_v15  ;;  %v663_v62 = vsel %vm534_vm0, %v658_v54, %v662_v55  ;;  %v4289_v3 = vld [vmem:[%s5413_s4 + $0x1f0] sm:$0xff]  ;;  %v4271_v5 = vld [vmem:[%s5413_s4 + $0x168] sm:$0xff]  ;;  %v4261_v10 = vld [vmem:[%s5413_s4 + $0x120] sm:$0xff]  ;;  %v664_v15 = vshrl.u32 %v4636_v36, 16 }
  0x1c   : > { %413 = vmatpush.bf16.msra.mxu0 %v4236_v19  ;;  %v333_v6 = vld [vmem:[%s4587_s11 + $0x8] sm:$0xf]  ;;  %v4270_v11 = vld [vmem:[%s5413_s4 + $0x160] sm:$0xff]  ;;  %v4260_v18 = vld [vmem:[%s5413_s4 + $0x118] sm:$0xff]  ;;  %v549_v26 = vor.u32 %v547_v14, %v545_v53 }
  0x1d   : > { %489 = vmatpush.bf16.msra.mxu1 %v4227_v20  ;;  %v314_v7 = vld [vmem:[%s4575_s28 + $0x8] sm:$0xf]  ;;  %v356_v12 = vunpack.c.l.b16 %v333_v6  ;;  %v4279_v16 = vld [vmem:[%s5413_s4 + $0x1a0] sm:$0xff]  ;;  %v4269_v19 = vld [vmem:[%s5413_s4 + $0x158] sm:$0xff]  ;;  %v666_v28 = vor.u32 %v664_v15, %v662_v55 }
  0x1e   : > { %604 = vmatpush.bf16.msra.mxu2 %v4244_v22  ;;  %v4280_v8 = vld [vmem:[%s5413_s4 + $0x1a8] sm:$0xff]  ;;  %v432_v13 = vunpack.c.l.b16 %v314_v7  ;;  %v4287_v17 = vld [vmem:[%s5413_s4 + $0x1e0] sm:$0xff]  ;;  %v4278_v29 = vld [vmem:[%s5413_s4 + $0x198] sm:$0xff] }
  0x1f   : > { %721 = vmatpush.bf16.msra.mxu3 %v4252_v23  ;;  %v4288_v9 = vld [vmem:[%s5413_s4 + $0x1e8] sm:$0xff]  ;;  %v358_v22 = vpack.c.b16 %v356_v12, %v356_v12  ;;  %v4268_v36 = vld [vmem:[%s5413_s4 + $0x150] sm:$0xff]  ;;  %v4751_v37 = vld [vmem:[%s4717_s24] sm:$0xff]  }
  0x20   : > { %414 = vmatpush.bf16.msra.mxu0 %v4235_v30  ;;  %v1034_v20 = vld [vmem:[%s4717_s24 + $0x8] sm:$0xf]  ;;  %v1035_v21 = vld [vmem:[%s4717_s24 + $0xc] sm:$0x1]  ;;  %v434_v23 = vpack.c.b16 %v432_v13, %v432_v13  ;;  %v4286_v30 = vld [vmem:[%s5413_s4 + $0x1d8] sm:$0xff] }
  0x21   : > { %490 = vmatpush.bf16.msra.mxu1 %v4226_v31  ;;  %v738_v31 = vld [vmem:[%s4575_s28] sm:$0xe]  ;;  %v4742_v32 = vunpack.c.l.b16 %v1034_v20  ;;  %v4277_v40 = vld [vmem:[%s5413_s4 + $0x190] sm:$0xff]  ;;  %v4267_v44 = vld [vmem:[%s5413_s4 + $0x148] sm:$0xff] }
  0x22   : > { %605 = vmatpush.bf16.msra.mxu2 %v4243_v33  ;;  %v1060_v33 = vunpack.c.l.b16 %v1035_v21  ;;  %v4285_v41 = vld [vmem:[%s5413_s4 + $0x1d0] sm:$0xff]  ;;  %v4276_v46 = vld [vmem:[%s5413_s4 + $0x188] sm:$0xff]  ;;  %v4266_v52 = vld [vmem:[%s5413_s4 + $0x140] sm:$0xff] }
  0x23   : > { %722 = vmatpush.bf16.msra.mxu3 %v4251_v34  ;;  %v4259_v34 = vld [vmem:[%s5413_s4 + $0x110] sm:$0xff]  ;;  %v4284_v47 = vld [vmem:[%s5413_s4 + $0x1c8] sm:$0xff]  ;;  %v4298_v53 = vld [vmem:[%s5413_s4 + $0x238] sm:$0xff] }
  0x24   : > { %415 = vmatpush.bf16.msra.mxu0 %v4234_v38  ;;  %v4754_v38 = vunpack.c.h.b16 %v4612_v24  ;;  %v4258_v24 = vld [vmem:[%s5413_s4 + $0x108] sm:$0xff]  ;;  %v4306_v54 = vld [vmem:[%s5413_s4 + $0x278] sm:$0xff]  ;;  %v4321_v6 = vld [vmem:[%s5413_s4 + $0x2f0] sm:$0xff] }
  0x25   : > { %491 = vmatpush.bf16.msra.mxu1 %v4225_v39  ;;  %v757_v39 = vunpack.c.l.b16 %v738_v31  ;;  %v4296_v7 = vld [vmem:[%s5413_s4 + $0x228] sm:$0xff]  ;;  %v4295_v12 = vld [vmem:[%s5413_s4 + $0x220] sm:$0xff]  ;;  %v4302_v21 = vld [vmem:[%s5413_s4 + $0x258] sm:$0xff] }
  0x26   : > { %606 = vmatpush.bf16.msra.mxu2 %v4242_v42  ;;  %v4763_v42 = vpack.c.b16 %v1060_v33, %v4742_v32  ;;  %v4303_v13 = vld [vmem:[%s5413_s4 + $0x260] sm:$0xff]  ;;  %v935_v14 = vld [vmem:[%s4804_s8 + $0x8] sm:$0xf]  ;;  %v4293_v33 = vld [vmem:[%s5413_s4 + $0x210] sm:$0xff] }
  0x27   : > { %723 = vmatpush.bf16.msra.mxu3 %v4250_v43  ;;  %v1066_v43 = vshll.u32 %v4751_v37, 16  ;;  %v758_v45 = vpack.c.b16 %v4754_v38, %v757_v39  ;;  %v4311_v15 = vld [vmem:[%s5413_s4 + $0x2a0] sm:$0xff] }
  0x28   : > { %416 = vmatpush.bf16.msra.mxu0 %v4233_v48  ;;  %v1064_v48 = vshrl.u32 %v4751_v37, 16  ;;  %v1075_v20 = vshrl.u32 %v4763_v42, 16 }
  0x29   : > { %492 = vmatpush.bf16.msra.mxu1 %v4224_v49  ;;  %v1068_v49 = vrot.slane %v1066_v43, 1  ;;  %v760_v55 = vrot.slane %v758_v45, 1  ;;  %v1266_v43 = vld [vmem:[%s4717_s24] sm:$0xe]  ;;  %v1362_v45 = vld [vmem:[%s4575_s28 + $0xc] sm:$0x7] }
  0x2a   : > { %607 = vmatpush.bf16.msra.mxu2 %v4241_v50  ;;  %v1071_v50 = vshll.u32 %v4763_v42, 16 }
  0x2b   : > { %724 = vmatpush.bf16.msra.mxu3 %v4249_v51  ;;  %417 = vmatmul.bf16.vlgmr.msra.gmra.mxu0 %v4232_v58  ;;  %v4257_v51 = vld [vmem:[%s5413_s4 + $0x100] sm:$0xff] }
  0x2c   : > { %813 = vmatpush.bf16.msrb.mxu0 %v4264_v56  ;;  %493 = vmatmul.bf16.vlgmr.msra.gmra.mxu1 %v4223_v59  ;;  %v761_v56 = vrot.slane %v4633_v35, 1  ;;  %v4283_v58 = vld [vmem:[%s5413_s4 + $0x1c0] sm:$0xff]  ;;  %v1069_v59 = vor.u32 %v1068_v49, %v1064_v48  ;;  %v4300_v35 = vld [vmem:[%s5413_s4 + $0x248] sm:$0xff] }
  0x2d   : > { %912 = vmatpush.bf16.msrb.mxu1 %v4273_v57  ;;  %608 = vmatmul.bf16.vlgmr.msra.gmra.mxu2 %v546_v60  ;;  %v4275_v57 = vld [vmem:[%s5413_s4 + $0x180] sm:$0xff]  ;;  %v1073_v60 = vrot.slane %v1071_v50, 1  ;;  %v1285_v50 = vunpack.c.l.b16 %v1266_v43  ;;  %v1670_v43 = vld [vmem:[%s4587_s11 + $0xc] sm:$0xf] }
  0x2e   : > { %725 = vmatmul.bf16.vlgmr.msra.gmra.mxu3 %v663_v62  ;;  %1011 = vmatpush.bf16.msrb.mxu2 %v4282_v61  ;;  %v4314_v61 = vld [vmem:[%s5413_s4 + $0x2b8] sm:$0xff] }
  0x2f   : > { %1128 = vmatpush.bf16.msrb.mxu3 %v4290_v63  ;;  %v4322_v62 = vld [vmem:[%s5413_s4 + $0x2f8] sm:$0xff]  ;;  %v4265_v63 = vld [vmem:[%s4717_s24] sm:$0xff]  ;;  %v1077_v31 = vor.u32 %v1075_v20, %v1073_v60 }
  0x30   : > { %814 = vmatpush.bf16.msrb.mxu0 %v4263_v0  ;;  %v762_v0 = vsel %vm759_vm1, %v760_v55, %v761_v56  ;;  %v4316_v55 = vld [vmem:[%s5413_s4 + $0x2c8] sm:$0xff] }
  0x31   : > { %913 = vmatpush.bf16.msrb.mxu1 %v4272_v1  ;;  %v4274_v1 = vld [vmem:[%s4804_s8] sm:$0xff] }
  0x32   : > { %1012 = vmatpush.bf16.msrb.mxu2 %v4281_v2  ;;  %v1074_v2 = vsel %vm534_vm0, %v1069_v59, %v1073_v60 }
  0x33   : > { %1129 = vmatpush.bf16.msrb.mxu3 %v4289_v3  ;;  %v4297_v3 = vld [vmem:[%s5413_s4 + $0x230] sm:$0xff] }
  0x34   : > { %815 = vmatpush.bf16.msrb.mxu0 %v4262_v4  ;;  %v4305_v4 = vld [vmem:[%s5413_s4 + $0x270] sm:$0xff] }
  0x35   : > { %914 = vmatpush.bf16.msrb.mxu1 %v4271_v5  ;;  %v4313_v5 = vld [vmem:[%s5413_s4 + $0x2b0] sm:$0xff] }
  0x36   : > { %1013 = vmatpush.bf16.msrb.mxu2 %v4280_v8  ;;  %v4304_v8 = vld [vmem:[%s5413_s4 + $0x268] sm:$0xff] }
  0x37   : > { %1130 = vmatpush.bf16.msrb.mxu3 %v4288_v9  ;;  %v4312_v9 = vld [vmem:[%s5413_s4 + $0x2a8] sm:$0xff] }
  0x38   : > { %816 = vmatpush.bf16.msrb.mxu0 %v4261_v10  ;;  %v4320_v10 = vld [vmem:[%s5413_s4 + $0x2e8] sm:$0xff] }
  0x39   : > { %915 = vmatpush.bf16.msrb.mxu1 %v4270_v11  ;;  %v836_v11 = vld [vmem:[%s4717_s24 + $0x8] sm:$0xf] }
  0x3a   : > { %1014 = vmatpush.bf16.msrb.mxu2 %v4279_v16  ;;  %v4319_v16 = vld [vmem:[%s5413_s4 + $0x2e0] sm:$0xff] }
  0x3b   : > { %1131 = vmatpush.bf16.msrb.mxu3 %v4287_v17  ;;  %422 = vmatmul.bf16.gmra.mxu0 %v358_v22  ;;  %v859_v17 = vunpack.c.l.b16 %v836_v11  ;;  %v4864_v22 = vld [vmem:[%s4804_s8 + $0x8] sm:$0xff]   ;;  %v1288_v11 = vrot.slane %v4763_v42, 1 }
  0x3c   : > { %817 = vmatpush.bf16.msrb.mxu0 %v4260_v18  ;;  %498 = vmatmul.bf16.gmra.mxu1 %v434_v23  ;;  %v958_v18 = vunpack.c.l.b16 %v935_v14  ;;  %v1152_v23 = vld [vmem:[%s4804_s8 + $0xc] sm:$0x1]  ;;  %v1176_v39 = vunpack.c.l.b16 %v4864_v22 }
  0x3d   : > { %916 = vmatpush.bf16.msrb.mxu1 %v4269_v19  ;;  %613 = vmatmul.bf16.gmra.mxu2 %v549_v26  ;;  %v4294_v19 = vld [vmem:[%s5413_s4 + $0x218] sm:$0xff]  ;;  %v4324_v42 = vld [vmem:[%s5413_s4 + $0x308] sm:$0xff] }
  0x3e   : > { %730 = vmatmul.bf16.gmra.mxu3 %v666_v28  ;;  %1015 = vmatpush.bf16.msrb.mxu2 %v4278_v29  ;;  %v4310_v26 = vld [vmem:[%s5413_s4 + $0x298] sm:$0xff]  ;;  %v861_v29 = vpack.c.b16 %v859_v17, %v859_v17 }
  0x3f   : > { %1132 = vmatpush.bf16.msrb.mxu3 %v4286_v30  ;;  %v4318_v28 = vld [vmem:[%s5413_s4 + $0x2d8] sm:$0xff]  ;;  %v960_v30 = vpack.c.b16 %v958_v18, %v958_v18 }
  0x40   : > { %818 = vmatpush.bf16.msrb.mxu0 %v4259_v34  ;;  %v4301_v34 = vld [vmem:[%s5413_s4 + $0x250] sm:$0xff] }
  0x41   : > { %917 = vmatpush.bf16.msrb.mxu1 %v4268_v36  ;;  %v4309_v36 = vld [vmem:[%s5413_s4 + $0x290] sm:$0xff] }
  0x42   : > { %1016 = vmatpush.bf16.msrb.mxu2 %v4277_v40  ;;  %v1177_v40 = vunpack.c.l.b16 %v1152_v23  ;;  %v4329_v23 = vld [vmem:[%s5413_s4 + $0x330] sm:$0xff] }
  0x43   : > { %1133 = vmatpush.bf16.msrb.mxu3 %v4285_v41  ;;  %v4441_v41 = vld [vmem:[%s4804_s8] sm:$0xff]  }
  0x44   : > { %819 = vmatpush.bf16.msrb.mxu0 %v4258_v24  ;;  %v1361_v24 = vld [vmem:[%s4575_s28] sm:$0x8]  ;;  %v4898_v48 = vpack.c.b16 %v1177_v40, %v1176_v39  ;;  %v1183_v49 = vshll.u32 %v4441_v41, 16 }
  0x45   : > { %918 = vmatpush.bf16.msrb.mxu1 %v4267_v44  ;;  %v4317_v44 = vld [vmem:[%s5413_s4 + $0x2d0] sm:$0xff]  ;;  %v4327_v40 = vld [vmem:[%s5413_s4 + $0x320] sm:$0xff] }
  0x46   : > { %1017 = vmatpush.bf16.msrb.mxu2 %v4276_v46  ;;  %v1462_v46 = vld [vmem:[%s4587_s11 + $0xc] sm:$0x7]  ;;  %v1185_v59 = vrot.slane %v1183_v49, 1  ;;  %v1188_v60 = vshll.u32 %v4898_v48, 16  ;;  %v1689_v49 = vunpack.c.l.b16 %v1670_v43 }
  0x47   : > { %1134 = vmatpush.bf16.msrb.mxu3 %v4284_v47  ;;  %v4892_v47 = vunpack.c.h.b16 %v4751_v37  ;;  %v4292_v37 = vld [vmem:[%s5413_s4 + $0x208] sm:$0xff] }
  0x48   : > { %820 = vmatpush.bf16.msrb.mxu0 %v4257_v51  ;;  %v1382_v51 = vunpack.c.l.b16 %v1361_v24  ;;  %v4343_v24 = vld [vmem:[%s5413_s4 + $0x3a0] sm:$0xff] }
  0x49   : > { %919 = vmatpush.bf16.msrb.mxu1 %v4266_v52  ;;  %v4308_v52 = vld [vmem:[%s5413_s4 + $0x288] sm:$0xff] }
  0x4a   : > { %1018 = vmatpush.bf16.msrb.mxu2 %v4275_v57  ;;  %v4454_v57 = vld [vmem:[%s4587_s11] sm:$0x8] }
  0x4b   : > { %1135 = vmatpush.bf16.msrb.mxu3 %v4283_v58  ;;  %821 = vmatmul.bf16.vlgmr.msrb.gmra.mxu0 %v762_v0  ;;  %v1181_v58 = vshrl.u32 %v4441_v41, 16  ;;  %v4299_v0 = vld [vmem:[%s5413_s4 + $0x240] sm:$0xff] }
  0x4c   : > { %1245 = vmatpush.bf16.msra.mxu0 %v4298_v53  ;;  %920 = vmatmul.bf16.vlgmr.msrb.gmra.mxu1 %v4265_v63  ;;  %v1383_v53 = vunpack.c.l.b16 %v1362_v45  ;;  %v4291_v63 = vld [vmem:[%s5413_s4 + $0x200] sm:$0xff]  ;;  %v1192_v45 = vshrl.u32 %v4898_v48, 16  ;;  %v4342_v48 = vld [vmem:[%s5413_s4 + $0x398] sm:$0xff] }
  0x4d   : > { %1340 = vmatpush.bf16.msra.mxu1 %v4306_v54  ;;  %1019 = vmatmul.bf16.vlgmr.msrb.gmra.mxu2 %v4274_v1  ;;  %v1483_v54 = vunpack.c.l.b16 %v1462_v46  ;;  %v4335_v41 = vld [vmem:[%s5413_s4 + $0x360] sm:$0xff] }
  0x4e   : > { %1440 = vmatpush.bf16.msra.mxu2 %v4314_v61  ;;  %1136 = vmatmul.bf16.vlgmr.msrb.gmra.mxu3 %v1074_v2  ;;  %v1286_v61 = vpack.c.b16 %v4892_v47, %v1285_v50  ;;  %v4926_v1 = vpack.c.b16 %v1383_v53, %v4614_v25  ;;  %v4326_v50 = vld [vmem:[%s5413_s4 + $0x318] sm:$0xff]  ;;  %v1690_v53 = vpack.c.b16 %v1689_v49, %v4616_v27  ;;  %v4369_v49 = vld [vmem:[%s5413_s4 + $0x470] sm:$0xff] }
  0x4f   : > { %1539 = vmatpush.bf16.msra.mxu3 %v4322_v62  ;;  %v4917_v62 = vpack.c.b16 %v4754_v38, %v1382_v51  ;;  %v4334_v51 = vld [vmem:[%s5413_s4 + $0x358] sm:$0xff] }
  0x50   : > { %1246 = vmatpush.bf16.msra.mxu0 %v4297_v3  ;;  %v4931_v3 = vpack.c.b16 %v1483_v54, %v4616_v27  ;;  %v4325_v54 = vld [vmem:[%s5413_s4 + $0x310] sm:$0xff] }
  0x51   : > { %1341 = vmatpush.bf16.msra.mxu1 %v4305_v4  ;;  %v4307_v4 = vld [vmem:[%s5413_s4 + $0x280] sm:$0xff]  ;;  %v1387_v14 = vrot.slane %v4917_v62, 3  ;;  %v4349_v27 = vld [vmem:[%s5413_s4 + $0x3d0] sm:$0xff] }
  0x52   : > { %1441 = vmatpush.bf16.msra.mxu2 %v4313_v5  ;;  %v4315_v5 = vld [vmem:[%s5413_s4 + $0x2c0] sm:$0xff]  ;;  %v1487_v17 = vrot.slane %v4931_v3, 3  ;;  %v4348_v3 = vld [vmem:[%s5413_s4 + $0x3c8] sm:$0xff] }
  0x53   : > { %1540 = vmatpush.bf16.msra.mxu3 %v4321_v6  ;;  %v4330_v6 = vld [vmem:[%s5413_s4 + $0x338] sm:$0xff] }
  0x54   : > { %1247 = vmatpush.bf16.msra.mxu0 %v4296_v7  ;;  %v4338_v7 = vld [vmem:[%s5413_s4 + $0x378] sm:$0xff] }
  0x55   : > { %1342 = vmatpush.bf16.msra.mxu1 %v4304_v8  ;;  %v1186_v8 = vor.u32 %v1185_v59, %v1181_v58  ;;  %v1870_v58 = vld [vmem:[%s4717_s24 + $0xc] sm:$0x7]  ;;  %v1583_v59 = vshrl.u32 %v4917_v62, 16 }
  0x56   : > { %1442 = vmatpush.bf16.msra.mxu2 %v4312_v9  ;;  %v1190_v9 = vrot.slane %v1188_v60, 1  ;;  %v1586_v60 = vshll.u32 %v4917_v62, 16  ;;  %v4332_v62 = vld [vmem:[%s5413_s4 + $0x348] sm:$0xff] }
  0x57   : > { %1541 = vmatpush.bf16.msra.mxu3 %v4320_v10  ;;  %v1287_v10 = vrot.slane %v1286_v61, 1 }
  0x58   : > { %1248 = vmatpush.bf16.msra.mxu0 %v4295_v12  ;;  %v4346_v12 = vld [vmem:[%s5413_s4 + $0x3b8] sm:$0xff]  ;;  %v1191_v18 = vsel %vm534_vm0, %v1186_v8, %v1190_v9  ;;  %v1585_v8 = vrot.slane %v1583_v59, 3 }
  0x59   : > { %1343 = vmatpush.bf16.msra.mxu1 %v4303_v13  ;;  %v4354_v13 = vld [vmem:[%s5413_s4 + $0x3f8] sm:$0xff] }
  0x5a   : > { %1443 = vmatpush.bf16.msra.mxu2 %v4311_v15  ;;  %v1388_v15 = vrot.slane %v4926_v1, 3  ;;  %v4382_v59 = vld [vmem:[%s5413_s4 + $0x4d8] sm:$0xff] }
  0x5b   : > { %1542 = vmatpush.bf16.msra.mxu3 %v4319_v16  ;;  %826 = vmatmul.bf16.gmra.mxu0 %v761_v56  ;;  %v4453_v56 = vld [vmem:[%s4587_s11] sm:$0xf0] }
  0x5c   : > { %1249 = vmatpush.bf16.msra.mxu0 %v4294_v19  ;;  %925 = vmatmul.bf16.gmra.mxu1 %v861_v29  ;;  %v4928_v2 = vor.u32 %v4454_v57, %v4453_v56  ;;  %v1289_v19 = vsel %vm759_vm1, %v1287_v10, %v1288_v11  ;;  %v1389_v20 = vsel %vm1386_vm2, %v1387_v14, %v1388_v15  ;;  %v4353_v29 = vld [vmem:[%s5413_s4 + $0x3f0] sm:$0xff]  ;;  %v1869_v57 = vld [vmem:[%s4717_s24] sm:$0x8] }
  0x5d   : > { %1344 = vmatpush.bf16.msra.mxu1 %v4302_v21  ;;  %1024 = vmatmul.bf16.gmra.mxu2 %v960_v30  ;;  %v4328_v30 = vld [vmem:[%s5413_s4 + $0x328] sm:$0xff]  ;;  %v4341_v56 = vld [vmem:[%s5413_s4 + $0x390] sm:$0xff]  ;;  %v1890_v1 = vunpack.c.l.b16 %v1869_v57  ;;  %v4366_v57 = vld [vmem:[%s5413_s4 + $0x458] sm:$0xff] }
  0x5e   : > { %1444 = vmatpush.bf16.msra.mxu2 %v4310_v26  ;;  %1141 = vmatmul.bf16.gmra.mxu3 %v1077_v31  ;;  %v1486_v16 = vrot.slane %v4928_v2, 3  ;;  %v4337_v26 = vld [vmem:[%s5413_s4 + $0x370] sm:$0xff]  ;;  %v4336_v31 = vld [vmem:[%s5413_s4 + $0x368] sm:$0xff] }
  0x5f   : > { %1543 = vmatpush.bf16.msra.mxu3 %v4318_v28  ;;  %v4345_v28 = vld [vmem:[%s5413_s4 + $0x3b0] sm:$0xff] }
  0x60   : > { %1250 = vmatpush.bf16.msra.mxu0 %v4293_v33  ;;  %v1488_v21 = vsel %vm1386_vm2, %v1486_v16, %v1487_v17  ;;  %v4344_v33 = vld [vmem:[%s5413_s4 + $0x3a8] sm:$0xff]  ;;  %v4323_v16 = vld [vmem:[%s5413_s4 + $0x300] sm:$0xff] }
  0x61   : > { %1345 = vmatpush.bf16.msra.mxu1 %v4301_v34  ;;  %v4352_v34 = vld [vmem:[%s5413_s4 + $0x3e8] sm:$0xff] }
  0x62   : > { %1445 = vmatpush.bf16.msra.mxu2 %v4309_v36  ;;  %v1560_v36 = vld [vmem:[%s4575_s28 + $0xc] sm:$0xf] }
  0x63   : > { %1544 = vmatpush.bf16.msra.mxu3 %v4317_v44  ;;  %v4351_v44 = vld [vmem:[%s5413_s4 + $0x3e0] sm:$0xff]  ;;  %v5005_v46 = vunpack.c.l.b16 %v1560_v36 }
  0x64   : > { %1251 = vmatpush.bf16.msra.mxu0 %v4292_v37  ;;  %v4350_v37 = vld [vmem:[%s5413_s4 + $0x3d8] sm:$0xff] }
  0x65   : > { %1346 = vmatpush.bf16.msra.mxu1 %v4300_v35  ;;  %v1194_v35 = vor.u32 %v1192_v45, %v1190_v9  ;;  %v1588_v9 = vrot.slane %v1586_v60, 4  ;;  %v4361_v45 = vld [vmem:[%s5413_s4 + $0x430] sm:$0xff]  ;;  %v4456_v60 = vld [vmem:[%s4804_s8] sm:$0xf0] }
  0x66   : > { %1446 = vmatpush.bf16.msra.mxu2 %v4308_v52  ;;  %v1580_v52 = vpack.c.b16 %v5005_v46, %v4614_v25 }
  0x67   : > { %1545 = vmatpush.bf16.msra.mxu3 %v4316_v55  ;;  %v4333_v55 = vld [vmem:[%s5413_s4 + $0x350] sm:$0xff] }
  0x68   : > { %1252 = vmatpush.bf16.msra.mxu0 %v4291_v63  ;;  %v1591_v61 = vshrl.u32 %v1580_v52, 16  ;;  %v1594_v63 = vshll.u32 %v1580_v52, 16  ;;  %v4367_v52 = vld [vmem:[%s5413_s4 + $0x460] sm:$0xff] }
  0x69   : > { %1347 = vmatpush.bf16.msra.mxu1 %v4299_v0  ;;  %v1692_v0 = vshrl.u32 %v4928_v2, 16 }
  0x6a   : > { %1447 = vmatpush.bf16.msra.mxu2 %v4307_v4  ;;  %v1695_v4 = vshll.u32 %v4928_v2, 16  ;;  %v4340_v2 = vld [vmem:[%s5413_s4 + $0x388] sm:$0xff]  ;;  %v1593_v10 = vrot.slane %v1591_v61, 3  ;;  %v4457_v61 = vld [vmem:[%s4804_s8] sm:$0x8] }
  0x6b   : > { %1546 = vmatpush.bf16.msra.mxu3 %v4315_v5  ;;  %1253 = vmatmul.bf16.vlgmr.msra.gmra.mxu0 %v1191_v18  ;;  %v1700_v5 = vshrl.u32 %v1690_v53, 16  ;;  %v5065_v18 = vpack.c.b16 %v4892_v47, %v1890_v1 }
  0x6c   : > { %1649 = vmatpush.bf16.msrb.mxu0 %v4330_v6  ;;  %1348 = vmatmul.bf16.vlgmr.msra.gmra.mxu1 %v1289_v19  ;;  %v1703_v6 = vshll.u32 %v1690_v53, 16  ;;  %v2067_v53 = vld [vmem:[%s4717_s24 + $0xc] sm:$0xf] }
  0x6d   : > { %1758 = vmatpush.bf16.msrb.mxu1 %v4338_v7  ;;  %1448 = vmatmul.bf16.vlgmr.msra.gmra.mxu2 %v1389_v20  ;;  %v1891_v7 = vunpack.c.l.b16 %v1870_v58  ;;  %v1702_v14 = vrot.slane %v1700_v5, 3  ;;  %v4339_v20 = vld [vmem:[%s5413_s4 + $0x380] sm:$0xff]  ;;  %v1894_v36 = vrot.slane %v5065_v18, 3  ;;  %v4374_v58 = vld [vmem:[%s5413_s4 + $0x498] sm:$0xff]  ;;  %v4357_v5 = vld [vmem:[%s5413_s4 + $0x410] sm:$0xff] }
  0x6e   : > { %1848 = vmatpush.bf16.msrb.mxu2 %v4346_v12  ;;  %1547 = vmatmul.bf16.vlgmr.msra.gmra.mxu3 %v1488_v21  ;;  %v1694_v12 = vrot.slane %v1692_v0, 3  ;;  %v4347_v21 = vld [vmem:[%s5413_s4 + $0x3c0] sm:$0xff]  ;;  %v1969_v0 = vld [vmem:[%s4804_s8 + $0xc] sm:$0x7]  ;;  %s311_s8 = scalar_lea.vmem %s5415_s6, %s4469_s15 }
  0x6f   : > { %1947 = vmatpush.bf16.msrb.mxu3 %v4354_v13  ;;  %v1697_v13 = vrot.slane %v1695_v4, 4  ;;  %v5068_v19 = vpack.c.b16 %v1891_v7, %v4742_v32  ;;  %v1990_v1 = vunpack.c.l.b16 %v1969_v0  ;;  %v2089_v7 = vshrl.u32 %v5065_v18, 16  ;;  %v4391_v0 = vld [vmem:[%s5413_s4 + $0x520] sm:$0xff] }
  0x70   : > { %1650 = vmatpush.bf16.msrb.mxu0 %v4329_v23  ;;  %v4362_v23 = vld [vmem:[%s5413_s4 + $0x438] sm:$0xff] }
  0x71   : > { %1759 = vmatpush.bf16.msrb.mxu1 %v4337_v26  ;;  %v4370_v26 = vld [vmem:[%s5413_s4 + $0x478] sm:$0xff] }
  0x72   : > { %1849 = vmatpush.bf16.msrb.mxu2 %v4345_v28  ;;  %v1589_v28 = vor.u32 %v1588_v9, %v1585_v8  ;;  %v4356_v9 = vld [vmem:[%s5413_s4 + $0x408] sm:$0xff] }
  0x73   : > { %1948 = vmatpush.bf16.msrb.mxu3 %v4353_v29 }
  0x74   : > { %1651 = vmatpush.bf16.msrb.mxu0 %v4328_v30  ;;  %v1698_v30 = vor.u32 %v1697_v13, %v1694_v12  ;;  %v2206_v13 = vshrl.u32 %v4864_v22, 16 }
  0x75   : > { %1760 = vmatpush.bf16.msrb.mxu1 %v4336_v31 }
  0x76   : > { %1850 = vmatpush.bf16.msrb.mxu2 %v4344_v33  ;;  %v4378_v33 = vld [vmem:[%s5413_s4 + $0x4b8] sm:$0xff] }
  0x77   : > { %1949 = vmatpush.bf16.msrb.mxu3 %v4352_v34  ;;  %v4386_v34 = vld [vmem:[%s5413_s4 + $0x4f8] sm:$0xff] }
  0x78   : > { %1652 = vmatpush.bf16.msrb.mxu0 %v4327_v40  ;;  %v1895_v40 = vrot.slane %v5068_v19, 3 }
  0x79   : > { %1761 = vmatpush.bf16.msrb.mxu1 %v4335_v41 }
  0x7a   : > { %1851 = vmatpush.bf16.msrb.mxu2 %v4343_v24  ;;  %v1796_v24 = vpack.c.b16 %v4614_v25, %v4754_v38  ;;  %v4385_v25 = vld [vmem:[%s5413_s4 + $0x4f0] sm:$0xff]  ;;  %v4360_v38 = vld [vmem:[%s5413_s4 + $0x428] sm:$0xff] }
  0x7b   : > { %1950 = vmatpush.bf16.msrb.mxu3 %v4351_v44  ;;  %1258 = vmatmul.bf16.gmra.mxu0 %v1194_v35  ;;  %v1896_v44 = vsel %vm1386_vm2, %v1894_v36, %v1895_v40  ;;  %v4359_v35 = vld [vmem:[%s5413_s4 + $0x420] sm:$0xff] }
  0x7c   : > { %1653 = vmatpush.bf16.msrb.mxu0 %v4326_v50  ;;  %1353 = vmatmul.bf16.gmra.mxu1 %v1288_v11  ;;  %v1596_v11 = vrot.slane %v1594_v63, 4  ;;  %v4377_v50 = vld [vmem:[%s5413_s4 + $0x4b0] sm:$0xff]  ;;  %v1797_v63 = vpack.c.b16 %v5005_v46, %v5005_v46 }
  0x7d   : > { %1762 = vmatpush.bf16.msrb.mxu1 %v4334_v51  ;;  %1453 = vmatmul.bf16.gmra.mxu2 %v1388_v15  ;;  %v1705_v15 = vrot.slane %v1703_v6, 4  ;;  %v4368_v51 = vld [vmem:[%s5413_s4 + $0x468] sm:$0xff]  ;;  %v4365_v6 = vld [vmem:[%s5413_s4 + $0x450] sm:$0xff] }
  0x7e   : > { %1852 = vmatpush.bf16.msrb.mxu2 %v4342_v48  ;;  %1552 = vmatmul.bf16.gmra.mxu3 %v1487_v17  ;;  %v4331_v17 = vld [vmem:[%s5413_s4 + $0x340] sm:$0xff]  ;;  %v5082_v29 = vor.u32 %v1596_v11, %v1593_v10  ;;  %v4376_v48 = vld [vmem:[%s5413_s4 + $0x4a8] sm:$0xff]  ;;  %v4373_v46 = vld [vmem:[%s5413_s4 + $0x490] sm:$0xff] }
  0x7f   : > { %1951 = vmatpush.bf16.msrb.mxu3 %v4350_v37  ;;  %v5084_v31 = vor.u32 %v1705_v15, %v1702_v14  ;;  %v4384_v37 = vld [vmem:[%s5413_s4 + $0x4e8] sm:$0xff]  ;;  %v2209_v14 = vshll.u32 %v4864_v22, 16 }
  0x80   : > { %1654 = vmatpush.bf16.msrb.mxu0 %v4325_v54  ;;  %v1598_v41 = vsel %vm1581_vm3, %v1589_v28, %v5082_v29  ;;  %v4375_v54 = vld [vmem:[%s5413_s4 + $0x4a0] sm:$0xff]  ;;  %v4364_v10 = vld [vmem:[%s5413_s4 + $0x448] sm:$0xff] }
  0x81   : > { %1763 = vmatpush.bf16.msrb.mxu1 %v4333_v55  ;;  %v1707_v43 = vsel %vm1581_vm3, %v1698_v30, %v5084_v31  ;;  %v4383_v55 = vld [vmem:[%s5413_s4 + $0x4e0] sm:$0xff]  ;;  %v4372_v15 = vld [vmem:[%s5413_s4 + $0x488] sm:$0xff]  ;;  %v2208_v30 = vrot.slane %v2206_v13, 3  ;;  %v2211_v22 = vrot.slane %v2209_v14, 4  ;;  %v4399_v13 = vld [vmem:[%s5413_s4 + $0x558] sm:$0xff] }
  0x82   : > { %1853 = vmatpush.bf16.msrb.mxu2 %v4341_v56  ;;  %v5138_v56 = vunpack.c.l.b16 %v2067_v53  ;;  %v4402_v53 = vld [vmem:[%s5413_s4 + $0x570] sm:$0xff]  ;;  %v4407_v14 = vld [vmem:[%s5413_s4 + $0x598] sm:$0xff] }
  0x83   : > { %1952 = vmatpush.bf16.msrb.mxu3 %v4349_v27  ;;  %v4358_v27 = vld [vmem:[%s5413_s4 + $0x418] sm:$0xff] }
  0x84   : > { %1655 = vmatpush.bf16.msrb.mxu0 %v4324_v42  ;;  %v2087_v4 = vpack.c.b16 %v5138_v56, %v4742_v32  ;;  %v5165_v42 = vor.u32 %v4457_v61, %v4456_v60 }
  0x85   : > { %1764 = vmatpush.bf16.msrb.mxu1 %v4332_v62  ;;  %v4381_v62 = vld [vmem:[%s5413_s4 + $0x4d0] sm:$0xff] }
  0x86   : > { %1854 = vmatpush.bf16.msrb.mxu2 %v4340_v2  ;;  %v2092_v2 = vshll.u32 %v5065_v18, 16  ;;  %v2100_v8 = vshll.u32 %v2087_v4, 16  ;;  %v2198_v11 = vshrl.u32 %v5165_v42, 16  ;;  %v2201_v12 = vshll.u32 %v5165_v42, 16 }
  0x87   : > { %1953 = vmatpush.bf16.msrb.mxu3 %v4348_v3  ;;  %v2097_v3 = vshrl.u32 %v2087_v4, 16  ;;  %v2091_v18 = vrot.slane %v2089_v7, 3  ;;  %v1993_v36 = vrot.slane %v5165_v42, 3  ;;  %v2375_v4 = vld [vmem:[%s4575_s28 + $0x4] sm:$0xc] }
  0x88   : > { %1656 = vmatpush.bf16.msrb.mxu0 %v4323_v16  ;;  %v4380_v16 = vld [vmem:[%s5413_s4 + $0x4c8] sm:$0xff]  ;;  %v2094_v19 = vrot.slane %v2092_v2, 4  ;;  %v2200_v28 = vrot.slane %v2198_v11, 3  ;;  %v4400_v42 = vld [vmem:[%s5413_s4 + $0x560] sm:$0xff] }
  0x89   : > { %1765 = vmatpush.bf16.msrb.mxu1 %v4331_v17  ;;  %v5195_v17 = vpack.c.b16 %v1990_v1, %v1176_v39  ;;  %v4371_v39 = vld [vmem:[%s5413_s4 + $0x480] sm:$0xff]  ;;  %v5280_v2 = vld [vmem:[%s4587_s11 + $0xc] sm:$0xf] }
  0x8a   : > { %1855 = vmatpush.bf16.msrb.mxu2 %v4339_v20  ;;  %v2099_v20 = vrot.slane %v2097_v3, 3  ;;  %v4416_v7 = vld [vmem:[%s5413_s4 + $0x5e0] sm:$0xff]  ;;  %v2696_v3 = vld [vmem:[%s4587_s11 + $0x10] sm:$0x7] }
  0x8b   : > { %1954 = vmatpush.bf16.msrb.mxu3 %v4347_v21  ;;  %1657 = vmatmul.bf16.vlgmr.msrb.gmra.mxu0 %v1598_v41  ;;  %v2102_v21 = vrot.slane %v2100_v8, 4  ;;  %v2095_v41 = vor.u32 %v2094_v19, %v2091_v18  ;;  %v4415_v18 = vld [vmem:[%s5413_s4 + $0x5d8] sm:$0xff]  ;;  %v4043_v19 = vld [vmem:[%s4587_s11 + $0x4] sm:$0xc] }
  0x8c   : > { %2046 = vmatpush.bf16.msra.mxu0 %v4362_v23  ;;  %1766 = vmatmul.bf16.vlgmr.msrb.gmra.mxu1 %v1707_v43  ;;  %v4355_v23 = vld [vmem:[%s5413_s4 + $0x400] sm:$0xff] }
  0x8d   : > { %2155 = vmatpush.bf16.msra.mxu1 %v4370_v26  ;;  %1856 = vmatmul.bf16.vlgmr.msrb.gmra.mxu2 %v1796_v24  ;;  %v4363_v26 = vld [vmem:[%s5413_s4 + $0x440] sm:$0xff]  ;;  %v5217_v43 = vor.u32 %v2102_v21, %v2099_v20  ;;  %v4411_v24 = vld [vmem:[%s5413_s4 + $0x5b8] sm:$0xff]  ;;  %v4395_v20 = vld [vmem:[%s4587_s11 + $0x4] sm:$0xf0] }
  0x8e   : > { %2264 = vmatpush.bf16.msra.mxu2 %v4378_v33  ;;  %1955 = vmatmul.bf16.vlgmr.msrb.gmra.mxu3 %v1896_v44  ;;  %v4394_v33 = vld [vmem:[%s5413_s4 + $0x538] sm:$0xff] }
  0x8f   : > { %2354 = vmatpush.bf16.msra.mxu3 %v4386_v34  ;;  %v4403_v34 = vld [vmem:[%s5413_s4 + $0x578] sm:$0xff] }
  0x90   : > { %2047 = vmatpush.bf16.msra.mxu0 %v4361_v45  ;;  %v4419_v44 = vld [vmem:[%s5413_s4 + $0x5f8] sm:$0xff] }
  0x91   : > { %2156 = vmatpush.bf16.msra.mxu1 %v4369_v49  ;;  %v5225_v49 = vor.u32 %v2211_v22, %v2208_v30  ;;  %v2303_v22 = vpack.c.b16 %v5138_v56, %v5138_v56  ;;  %v4406_v56 = vld [vmem:[%s5413_s4 + $0x590] sm:$0xff] }
  0x92   : > { %2265 = vmatpush.bf16.msra.mxu2 %v4377_v50 }
  0x93   : > { %2355 = vmatpush.bf16.msra.mxu3 %v4385_v25 }
  0x94   : > { %2048 = vmatpush.bf16.msra.mxu0 %v4360_v38 }
  0x95   : > { %2157 = vmatpush.bf16.msra.mxu1 %v4368_v51  ;;  %v2104_v51 = vsel %vm1581_vm3, %v2095_v41, %v5217_v43  ;;  %v2484_v41 = vld [vmem:[%s4587_s11 + $0x10] sm:$0x3] }
  0x96   : > { %2266 = vmatpush.bf16.msra.mxu2 %v4376_v48  ;;  %v2302_v48 = vpack.c.b16 %v4742_v32, %v4892_v47  ;;  %v4418_v32 = vld [vmem:[%s5413_s4 + $0x5f0] sm:$0xff]  ;;  %v4392_v47 = vld [vmem:[%s5413_s4 + $0x528] sm:$0xff] }
  0x97   : > { %2356 = vmatpush.bf16.msra.mxu3 %v4384_v37 }
  0x98   : > { %2049 = vmatpush.bf16.msra.mxu0 %v4359_v35 }
  0x99   : > { %2158 = vmatpush.bf16.msra.mxu1 %v4367_v52  ;;  %v4393_v52 = vld [vmem:[%s5413_s4 + $0x530] sm:$0xff] }
  0x9a   : > { %2267 = vmatpush.bf16.msra.mxu2 %v4375_v54  ;;  %v4410_v54 = vld [vmem:[%s5413_s4 + $0x5b0] sm:$0xff] }
  0x9b   : > { %2357 = vmatpush.bf16.msra.mxu3 %v4383_v55  ;;  %1662 = vmatmul.bf16.gmra.mxu0 %v5082_v29  ;;  %v2203_v29 = vrot.slane %v2201_v12, 4  ;;  %v4401_v55 = vld [vmem:[%s5413_s4 + $0x568] sm:$0xff]  ;;  %v4390_v12 = vld [vmem:[%s5413_s4 + $0x518] sm:$0xff] }
  0x9c   : > { %2050 = vmatpush.bf16.msra.mxu0 %v4358_v27  ;;  %1771 = vmatmul.bf16.gmra.mxu1 %v5084_v31  ;;  %v4379_v31 = vld [vmem:[%s5413_s4 + $0x4c0] sm:$0xff]  ;;  %v4409_v27 = vld [vmem:[%s5413_s4 + $0x5a8] sm:$0xff] }
  0x9d   : > { %2159 = vmatpush.bf16.msra.mxu1 %v4366_v57  ;;  %1861 = vmatmul.bf16.gmra.mxu2 %v1797_v63  ;;  %v2204_v45 = vor.u32 %v2203_v29, %v2200_v28  ;;  %v4417_v57 = vld [vmem:[%s5413_s4 + $0x5e8] sm:$0xff] }
  0x9e   : > { %2268 = vmatpush.bf16.msra.mxu2 %v4374_v58  ;;  %1960 = vmatmul.bf16.gmra.mxu3 %v1895_v40  ;;  %v1994_v40 = vrot.slane %v5195_v17, 3  ;;  %v4388_v17 = vld [vmem:[%s5413_s4 + $0x508] sm:$0xff] }
  0x9f   : > { %2358 = vmatpush.bf16.msra.mxu3 %v4382_v59  ;;  %v2213_v35 = vsel %vm1581_vm3, %v2204_v45, %v5225_v49 }
  0xa0   : > { %2051 = vmatpush.bf16.msra.mxu0 %v4357_v5  ;;  %v1995_v38 = vsel %vm1386_vm2, %v1993_v36, %v1994_v40  ;;  %v5265_v5 = vld [vmem:[%s4575_s28 + $0x8] sm:$0xff]   ;;  %v4398_v36 = vld [vmem:[%s5413_s4 + $0x550] sm:$0xff] }
  0xa1   : > { %2160 = vmatpush.bf16.msra.mxu1 %v4365_v6  ;;  %v4446_v8 = vunpack.c.l.b16 %v5265_v5 }
  0xa2   : > { %2269 = vmatpush.bf16.msra.mxu2 %v4373_v46  ;;  %v4408_v46 = vld [vmem:[%s5413_s4 + $0x5a0] sm:$0xff] }
  0xa3   : > { %2359 = vmatpush.bf16.msra.mxu3 %v4381_v62  ;;  %v2586_v62 = vld [vmem:[%s4575_s28 + $0x10] sm:$0x7] }
  0xa4   : > { %2052 = vmatpush.bf16.msra.mxu0 %v4356_v9  ;;  %v2400_v9 = vunpack.c.l.b16 %v2375_v4  ;;  %v2605_v11 = vunpack.c.l.b16 %v2586_v62 }
  0xa5   : > { %2161 = vmatpush.bf16.msra.mxu1 %v4364_v10  ;;  %v4447_v10 = vunpack.c.h.b16 %v5265_v5 }
  0xa6   : > { %2270 = vmatpush.bf16.msra.mxu2 %v4372_v15  ;;  %v2508_v15 = vunpack.c.l.b16 %v5280_v2 }
  0xa7   : > { %2360 = vmatpush.bf16.msra.mxu3 %v4380_v16  ;;  %v2715_v16 = vunpack.c.l.b16 %v2696_v3 }
  0xa8   : > { %2053 = vmatpush.bf16.msra.mxu0 %v4355_v23  ;;  %v418_v50 = vpop.f32.mrf.mxu0 }
  0xa9   : > { %2162 = vmatpush.bf16.msra.mxu1 %v4363_v26  ;;  %v494_v25 = vpop.f32.mrf.mxu1  ;;  %v5302_v26 = vpack.c.b16 %v4446_v8, %v2400_v9  ;;  %v4404_v9 = vld [vmem:[%s5413_s4 + $0x580] sm:$0xff] }
  0xaa   : > { %2271 = vmatpush.bf16.msra.mxu2 %v4371_v39  ;;  %v495_v37 = vadd.f32 %v494_v25, %v418_v50  ;;  %v2378_v39 = vld [vmem:[%s4575_s28 + $0x10] sm:$0x3] }
  0xab   : > { %2361 = vmatpush.bf16.msra.mxu3 %v4379_v31  ;;  %2054 = vmatmul.bf16.vlgmr.msra.gmra.mxu0 %v1995_v38  ;;  %v5307_v31 = vpack.c.b16 %v2605_v11, %v4447_v10  ;;  %v4414_v50 = vld [vmem:[%s5413_s4 + $0x5d0] sm:$0xff]  ;;  %v2403_v25 = vunpack.c.l.b16 %v2378_v39  ;;  %v2609_v38 = vshrl.u32 %v5302_v26, 16  ;;  %v2407_v11 = vrot.slane %v5302_v26, 2 }
  0xac   : > { %2460 = vmatpush.bf16.msrb.mxu0 %v4394_v33  ;;  %2163 = vmatmul.bf16.vlgmr.msra.gmra.mxu1 %v2104_v51  ;;  %v2612_v51 = vshll.u32 %v5302_v26, 16 }
  0xad   : > { %2565 = vmatpush.bf16.msrb.mxu1 %v4403_v34  ;;  %2272 = vmatmul.bf16.vlgmr.msra.gmra.mxu2 %v2213_v35  ;;  %v4389_v34 = vld [vmem:[%s5413_s4 + $0x510] sm:$0xff]  ;;  %v2620_v35 = vshll.u32 %v5307_v31, 16 }
  0xae   : > { %2675 = vmatpush.bf16.msrb.mxu2 %v4411_v24  ;;  %2362 = vmatmul.bf16.vlgmr.msra.gmra.mxu3 %v2302_v48  ;;  %v5316_v24 = vor.u32 %v4395_v20, %v4043_v19  ;;  %v2509_v48 = vunpack.c.l.b16 %v2484_v41  ;;  %v4425_v41 = vld [vmem:[%s5413_s4 + $0x628] sm:$0xff] }
  0xaf   : > { %2784 = vmatpush.bf16.msrb.mxu3 %v4419_v44  ;;  %v2716_v44 = vpack.c.b16 %v2715_v16, %v2508_v15  ;;  %v2622_v4 = vrot.slane %v2620_v35, 3 }
  0xb0   : > { %2461 = vmatpush.bf16.msrb.mxu0 %v4393_v52  ;;  %v609_v58 = vpop.f32.mrf.mxu2  ;;  %v420_v61 = vpop.f32.mrf.mxu0 }
  0xb1   : > { %2566 = vmatpush.bf16.msrb.mxu1 %v4402_v53  ;;  %v726_v59 = vpop.f32.mrf.mxu3  ;;  %v618_v60 = vadd.f32 %v609_v58, %v495_v37  ;;  %v496_v63 = vpop.f32.mrf.mxu1  ;;  %v2617_v37 = vshrl.u32 %v5307_v31, 16  ;;  %v2726_v52 = vshrl.u32 %v2716_v44, 16  ;;  %v2729_v53 = vshll.u32 %v2716_v44, 16 }
  0xb2   : > { %2676 = vmatpush.bf16.msrb.mxu2 %v4410_v54  ;;  %v497_v6 = vadd.f32 %v496_v63, %v420_v61  ;;  %v4405_v54 = vld [vmem:[%s5413_s4 + $0x588] sm:$0xff]  ;;  %v2614_v58 = vrot.slane %v2612_v51, 3  ;;  %v5350_v63 = vpack.c.b16 %v2509_v48, %v2508_v15 }
  0xb3   : > { %2785 = vmatpush.bf16.msrb.mxu3 %v4418_v32  ;;  %v5274_v1 = vadd.f32 %v726_v59, %v618_v60  ;;  %v4413_v32 = vld [vmem:[%s5413_s4 + $0x5c8] sm:$0xff]  ;;  %v2731_v2 = vrot.slane %v2729_v53, 3  ;;  %v2805_v53 = vld [vmem:[%s4575_s28 + $0x4] sm:$0x8] }
  0xb4   : > { %2462 = vmatpush.bf16.msrb.mxu0 %v4392_v47  ;;  %v2513_v15 = vrot.slane %v5350_v63, 2  ;;  %v4420_v63 = vld [vmem:[%s5413_s4 + $0x600] sm:$0xff] }
  0xb5   : > { %2567 = vmatpush.bf16.msrb.mxu1 %v4401_v55 }
  0xb6   : > { %2677 = vmatpush.bf16.msrb.mxu2 %v4409_v27  ;;  %v5348_v27 = vpack.c.b16 %v2403_v25, %v4447_v10  ;;  %v4412_v10 = vld [vmem:[%s5413_s4 + $0x5c0] sm:$0xff] }
  0xb7   : > { %2786 = vmatpush.bf16.msrb.mxu3 %v4417_v57  ;;  %v2611_v57 = vrot.slane %v2609_v38, 2  ;;  %v4424_v38 = vld [vmem:[%s5413_s4 + $0x620] sm:$0xff] }
  0xb8   : > { %2463 = vmatpush.bf16.msrb.mxu0 %v4391_v0  ;;  %v611_v21 = vpop.f32.mrf.mxu2  ;;  %v423_v29 = vpop.f32.mrf.mxu0  ;;  %v2619_v0 = vrot.slane %v2617_v37, 2  ;;  %v4423_v37 = vld [vmem:[%s5413_s4 + $0x618] sm:$0xff] }
  0xb9   : > { %2568 = vmatpush.bf16.msrb.mxu1 %v4400_v42  ;;  %v728_v23 = vpop.f32.mrf.mxu3  ;;  %v619_v28 = vadd.f32 %v611_v21, %v497_v6  ;;  %v499_v30 = vpop.f32.mrf.mxu1  ;;  %v4387_v6 = vld [vmem:[%s5413_s4 + $0x500] sm:$0xff]  ;;  %v2615_v16 = vor.u32 %v2614_v58, %v2611_v57 }
  0xba   : > { %2678 = vmatpush.bf16.msrb.mxu2 %v4408_v46  ;;  %v500_v33 = vadd.f32 %v499_v30, %v423_v29  ;;  %v4396_v42 = vld [vmem:[%s5413_s4 + $0x540] sm:$0xff] }
  0xbb   : > { %2787 = vmatpush.bf16.msrb.mxu3 %v4416_v7  ;;  %v5318_v45 = vadd.f32 %v728_v23, %v619_v28  ;;  %2059 = vmatmul.bf16.gmra.mxu0 %v1994_v40  ;;  %v4397_v40 = vld [vmem:[%s5413_s4 + $0x548] sm:$0xff]  ;;  %v2728_v7 = vrot.slane %v2726_v52, 2  ;;  %v4422_v52 = vld [vmem:[%s5413_s4 + $0x610] sm:$0xff] }
  0xbc   : > { %2464 = vmatpush.bf16.msrb.mxu0 %v4390_v12  ;;  %2168 = vmatmul.bf16.gmra.mxu1 %v5217_v43  ;;  %v2718_v43 = vshrl.u32 %v5316_v24, 16  ;;  %v4427_v12 = vld [vmem:[%s5413_s4 + $0x638] sm:$0xff] }
  0xbd   : > { %2569 = vmatpush.bf16.msrb.mxu1 %v4399_v13  ;;  %2277 = vmatmul.bf16.gmra.mxu2 %v5225_v49  ;;  %v2721_v49 = vshll.u32 %v5316_v24, 16  ;;  %v2408_v13 = vrot.slane %v5348_v27, 2  ;;  %v2732_v20 = vor.u32 %v2731_v2, %v2728_v7 }
  0xbe   : > { %2679 = vmatpush.bf16.msrb.mxu2 %v4407_v14  ;;  %2367 = vmatmul.bf16.gmra.mxu3 %v2303_v22  ;;  %v2720_v46 = vrot.slane %v2718_v43, 2  ;;  %v2512_v14 = vrot.slane %v5316_v24, 2 }
  0xbf   : > { %2788 = vmatpush.bf16.msrb.mxu3 %v4415_v18  ;;  %v2723_v62 = vrot.slane %v2721_v49, 3  ;;  %v2623_v18 = vor.u32 %v2622_v4, %v2619_v0  ;;  %v2409_v29 = vsel %vm2406_vm4, %v2407_v11, %v2408_v13 }
  0xc0   : > { %2465 = vmatpush.bf16.msrb.mxu0 %v4389_v34  ;;  %v614_v47 = vpop.f32.mrf.mxu2  ;;  %v425_v60 = vpop.f32.mrf.mxu0  ;;  %v2514_v30 = vsel %vm2406_vm4, %v2512_v14, %v2513_v15  ;;  %v4426_v34 = vld [vmem:[%s5413_s4 + $0x630] sm:$0xff] }
  0xc1   : > { %2570 = vmatpush.bf16.msrb.mxu1 %v4398_v36  ;;  %v731_v55 = vpop.f32.mrf.mxu3  ;;  %v620_v59 = vadd.f32 %v614_v47, %v500_v33  ;;  %v501_v61 = vpop.f32.mrf.mxu1  ;;  %v2724_v19 = vor.u32 %v2723_v62, %v2720_v46  ;;  %v2624_v39 = vsel %vm2607_vm5, %v2615_v16, %v2623_v18  ;;  %v2824_v47 = vunpack.c.l.b16 %v2805_v53 }
  0xc2   : > { %2680 = vmatpush.bf16.msrb.mxu2 %v4406_v56 }
  0xc3   : > { %2789 = vmatpush.bf16.msrb.mxu3 %v4414_v50  ;;  %v737_v3 = vadd.f32 %v731_v55, %v620_v59  ;;  %v2733_v33 = vsel %vm2607_vm5, %v2724_v19, %v2732_v20  ;;  %v4421_v55 = vld [vmem:[%s5413_s4 + $0x608] sm:$0xff]  ;;  %v2825_v61 = vpack.c.b16 %v4446_v8, %v2824_v47 }
  0xc4   : > { %2466 = vmatpush.bf16.msrb.mxu0 %v4388_v17 }
  0xc5   : > { %2571 = vmatpush.bf16.msrb.mxu1 %v4397_v40  ;;  %v2826_v4 = vrot.slane %v2825_v61, 3 }
  0xc6   : > { %2681 = vmatpush.bf16.msrb.mxu2 %v4405_v54 }
  0xc7   : > { %2790 = vmatpush.bf16.msrb.mxu3 %v4413_v32 }
  0xc8   : > { %2467 = vmatpush.bf16.msrb.mxu0 %v4387_v6  ;;  %v616_v21 = vpop.f32.mrf.mxu2  ;;  %v822_v26 = vpop.f32.mrf.mxu0  ;;  %v2827_v6 = vrot.slane %v5307_v31, 3 }
  0xc9   : > { %2572 = vmatpush.bf16.msrb.mxu1 %v4396_v42  ;;  %v733_v23 = vpop.f32.mrf.mxu3  ;;  %v921_v28 = vpop.f32.mrf.mxu1  ;;  %v831_v22 = vadd.f32 %v822_v26, %v5274_v1 }
  0xca   : > { %2682 = vmatpush.bf16.msrb.mxu2 %v4404_v9  ;;  %v2828_v2 = vsel %vm1386_vm2, %v2826_v4, %v2827_v6 }
  0xcb   : > { %2791 = vmatpush.bf16.msrb.mxu3 %v4412_v10  ;;  %v930_v36 = vadd.f32 %v921_v28, %v831_v22  ;;  %2468 = vmatmul.bf16.vlgmr.msrb.gmra.mxu0 %v2409_v29 }
  0xcc   : > { %2879 = vmatpush.bf16.msra.mxu0 %v4427_v12  ;;  %2573 = vmatmul.bf16.vlgmr.msrb.gmra.mxu1 %v2514_v30 }
  0xcd   : > { %4460 = vmatpush.bf16.msra.mxu1 %v4427_v12  ;;  %2683 = vmatmul.bf16.vlgmr.msrb.gmra.mxu2 %v2624_v39 }
  0xce   : > { %2792 = vmatmul.bf16.vlgmr.msrb.gmra.mxu3 %v2733_v33 }
  0xd0   : > { %2880 = vmatpush.bf16.msra.mxu0 %v4426_v34  ;;  %v1020_v24 = vpop.f32.mrf.mxu2  ;;  %v824_v56 = vpop.f32.mrf.mxu0 }
  0xd1   : > { %4461 = vmatpush.bf16.msra.mxu1 %v4426_v34  ;;  %v1137_v44 = vpop.f32.mrf.mxu3  ;;  %v1029_v1 = vadd.f32 %v1020_v24, %v930_v36  ;;  %v923_v50 = vpop.f32.mrf.mxu1  ;;  %v832_v25 = vadd.f32 %v824_v56, %v5318_v45 }
  0xd3   : > { %v1146_v51 = vadd.f32 %v1137_v44, %v1029_v1  ;;  %v931_v48 = vadd.f32 %v923_v50, %v832_v25 }
  0xd4   : > { %2881 = vmatpush.bf16.msra.mxu0 %v4425_v41 }
  0xd5   : > { %4462 = vmatpush.bf16.msra.mxu1 %v4425_v41 }
  0xd8   : > { %2882 = vmatpush.bf16.msra.mxu0 %v4424_v38  ;;  %v1022_v35 = vpop.f32.mrf.mxu2  ;;  %v827_v43 = vpop.f32.mrf.mxu0 }
  0xd9   : > { %4463 = vmatpush.bf16.msra.mxu1 %v4424_v38  ;;  %v1139_v17 = vpop.f32.mrf.mxu3  ;;  %v1030_v40 = vadd.f32 %v1022_v35, %v931_v48  ;;  %v926_v45 = vpop.f32.mrf.mxu1  ;;  %v833_v49 = vadd.f32 %v827_v43, %v737_v3 }
  0xdb   : > { %v1147_v54 = vadd.f32 %v1139_v17, %v1030_v40  ;;  %v932_v32 = vadd.f32 %v926_v45, %v833_v49  ;;  %2473 = vmatmul.bf16.gmra.mxu0 %v2408_v13 }
  0xdc   : > { %2883 = vmatpush.bf16.msra.mxu0 %v4423_v37  ;;  %2578 = vmatmul.bf16.gmra.mxu1 %v2513_v15 }
  0xdd   : > { %4464 = vmatpush.bf16.msra.mxu1 %v4423_v37  ;;  %2688 = vmatmul.bf16.gmra.mxu2 %v2623_v18 }
  0xde   : > { %2797 = vmatmul.bf16.gmra.mxu3 %v2732_v20 }
  0xe0   : > { %2884 = vmatpush.bf16.msra.mxu0 %v4422_v52  ;;  %v1025_v27 = vpop.f32.mrf.mxu2  ;;  %v829_v59 = vpop.f32.mrf.mxu0 }
  0xe1   : > { %4465 = vmatpush.bf16.msra.mxu1 %v4422_v52  ;;  %v1142_v57 = vpop.f32.mrf.mxu3  ;;  %v1031_v58 = vadd.f32 %v1025_v27, %v932_v32  ;;  %v928_v60 = vpop.f32.mrf.mxu1 }
  0xe3   : > { %v1148_v0 = vadd.f32 %v1142_v57, %v1031_v58 }
  0xe4   : > { %2885 = vmatpush.bf16.msra.mxu0 %v4421_v55 }
  0xe5   : > { %4466 = vmatpush.bf16.msra.mxu1 %v4421_v55 }
  0xe8   : > { %2886 = vmatpush.bf16.msra.mxu0 %v4420_v63  ;;  %v1027_v42 = vpop.f32.mrf.mxu2  ;;  %v1254_v62 = vpop.f32.mrf.mxu0 }
  0xe9   : > { %4467 = vmatpush.bf16.msra.mxu1 %v4420_v63  ;;  %v1144_v46 = vpop.f32.mrf.mxu3  ;;  %v1349_v7 = vpop.f32.mrf.mxu1  ;;  %v1263_v5 = vadd.f32 %v1254_v62, %v1146_v51 }
  0xeb   : > { %v1358_v8 = vadd.f32 %v1349_v7, %v1263_v5  ;;  %2887 = vmatmul.bf16.vlgmr.msra.gmra.mxu0 %v2828_v2 }
  0xec   : > { %2892 = vmatmul.bf16.vlgmr.msra.gmra.mxu1 %v2827_v6 }
  0xf0   : > { %v1449_v3 = vpop.f32.mrf.mxu2  ;;  %v1256_v11 = vpop.f32.mrf.mxu0 }
  0xf1   : > { %v1548_v9 = vpop.f32.mrf.mxu3  ;;  %v1458_v10 = vadd.f32 %v1449_v3, %v1358_v8  ;;  %v1351_v12 = vpop.f32.mrf.mxu1  ;;  %v1264_v13 = vadd.f32 %v1256_v11, %v1147_v54 }
  0xf3   : > { %v1557_v14 = vadd.f32 %v1548_v9, %v1458_v10  ;;  %v1359_v31 = vadd.f32 %v1351_v12, %v1264_v13 }
  0xf8   : > { %v1451_v15 = vpop.f32.mrf.mxu2  ;;  %v1259_v19 = vpop.f32.mrf.mxu0 }
  0xf9   : > { %v1550_v16 = vpop.f32.mrf.mxu3  ;;  %v1459_v18 = vadd.f32 %v1451_v15, %v1359_v31  ;;  %v1354_v20 = vpop.f32.mrf.mxu1  ;;  %v1265_v21 = vadd.f32 %v1259_v19, %v1148_v0 }
  0xfb   : > { %v1558_v23 = vadd.f32 %v1550_v16, %v1459_v18  ;;  %v1360_v26 = vadd.f32 %v1354_v20, %v1265_v21 }
 0x100   : > { %v1454_v28 = vpop.f32.mrf.mxu2  ;;  %v1261_v22 = vpop.f32.mrf.mxu0 }
 0x101   : > { %v1553_v29 = vpop.f32.mrf.mxu3  ;;  %v1460_v30 = vadd.f32 %v1454_v28, %v1360_v26  ;;  %v1356_v39 = vpop.f32.mrf.mxu1 }
 0x103   : > { %v1559_v33 = vadd.f32 %v1553_v29, %v1460_v30 }
 0x108   : > { %v1456_v34 = vpop.f32.mrf.mxu2  ;;  %v1658_v41 = vpop.f32.mrf.mxu0 }
 0x109   : > { %v1555_v36 = vpop.f32.mrf.mxu3  ;;  %v1767_v24 = vpop.f32.mrf.mxu1  ;;  %v1667_v44 = vadd.f32 %v1658_v41, %v1557_v14 }
 0x10b   : > { %v1776_v1 = vadd.f32 %v1767_v24, %v1667_v44 }
 0x110   : > { %v1857_v56 = vpop.f32.mrf.mxu2  ;;  %v1660_v38 = vpop.f32.mrf.mxu0 }
 0x111   : > { %v1956_v50 = vpop.f32.mrf.mxu3  ;;  %v1866_v25 = vadd.f32 %v1857_v56, %v1776_v1  ;;  %v1769_v51 = vpop.f32.mrf.mxu1  ;;  %v1668_v48 = vadd.f32 %v1660_v38, %v1558_v23 }
 0x113   : > { %v1965_v37 = vadd.f32 %v1956_v50, %v1866_v25  ;;  %v1777_v35 = vadd.f32 %v1769_v51, %v1668_v48 }
 0x118   : > { %v1859_v17 = vpop.f32.mrf.mxu2  ;;  %v1663_v45 = vpop.f32.mrf.mxu0 }
 0x119   : > { %v1958_v40 = vpop.f32.mrf.mxu3  ;;  %v1867_v43 = vadd.f32 %v1859_v17, %v1777_v35  ;;  %v1772_v49 = vpop.f32.mrf.mxu1  ;;  %v1669_v5 = vadd.f32 %v1663_v45, %v1559_v33 }
 0x11b   : > { %v1966_v52 = vadd.f32 %v1958_v40, %v1867_v43  ;;  %v1778_v11 = vadd.f32 %v1772_v49, %v1669_v5  ;;  %v4478_v43 = vld [vmem:[%s5414_s5] ss:$0 sm:$0xff] }
 0x120   : > { %v1862_v53 = vpop.f32.mrf.mxu2  ;;  %v1665_v32 = vpop.f32.mrf.mxu0 }
 0x121   : > { %v1961_v54 = vpop.f32.mrf.mxu3  ;;  %v1774_v47 = vpop.f32.mrf.mxu1  ;;  %v1868_v12 = vadd.f32 %v1862_v53, %v1778_v11 }
 0x123   : > { %v1967_v13 = vadd.f32 %v1961_v54, %v1868_v12 }
 0x128   : > { %v1864_v55 = vpop.f32.mrf.mxu2  ;;  %v2055_v57 = vpop.f32.mrf.mxu0 }
 0x129   : > { %v1963_v27 = vpop.f32.mrf.mxu3  ;;  %v2164_v58 = vpop.f32.mrf.mxu1  ;;  %v2064_v19 = vadd.f32 %v2055_v57, %v1965_v37 }
 0x12b   : > { %v2173_v30 = vadd.f32 %v2164_v58, %v2064_v19 }
 0x130   : > { %v2273_v59 = vpop.f32.mrf.mxu2  ;;  %v2057_v61 = vpop.f32.mrf.mxu0 }
 0x131   : > { %v2363_v60 = vpop.f32.mrf.mxu3  ;;  %v2166_v63 = vpop.f32.mrf.mxu1  ;;  %v2065_v22 = vadd.f32 %v2057_v61, %v1966_v52  ;;  %v2282_v39 = vadd.f32 %v2273_v59, %v2173_v30 }
 0x133   : > { %v2174_v34 = vadd.f32 %v2166_v63, %v2065_v22  ;;  %v2372_v41 = vadd.f32 %v2363_v60, %v2282_v39 }
 0x138   : > { %v2275_v0 = vpop.f32.mrf.mxu2  ;;  %v2060_v6 = vpop.f32.mrf.mxu0 }
 0x139   : > { %v2365_v4 = vpop.f32.mrf.mxu3  ;;  %v2169_v42 = vpop.f32.mrf.mxu1  ;;  %v2066_v18 = vadd.f32 %v2060_v6, %v1967_v13  ;;  %v2283_v24 = vadd.f32 %v2275_v0, %v2174_v34 }
 0x13b   : > { %v2175_v20 = vadd.f32 %v2169_v42, %v2066_v18  ;;  %v2373_v51 = vadd.f32 %v2365_v4, %v2283_v24 }
 0x140   : > { %v2278_v46 = vpop.f32.mrf.mxu2  ;;  %v2062_v7 = vpop.f32.mrf.mxu0 }
 0x141   : > { %v2368_v62 = vpop.f32.mrf.mxu3  ;;  %v2171_v2 = vpop.f32.mrf.mxu1  ;;  %v2284_v21 = vadd.f32 %v2278_v46, %v2175_v20 }
 0x143   : > { %v2374_v33 = vadd.f32 %v2368_v62, %v2284_v21 }
 0x148   : > { %v2280_v8 = vpop.f32.mrf.mxu2  ;;  %v2469_v9 = vpop.f32.mrf.mxu0 }
 0x149   : > { %v2370_v3 = vpop.f32.mrf.mxu3  ;;  %v2574_v10 = vpop.f32.mrf.mxu1  ;;  %v2478_v25 = vadd.f32 %v2469_v9, %v2372_v41 }
 0x14b   : > { %v2583_v37 = vadd.f32 %v2574_v10, %v2478_v25 }
 0x150   : > { %v2684_v14 = vpop.f32.mrf.mxu2  ;;  %v2471_v15 = vpop.f32.mrf.mxu0 }
 0x151   : > { %v2793_v31 = vpop.f32.mrf.mxu3  ;;  %v2576_v16 = vpop.f32.mrf.mxu1  ;;  %v2479_v35 = vadd.f32 %v2471_v15, %v2373_v51  ;;  %v2693_v17 = vadd.f32 %v2684_v14, %v2583_v37 }
 0x153   : > { %v2584_v54 = vadd.f32 %v2576_v16, %v2479_v35  ;;  %v2802_v47 = vadd.f32 %v2793_v31, %v2693_v17 }
 0x158   : > { %v2686_v23 = vpop.f32.mrf.mxu2  ;;  %v2474_v28 = vpop.f32.mrf.mxu0 }
 0x159   : > { %v2795_v26 = vpop.f32.mrf.mxu3  ;;  %v2579_v29 = vpop.f32.mrf.mxu1  ;;  %v2480_v36 = vadd.f32 %v2474_v28, %v2374_v33  ;;  %v2694_v55 = vadd.f32 %v2686_v23, %v2584_v54 }
 0x15b   : > { %v2585_v38 = vadd.f32 %v2579_v29, %v2480_v36  ;;  %v2803_v59 = vadd.f32 %v2795_v26, %v2694_v55 }
 0x160   : > { %v2689_v44 = vpop.f32.mrf.mxu2  ;;  %v2476_v56 = vpop.f32.mrf.mxu0 }
 0x161   : > { %v2798_v1 = vpop.f32.mrf.mxu3  ;;  %v2581_v50 = vpop.f32.mrf.mxu1  ;;  %v2695_v48 = vadd.f32 %v2689_v44, %v2585_v38 }
 0x163   : > { %v2804_v40 = vadd.f32 %v2798_v1, %v2695_v48 }
 0x168   : > { %v2691_v45 = vpop.f32.mrf.mxu2  ;;  %v2888_v52 = vpop.f32.mrf.mxu0 }
 0x169   : > { %v2800_v49 = vpop.f32.mrf.mxu3  ;;  %v2893_v53 = vpop.f32.mrf.mxu1  ;;  %v2897_v57 = vadd.f32 %v2888_v52, %v2802_v47 }
 0x16a   : > { %v2899_v32 = vadd.f32 %v2893_v53, %v2804_v40 }
 0x16b   : > { %v2904_v0 = vadd.f32 %v4478_v43, %v2897_v57 }
 0x16c   : > { %v2906_v27 = vadd.f32 %v4478_v43, %v2899_v32 }
 0x16d   : > { %v2907_v42 = vmax.f32 %v2904_v0, 0.0 }
 0x16e   : > { %v2909_v58 = vmax.f32 %v2906_v27, 0.0 }
 0x170   : > { %v2912_v60 = vpack.c.bf16 %v2909_v58, %v2909_v58  ;;  %v2890_v61 = vpop.f32.mrf.mxu0 }
 0x171   : > { %v2895_v63 = vpop.f32.mrf.mxu1  ;;  %v2898_v4 = vadd.f32 %v2890_v61, %v2803_v59 }
 0x172   : > { %2915 = vst [vmem:[%s311_s8 + $0x8] sm:$0xf] %v2912_v60 }
 0x173   : > { %v2905_v6 = vadd.f32 %v4478_v43, %v2898_v4 }
 0x175   : > { %v2908_v46 = vmax.f32 %v2905_v6, 0.0 }
 0x177   : > { %v4451_v62 = vpack.c.bf16 %v2908_v46, %v2907_v42 }
 0x179   : > { %4452 = vst [vmem:[%s311_s8] sm:$0xff] %v4451_v62  }
 0x17a PF: > { %s16_s21 = sadd.s32 1, %s4485_s21  }
 0x17b   : > { %p13_p4 = scmp.ge.s32.totalorder %s16_s21, 4  }
 0x17d   :  { %15 = sbr.rel (!%p13_p4) target bundleno = 1 (0x1), region = 107 }

// kernel: basic_ag_forward.8
= control target key start
LH: loop header
LB: loop body
LE: loop exit
PB: predicated region body
PF: predicated region fallthrough
CT: control target
= control target key end

     0   :  { %s4057_s21 = smov 0   ;;  %s4781_s0 = inlined_call_operand.vmem [shape: bf16[2,20,128], index: 0, kind: input, shape index: {}]   ;;  %s4782_s1 = inlined_call_operand.vmem [shape: bf16[2,20,128], index: 1, kind: input, shape index: {}]   ;;  %s4783_s2 = inlined_call_operand.vmem [shape: bf16[2,20,128], index: 2, kind: input, shape index: {}]   ;;  %s4784_s3 = inlined_call_operand.vmem [shape: bf16[2,20,128], index: 3, kind: input, shape index: {}]   ;;  %s4785_s4 = inlined_call_operand.vmem [shape: bf16[25,128,128], index: 4, kind: input, shape index: {}]   ;;  %s4786_s5 = inlined_call_operand.vmem [shape: f32[1,128], index: 5, kind: input, shape index: {}]   ;;  %s4787_s6 = inlined_call_operand.vmem [shape: bf16[2,8,128], index: 6, kind: output, shape index: {}]  }
   0x1 LB: > { %s2593_s22 = sadd.s32 4294967295, %s4020_s21   ;;  %p2597_p0 = scmp.ge.s32.totalorder %s4020_s21, 1  ;;  %s4020_s21 = sphi %s4057_s21, %s16_s21  }
   0x2   : > { %p242_p1 = scmp.lt.s32.totalorder %s4020_s21, 3 }
   0x4   : > { %p243_p2 = pnand %p2597_p0, %p242_p1 }
   0x5   : > { %p286_p3 = scmp.lt.s32.totalorder (!%p243_p2), %s2593_s22, 1 }
   0x6   : > { %246 = sbr.rel (%p243_p2) target bundleno = 370 (0x172), region = 44 }
   0xb   : > { %v3816_v0 = vld [vmem:[%s4785_s4 + $0x78] sm:$0xff]  ;;  %v3815_v4 = vld [vmem:[%s4785_s4 + $0x70] sm:$0xff]  ;;  %s4789_s22 = smov (!%p286_p3, %s2593_s22), 1  ;;  %v3814_v8 = vld [vmem:[%s4785_s4 + $0x68] sm:$0xff] }
   0xc   : > { %v3824_v1 = vld [vmem:[%s4785_s4 + $0xb8] sm:$0xff]  ;;  %393 = vmatpush.bf16.msra.mxu0 %v3816_v0  ;;  %v3823_v5 = vld [vmem:[%s4785_s4 + $0xb0] sm:$0xff]  ;;  %v3822_v9 = vld [vmem:[%s4785_s4 + $0xa8] sm:$0xff]  ;;  %s4104_s25 = smul.u32 12, %s4789_s22  ;;  %s2602_s14 = sshll.u32 %s4789_s22, 2 }
   0xd   : > { %v3808_v2 = vld [vmem:[%s4785_s4 + $0x38] sm:$0xff]  ;;  %547 = vmatpush.bf16.msra.mxu2 %v3824_v1  ;;  %v3807_v6 = vld [vmem:[%s4785_s4 + $0x30] sm:$0xff]  ;;  %v3806_v10 = vld [vmem:[%s4785_s4 + $0x28] sm:$0xff]  ;;  %s309_s17 = scalar_lea.vmem %s4787_s6, %s2602_s14 }
   0xe   : > { %v3833_v3 = vld [vmem:[%s4785_s4 + $0xf8] sm:$0xff]  ;;  %454 = vmatpush.bf16.msra.mxu1 %v3808_v2  ;;  %v3832_v7 = vld [vmem:[%s4785_s4 + $0xf0] sm:$0xff]  ;;  %v3831_v11 = vld [vmem:[%s4785_s4 + $0xe8] sm:$0xff]  ;;  %s4122_s12 = scalar_lea.vmem %s4781_s0, %s4104_s25  ;;  %s4140_s26 = scalar_lea.vmem %s4782_s1, %s4104_s25 }
   0xf   : > { %641 = vmatpush.bf16.msra.mxu3 %v3833_v3  ;;  %v3813_v12 = vld [vmem:[%s4785_s4 + $0x60] sm:$0xff]  ;;  %v3812_v16 = vld [vmem:[%s4785_s4 + $0x58] sm:$0xff]  ;;  %v3811_v21 = vld [vmem:[%s4785_s4 + $0x50] sm:$0xff]  ;;  %s4235_s20 = scalar_lea.vmem %s4783_s2, %s4104_s25  ;;  %s4311_s7 = scalar_lea.vmem %s4784_s3, %s4104_s25 }
  0x10   : > { %394 = vmatpush.bf16.msra.mxu0 %v3815_v4  ;;  %v3821_v13 = vld [vmem:[%s4785_s4 + $0xa0] sm:$0xff]  ;;  %v3820_v17 = vld [vmem:[%s4785_s4 + $0x98] sm:$0xff]  ;;  %v3819_v24 = vld [vmem:[%s4785_s4 + $0x90] sm:$0xff] }
  0x11   : > { %548 = vmatpush.bf16.msra.mxu2 %v3823_v5  ;;  %v3805_v14 = vld [vmem:[%s4785_s4 + $0x20] sm:$0xff]  ;;  %v3804_v18 = vld [vmem:[%s4785_s4 + $0x18] sm:$0xff]  ;;  %v3803_v28 = vld [vmem:[%s4785_s4 + $0x10] sm:$0xff] }
  0x12   : > { %455 = vmatpush.bf16.msra.mxu1 %v3807_v6  ;;  %v3830_v15 = vld [vmem:[%s4785_s4 + $0xe0] sm:$0xff]  ;;  %v3829_v19 = vld [vmem:[%s4785_s4 + $0xd8] sm:$0xff]  ;;  %v3828_v29 = vld [vmem:[%s4785_s4 + $0xd0] sm:$0xff] }
  0x13   : > { %642 = vmatpush.bf16.msra.mxu3 %v3832_v7  ;;  %v467_v20 = vld [vmem:[%s4122_s12] sm:$0xf]  ;;  %v4147_v22 = vld [vmem:[%s4122_s12 + $0x4] sm:$0x1]  ;;  %v3810_v32 = vld [vmem:[%s4785_s4 + $0x48] sm:$0xff] }
  0x14   : > { %395 = vmatpush.bf16.msra.mxu0 %v3814_v8  ;;  %v488_v23 = vunpack.c.l.b16 %v467_v20  ;;  %v489_v25 = vunpack.c.l.b16 %v4147_v22  ;;  %v2749_v26 = vld [vmem:[%s4140_s26] sm:$0xf]  ;;  %v3825_v27 = vld [vmem:[%s4140_s26] sm:$0x10]  ;;  %v3818_v33 = vld [vmem:[%s4785_s4 + $0x88] sm:$0xff] }
  0x15   : > { %549 = vmatpush.bf16.msra.mxu2 %v3822_v9  ;;  %v2750_v31 = vor.u32 %v3825_v27, %v2749_v26  ;;  %v3802_v35 = vld [vmem:[%s4785_s4 + $0x8] sm:$0xff]  ;;  %v3809_v38 = vld [vmem:[%s4785_s4 + $0x40] sm:$0xff]  ;;  %v3841_v42 = vld [vmem:[%s4785_s4 + $0x138] sm:$0xff] }
  0x16   : > { %456 = vmatpush.bf16.msra.mxu1 %v3806_v10  ;;  %v490_v30 = vpack.c.b16 %v489_v25, %v488_v23  ;;  %v3827_v36 = vld [vmem:[%s4785_s4 + $0xc8] sm:$0xff]  ;;  %v3817_v39 = vld [vmem:[%s4785_s4 + $0x80] sm:$0xff]  ;;  %v3857_v43 = vld [vmem:[%s4785_s4 + $0x1b8] sm:$0xff] }
  0x17   : > { %643 = vmatpush.bf16.msra.mxu3 %v3831_v11  ;;  %v588_v37 = vshll.u32 %v2750_v31, 16  ;;  %v3801_v44 = vld [vmem:[%s4785_s4] sm:$0xff]  ;;  %v586_v46 = vshrl.u32 %v2750_v31, 16  ;;  %v3849_v48 = vld [vmem:[%s4785_s4 + $0x178] sm:$0xff]  ;;  %v3840_v51 = vld [vmem:[%s4785_s4 + $0x130] sm:$0xff] }
  0x18   : > { %396 = vmatpush.bf16.msra.mxu0 %v3813_v12  ;;  %v494_v34 = vshll.u32 %v490_v30, 16  ;;  %v492_v40 = vshrl.u32 %v490_v30, 16  ;;  %v3826_v45 = vld [vmem:[%s4785_s4 + $0xc0] sm:$0xff]  ;;  %v3865_v49 = vld [vmem:[%s4785_s4 + $0x1f8] sm:$0xff]  ;;  %v3856_v52 = vld [vmem:[%s4785_s4 + $0x1b0] sm:$0xff] }
  0x19   : > { %550 = vmatpush.bf16.msra.mxu2 %v3821_v13  ;;  %v590_v47 = vrot.slane %v588_v37, 1  ;;  %v327_v53 = vld [vmem:[%s4140_s26] sm:$0xf]  ;;  %v3848_v55 = vld [vmem:[%s4785_s4 + $0x170] sm:$0xff]  ;;  %v3839_v58 = vld [vmem:[%s4785_s4 + $0x128] sm:$0xff] }
  0x1a   : > { %457 = vmatpush.bf16.msra.mxu1 %v3805_v14  ;;  %v496_v41 = vrot.slane %v494_v34, 1  ;;  %v3864_v56 = vld [vmem:[%s4785_s4 + $0x1f0] sm:$0xff]  ;;  %v310_v57 = vld [vmem:[%s4122_s12] sm:$0xf]  ;;  %v3855_v59 = vld [vmem:[%s4785_s4 + $0x1a8] sm:$0xff] }
  0x1b   : > { %644 = vmatpush.bf16.msra.mxu3 %v3830_v15  ;;  %v591_v54 = vor.u32 %v590_v47, %v586_v46  ;;  %v3847_v60 = vld [vmem:[%s4785_s4 + $0x168] sm:$0xff]  ;;  %v3838_v62 = vld [vmem:[%s4785_s4 + $0x120] sm:$0xff]  ;;  %v3837_v4 = vld [vmem:[%s4785_s4 + $0x118] sm:$0xff] }
  0x1c   : > { %397 = vmatpush.bf16.msra.mxu0 %v3812_v16  ;;  %v497_v50 = vor.u32 %v496_v41, %v492_v40  ;;  %v3863_v61 = vld [vmem:[%s4785_s4 + $0x1e8] sm:$0xff]  ;;  %v3854_v63 = vld [vmem:[%s4785_s4 + $0x1a0] sm:$0xff]  ;;  %v3853_v5 = vld [vmem:[%s4785_s4 + $0x198] sm:$0xff] }
  0x1d   : > { %551 = vmatpush.bf16.msra.mxu2 %v3820_v17  ;;  %v3846_v0 = vld [vmem:[%s4785_s4 + $0x160] sm:$0xff]  ;;  %v3845_v6 = vld [vmem:[%s4785_s4 + $0x158] sm:$0xff]  ;;  %v3836_v10 = vld [vmem:[%s4785_s4 + $0x110] sm:$0xff] }
  0x1e   : > { %458 = vmatpush.bf16.msra.mxu1 %v3804_v18  ;;  %v3862_v1 = vld [vmem:[%s4785_s4 + $0x1e0] sm:$0xff]  ;;  %v3861_v7 = vld [vmem:[%s4785_s4 + $0x1d8] sm:$0xff]  ;;  %v3852_v11 = vld [vmem:[%s4785_s4 + $0x190] sm:$0xff] }
  0x1f   : > { %645 = vmatpush.bf16.msra.mxu3 %v3829_v19  ;;  %v900_v2 = vld [vmem:[%s4235_s20] sm:$0xf]  ;;  %v4245_v3 = vld [vmem:[%s4235_s20 + $0x4] sm:$0x1]  ;;  %v3844_v13 = vld [vmem:[%s4785_s4 + $0x150] sm:$0xff] }
  0x20   : > { %398 = vmatpush.bf16.msra.mxu0 %v3811_v21  ;;  %v921_v8 = vunpack.c.l.b16 %v900_v2  ;;  %v922_v9 = vunpack.c.l.b16 %v4245_v3  ;;  %v655_v12 = vld [vmem:[%s4122_s12] sm:$0xe]  ;;  %v3860_v14 = vld [vmem:[%s4785_s4 + $0x1d0] sm:$0xff]  ;;  %v3835_v16 = vld [vmem:[%s4785_s4 + $0x108] sm:$0xff] }
  0x21   : > { %552 = vmatpush.bf16.msra.mxu2 %v3819_v24  ;;  %v3851_v17 = vld [vmem:[%s4785_s4 + $0x188] sm:$0xff]  ;;  %v674_v18 = vunpack.c.l.b16 %v655_v12  ;;  %v3834_v23 = vld [vmem:[%s4785_s4 + $0x100] sm:$0xff]  ;;  %v3874_v27 = vld [vmem:[%s4785_s4 + $0x238] sm:$0xff] }
  0x22   : > { %459 = vmatpush.bf16.msra.mxu1 %v3803_v28  ;;  %v923_v15 = vpack.c.b16 %v922_v9, %v921_v8  ;;  %v3843_v19 = vld [vmem:[%s4785_s4 + $0x148] sm:$0xff]  ;;  %v3850_v24 = vld [vmem:[%s4785_s4 + $0x180] sm:$0xff]  ;;  %v3890_v28 = vld [vmem:[%s4785_s4 + $0x2b8] sm:$0xff] }
  0x23   : > { %646 = vmatpush.bf16.msra.mxu3 %v3828_v29  ;;  %v3859_v20 = vld [vmem:[%s4785_s4 + $0x1c8] sm:$0xff]  ;;  %v675_v26 = vpack.c.b16 %v489_v25, %v674_v18  ;;  %v3842_v29 = vld [vmem:[%s4785_s4 + $0x140] sm:$0xff]  ;;  %v3882_v31 = vld [vmem:[%s4785_s4 + $0x278] sm:$0xff] }
  0x24   : > { %399 = vmatpush.bf16.msra.mxu0 %v3810_v32  ;;  %v927_v21 = vshll.u32 %v923_v15, 16  ;;  %v3858_v30 = vld [vmem:[%s4785_s4 + $0x1c0] sm:$0xff]  ;;  %v925_v22 = vshrl.u32 %v923_v15, 16  ;;  %v3898_v32 = vld [vmem:[%s4785_s4 + $0x2f8] sm:$0xff]  ;;  %v3872_v41 = vld [vmem:[%s4785_s4 + $0x228] sm:$0xff] }
  0x25   : > { %553 = vmatpush.bf16.msra.mxu2 %v3818_v33  ;;  %v676_v33 = vrot.slane %v675_v26, 1  ;;  %v820_v34 = vld [vmem:[%s4311_s7] sm:$0xf]  ;;  %v3892_v12 = vld [vmem:[%s4785_s4 + $0x2c8] sm:$0xff]  ;;  %v3906_v18 = vld [vmem:[%s4785_s4 + $0x338] sm:$0xff] }
  0x26   : > { %460 = vmatpush.bf16.msra.mxu1 %v3802_v35  ;;  %v929_v25 = vrot.slane %v927_v21, 1  ;;  %v3873_v35 = vld [vmem:[%s4785_s4 + $0x230] sm:$0xff]  ;;  %v740_v40 = vld [vmem:[%s4235_s20] sm:$0xf]  ;;  %v3914_v3 = vld [vmem:[%s4785_s4 + $0x378] sm:$0xff] }
  0x27   : > { %647 = vmatpush.bf16.msra.mxu3 %v3827_v36  ;;  %v3889_v36 = vld [vmem:[%s4785_s4 + $0x2b0] sm:$0xff]  ;;  %v3887_v46 = vld [vmem:[%s4785_s4 + $0x2a0] sm:$0xff] }
  0x28   : > { %400 = vmatpush.bf16.msra.mxu0 %v3809_v38  ;;  %v930_v37 = vor.u32 %v929_v25, %v925_v22  ;;  %v3881_v38 = vld [vmem:[%s4785_s4 + $0x270] sm:$0xff]  ;;  %v3879_v47 = vld [vmem:[%s4785_s4 + $0x260] sm:$0xff] }
  0x29   : > { %554 = vmatpush.bf16.msra.mxu2 %v3817_v39  ;;  %v3897_v39 = vld [vmem:[%s4785_s4 + $0x2f0] sm:$0xff] }
  0x2a   : > { %461 = vmatpush.bf16.msra.mxu1 %v3801_v44  ;;  %v3896_v44 = vld [vmem:[%s4785_s4 + $0x2e8] sm:$0xff]  ;;  %v3921_v22 = vld [vmem:[%s4785_s4 + $0x3b0] sm:$0xff] }
  0x2b   : > { %648 = vmatpush.bf16.msra.mxu3 %v3826_v45  ;;  %401 = vmatmul.bf16.vlgmr.msra.gmra.mxu0 %v327_v53  ;;  %v3871_v45 = vld [vmem:[%s4785_s4 + $0x220] sm:$0xff]  ;;  %v3878_v53 = vld [vmem:[%s4785_s4 + $0x258] sm:$0xff]  ;;  %v3913_v25 = vld [vmem:[%s4785_s4 + $0x370] sm:$0xff] }
  0x2c   : > { %726 = vmatpush.bf16.msrb.mxu0 %v3841_v42  ;;  %555 = vmatmul.bf16.vlgmr.msra.gmra.mxu2 %v497_v50  ;;  %v3888_v42 = vld [vmem:[%s4785_s4 + $0x2a8] sm:$0xff]  ;;  %v3886_v50 = vld [vmem:[%s4785_s4 + $0x298] sm:$0xff] }
  0x2d   : > { %886 = vmatpush.bf16.msrb.mxu2 %v3857_v43  ;;  %462 = vmatmul.bf16.vlgmr.msra.gmra.mxu1 %v310_v57  ;;  %v3880_v43 = vld [vmem:[%s4785_s4 + $0x268] sm:$0xff]  ;;  %v3885_v57 = vld [vmem:[%s4785_s4 + $0x290] sm:$0xff] }
  0x2e   : > { %806 = vmatpush.bf16.msrb.mxu1 %v3849_v48  ;;  %649 = vmatmul.bf16.vlgmr.msra.gmra.mxu3 %v591_v54  ;;  %v3895_v48 = vld [vmem:[%s4785_s4 + $0x2e0] sm:$0xff]  ;;  %v3894_v54 = vld [vmem:[%s4785_s4 + $0x2d8] sm:$0xff] }
  0x2f   : > { %980 = vmatpush.bf16.msrb.mxu3 %v3865_v49  ;;  %v3870_v49 = vld [vmem:[%s4785_s4 + $0x218] sm:$0xff] }
  0x30   : > { %727 = vmatpush.bf16.msrb.mxu0 %v3840_v51  ;;  %v2993_v51 = vld [vmem:[%s4311_s7] sm:$0xf] }
  0x31   : > { %887 = vmatpush.bf16.msrb.mxu2 %v3856_v52  ;;  %v3866_v52 = vld [vmem:[%s4311_s7] sm:$0x10] }
  0x32   : > { %807 = vmatpush.bf16.msrb.mxu1 %v3848_v55  ;;  %v3869_v55 = vld [vmem:[%s4785_s4 + $0x210] sm:$0xff] }
  0x33   : > { %981 = vmatpush.bf16.msrb.mxu3 %v3864_v56  ;;  %v2994_v56 = vor.u32 %v3866_v52, %v2993_v51  ;;  %v1533_v51 = vld [vmem:[%s4122_s12] sm:$0x8]  ;;  %v3909_v52 = vld [vmem:[%s4785_s4 + $0x350] sm:$0xff] }
  0x34   : > { %728 = vmatpush.bf16.msrb.mxu0 %v3839_v58  ;;  %v4378_v58 = vld [vmem:[%s4122_s12] sm:$0xc] }
  0x35   : > { %888 = vmatpush.bf16.msrb.mxu2 %v3855_v59  ;;  %v1174_v59 = vld [vmem:[%s4122_s12 + $0x4] sm:$0x3]  ;;  %v1194_v2 = vunpack.c.l.b16 %v4378_v58 }
  0x36   : > { %808 = vmatpush.bf16.msrb.mxu1 %v3847_v60  ;;  %v3877_v60 = vld [vmem:[%s4785_s4 + $0x250] sm:$0xff] }
  0x37   : > { %982 = vmatpush.bf16.msrb.mxu3 %v3863_v61  ;;  %v3893_v61 = vld [vmem:[%s4785_s4 + $0x2d0] sm:$0xff] }
  0x38   : > { %729 = vmatpush.bf16.msrb.mxu0 %v3838_v62  ;;  %v1088_v62 = vld [vmem:[%s4235_s20] sm:$0xe] }
  0x39   : > { %889 = vmatpush.bf16.msrb.mxu2 %v3854_v63  ;;  %v4389_v63 = vld [vmem:[%s4140_s26] sm:$0xc] }
  0x3a   : > { %809 = vmatpush.bf16.msrb.mxu1 %v3846_v0  ;;  %v1262_v0 = vld [vmem:[%s4140_s26 + $0x4] sm:$0x3]  ;;  %v1282_v8 = vunpack.c.l.b16 %v4389_v63 }
  0x3b   : > { %983 = vmatpush.bf16.msrb.mxu3 %v3862_v1  ;;  %v1021_v1 = vshll.u32 %v2994_v56, 16 }
  0x3c   : > { %730 = vmatpush.bf16.msrb.mxu0 %v3837_v4  ;;  %v1195_v4 = vunpack.c.l.b16 %v1174_v59  ;;  %v1552_v59 = vunpack.c.l.b16 %v1533_v51  ;;  %v1978_v51 = vld [vmem:[%s4235_s20] sm:$0x8] }
  0x3d   : > { %890 = vmatpush.bf16.msrb.mxu2 %v3853_v5  ;;  %v3868_v5 = vld [vmem:[%s4785_s4 + $0x208] sm:$0xff] }
  0x3e   : > { %810 = vmatpush.bf16.msrb.mxu1 %v3845_v6  ;;  %v3884_v6 = vld [vmem:[%s4785_s4 + $0x288] sm:$0xff]  ;;  %v1196_v15 = vpack.c.b16 %v1195_v4, %v1194_v2 }
  0x3f   : > { %984 = vmatpush.bf16.msrb.mxu3 %v3861_v7  ;;  %v1107_v7 = vunpack.c.l.b16 %v1088_v62  ;;  %v3924_v4 = vld [vmem:[%s4785_s4 + $0x3c8] sm:$0xff] }
  0x40   : > { %731 = vmatpush.bf16.msrb.mxu0 %v3836_v10  ;;  %v1283_v10 = vunpack.c.l.b16 %v1262_v0 }
  0x41   : > { %891 = vmatpush.bf16.msrb.mxu2 %v3852_v11  ;;  %v3876_v11 = vld [vmem:[%s4785_s4 + $0x248] sm:$0xff] }
  0x42   : > { %811 = vmatpush.bf16.msrb.mxu1 %v3844_v13  ;;  %v1019_v13 = vshrl.u32 %v2994_v56, 16  ;;  %v1284_v21 = vpack.c.b16 %v1283_v10, %v1282_v8  ;;  %v1619_v56 = vld [vmem:[%s4235_s20 + $0x4] sm:$0x3] }
  0x43   : > { %985 = vmatpush.bf16.msrb.mxu3 %v3860_v14  ;;  %v1023_v14 = vrot.slane %v1021_v1, 1  ;;  %v1640_v1 = vunpack.c.l.b16 %v1619_v56  ;;  %v3915_v10 = vld [vmem:[%s4785_s4 + $0x380] sm:$0xff]  ;;  %v3948_v56 = vld [vmem:[%s4785_s4 + $0x488] sm:$0xff] }
  0x44   : > { %732 = vmatpush.bf16.msrb.mxu0 %v3835_v16  ;;  %v3867_v16 = vld [vmem:[%s4785_s4 + $0x200] sm:$0xff] }
  0x45   : > { %892 = vmatpush.bf16.msrb.mxu2 %v3851_v17  ;;  %v3883_v17 = vld [vmem:[%s4785_s4 + $0x280] sm:$0xff]  ;;  %v1024_v26 = vor.u32 %v1023_v14, %v1019_v13 }
  0x46   : > { %812 = vmatpush.bf16.msrb.mxu1 %v3843_v19  ;;  %v3922_v19 = vld [vmem:[%s4785_s4 + $0x3b8] sm:$0xff] }
  0x47   : > { %986 = vmatpush.bf16.msrb.mxu3 %v3859_v20  ;;  %v1108_v20 = vpack.c.b16 %v922_v9, %v1107_v7  ;;  %v3930_v9 = vld [vmem:[%s4785_s4 + $0x3f8] sm:$0xff] }
  0x48   : > { %733 = vmatpush.bf16.msrb.mxu0 %v3834_v23  ;;  %v3875_v23 = vld [vmem:[%s4785_s4 + $0x240] sm:$0xff] }
  0x49   : > { %893 = vmatpush.bf16.msrb.mxu2 %v3850_v24  ;;  %v3891_v24 = vld [vmem:[%s4785_s4 + $0x2c0] sm:$0xff] }
  0x4a   : > { %813 = vmatpush.bf16.msrb.mxu1 %v3842_v29  ;;  %v1285_v29 = vrot.slane %v1284_v21, 2  ;;  %v3962_v21 = vld [vmem:[%s4785_s4 + $0x4f8] sm:$0xff] }
  0x4b   : > { %987 = vmatpush.bf16.msrb.mxu3 %v3858_v30  ;;  %734 = vmatmul.bf16.vlgmr.msrb.gmra.mxu0 %v676_v33  ;;  %v3905_v30 = vld [vmem:[%s4785_s4 + $0x330] sm:$0xff]  ;;  %v3920_v33 = vld [vmem:[%s4785_s4 + $0x3a8] sm:$0xff] }
  0x4c   : > { %1074 = vmatpush.bf16.msra.mxu0 %v3874_v27  ;;  %894 = vmatmul.bf16.vlgmr.msrb.gmra.mxu2 %v820_v34  ;;  %v1197_v27 = vrot.slane %v1196_v15, 2  ;;  %v3912_v34 = vld [vmem:[%s4785_s4 + $0x368] sm:$0xff] }
  0x4d   : > { %1247 = vmatpush.bf16.msra.mxu2 %v3890_v28  ;;  %814 = vmatmul.bf16.vlgmr.msrb.gmra.mxu1 %v740_v40  ;;  %v1109_v28 = vrot.slane %v1108_v20, 1  ;;  %v3927_v40 = vld [vmem:[%s4785_s4 + $0x3e0] sm:$0xff]  ;;  %v3946_v20 = vld [vmem:[%s4785_s4 + $0x478] sm:$0xff] }
  0x4e   : > { %1159 = vmatpush.bf16.msra.mxu1 %v3882_v31  ;;  %988 = vmatmul.bf16.vlgmr.msrb.gmra.mxu3 %v930_v37  ;;  %v3929_v31 = vld [vmem:[%s4785_s4 + $0x3f0] sm:$0xff]  ;;  %v3919_v37 = vld [vmem:[%s4785_s4 + $0x3a0] sm:$0xff] }
  0x4f   : > { %1335 = vmatpush.bf16.msra.mxu3 %v3898_v32  ;;  %v3904_v32 = vld [vmem:[%s4785_s4 + $0x328] sm:$0xff] }
  0x50   : > { %1075 = vmatpush.bf16.msra.mxu0 %v3873_v35  ;;  %v3928_v35 = vld [vmem:[%s4785_s4 + $0x3e8] sm:$0xff] }
  0x51   : > { %1248 = vmatpush.bf16.msra.mxu2 %v3889_v36  ;;  %v3903_v36 = vld [vmem:[%s4785_s4 + $0x320] sm:$0xff] }
  0x52   : > { %1160 = vmatpush.bf16.msra.mxu1 %v3881_v38  ;;  %v1349_v38 = vld [vmem:[%s4122_s12 + $0x4] sm:$0x7] }
  0x53   : > { %1336 = vmatpush.bf16.msra.mxu3 %v3897_v39  ;;  %v3911_v39 = vld [vmem:[%s4785_s4 + $0x360] sm:$0xff] }
  0x54   : > { %1076 = vmatpush.bf16.msra.mxu0 %v3872_v41  ;;  %v1441_v41 = vld [vmem:[%s4140_s26 + $0x4] sm:$0x7] }
  0x55   : > { %1249 = vmatpush.bf16.msra.mxu2 %v3888_v42  ;;  %v1368_v42 = vunpack.c.l.b16 %v1349_v38 }
  0x56   : > { %1161 = vmatpush.bf16.msra.mxu1 %v3880_v43  ;;  %v3902_v43 = vld [vmem:[%s4785_s4 + $0x318] sm:$0xff] }
  0x57   : > { %1337 = vmatpush.bf16.msra.mxu3 %v3896_v44  ;;  %v3918_v44 = vld [vmem:[%s4785_s4 + $0x398] sm:$0xff]  ;;  %v1553_v7 = vpack.c.b16 %v1368_v42, %v1552_v59  ;;  %v1997_v59 = vunpack.c.l.b16 %v1978_v51 }
  0x58   : > { %1077 = vmatpush.bf16.msra.mxu0 %v3871_v45  ;;  %v1460_v45 = vunpack.c.l.b16 %v1441_v41 }
  0x59   : > { %1250 = vmatpush.bf16.msra.mxu2 %v3887_v46  ;;  %v3910_v46 = vld [vmem:[%s4785_s4 + $0x358] sm:$0xff] }
  0x5a   : > { %1162 = vmatpush.bf16.msra.mxu1 %v3879_v47  ;;  %v3926_v47 = vld [vmem:[%s4785_s4 + $0x3d8] sm:$0xff] }
  0x5b   : > { %1338 = vmatpush.bf16.msra.mxu3 %v3895_v48  ;;  %v1369_v48 = vpack.c.b16 %v1368_v42, %v1194_v2  ;;  %v3908_v2 = vld [vmem:[%s4785_s4 + $0x348] sm:$0xff]  ;;  %v3942_v42 = vld [vmem:[%s4785_s4 + $0x458] sm:$0xff] }
  0x5c   : > { %1078 = vmatpush.bf16.msra.mxu0 %v3870_v49  ;;  %v3901_v49 = vld [vmem:[%s4785_s4 + $0x310] sm:$0xff] }
  0x5d   : > { %1251 = vmatpush.bf16.msra.mxu2 %v3886_v50  ;;  %v3917_v50 = vld [vmem:[%s4785_s4 + $0x390] sm:$0xff]  ;;  %v1374_v58 = vshll.u32 %v1369_v48, 16 }
  0x5e   : > { %1163 = vmatpush.bf16.msra.mxu1 %v3878_v53  ;;  %v1461_v53 = vpack.c.b16 %v1460_v45, %v1282_v8  ;;  %v3899_v8 = vld [vmem:[%s4785_s4 + $0x300] sm:$0xff]  ;;  %v3933_v45 = vld [vmem:[%s4785_s4 + $0x410] sm:$0xff] }
  0x5f   : > { %1339 = vmatpush.bf16.msra.mxu3 %v3894_v54  ;;  %v3925_v54 = vld [vmem:[%s4785_s4 + $0x3d0] sm:$0xff] }
  0x60   : > { %1079 = vmatpush.bf16.msra.mxu0 %v3869_v55  ;;  %v4504_v55 = vld [vmem:[%s4235_s20] sm:$0xc]  ;;  %v1463_v62 = vshrl.u32 %v1461_v53, 16  ;;  %v1466_v63 = vshll.u32 %v1461_v53, 16 }
  0x61   : > { %1252 = vmatpush.bf16.msra.mxu2 %v3885_v57  ;;  %v1371_v57 = vshrl.u32 %v1369_v48, 16  ;;  %v1639_v0 = vunpack.c.l.b16 %v4504_v55  ;;  %v3932_v55 = vld [vmem:[%s4785_s4 + $0x408] sm:$0xff] }
  0x62   : > { %1164 = vmatpush.bf16.msra.mxu1 %v3877_v60  ;;  %v3900_v60 = vld [vmem:[%s4785_s4 + $0x308] sm:$0xff]  ;;  %v1465_v13 = vrot.slane %v1463_v62, 2  ;;  %v1468_v14 = vrot.slane %v1466_v63, 3 }
  0x63   : > { %1340 = vmatpush.bf16.msra.mxu3 %v3893_v61  ;;  %v3916_v61 = vld [vmem:[%s4785_s4 + $0x388] sm:$0xff]  ;;  %v1641_v15 = vpack.c.b16 %v1640_v1, %v1639_v0  ;;  %v3931_v1 = vld [vmem:[%s4785_s4 + $0x400] sm:$0xff] }
  0x64   : > { %1080 = vmatpush.bf16.msra.mxu0 %v3868_v5  ;;  %v1373_v5 = vrot.slane %v1371_v57, 2 }
  0x65   : > { %1253 = vmatpush.bf16.msra.mxu2 %v3884_v6  ;;  %v1376_v6 = vrot.slane %v1374_v58, 3 }
  0x66   : > { %1165 = vmatpush.bf16.msra.mxu1 %v3876_v11  ;;  %v3938_v11 = vld [vmem:[%s4785_s4 + $0x438] sm:$0xff] }
  0x67   : > { %1341 = vmatpush.bf16.msra.mxu3 %v3892_v12  ;;  %v3954_v12 = vld [vmem:[%s4785_s4 + $0x4b8] sm:$0xff] }
  0x68   : > { %1081 = vmatpush.bf16.msra.mxu0 %v3867_v16  ;;  %v3907_v16 = vld [vmem:[%s4785_s4 + $0x340] sm:$0xff] }
  0x69   : > { %1254 = vmatpush.bf16.msra.mxu2 %v3883_v17  ;;  %v3923_v17 = vld [vmem:[%s4785_s4 + $0x3c0] sm:$0xff] }
  0x6a   : > { %1166 = vmatpush.bf16.msra.mxu1 %v3875_v23  ;;  %v1469_v23 = vor.u32 %v1468_v14, %v1465_v13  ;;  %v3978_v14 = vld [vmem:[%s4785_s4 + $0x578] sm:$0xff] }
  0x6b   : > { %1342 = vmatpush.bf16.msra.mxu3 %v3891_v24  ;;  %1082 = vmatmul.bf16.vlgmr.msra.gmra.mxu0 %v1024_v26  ;;  %v1642_v24 = vrot.slane %v1641_v15, 2  ;;  %v3937_v26 = vld [vmem:[%s4785_s4 + $0x430] sm:$0xff]  ;;  %v3995_v15 = vld [vmem:[%s4785_s4 + $0x5f8] sm:$0xff] }
  0x6c   : > { %1427 = vmatpush.bf16.msrb.mxu0 %v3906_v18  ;;  %1255 = vmatmul.bf16.vlgmr.msra.gmra.mxu2 %v1197_v27  ;;  %v1377_v18 = vor.u32 %v1376_v6, %v1373_v5  ;;  %v3953_v27 = vld [vmem:[%s4785_s4 + $0x4b0] sm:$0xff]  ;;  %v3986_v5 = vld [vmem:[%s4785_s4 + $0x5b8] sm:$0xff] }
  0x6d   : > { %1604 = vmatpush.bf16.msrb.mxu2 %v3922_v19  ;;  %1167 = vmatmul.bf16.vlgmr.msra.gmra.mxu1 %v1109_v28  ;;  %v1554_v19 = vrot.slane %v1553_v7, 3  ;;  %v3936_v28 = vld [vmem:[%s4785_s4 + $0x428] sm:$0xff] }
  0x6e   : > { %1519 = vmatpush.bf16.msrb.mxu1 %v3914_v3  ;;  %1343 = vmatmul.bf16.vlgmr.msra.gmra.mxu3 %v1285_v29  ;;  %v3945_v3 = vld [vmem:[%s4785_s4 + $0x470] sm:$0xff]  ;;  %v3952_v29 = vld [vmem:[%s4785_s4 + $0x4a8] sm:$0xff] }
  0x6f   : > { %1692 = vmatpush.bf16.msrb.mxu3 %v3930_v9  ;;  %v3961_v9 = vld [vmem:[%s4785_s4 + $0x4f0] sm:$0xff] }
  0x70   : > { %1428 = vmatpush.bf16.msrb.mxu0 %v3905_v30  ;;  %v3944_v30 = vld [vmem:[%s4785_s4 + $0x468] sm:$0xff] }
  0x71   : > { %1605 = vmatpush.bf16.msrb.mxu2 %v3921_v22  ;;  %v3960_v22 = vld [vmem:[%s4785_s4 + $0x4e8] sm:$0xff] }
  0x72   : > { %1520 = vmatpush.bf16.msrb.mxu1 %v3913_v25  ;;  %v3935_v25 = vld [vmem:[%s4785_s4 + $0x420] sm:$0xff] }
  0x73   : > { %1693 = vmatpush.bf16.msrb.mxu3 %v3929_v31  ;;  %v3951_v31 = vld [vmem:[%s4785_s4 + $0x4a0] sm:$0xff] }
  0x74   : > { %1429 = vmatpush.bf16.msrb.mxu0 %v3904_v32  ;;  %v1706_v32 = vld [vmem:[%s4311_s7] sm:$0xc] }
  0x75   : > { %1606 = vmatpush.bf16.msrb.mxu2 %v3920_v33  ;;  %v1886_v33 = vld [vmem:[%s4311_s7 + $0x4] sm:$0x7] }
  0x76   : > { %1521 = vmatpush.bf16.msrb.mxu1 %v3912_v34  ;;  %v3943_v34 = vld [vmem:[%s4785_s4 + $0x460] sm:$0xff]  ;;  %v1905_v38 = vunpack.c.l.b16 %v1886_v33 }
  0x77   : > { %1694 = vmatpush.bf16.msrb.mxu3 %v3928_v35  ;;  %v3959_v35 = vld [vmem:[%s4785_s4 + $0x4e0] sm:$0xff] }
  0x78   : > { %1430 = vmatpush.bf16.msrb.mxu0 %v3903_v36  ;;  %v1794_v36 = vld [vmem:[%s4235_s20 + $0x4] sm:$0x7] }
  0x79   : > { %1607 = vmatpush.bf16.msrb.mxu2 %v3919_v37  ;;  %v1727_v37 = vunpack.c.l.b16 %v1706_v32  ;;  %v1813_v41 = vunpack.c.l.b16 %v1794_v36 }
  0x7a   : > { %1522 = vmatpush.bf16.msrb.mxu1 %v3911_v39  ;;  %v3934_v39 = vld [vmem:[%s4785_s4 + $0x418] sm:$0xff] }
  0x7b   : > { %1695 = vmatpush.bf16.msrb.mxu3 %v3927_v40  ;;  %v3950_v40 = vld [vmem:[%s4785_s4 + $0x498] sm:$0xff]  ;;  %v1814_v48 = vpack.c.b16 %v1813_v41, %v1639_v0 }
  0x7c   : > { %1431 = vmatpush.bf16.msrb.mxu0 %v3902_v43  ;;  %v3958_v43 = vld [vmem:[%s4785_s4 + $0x4d8] sm:$0xff] }
  0x7d   : > { %1608 = vmatpush.bf16.msrb.mxu2 %v3918_v44  ;;  %v1906_v44 = vpack.c.b16 %v1905_v38, %v1727_v37  ;;  %v1816_v57 = vshrl.u32 %v1814_v48, 16  ;;  %v1819_v58 = vshll.u32 %v1814_v48, 16  ;;  %v3991_v38 = vld [vmem:[%s4785_s4 + $0x5d8] sm:$0xff] }
  0x7e   : > { %1523 = vmatpush.bf16.msrb.mxu1 %v3910_v46  ;;  %v3949_v46 = vld [vmem:[%s4785_s4 + $0x490] sm:$0xff] }
  0x7f   : > { %1696 = vmatpush.bf16.msrb.mxu3 %v3926_v47  ;;  %v1707_v47 = vld [vmem:[%s4311_s7 + $0x4] sm:$0x3]  ;;  %v1908_v53 = vshrl.u32 %v1906_v44, 16  ;;  %v1818_v6 = vrot.slane %v1816_v57, 2  ;;  %v1821_v7 = vrot.slane %v1819_v58, 3  ;;  %v3972_v57 = vld [vmem:[%s4785_s4 + $0x548] sm:$0xff] }
  0x80   : > { %1432 = vmatpush.bf16.msrb.mxu0 %v3901_v49  ;;  %v3941_v49 = vld [vmem:[%s4785_s4 + $0x450] sm:$0xff]  ;;  %v3989_v58 = vld [vmem:[%s4785_s4 + $0x5c8] sm:$0xff] }
  0x81   : > { %1609 = vmatpush.bf16.msrb.mxu2 %v3917_v50  ;;  %v3957_v50 = vld [vmem:[%s4785_s4 + $0x4d0] sm:$0xff]  ;;  %v1910_v63 = vrot.slane %v1908_v53, 2 }
  0x82   : > { %1524 = vmatpush.bf16.msrb.mxu1 %v3909_v52  ;;  %v1728_v52 = vunpack.c.l.b16 %v1707_v47 }
  0x83   : > { %1697 = vmatpush.bf16.msrb.mxu3 %v3925_v54  ;;  %v1911_v54 = vshll.u32 %v1906_v44, 16  ;;  %v3981_v44 = vld [vmem:[%s4785_s4 + $0x590] sm:$0xff] }
  0x84   : > { %1433 = vmatpush.bf16.msrb.mxu0 %v3900_v60  ;;  %v3940_v60 = vld [vmem:[%s4785_s4 + $0x448] sm:$0xff]  ;;  %v1729_v62 = vpack.c.b16 %v1728_v52, %v1727_v37  ;;  %v3974_v37 = vld [vmem:[%s4785_s4 + $0x558] sm:$0xff] }
  0x85   : > { %1610 = vmatpush.bf16.msrb.mxu2 %v3916_v61  ;;  %v3956_v61 = vld [vmem:[%s4785_s4 + $0x4c8] sm:$0xff]  ;;  %v1913_v0 = vrot.slane %v1911_v54, 3 }
  0x86   : > { %1525 = vmatpush.bf16.msrb.mxu1 %v3908_v2  ;;  %v3947_v2 = vld [vmem:[%s4785_s4 + $0x480] sm:$0xff]  ;;  %v3964_v54 = vld [vmem:[%s4785_s4 + $0x508] sm:$0xff] }
  0x87   : > { %1698 = vmatpush.bf16.msrb.mxu3 %v3924_v4  ;;  %v3970_v4 = vld [vmem:[%s4785_s4 + $0x538] sm:$0xff]  ;;  %v1914_v13 = vor.u32 %v1913_v0, %v1910_v63  ;;  %v3979_v63 = vld [vmem:[%s4785_s4 + $0x580] sm:$0xff] }
  0x88   : > { %1434 = vmatpush.bf16.msrb.mxu0 %v3899_v8  ;;  %v1998_v8 = vpack.c.b16 %v1813_v41, %v1997_v59  ;;  %v4003_v0 = vld [vmem:[%s4785_s4 + $0x638] sm:$0xff] }
  0x89   : > { %1611 = vmatpush.bf16.msrb.mxu2 %v3915_v10  ;;  %v3939_v10 = vld [vmem:[%s4785_s4 + $0x440] sm:$0xff] }
  0x8a   : > { %1526 = vmatpush.bf16.msrb.mxu1 %v3907_v16  ;;  %v1822_v16 = vor.u32 %v1821_v7, %v1818_v6  ;;  %v3988_v6 = vld [vmem:[%s4785_s4 + $0x5c0] sm:$0xff] }
  0x8b   : > { %1699 = vmatpush.bf16.msrb.mxu3 %v3923_v17  ;;  %1435 = vmatmul.bf16.vlgmr.msrb.gmra.mxu0 %v1377_v18  ;;  %v1999_v17 = vrot.slane %v1998_v8, 3  ;;  %v3969_v18 = vld [vmem:[%s4785_s4 + $0x530] sm:$0xff]  ;;  %v2063_v8 = vld [vmem:[%s4122_s12 + $0x4] sm:$0xf] }
  0x8c   : > { %1780 = vmatpush.bf16.msra.mxu0 %v3938_v11  ;;  %1612 = vmatmul.bf16.vlgmr.msrb.gmra.mxu2 %v1554_v19  ;;  %v3955_v11 = vld [vmem:[%s4785_s4 + $0x4c0] sm:$0xff]  ;;  %v3985_v19 = vld [vmem:[%s4785_s4 + $0x5b0] sm:$0xff] }
  0x8d   : > { %1964 = vmatpush.bf16.msra.mxu2 %v3954_v12  ;;  %1527 = vmatmul.bf16.vlgmr.msrb.gmra.mxu1 %v1469_v23  ;;  %v1730_v12 = vrot.slane %v1729_v62, 2  ;;  %v3968_v23 = vld [vmem:[%s4785_s4 + $0x528] sm:$0xff]  ;;  %v3963_v62 = vld [vmem:[%s4785_s4 + $0x500] sm:$0xff] }
  0x8e   : > { %1872 = vmatpush.bf16.msra.mxu1 %v3946_v20  ;;  %1700 = vmatmul.bf16.vlgmr.msrb.gmra.mxu3 %v1642_v24  ;;  %v3977_v20 = vld [vmem:[%s4785_s4 + $0x570] sm:$0xff]  ;;  %v3984_v24 = vld [vmem:[%s4785_s4 + $0x5a8] sm:$0xff] }
  0x8f   : > { %2049 = vmatpush.bf16.msra.mxu3 %v3962_v21  ;;  %v3994_v21 = vld [vmem:[%s4785_s4 + $0x5f0] sm:$0xff] }
  0x90   : > { %1781 = vmatpush.bf16.msra.mxu0 %v3937_v26  ;;  %v3976_v26 = vld [vmem:[%s4785_s4 + $0x568] sm:$0xff] }
  0x91   : > { %1965 = vmatpush.bf16.msra.mxu2 %v3953_v27  ;;  %v3993_v27 = vld [vmem:[%s4785_s4 + $0x5e8] sm:$0xff] }
  0x92   : > { %1873 = vmatpush.bf16.msra.mxu1 %v3945_v3  ;;  %v3967_v3 = vld [vmem:[%s4785_s4 + $0x520] sm:$0xff] }
  0x93   : > { %2050 = vmatpush.bf16.msra.mxu3 %v3961_v9  ;;  %v3983_v9 = vld [vmem:[%s4785_s4 + $0x5a0] sm:$0xff] }
  0x94   : > { %1782 = vmatpush.bf16.msra.mxu0 %v3936_v28  ;;  %v2223_v28 = vld [vmem:[%s4122_s12 + $0x4] sm:$0xf] }
  0x95   : > { %1966 = vmatpush.bf16.msra.mxu2 %v3952_v29  ;;  %v4681_v29 = vld [vmem:[%s4122_s12 + $0x8] sm:$0x1]  ;;  %v2244_v32 = vunpack.c.l.b16 %v2223_v28 }
  0x96   : > { %1874 = vmatpush.bf16.msra.mxu1 %v3944_v30  ;;  %v2245_v33 = vunpack.c.l.b16 %v4681_v29 }
  0x97   : > { %2051 = vmatpush.bf16.msra.mxu3 %v3960_v22  ;;  %v3975_v22 = vld [vmem:[%s4785_s4 + $0x560] sm:$0xff] }
  0x98   : > { %1783 = vmatpush.bf16.msra.mxu0 %v3935_v25  ;;  %v3992_v25 = vld [vmem:[%s4785_s4 + $0x5e0] sm:$0xff]  ;;  %v2246_v41 = vpack.c.b16 %v2245_v33, %v2244_v32 }
  0x99   : > { %1967 = vmatpush.bf16.msra.mxu2 %v3951_v31 }
  0x9a   : > { %1875 = vmatpush.bf16.msra.mxu1 %v3943_v34  ;;  %v3966_v34 = vld [vmem:[%s4785_s4 + $0x518] sm:$0xff]  ;;  %v2250_v52 = vshll.u32 %v2246_v41, 16  ;;  %v2248_v59 = vshrl.u32 %v2246_v41, 16 }
  0x9b   : > { %2052 = vmatpush.bf16.msra.mxu3 %v3959_v35  ;;  %v3982_v35 = vld [vmem:[%s4785_s4 + $0x598] sm:$0xff] }
  0x9c   : > { %1784 = vmatpush.bf16.msra.mxu0 %v3934_v39  ;;  %v3717_v39 = vld [vmem:[%s4140_s26 + $0x4] sm:$0xf] }
  0x9d   : > { %1968 = vmatpush.bf16.msra.mxu2 %v3950_v40  ;;  %v3987_v40 = vld [vmem:[%s4140_s26 + $0x4] sm:$0x10] }
  0x9e   : > { %1876 = vmatpush.bf16.msra.mxu1 %v3942_v42 }
  0x9f   : > { %2053 = vmatpush.bf16.msra.mxu3 %v3958_v43  ;;  %v3965_v43 = vld [vmem:[%s4785_s4 + $0x510] sm:$0xff] }
  0xa0   : > { %1785 = vmatpush.bf16.msra.mxu0 %v3933_v45 }
  0xa1   : > { %1969 = vmatpush.bf16.msra.mxu2 %v3949_v46  ;;  %v3718_v46 = vor.u32 %v3987_v40, %v3717_v39 }
  0xa2   : > { %1877 = vmatpush.bf16.msra.mxu1 %v3941_v49  ;;  %v3973_v49 = vld [vmem:[%s4785_s4 + $0x550] sm:$0xff] }
  0xa3   : > { %2054 = vmatpush.bf16.msra.mxu3 %v3957_v50  ;;  %v3990_v50 = vld [vmem:[%s4785_s4 + $0x5d0] sm:$0xff] }
  0xa4   : > { %1786 = vmatpush.bf16.msra.mxu0 %v3932_v55  ;;  %v3980_v55 = vld [vmem:[%s4785_s4 + $0x588] sm:$0xff] }
  0xa5   : > { %1970 = vmatpush.bf16.msra.mxu2 %v3948_v56  ;;  %v2344_v56 = vshll.u32 %v3718_v46, 16 }
  0xa6   : > { %1878 = vmatpush.bf16.msra.mxu1 %v3940_v60  ;;  %v2252_v60 = vrot.slane %v2250_v52, 1 }
  0xa7   : > { %2055 = vmatpush.bf16.msra.mxu3 %v3956_v61 }
  0xa8   : > { %1787 = vmatpush.bf16.msra.mxu0 %v3931_v1  ;;  %v402_v30 = vpop.f32.mrf.mxu0  ;;  %v2342_v1 = vshrl.u32 %v3718_v46, 16  ;;  %v2253_v7 = vor.u32 %v2252_v60, %v2248_v59 }
  0xa9   : > { %1971 = vmatpush.bf16.msra.mxu2 %v3947_v2  ;;  %v2346_v2 = vrot.slane %v2344_v56, 1 }
  0xaa   : > { %1879 = vmatpush.bf16.msra.mxu1 %v3939_v10  ;;  %v463_v31 = vpop.f32.mrf.mxu1 }
  0xab   : > { %2056 = vmatpush.bf16.msra.mxu3 %v3955_v11  ;;  %1788 = vmatmul.bf16.vlgmr.msra.gmra.mxu0 %v1730_v12  ;;  %v464_v36 = vadd.f32 %v463_v31, %v402_v30  ;;  %v2347_v10 = vor.u32 %v2346_v2, %v2342_v1  ;;  %v2143_v11 = vld [vmem:[%s4140_s26 + $0x4] sm:$0xf]  ;;  %v4002_v12 = vld [vmem:[%s4785_s4 + $0x630] sm:$0xff]  ;;  %v3997_v30 = vld [vmem:[%s4785_s4 + $0x608] sm:$0xff] }
  0xac   : > { %2129 = vmatpush.bf16.msrb.mxu0 %v3970_v4  ;;  %1972 = vmatmul.bf16.vlgmr.msra.gmra.mxu2 %v1914_v13  ;;  %v4001_v13 = vld [vmem:[%s4785_s4 + $0x628] sm:$0xff]  ;;  %v3996_v31 = vld [vmem:[%s4785_s4 + $0x600] sm:$0xff] }
  0xad   : > { %2303 = vmatpush.bf16.msrb.mxu2 %v3986_v5  ;;  %1880 = vmatmul.bf16.vlgmr.msra.gmra.mxu1 %v1822_v16  ;;  %v3971_v5 = vld [vmem:[%s4785_s4 + $0x540] sm:$0xff] }
  0xae   : > { %2209 = vmatpush.bf16.msrb.mxu1 %v3978_v14  ;;  %2057 = vmatmul.bf16.vlgmr.msra.gmra.mxu3 %v1999_v17  ;;  %v4000_v14 = vld [vmem:[%s4785_s4 + $0x620] sm:$0xff] }
  0xaf   : > { %2397 = vmatpush.bf16.msrb.mxu3 %v3995_v15  ;;  %v556_v42 = vpop.f32.mrf.mxu2 }
  0xb0   : > { %2130 = vmatpush.bf16.msrb.mxu0 %v3969_v18  ;;  %v560_v45 = vadd.f32 %v556_v42, %v464_v36  ;;  %v404_v48 = vpop.f32.mrf.mxu0 }
  0xb1   : > { %2304 = vmatpush.bf16.msrb.mxu2 %v3985_v19  ;;  %v650_v47 = vpop.f32.mrf.mxu3  ;;  %v3999_v19 = vld [vmem:[%s4785_s4 + $0x618] sm:$0xff] }
  0xb2   : > { %2210 = vmatpush.bf16.msrb.mxu1 %v3977_v20  ;;  %v654_v51 = vadd.f32 %v650_v47, %v560_v45  ;;  %v465_v53 = vpop.f32.mrf.mxu1 }
  0xb3   : > { %2398 = vmatpush.bf16.msrb.mxu3 %v3994_v21 }
  0xb4   : > { %2131 = vmatpush.bf16.msrb.mxu0 %v3968_v23  ;;  %v3998_v23 = vld [vmem:[%s4785_s4 + $0x610] sm:$0xff] }
  0xb5   : > { %2305 = vmatpush.bf16.msrb.mxu2 %v3984_v24 }
  0xb6   : > { %2211 = vmatpush.bf16.msrb.mxu1 %v3976_v26  ;;  %v2411_v26 = vld [vmem:[%s4122_s12 + $0x4] sm:$0xe] }
  0xb7   : > { %2399 = vmatpush.bf16.msrb.mxu3 %v3993_v27  ;;  %v558_v61 = vpop.f32.mrf.mxu2  ;;  %v2430_v28 = vunpack.c.l.b16 %v2411_v26 }
  0xb8   : > { %2132 = vmatpush.bf16.msrb.mxu0 %v3967_v3 }
  0xb9   : > { %2306 = vmatpush.bf16.msrb.mxu2 %v3983_v9  ;;  %v652_v4 = vpop.f32.mrf.mxu3 }
  0xba   : > { %2212 = vmatpush.bf16.msrb.mxu1 %v3975_v22 }
  0xbb   : > { %2400 = vmatpush.bf16.msrb.mxu3 %v3992_v25  ;;  %v2431_v25 = vpack.c.b16 %v2245_v33, %v2430_v28 }
  0xbc   : > { %2133 = vmatpush.bf16.msrb.mxu0 %v3966_v34 }
  0xbd   : > { %2307 = vmatpush.bf16.msrb.mxu2 %v3982_v35  ;;  %v2432_v34 = vrot.slane %v2431_v25, 1 }
  0xbe   : > { %2213 = vmatpush.bf16.msrb.mxu1 %v3974_v37 }
  0xbf   : > { %2401 = vmatpush.bf16.msrb.mxu3 %v3991_v38 }
  0xc0   : > { %2134 = vmatpush.bf16.msrb.mxu0 %v3965_v43 }
  0xc1   : > { %2308 = vmatpush.bf16.msrb.mxu2 %v3981_v44 }
  0xc2   : > { %2214 = vmatpush.bf16.msrb.mxu1 %v3973_v49 }
  0xc3   : > { %2402 = vmatpush.bf16.msrb.mxu3 %v3990_v50 }
  0xc4   : > { %2135 = vmatpush.bf16.msrb.mxu0 %v3964_v54 }
  0xc5   : > { %2309 = vmatpush.bf16.msrb.mxu2 %v3980_v55 }
  0xc6   : > { %2215 = vmatpush.bf16.msrb.mxu1 %v3972_v57 }
  0xc7   : > { %2403 = vmatpush.bf16.msrb.mxu3 %v3989_v58 }
  0xc8   : > { %2136 = vmatpush.bf16.msrb.mxu0 %v3963_v62  ;;  %v735_v15 = vpop.f32.mrf.mxu0 }
  0xc9   : > { %2310 = vmatpush.bf16.msrb.mxu2 %v3979_v63  ;;  %v739_v16 = vadd.f32 %v735_v15, %v654_v51 }
  0xca   : > { %2216 = vmatpush.bf16.msrb.mxu1 %v3971_v5  ;;  %v815_v17 = vpop.f32.mrf.mxu1 }
  0xcb   : > { %2404 = vmatpush.bf16.msrb.mxu3 %v3988_v6  ;;  %2137 = vmatmul.bf16.vlgmr.msrb.gmra.mxu0 %v2063_v8  ;;  %v819_v18 = vadd.f32 %v815_v17, %v739_v16 }
  0xcc   : > { %2482 = vmatpush.bf16.msra.mxu0 %v4003_v0  ;;  %2311 = vmatmul.bf16.vlgmr.msrb.gmra.mxu2 %v2253_v7 }
  0xcd   : > { %2217 = vmatmul.bf16.vlgmr.msrb.gmra.mxu1 %v2143_v11 }
  0xce   : > { %2405 = vmatmul.bf16.vlgmr.msrb.gmra.mxu3 %v2347_v10 }
  0xcf   : > { %v895_v20 = vpop.f32.mrf.mxu2 }
  0xd0   : > { %2483 = vmatpush.bf16.msra.mxu0 %v4002_v12  ;;  %v899_v21 = vadd.f32 %v895_v20, %v819_v18  ;;  %v737_v27 = vpop.f32.mrf.mxu0 }
  0xd1   : > { %v989_v24 = vpop.f32.mrf.mxu3 }
  0xd2   : > { %v993_v3 = vadd.f32 %v989_v24, %v899_v21  ;;  %v817_v9 = vpop.f32.mrf.mxu1 }
  0xd4   : > { %2484 = vmatpush.bf16.msra.mxu0 %v4001_v13 }
  0xd7   : > { %v897_v22 = vpop.f32.mrf.mxu2 }
  0xd8   : > { %2485 = vmatpush.bf16.msra.mxu0 %v4000_v14 }
  0xd9   : > { %v991_v32 = vpop.f32.mrf.mxu3 }
  0xdc   : > { %2486 = vmatpush.bf16.msra.mxu0 %v3999_v19  ;;  %v4013_v19 = vld [vmem:[%s4786_s5] ss:$0 sm:$0xff] }
  0xe0   : > { %2487 = vmatpush.bf16.msra.mxu0 %v3998_v23 }
  0xe4   : > { %2488 = vmatpush.bf16.msra.mxu0 %v3997_v30 }
  0xe8   : > { %2489 = vmatpush.bf16.msra.mxu0 %v3996_v31  ;;  %v1083_v35 = vpop.f32.mrf.mxu0 }
  0xe9   : > { %v1087_v36 = vadd.f32 %v1083_v35, %v993_v3 }
  0xea   : > { %v1168_v37 = vpop.f32.mrf.mxu1 }
  0xeb   : > { %2490 = vmatmul.bf16.vlgmr.msra.gmra.mxu0 %v2432_v34  ;;  %v1172_v38 = vadd.f32 %v1168_v37, %v1087_v36 }
  0xef   : > { %v1256_v39 = vpop.f32.mrf.mxu2 }
  0xf0   : > { %v1260_v40 = vadd.f32 %v1256_v39, %v1172_v38  ;;  %v1085_v42 = vpop.f32.mrf.mxu0 }
  0xf1   : > { %v1344_v41 = vpop.f32.mrf.mxu3 }
  0xf2   : > { %v1348_v43 = vadd.f32 %v1344_v41, %v1260_v40  ;;  %v1170_v29 = vpop.f32.mrf.mxu1 }
  0xf7   : > { %v1258_v33 = vpop.f32.mrf.mxu2 }
  0xf9   : > { %v1346_v44 = vpop.f32.mrf.mxu3 }
 0x108   : > { %v1436_v45 = vpop.f32.mrf.mxu0 }
 0x109   : > { %v1440_v46 = vadd.f32 %v1436_v45, %v1348_v43 }
 0x10a   : > { %v1528_v47 = vpop.f32.mrf.mxu1 }
 0x10b   : > { %v1532_v48 = vadd.f32 %v1528_v47, %v1440_v46 }
 0x10f   : > { %v1613_v49 = vpop.f32.mrf.mxu2 }
 0x110   : > { %v1617_v50 = vadd.f32 %v1613_v49, %v1532_v48  ;;  %v1438_v52 = vpop.f32.mrf.mxu0 }
 0x111   : > { %v1701_v51 = vpop.f32.mrf.mxu3 }
 0x112   : > { %v1705_v53 = vadd.f32 %v1701_v51, %v1617_v50  ;;  %v1530_v54 = vpop.f32.mrf.mxu1 }
 0x117   : > { %v1615_v55 = vpop.f32.mrf.mxu2 }
 0x119   : > { %v1703_v56 = vpop.f32.mrf.mxu3 }
 0x128   : > { %v1789_v57 = vpop.f32.mrf.mxu0 }
 0x129   : > { %v1793_v5 = vadd.f32 %v1789_v57, %v1705_v53 }
 0x12a   : > { %v1881_v58 = vpop.f32.mrf.mxu1 }
 0x12b   : > { %v1885_v10 = vadd.f32 %v1881_v58, %v1793_v5 }
 0x12f   : > { %v1973_v59 = vpop.f32.mrf.mxu2 }
 0x130   : > { %v1791_v61 = vpop.f32.mrf.mxu0  ;;  %v1977_v11 = vadd.f32 %v1973_v59, %v1885_v10 }
 0x131   : > { %v2058_v60 = vpop.f32.mrf.mxu3 }
 0x132   : > { %v1883_v62 = vpop.f32.mrf.mxu1  ;;  %v2062_v14 = vadd.f32 %v2058_v60, %v1977_v11 }
 0x137   : > { %v1975_v63 = vpop.f32.mrf.mxu2 }
 0x139   : > { %v2060_v0 = vpop.f32.mrf.mxu3 }
 0x148   : > { %v2138_v1 = vpop.f32.mrf.mxu0 }
 0x149   : > { %v2142_v15 = vadd.f32 %v2138_v1, %v2062_v14 }
 0x14a   : > { %v2218_v2 = vpop.f32.mrf.mxu1 }
 0x14b   : > { %v2222_v16 = vadd.f32 %v2218_v2, %v2142_v15 }
 0x14f   : > { %v2312_v4 = vpop.f32.mrf.mxu2 }
 0x150   : > { %v2140_v7 = vpop.f32.mrf.mxu0  ;;  %v2316_v17 = vadd.f32 %v2312_v4, %v2222_v16 }
 0x151   : > { %v2406_v6 = vpop.f32.mrf.mxu3 }
 0x152   : > { %v2220_v8 = vpop.f32.mrf.mxu1  ;;  %v2410_v18 = vadd.f32 %v2406_v6, %v2316_v17 }
 0x157   : > { %v2314_v12 = vpop.f32.mrf.mxu2 }
 0x159   : > { %v2408_v13 = vpop.f32.mrf.mxu3 }
 0x168   : > { %v2491_v20 = vpop.f32.mrf.mxu0 }
 0x169   : > { %v2495_v21 = vadd.f32 %v2491_v20, %v2410_v18 }
 0x16b   : > { %v2500_v23 = vadd.f32 %v4013_v19, %v2495_v21 }
 0x16d   : > { %v2501_v24 = vmax.f32 %v2500_v23, 0.0 }
 0x16f   : > { %v2502_v26 = vpack.c.bf16 %v2501_v24, %v2501_v24 }
 0x170   : > { %v2493_v27 = vpop.f32.mrf.mxu0 }
 0x171   : > { %2503 = vst [vmem:[%s309_s17] sm:$0xf] %v2502_v26 }
 0x172 PF: > { %s16_s21 = sadd.s32 1, %s4020_s21  }
 0x173   : > { %p13_p4 = scmp.ge.s32.totalorder %s16_s21, 4  }
 0x175   :  { %15 = sbr.rel (!%p13_p4) target bundleno = 1 (0x1), region = 107 }

// kernel: basic_ag_forward.9
= control target key start
LH: loop header
LB: loop body
LE: loop exit
PB: predicated region body
PF: predicated region fallthrough
CT: control target
= control target key end

     0   :  { %s1707_s12 = smov 0   ;;  %s2034_s0 = inlined_call_operand.vmem [shape: bf16[2,42,128], index: 0, kind: input, shape index: {}]   ;;  %s2035_s1 = inlined_call_operand.vmem [shape: bf16[9,128,128], index: 1, kind: input, shape index: {}]   ;;  %s2036_s2 = inlined_call_operand.vmem [shape: f32[1,128], index: 2, kind: input, shape index: {}]   ;;  %s2037_s3 = inlined_call_operand.vmem [shape: bf16[2,24,128], index: 3, kind: output, shape index: {}]  }
   0x1 LB: > { %s1149_s13 = sadd.s32 4294967295, %s1685_s12   ;;  %p1153_p0 = scmp.ge.s32.totalorder %s1685_s12, 1  ;;  %s1685_s12 = sphi %s1707_s12, %s13_s12  }
   0x2   : > { %p137_p1 = scmp.lt.s32.totalorder %s1685_s12, 3 }
   0x4   : > { %p138_p2 = pnand %p1153_p0, %p137_p1 }
   0x5   : > { %p161_p3 = scmp.lt.s32.totalorder (!%p138_p2), %s1149_s13, 1 }
   0x6   : > { %141 = sbr.rel (%p138_p2) target bundleno = 250 (0xfa), region = 32 }
   0xb   : > { %v1589_v0 = vld [vmem:[%s2035_s1 + $0x78] sm:$0xff]  ;;  %v1588_v4 = vld [vmem:[%s2035_s1 + $0x70] sm:$0xff]  ;;  %s2039_s13 = smov (!%p161_p3, %s1149_s13), 1  ;;  %v1587_v8 = vld [vmem:[%s2035_s1 + $0x68] sm:$0xff]  ;;  %vm218_vm0 = vsmask.f32 7424 }
   0xc   : > { %v1581_v1 = vld [vmem:[%s2035_s1 + $0x38] sm:$0xff]  ;;  %284 = vmatpush.bf16.msra.mxu0 %v1589_v0  ;;  %v1580_v5 = vld [vmem:[%s2035_s1 + $0x30] sm:$0xff]  ;;  %s1668_s30 = smul.u32 24, %s2039_s13  ;;  %v1579_v9 = vld [vmem:[%s2035_s1 + $0x28] sm:$0xff]  ;;  %vm392_vm1 = vcmask 1046528   ;;  %vm492_vm2 = vcmask 1044480  }
   0xd   : > { %v1597_v2 = vld [vmem:[%s2035_s1 + $0xb8] sm:$0xff]  ;;  %353 = vmatpush.bf16.msra.mxu1 %v1581_v1  ;;  %v1596_v6 = vld [vmem:[%s2035_s1 + $0xb0] sm:$0xff]  ;;  %v1595_v10 = vld [vmem:[%s2035_s1 + $0xa8] sm:$0xff]  ;;  %vm588_vm3 = vsmask.f32 4352  ;;  %vm798_vm4 = vcmask 1045504  }
   0xe   : > { %v1605_v3 = vld [vmem:[%s2035_s1 + $0xf8] sm:$0xff]  ;;  %446 = vmatpush.bf16.msra.mxu2 %v1597_v2  ;;  %v1604_v7 = vld [vmem:[%s2035_s1 + $0xf0] sm:$0xff]  ;;  %v1603_v11 = vld [vmem:[%s2035_s1 + $0xe8] sm:$0xff]  ;;  %s1757_s16 = scalar_lea.vmem %s2034_s0, %s1668_s30  ;;  %vm894_vm5 = vsmask.f32 5376  ;;  %s1669_s18 = smul.u32 12, %s2039_s13 }
   0xf   : > { %546 = vmatpush.bf16.msra.mxu3 %v1605_v3  ;;  %v1586_v12 = vld [vmem:[%s2035_s1 + $0x60] sm:$0xff]  ;;  %v1772_v16 = vld [vmem:[%s1757_s16 + $0x8] sm:$0xff]   ;;  %v1585_v18 = vld [vmem:[%s2035_s1 + $0x58] sm:$0xff] }
  0x10   : > { %285 = vmatpush.bf16.msra.mxu0 %v1588_v4  ;;  %v1578_v13 = vld [vmem:[%s2035_s1 + $0x20] sm:$0xff]  ;;  %v190_v17 = vld [vmem:[%s1757_s16 + $0xc] sm:$0x1]  ;;  %v1577_v19 = vld [vmem:[%s2035_s1 + $0x18] sm:$0xff]  ;;  %v1782_v20 = vunpack.c.l.b16 %v1772_v16  ;;  %s170_s21 = scalar_lea.vmem %s2037_s3, %s1669_s18 }
  0x11   : > { %354 = vmatpush.bf16.msra.mxu1 %v1580_v5  ;;  %v1594_v14 = vld [vmem:[%s2035_s1 + $0xa0] sm:$0xff]  ;;  %v215_v21 = vunpack.c.l.b16 %v190_v17  ;;  %v1593_v22 = vld [vmem:[%s2035_s1 + $0x98] sm:$0xff]  ;;  %v468_v27 = vld [vmem:[%s1757_s16 + $0xc] sm:$0x7] }
  0x12   : > { %447 = vmatpush.bf16.msra.mxu2 %v1596_v6  ;;  %v1602_v15 = vld [vmem:[%s2035_s1 + $0xe0] sm:$0xff]  ;;  %v1601_v23 = vld [vmem:[%s2035_s1 + $0xd8] sm:$0xff]  ;;  %v1584_v28 = vld [vmem:[%s2035_s1 + $0x50] sm:$0xff]  ;;  %v489_v37 = vunpack.c.l.b16 %v468_v27  ;;  %v302_v27 = vpack.c.b16 %v1782_v20, %v1782_v20 }
  0x13   : > { %547 = vmatpush.bf16.msra.mxu3 %v1604_v7  ;;  %v1791_v24 = vld [vmem:[%s1757_s16] sm:$0xff]   ;;  %v1576_v29 = vld [vmem:[%s2035_s1 + $0x10] sm:$0xff]  ;;  %v1803_v30 = vpack.c.b16 %v215_v21, %v1782_v20  ;;  %v1583_v38 = vld [vmem:[%s2035_s1 + $0x48] sm:$0xff] }
  0x14   : > { %286 = vmatpush.bf16.msra.mxu0 %v1587_v8  ;;  %v371_v25 = vld [vmem:[%s1757_s16] sm:$0xe]  ;;  %v222_v31 = vshll.u32 %v1791_v24, 16  ;;  %v1592_v32 = vld [vmem:[%s2035_s1 + $0x90] sm:$0xff]  ;;  %v1813_v34 = vunpack.c.h.b16 %v1791_v24  ;;  %v1575_v39 = vld [vmem:[%s2035_s1 + $0x8] sm:$0xff]  ;;  %v220_v40 = vshrl.u32 %v1791_v24, 16  ;;  %v1834_v47 = vpack.c.b16 %v489_v37, %v1782_v20 }
  0x15   : > { %355 = vmatpush.bf16.msra.mxu1 %v1579_v9  ;;  %v467_v26 = vld [vmem:[%s1757_s16] sm:$0x8]  ;;  %v1600_v33 = vld [vmem:[%s2035_s1 + $0xd0] sm:$0xff]  ;;  %v390_v35 = vunpack.c.l.b16 %v371_v25  ;;  %v227_v42 = vshll.u32 %v1803_v30, 16  ;;  %v1591_v43 = vld [vmem:[%s2035_s1 + $0x88] sm:$0xff]  ;;  %v394_v55 = vrot.slane %v1803_v30, 1 }
  0x16   : > { %448 = vmatpush.bf16.msra.mxu2 %v1595_v10  ;;  %v488_v36 = vunpack.c.l.b16 %v467_v26  ;;  %v224_v41 = vrot.slane %v222_v31, 1  ;;  %v1599_v44 = vld [vmem:[%s2035_s1 + $0xc8] sm:$0xff]  ;;  %v1582_v48 = vld [vmem:[%s2035_s1 + $0x40] sm:$0xff]  ;;  %v494_v57 = vrot.slane %v1834_v47, 3  ;;  %v1613_v58 = vld [vmem:[%s2035_s1 + $0x138] sm:$0xff] }
  0x17   : > { %548 = vmatpush.bf16.msra.mxu3 %v1603_v11  ;;  %v391_v45 = vpack.c.b16 %v1813_v34, %v390_v35  ;;  %v1574_v49 = vld [vmem:[%s2035_s1] sm:$0xff]  ;;  %v1842_v51 = vrot.slane %v227_v42, 1  ;;  %v1621_v59 = vld [vmem:[%s2035_s1 + $0x178] sm:$0xff]  ;;  %v1612_v1 = vld [vmem:[%s2035_s1 + $0x130] sm:$0xff] }
  0x18   : > { %287 = vmatpush.bf16.msra.mxu0 %v1586_v12  ;;  %v1831_v46 = vpack.c.b16 %v1813_v34, %v488_v36  ;;  %v225_v50 = vor.u32 %v224_v41, %v220_v40  ;;  %v1590_v52 = vld [vmem:[%s2035_s1 + $0x80] sm:$0xff]  ;;  %v1629_v62 = vld [vmem:[%s2035_s1 + $0x1b8] sm:$0xff]  ;;  %v1620_v2 = vld [vmem:[%s2035_s1 + $0x170] sm:$0xff]  ;;  %v601_v40 = vshll.u32 %v1772_v16, 16 }
  0x19   : > { %356 = vmatpush.bf16.msra.mxu1 %v1578_v13  ;;  %v1598_v53 = vld [vmem:[%s2035_s1 + $0xc0] sm:$0xff]  ;;  %v393_v54 = vrot.slane %v391_v45, 1  ;;  %v1637_v0 = vld [vmem:[%s2035_s1 + $0x1f8] sm:$0xff]  ;;  %v1628_v3 = vld [vmem:[%s2035_s1 + $0x1b0] sm:$0xff] }
  0x1a   : > { %449 = vmatpush.bf16.msra.mxu2 %v1594_v14  ;;  %v493_v56 = vrot.slane %v1831_v46, 3  ;;  %v230_v60 = vsel %vm218_vm0, %v225_v50, %v1842_v51  ;;  %v1636_v4 = vld [vmem:[%s2035_s1 + $0x1f0] sm:$0xff]  ;;  %v1611_v5 = vld [vmem:[%s2035_s1 + $0x128] sm:$0xff]  ;;  %v1610_v9 = vld [vmem:[%s2035_s1 + $0x120] sm:$0xff]  ;;  %v231_v14 = vshrl.u32 %v1803_v30, 16  ;;  %v590_v37 = vshrl.u32 %v1831_v46, 16 }
  0x1b   : > { %549 = vmatpush.bf16.msra.mxu3 %v1602_v15  ;;  %v395_v61 = vsel %vm392_vm1, %v393_v54, %v394_v55  ;;  %v1619_v6 = vld [vmem:[%s2035_s1 + $0x168] sm:$0xff]  ;;  %v1618_v10 = vld [vmem:[%s2035_s1 + $0x160] sm:$0xff]  ;;  %v873_v13 = vld [vmem:[%s1757_s16 + $0x10] sm:$0x7]  ;;  %v586_v15 = vunpack.c.h.b16 %v1772_v16 }
  0x1c   : > { %288 = vmatpush.bf16.msra.mxu0 %v1585_v18  ;;  %v495_v63 = vsel %vm492_vm2, %v493_v56, %v494_v57  ;;  %v1627_v7 = vld [vmem:[%s2035_s1 + $0x1a8] sm:$0xff]  ;;  %v767_v11 = vld [vmem:[%s1757_s16 + $0x4] sm:$0xc]  ;;  %v1617_v25 = vld [vmem:[%s2035_s1 + $0x158] sm:$0xff]  ;;  %v233_v26 = vor.u32 %v231_v14, %v1842_v51 }
  0x1d   : > { %357 = vmatpush.bf16.msra.mxu1 %v1577_v19  ;;  %v1635_v8 = vld [vmem:[%s2035_s1 + $0x1e8] sm:$0xff]  ;;  %v1626_v17 = vld [vmem:[%s2035_s1 + $0x1a0] sm:$0xff]  ;;  %v770_v31 = vld [vmem:[%s1757_s16 + $0x10] sm:$0x3]  ;;  %v695_v14 = vpack.c.b16 %v586_v15, %v586_v15 }
  0x1e   : > { %450 = vmatpush.bf16.msra.mxu2 %v1593_v22  ;;  %v1905_v12 = vld [vmem:[%s1757_s16 + $0x8] sm:$0xff]   ;;  %v1634_v18 = vld [vmem:[%s2035_s1 + $0x1e0] sm:$0xff]  ;;  %v792_v22 = vunpack.c.l.b16 %v767_v11  ;;  %v1608_v35 = vld [vmem:[%s2035_s1 + $0x110] sm:$0xff]  ;;  %v795_v41 = vunpack.c.l.b16 %v770_v31 }
  0x1f   : > { %550 = vmatpush.bf16.msra.mxu3 %v1601_v23  ;;  %v1652_v19 = vunpack.c.l.b16 %v1905_v12  ;;  %v1653_v21 = vunpack.c.h.b16 %v1905_v12  ;;  %v892_v23 = vunpack.c.l.b16 %v873_v13  ;;  %v1616_v36 = vld [vmem:[%s2035_s1 + $0x150] sm:$0xff]  ;;  %v1607_v47 = vld [vmem:[%s2035_s1 + $0x108] sm:$0xff]  ;;  %v1641_v13 = vld [vmem:[%s2035_s1 + $0x218] sm:$0xff] }
  0x20   : > { %289 = vmatpush.bf16.msra.mxu0 %v1584_v28  ;;  %v1625_v28 = vld [vmem:[%s2035_s1 + $0x198] sm:$0xff]  ;;  %v1624_v42 = vld [vmem:[%s2035_s1 + $0x190] sm:$0xff]  ;;  %v1623_v54 = vld [vmem:[%s2035_s1 + $0x188] sm:$0xff] }
  0x21   : > { %358 = vmatpush.bf16.msra.mxu1 %v1576_v29  ;;  %v1633_v29 = vld [vmem:[%s2035_s1 + $0x1d8] sm:$0xff]  ;;  %v1632_v30 = vld [vmem:[%s2035_s1 + $0x1d0] sm:$0xff] }
  0x22   : > { %451 = vmatpush.bf16.msra.mxu2 %v1592_v32  ;;  %v1936_v32 = vpack.c.b16 %v1652_v19, %v792_v22  ;;  %v1644_v11 = vld [vmem:[%s2035_s1 + $0x230] sm:$0xff]  ;;  %v1638_v22 = vld [vmem:[%s2035_s1 + $0x200] sm:$0xff] }
  0x23   : > { %551 = vmatpush.bf16.msra.mxu3 %v1600_v33  ;;  %v1938_v33 = vpack.c.b16 %v892_v23, %v1653_v21 }
  0x24   : > { %290 = vmatpush.bf16.msra.mxu0 %v1583_v38  ;;  %v593_v38 = vshll.u32 %v1831_v46, 16 }
  0x25   : > { %359 = vmatpush.bf16.msra.mxu1 %v1575_v39  ;;  %v598_v39 = vshrl.u32 %v1772_v16, 16  ;;  %v904_v45 = vshrl.u32 %v1938_v33, 16  ;;  %v907_v46 = vshll.u32 %v1938_v33, 16  ;;  %v1639_v16 = vld [vmem:[%s2035_s1 + $0x208] sm:$0xff] }
  0x26   : > { %452 = vmatpush.bf16.msra.mxu2 %v1591_v43  ;;  %v896_v43 = vshrl.u32 %v1936_v32, 16  ;;  %v595_v50 = vrot.slane %v593_v38, 4 }
  0x27   : > { %552 = vmatpush.bf16.msra.mxu3 %v1599_v44  ;;  %v899_v44 = vshll.u32 %v1936_v32, 16  ;;  %v600_v51 = vrot.slane %v598_v39, 3 }
  0x28   : > { %291 = vmatpush.bf16.msra.mxu0 %v1582_v48  ;;  %v1615_v48 = vld [vmem:[%s2035_s1 + $0x148] sm:$0xff]  ;;  %v898_v56 = vrot.slane %v896_v43, 2 }
  0x29   : > { %360 = vmatpush.bf16.msra.mxu1 %v1574_v49  ;;  %v592_v49 = vrot.slane %v590_v37, 3 }
  0x2a   : > { %453 = vmatpush.bf16.msra.mxu2 %v1590_v52  ;;  %v603_v52 = vrot.slane %v601_v40, 4 }
  0x2b   : > { %553 = vmatpush.bf16.msra.mxu3 %v1598_v53  ;;  %292 = vmatmul.bf16.vlgmr.msra.gmra.mxu0 %v230_v60  ;;  %v797_v53 = vpack.c.b16 %v795_v41, %v1653_v21  ;;  %v1606_v60 = vld [vmem:[%s2035_s1 + $0x100] sm:$0xff] }
  0x2c   : > { %656 = vmatpush.bf16.msrb.mxu0 %v1613_v58  ;;  %361 = vmatmul.bf16.vlgmr.msra.gmra.mxu1 %v1791_v24  ;;  %v1609_v24 = vld [vmem:[%s2035_s1 + $0x118] sm:$0xff]  ;;  %v906_v58 = vrot.slane %v904_v45, 2 }
  0x2d   : > { %746 = vmatpush.bf16.msrb.mxu1 %v1621_v59  ;;  %454 = vmatmul.bf16.vlgmr.msra.gmra.mxu2 %v395_v61  ;;  %v909_v59 = vrot.slane %v907_v46, 3  ;;  %v1614_v61 = vld [vmem:[%s2035_s1 + $0x140] sm:$0xff] }
  0x2e   : > { %554 = vmatmul.bf16.vlgmr.msra.gmra.mxu3 %v495_v63  ;;  %852 = vmatpush.bf16.msrb.mxu2 %v1629_v62  ;;  %v1645_v62 = vld [vmem:[%s2035_s1 + $0x238] sm:$0xff]  ;;  %v596_v63 = vor.u32 %v595_v50, %v592_v49 }
  0x2f   : > { %962 = vmatpush.bf16.msrb.mxu3 %v1637_v0  ;;  %v604_v0 = vor.u32 %v603_v52, %v600_v51 }
  0x30   : > { %657 = vmatpush.bf16.msrb.mxu0 %v1612_v1  ;;  %v1622_v1 = vld [vmem:[%s2035_s1 + $0x180] sm:$0xff] }
  0x31   : > { %747 = vmatpush.bf16.msrb.mxu1 %v1620_v2  ;;  %v1630_v2 = vld [vmem:[%s2035_s1 + $0x1c0] sm:$0xff] }
  0x32   : > { %853 = vmatpush.bf16.msrb.mxu2 %v1628_v3  ;;  %v799_v3 = vrot.slane %v1936_v32, 2 }
  0x33   : > { %963 = vmatpush.bf16.msrb.mxu3 %v1636_v4  ;;  %v800_v4 = vrot.slane %v797_v53, 2 }
  0x34   : > { %658 = vmatpush.bf16.msrb.mxu0 %v1611_v5 }
  0x35   : > { %748 = vmatpush.bf16.msrb.mxu1 %v1619_v6  ;;  %v910_v6 = vor.u32 %v909_v59, %v906_v58 }
  0x36   : > { %854 = vmatpush.bf16.msrb.mxu2 %v1627_v7  ;;  %v694_v7 = vpack.c.b16 %v1782_v20, %v1813_v34  ;;  %v1643_v20 = vld [vmem:[%s2035_s1 + $0x228] sm:$0xff]  ;;  %v1642_v34 = vld [vmem:[%s2035_s1 + $0x220] sm:$0xff] }
  0x37   : > { %964 = vmatpush.bf16.msrb.mxu3 %v1635_v8  ;;  %v605_v8 = vsel %vm588_vm3, %v596_v63, %v604_v0 }
  0x38   : > { %659 = vmatpush.bf16.msrb.mxu0 %v1610_v9  ;;  %v801_v9 = vsel %vm798_vm4, %v799_v3, %v800_v4 }
  0x39   : > { %749 = vmatpush.bf16.msrb.mxu1 %v1618_v10 }
  0x3a   : > { %855 = vmatpush.bf16.msrb.mxu2 %v1626_v17  ;;  %v1640_v17 = vld [vmem:[%s2035_s1 + $0x210] sm:$0xff] }
  0x3b   : > { %965 = vmatpush.bf16.msrb.mxu3 %v1634_v18  ;;  %297 = vmatmul.bf16.gmra.mxu0 %v233_v26  ;;  %v983_v18 = vld [vmem:[%s1757_s16 + $0x4] sm:$0x8] }
  0x3c   : > { %660 = vmatpush.bf16.msrb.mxu0 %v1609_v24  ;;  %366 = vmatmul.bf16.gmra.mxu1 %v302_v27  ;;  %v1002_v21 = vunpack.c.l.b16 %v983_v18  ;;  %v1005_v24 = vrot.slane %v1938_v33, 3 }
  0x3d   : > { %750 = vmatpush.bf16.msrb.mxu1 %v1617_v25  ;;  %459 = vmatmul.bf16.gmra.mxu2 %v394_v55  ;;  %v1631_v55 = vld [vmem:[%s2035_s1 + $0x1c8] sm:$0xff] }
  0x3e   : > { %559 = vmatmul.bf16.gmra.mxu3 %v494_v57  ;;  %856 = vmatpush.bf16.msrb.mxu2 %v1625_v28  ;;  %v901_v57 = vrot.slane %v899_v44, 3  ;;  %v1003_v15 = vpack.c.b16 %v1652_v19, %v1002_v21 }
  0x3f   : > { %966 = vmatpush.bf16.msrb.mxu3 %v1633_v29 }
  0x40   : > { %661 = vmatpush.bf16.msrb.mxu0 %v1608_v35  ;;  %v902_v5 = vor.u32 %v901_v57, %v898_v56  ;;  %v1004_v23 = vrot.slane %v1003_v15, 3 }
  0x41   : > { %751 = vmatpush.bf16.msrb.mxu1 %v1616_v36 }
  0x42   : > { %857 = vmatpush.bf16.msrb.mxu2 %v1624_v42  ;;  %v911_v10 = vsel %vm894_vm5, %v902_v5, %v910_v6  ;;  %v1006_v25 = vsel %vm492_vm2, %v1004_v23, %v1005_v24 }
  0x43   : > { %967 = vmatpush.bf16.msrb.mxu3 %v1632_v30 }
  0x44   : > { %662 = vmatpush.bf16.msrb.mxu0 %v1607_v47 }
  0x45   : > { %752 = vmatpush.bf16.msrb.mxu1 %v1615_v48 }
  0x46   : > { %858 = vmatpush.bf16.msrb.mxu2 %v1623_v54 }
  0x47   : > { %968 = vmatpush.bf16.msrb.mxu3 %v1631_v55 }
  0x48   : > { %663 = vmatpush.bf16.msrb.mxu0 %v1606_v60 }
  0x49   : > { %753 = vmatpush.bf16.msrb.mxu1 %v1614_v61 }
  0x4a   : > { %859 = vmatpush.bf16.msrb.mxu2 %v1622_v1 }
  0x4b   : > { %969 = vmatpush.bf16.msrb.mxu3 %v1630_v2  ;;  %664 = vmatmul.bf16.vlgmr.msrb.gmra.mxu0 %v605_v8  ;;  %v1678_v8 = vld [vmem:[%s2036_s2] ss:$0 sm:$0xff] }
  0x4c   : > { %1057 = vmatpush.bf16.msra.mxu0 %v1645_v62  ;;  %754 = vmatmul.bf16.vlgmr.msrb.gmra.mxu1 %v694_v7 }
  0x4d   : > { %1660 = vmatpush.bf16.msra.mxu1 %v1645_v62  ;;  %860 = vmatmul.bf16.vlgmr.msrb.gmra.mxu2 %v801_v9 }
  0x4e   : > { %970 = vmatmul.bf16.vlgmr.msrb.gmra.mxu3 %v911_v10 }
  0x50   : > { %1058 = vmatpush.bf16.msra.mxu0 %v1644_v11 }
  0x51   : > { %1661 = vmatpush.bf16.msra.mxu1 %v1644_v11 }
  0x54   : > { %1059 = vmatpush.bf16.msra.mxu0 %v1643_v20 }
  0x55   : > { %1662 = vmatpush.bf16.msra.mxu1 %v1643_v20 }
  0x58   : > { %1060 = vmatpush.bf16.msra.mxu0 %v1642_v34 }
  0x59   : > { %1663 = vmatpush.bf16.msra.mxu1 %v1642_v34 }
  0x5b   : > { %669 = vmatmul.bf16.gmra.mxu0 %v604_v0 }
  0x5c   : > { %1061 = vmatpush.bf16.msra.mxu0 %v1641_v13  ;;  %759 = vmatmul.bf16.gmra.mxu1 %v695_v14 }
  0x5d   : > { %1664 = vmatpush.bf16.msra.mxu1 %v1641_v13  ;;  %865 = vmatmul.bf16.gmra.mxu2 %v800_v4 }
  0x5e   : > { %975 = vmatmul.bf16.gmra.mxu3 %v910_v6 }
  0x60   : > { %1062 = vmatpush.bf16.msra.mxu0 %v1640_v17 }
  0x61   : > { %1665 = vmatpush.bf16.msra.mxu1 %v1640_v17 }
  0x64   : > { %1063 = vmatpush.bf16.msra.mxu0 %v1639_v16 }
  0x65   : > { %1666 = vmatpush.bf16.msra.mxu1 %v1639_v16 }
  0x68   : > { %1064 = vmatpush.bf16.msra.mxu0 %v1638_v22 }
  0x69   : > { %1667 = vmatpush.bf16.msra.mxu1 %v1638_v22 }
  0x6b   : > { %1065 = vmatmul.bf16.vlgmr.msra.gmra.mxu0 %v1006_v25 }
  0x6c   : > { %1070 = vmatmul.bf16.vlgmr.msra.gmra.mxu1 %v1005_v24 }
  0xa8   : > { %v293_v26 = vpop.f32.mrf.mxu0 }
  0xa9   : > { %v362_v27 = vpop.f32.mrf.mxu1 }
  0xaa   : > { %v363_v53 = vadd.f32 %v362_v27, %v293_v26 }
  0xb0   : > { %v455_v28 = vpop.f32.mrf.mxu2  ;;  %v295_v19 = vpop.f32.mrf.mxu0 }
  0xb1   : > { %v555_v12 = vpop.f32.mrf.mxu3  ;;  %v364_v29 = vpop.f32.mrf.mxu1  ;;  %v464_v54 = vadd.f32 %v455_v28, %v363_v53 }
  0xb2   : > { %v365_v56 = vadd.f32 %v364_v29, %v295_v19 }
  0xb3   : > { %v564_v58 = vadd.f32 %v555_v12, %v464_v54 }
  0xb8   : > { %v457_v31 = vpop.f32.mrf.mxu2  ;;  %v298_v35 = vpop.f32.mrf.mxu0 }
  0xb9   : > { %v557_v32 = vpop.f32.mrf.mxu3  ;;  %v367_v36 = vpop.f32.mrf.mxu1  ;;  %v465_v59 = vadd.f32 %v457_v31, %v365_v56 }
  0xba   : > { %v368_v47 = vadd.f32 %v367_v36, %v298_v35 }
  0xbb   : > { %v565_v2 = vadd.f32 %v557_v32, %v465_v59 }
  0xc0   : > { %v460_v37 = vpop.f32.mrf.mxu2  ;;  %v300_v39 = vpop.f32.mrf.mxu0 }
  0xc1   : > { %v560_v38 = vpop.f32.mrf.mxu3  ;;  %v369_v33 = vpop.f32.mrf.mxu1  ;;  %v466_v48 = vadd.f32 %v460_v37, %v368_v47 }
  0xc3   : > { %v566_v55 = vadd.f32 %v560_v38, %v466_v48 }
  0xc8   : > { %v462_v40 = vpop.f32.mrf.mxu2  ;;  %v665_v42 = vpop.f32.mrf.mxu0 }
  0xc9   : > { %v562_v41 = vpop.f32.mrf.mxu3  ;;  %v755_v30 = vpop.f32.mrf.mxu1  ;;  %v674_v0 = vadd.f32 %v665_v42, %v564_v58 }
  0xcb   : > { %v764_v4 = vadd.f32 %v755_v30, %v674_v0 }
  0xd0   : > { %v861_v43 = vpop.f32.mrf.mxu2  ;;  %v667_v45 = vpop.f32.mrf.mxu0 }
  0xd1   : > { %v971_v44 = vpop.f32.mrf.mxu3  ;;  %v757_v46 = vpop.f32.mrf.mxu1  ;;  %v675_v5 = vadd.f32 %v667_v45, %v565_v2  ;;  %v870_v6 = vadd.f32 %v861_v43, %v764_v4 }
  0xd3   : > { %v765_v34 = vadd.f32 %v757_v46, %v675_v5  ;;  %v980_v14 = vadd.f32 %v971_v44, %v870_v6 }
  0xd8   : > { %v863_v49 = vpop.f32.mrf.mxu2  ;;  %v670_v51 = vpop.f32.mrf.mxu0 }
  0xd9   : > { %v973_v50 = vpop.f32.mrf.mxu3  ;;  %v760_v52 = vpop.f32.mrf.mxu1  ;;  %v676_v57 = vadd.f32 %v670_v51, %v566_v55  ;;  %v871_v17 = vadd.f32 %v863_v49, %v765_v34 }
  0xdb   : > { %v766_v1 = vadd.f32 %v760_v52, %v676_v57  ;;  %v981_v15 = vadd.f32 %v973_v50, %v871_v17 }
  0xe0   : > { %v866_v60 = vpop.f32.mrf.mxu2  ;;  %v672_v62 = vpop.f32.mrf.mxu0 }
  0xe1   : > { %v976_v61 = vpop.f32.mrf.mxu3  ;;  %v762_v63 = vpop.f32.mrf.mxu1  ;;  %v872_v3 = vadd.f32 %v866_v60, %v766_v1 }
  0xe3   : > { %v982_v7 = vadd.f32 %v976_v61, %v872_v3 }
  0xe8   : > { %v868_v9 = vpop.f32.mrf.mxu2  ;;  %v1066_v11 = vpop.f32.mrf.mxu0 }
  0xe9   : > { %v978_v10 = vpop.f32.mrf.mxu3  ;;  %v1071_v20 = vpop.f32.mrf.mxu1  ;;  %v1075_v21 = vadd.f32 %v1066_v11, %v980_v14 }
  0xea   : > { %v1077_v13 = vadd.f32 %v1071_v20, %v982_v7 }
  0xeb   : > { %v1082_v25 = vadd.f32 %v1678_v8, %v1075_v21 }
  0xec   : > { %v1084_v18 = vadd.f32 %v1678_v8, %v1077_v13 }
  0xed   : > { %v1085_v28 = vmax.f32 %v1082_v25, 0.0 }
  0xee   : > { %v1087_v16 = vmax.f32 %v1084_v18, 0.0 }
  0xf0   : > { %v1090_v22 = vpack.c.bf16 %v1087_v16, %v1087_v16  ;;  %v1068_v23 = vpop.f32.mrf.mxu0 }
  0xf1   : > { %v1073_v24 = vpop.f32.mrf.mxu1  ;;  %v1076_v26 = vadd.f32 %v1068_v23, %v981_v15 }
  0xf2   : > { %1093 = vst [vmem:[%s170_s21 + $0x8] sm:$0xf] %v1090_v22 }
  0xf3   : > { %v1083_v27 = vadd.f32 %v1678_v8, %v1076_v26 }
  0xf5   : > { %v1086_v12 = vmax.f32 %v1083_v27, 0.0 }
  0xf7   : > { %v1657_v19 = vpack.c.bf16 %v1086_v12, %v1085_v28 }
  0xf9   : > { %1658 = vst [vmem:[%s170_s21] sm:$0xff] %v1657_v19  }
  0xfa PF: > { %s13_s12 = sadd.s32 1, %s1685_s12  }
  0xfb   : > { %p10_p4 = scmp.ge.s32.totalorder %s13_s12, 4  }
  0xfd   :  { %12 = sbr.rel (!%p10_p4) target bundleno = 1 (0x1), region = 70 }

// kernel: basic_ag_forward.10
= control target key start
LH: loop header
LB: loop body
LE: loop exit
PB: predicated region body
PF: predicated region fallthrough
CT: control target
= control target key end

     0   :  { %s2271_s12 = smov 0   ;;  %s2770_s0 = inlined_call_operand.vmem [shape: bf16[2,110,128], index: 0, kind: input, shape index: {}]   ;;  %s2771_s1 = inlined_call_operand.vmem [shape: bf16[9,128,128], index: 1, kind: input, shape index: {}]   ;;  %s2772_s2 = inlined_call_operand.vmem [shape: f32[1,128], index: 2, kind: input, shape index: {}]   ;;  %s2773_s3 = inlined_call_operand.vmem [shape: bf16[2,80,128], index: 3, kind: output, shape index: {}]  }
   0x1 LB: > { %s1623_s13 = sadd.s32 4294967295, %s2249_s12   ;;  %p1627_p0 = scmp.ge.s32.totalorder %s2249_s12, 1  ;;  %s2249_s12 = sphi %s2271_s12, %s13_s12  }
   0x2   : > { %p137_p1 = scmp.lt.s32.totalorder %s2249_s12, 3 }
   0x4   : > { %p138_p2 = pnand %p1627_p0, %p137_p1 }
   0x5   : > { %p161_p3 = scmp.lt.s32.totalorder (!%p138_p2), %s1623_s13, 1 }
   0x6   : > { %141 = sbr.rel (%p138_p2) target bundleno = 375 (0x177), region = 32 }
   0xb   : > { %v2115_v0 = vld [vmem:[%s2771_s1 + $0x78] sm:$0xff]  ;;  %v2114_v1 = vld [vmem:[%s2771_s1 + $0x70] sm:$0xff]  ;;  %s2775_s13 = smov (!%p161_p3, %s1623_s13), 1  ;;  %v2113_v4 = vld [vmem:[%s2771_s1 + $0x68] sm:$0xff]  ;;  %vm243_vm0 = vsmask.f32 7424 }
   0xc   : > { %341 = vmatpush.bf16.msra.mxu0 %v2115_v0  ;;  %2216 = vmatpush.bf16.msra.mxu1 %v2115_v0  ;;  %v2135_v2 = vld [vmem:[%s2771_s1 + $0xf8] sm:$0xff]  ;;  %v2134_v3 = vld [vmem:[%s2771_s1 + $0xf0] sm:$0xff]  ;;  %s2232_s24 = smul.u32 56, %s2775_s13  ;;  %v2133_v5 = vld [vmem:[%s2771_s1 + $0xe8] sm:$0xff]  ;;  %vm483_vm1 = vcmask 1046528   ;;  %vm949_vm4 = vcmask 1045504  }
   0xd   : > { %2217 = vmatpush.bf16.msra.mxu2 %v2115_v0  ;;  %712 = vmatpush.bf16.msra.mxu3 %v2135_v2  ;;  %v2112_v6 = vld [vmem:[%s2771_s1 + $0x60] sm:$0xff]  ;;  %v2111_v9 = vld [vmem:[%s2771_s1 + $0x58] sm:$0xff]  ;;  %v2110_v17 = vld [vmem:[%s2771_s1 + $0x50] sm:$0xff]  ;;  %vm777_vm2 = vsmask.f32 6400  ;;  %vm1415_vm5 = vcmask 1044480  }
   0xe   : > { %s2306_s4 = scalar_lea.vmem %s2770_s0, %s2232_s24  ;;  %v2132_v7 = vld [vmem:[%s2771_s1 + $0xe0] sm:$0xff]  ;;  %v2131_v14 = vld [vmem:[%s2771_s1 + $0xd8] sm:$0xff]  ;;  %v2130_v24 = vld [vmem:[%s2771_s1 + $0xd0] sm:$0xff]  ;;  %vm1243_vm3 = vsmask.f32 5376  ;;  %s2233_s18 = smul.u32 40, %s2775_s13 }
   0xf   : > { %v197_v8 = vld [vmem:[%s2306_s4 + $0x28] sm:$0x1]  ;;  %v2316_v10 = vld [vmem:[%s2306_s4] sm:$0xff]   ;;  %v2319_v11 = vld [vmem:[%s2306_s4 + $0x10] sm:$0xff] }
  0x10   : > { %342 = vmatpush.bf16.msra.mxu0 %v2114_v1  ;;  %2218 = vmatpush.bf16.msra.mxu1 %v2114_v1  ;;  %v2322_v12 = vld [vmem:[%s2306_s4 + $0x20] sm:$0xff]  ;;  %v236_v13 = vunpack.c.l.b16 %v197_v8  ;;  %v2328_v15 = vld [vmem:[%s2306_s4 + $0x8] sm:$0xff]  ;;  %v247_v16 = vshll.u32 %v2316_v10, 16  ;;  %v2335_v18 = vld [vmem:[%s2306_s4 + $0x18] sm:$0xff]  ;;  %v260_v19 = vshll.u32 %v2319_v11, 16  ;;  %v245_v25 = vshrl.u32 %v2316_v10, 16  ;;  %s2745_s21 = scalar_lea.vmem %s2773_s3, %s2233_s18 }
  0x11   : > { %2219 = vmatpush.bf16.msra.mxu2 %v2114_v1  ;;  %713 = vmatpush.bf16.msra.mxu3 %v2134_v3  ;;  %v276_v21 = vshll.u32 %v2322_v12, 16  ;;  %v592_v22 = vld [vmem:[%s2306_s4 + $0x4] sm:$0xe]  ;;  %v2343_v23 = vld [vmem:[%s2306_s4 + $0x8] sm:$0xff]   ;;  %v252_v27 = vshll.u32 %v2328_v15, 16  ;;  %v264_v28 = vshrl.u32 %v2319_v11, 16 }
  0x12   : > { %v2338_v20 = vpack.c.b16 %v236_v13, %v236_v13  ;;  %v249_v26 = vrot.slane %v247_v16, 1  ;;  %v2109_v29 = vld [vmem:[%s2771_s1 + $0x48] sm:$0xff]  ;;  %v2354_v30 = vrot.slane %v260_v19, 1  ;;  %v268_v31 = vshll.u32 %v2335_v18, 16  ;;  %v2108_v39 = vld [vmem:[%s2771_s1 + $0x40] sm:$0xff]  ;;  %v2107_v45 = vld [vmem:[%s2771_s1 + $0x38] sm:$0xff] }
  0x13   : > { %v631_v32 = vunpack.c.l.b16 %v592_v22  ;;  %v632_v33 = vunpack.c.l.b16 %v2343_v23  ;;  %v2358_v34 = vrot.slane %v276_v21, 1  ;;  %v280_v35 = vshrl.u32 %v2322_v12, 16  ;;  %v2129_v37 = vld [vmem:[%s2771_s1 + $0xc8] sm:$0xff]  ;;  %v2123_v48 = vld [vmem:[%s2771_s1 + $0xb8] sm:$0xff]  ;;  %v2128_v52 = vld [vmem:[%s2771_s1 + $0xc0] sm:$0xff] }
  0x14   : > { %343 = vmatpush.bf16.msra.mxu0 %v2113_v4  ;;  %2220 = vmatpush.bf16.msra.mxu1 %v2113_v4  ;;  %v284_v36 = vshll.u32 %v2338_v20, 16  ;;  %v254_v38 = vrot.slane %v252_v27, 1  ;;  %v250_v40 = vor.u32 %v249_v26, %v245_v25  ;;  %v266_v41 = vor.u32 %v264_v28, %v2354_v30  ;;  %v2370_v43 = vld [vmem:[%s2306_s4 + $0xc] sm:$0xff]  ;;  %v2143_v49 = vld [vmem:[%s2771_s1 + $0x138] sm:$0xff]  ;;  %v2104_v3 = vld [vmem:[%s2771_s1 + $0x20] sm:$0xff] }
  0x15   : > { %2221 = vmatpush.bf16.msra.mxu2 %v2113_v4  ;;  %714 = vmatpush.bf16.msra.mxu3 %v2133_v5  ;;  %v270_v42 = vrot.slane %v268_v31, 1  ;;  %v2374_v44 = vpack.c.b16 %v632_v33, %v631_v32  ;;  %v282_v46 = vor.u32 %v280_v35, %v2358_v34  ;;  %v649_v54 = vrot.slane %v2370_v43, 1  ;;  %v2106_v56 = vld [vmem:[%s2771_s1 + $0x30] sm:$0xff]  ;;  %v2171_v57 = vld [vmem:[%s2771_s1 + $0x1f8] sm:$0xff]  ;;  %v2105_v61 = vld [vmem:[%s2771_s1 + $0x28] sm:$0xff] }
  0x16   : > { %v286_v47 = vrot.slane %v284_v36, 1  ;;  %v255_v50 = vsel %vm243_vm0, %v250_v40, %v254_v38  ;;  %v2122_v58 = vld [vmem:[%s2771_s1 + $0xb0] sm:$0xff]  ;;  %v2121_v63 = vld [vmem:[%s2771_s1 + $0xa8] sm:$0xff]  ;;  %v256_v1 = vshrl.u32 %v2328_v15, 16  ;;  %v272_v2 = vshrl.u32 %v2335_v18, 16  ;;  %v2120_v4 = vld [vmem:[%s2771_s1 + $0xa0] sm:$0xff] }
  0x17   : > { %v271_v51 = vsel %vm243_vm0, %v266_v41, %v270_v42  ;;  %v648_v53 = vrot.slane %v2374_v44, 1  ;;  %v2142_v59 = vld [vmem:[%s2771_s1 + $0x130] sm:$0xff]  ;;  %v2141_v0 = vld [vmem:[%s2771_s1 + $0x128] sm:$0xff]  ;;  %v2140_v5 = vld [vmem:[%s2771_s1 + $0x120] sm:$0xff]  ;;  %v779_v27 = vshrl.u32 %v2374_v44, 16  ;;  %v790_v31 = vshll.u32 %v2370_v43, 16 }
  0x18   : > { %344 = vmatpush.bf16.msra.mxu0 %v2112_v6  ;;  %2222 = vmatpush.bf16.msra.mxu1 %v2112_v6  ;;  %v287_v55 = vsel %vm243_vm0, %v282_v46, %v286_v47  ;;  %v2170_v62 = vld [vmem:[%s2771_s1 + $0x1f0] sm:$0xff]  ;;  %v2119_v13 = vld [vmem:[%s2771_s1 + $0x98] sm:$0xff]  ;;  %v2209_v25 = vld [vmem:[%s2306_s4] sm:$0xf0]  ;;  %v485_v46 = vrot.slane %v2328_v15, 1 }
  0x19   : > { %2223 = vmatpush.bf16.msra.mxu2 %v2112_v6  ;;  %715 = vmatpush.bf16.msra.mxu3 %v2132_v7  ;;  %v650_v60 = vsel %vm483_vm1, %v648_v53, %v649_v54  ;;  %v258_v6 = vor.u32 %v256_v1, %v254_v38  ;;  %v274_v7 = vor.u32 %v272_v2, %v270_v42  ;;  %v2431_v8 = vld [vmem:[%s2306_s4 + $0x14] sm:$0xff]  ;;  %v2210_v26 = vld [vmem:[%s2306_s4] sm:$0xe]  ;;  %v2169_v28 = vld [vmem:[%s2771_s1 + $0x1e8] sm:$0xff]  ;;  %v781_v38 = vrot.slane %v779_v27, 1 }
  0x1a   : > { %v651_v19 = vrot.slane %v2431_v8, 1  ;;  %v2102_v21 = vld [vmem:[%s2771_s1 + $0x10] sm:$0xff]  ;;  %v2117_v35 = vld [vmem:[%s2771_s1 + $0x88] sm:$0xff]  ;;  %v792_v41 = vrot.slane %v790_v31, 2  ;;  %v2100_v42 = vld [vmem:[%s2771_s1] sm:$0xff] }
  0x1b   : > { %v263_v16 = vsel %vm243_vm0, %v258_v6, %v2354_v30  ;;  %v2118_v22 = vld [vmem:[%s2771_s1 + $0x90] sm:$0xff]  ;;  %v787_v30 = vshrl.u32 %v2370_v43, 16  ;;  %v2137_v36 = vld [vmem:[%s2771_s1 + $0x108] sm:$0xff]  ;;  %v2136_v47 = vld [vmem:[%s2771_s1 + $0x100] sm:$0xff] }
  0x1c   : > { %345 = vmatpush.bf16.msra.mxu0 %v2111_v9  ;;  %2224 = vmatpush.bf16.msra.mxu1 %v2111_v9  ;;  %v652_v32 = vsel %vm483_vm1, %v649_v54, %v651_v19  ;;  %v2497_v53 = vld [vmem:[%s2306_s4 + $0x1c] sm:$0xff]  ;;  %v2146_v27 = vld [vmem:[%s2771_s1 + $0x150] sm:$0xff] }
  0x1d   : > { %2225 = vmatpush.bf16.msra.mxu2 %v2111_v9  ;;  %716 = vmatpush.bf16.msra.mxu3 %v2131_v14  ;;  %v2103_v9 = vld [vmem:[%s2771_s1 + $0x18] sm:$0xff]  ;;  %v789_v40 = vrot.slane %v787_v30, 1  ;;  %v2148_v6 = vld [vmem:[%s2771_s1 + $0x160] sm:$0xff]  ;;  %v2174_v31 = vld [vmem:[%s2771_s1 + $0x210] sm:$0xff] }
  0x1e   : > { %v2139_v14 = vld [vmem:[%s2771_s1 + $0x118] sm:$0xff] }
  0x1f   : > { %v2167_v2 = vld [vmem:[%s2771_s1 + $0x1d8] sm:$0xff] }
  0x20   : > { %346 = vmatpush.bf16.msra.mxu0 %v2110_v17  ;;  %2226 = vmatpush.bf16.msra.mxu1 %v2110_v17 }
  0x21   : > { %2227 = vmatpush.bf16.msra.mxu2 %v2110_v17  ;;  %717 = vmatpush.bf16.msra.mxu3 %v2130_v24  ;;  %v279_v17 = vsel %vm243_vm0, %v274_v7, %v2358_v34  ;;  %v2138_v24 = vld [vmem:[%s2771_s1 + $0x110] sm:$0xff]  ;;  %v2101_v34 = vld [vmem:[%s2771_s1 + $0x8] sm:$0xff]  ;;  %v2176_v7 = vld [vmem:[%s2771_s1 + $0x220] sm:$0xff] }
  0x24   : > { %347 = vmatpush.bf16.msra.mxu0 %v2109_v29  ;;  %2228 = vmatpush.bf16.msra.mxu1 %v2109_v29 }
  0x25   : > { %2229 = vmatpush.bf16.msra.mxu2 %v2109_v29  ;;  %718 = vmatpush.bf16.msra.mxu3 %v2129_v37  ;;  %v782_v29 = vshll.u32 %v2374_v44, 16  ;;  %v2211_v37 = vor.u32 %v2210_v26, %v2209_v25  ;;  %v2116_v44 = vld [vmem:[%s2771_s1 + $0x80] sm:$0xff]  ;;  %v2175_v25 = vld [vmem:[%s2771_s1 + $0x218] sm:$0xff]  ;;  %v2166_v26 = vld [vmem:[%s2771_s1 + $0x1d0] sm:$0xff] }
  0x28   : > { %348 = vmatpush.bf16.msra.mxu0 %v2108_v39  ;;  %2230 = vmatpush.bf16.msra.mxu1 %v2108_v39 }
  0x29   : > { %2231 = vmatpush.bf16.msra.mxu2 %v2108_v39  ;;  %719 = vmatpush.bf16.msra.mxu3 %v2128_v52  ;;  %v784_v39 = vrot.slane %v782_v29, 2  ;;  %v2179_v52 = vld [vmem:[%s2771_s1 + $0x238] sm:$0xff]  ;;  %v808_v29 = vshll.u32 %v2497_v53, 16 }
  0x2b   : > { %349 = vmatmul.bf16.vlgmr.msra.gmra.mxu0 %v255_v50  ;;  %359 = vmatmul.bf16.vlgmr.msra.gmra.mxu1 %v271_v51  ;;  %v785_v50 = vor.u32 %v784_v39, %v781_v38  ;;  %v793_v51 = vor.u32 %v792_v41, %v789_v40  ;;  %v489_v38 = vrot.slane %v2335_v18, 1 }
  0x2c   : > { %428 = vmatpush.bf16.msrb.mxu1 %v2107_v45  ;;  %884 = vmatpush.bf16.msrb.mxu0 %v2143_v49  ;;  %v484_v45 = vrot.slane %v2211_v37, 1  ;;  %v2151_v49 = vld [vmem:[%s2771_s1 + $0x178] sm:$0xff] }
  0x2d   : > { %548 = vmatpush.bf16.msrb.mxu2 %v2123_v48  ;;  %1350 = vmatpush.bf16.msrb.mxu3 %v2171_v57  ;;  %v2163_v48 = vld [vmem:[%s2771_s1 + $0x1b8] sm:$0xff]  ;;  %v2150_v57 = vld [vmem:[%s2771_s1 + $0x170] sm:$0xff] }
  0x2e   : > { %369 = vmatmul.bf16.vlgmr.msra.gmra.mxu2 %v287_v55  ;;  %720 = vmatmul.bf16.vlgmr.msra.gmra.mxu3 %v650_v60  ;;  %v486_v54 = vsel %vm483_vm1, %v484_v45, %v485_v46  ;;  %v794_v55 = vsel %vm777_vm2, %v785_v50, %v793_v51  ;;  %v2168_v60 = vld [vmem:[%s2771_s1 + $0x1e0] sm:$0xff] }
  0x30   : > { %429 = vmatpush.bf16.msrb.mxu1 %v2106_v56  ;;  %885 = vmatpush.bf16.msrb.mxu0 %v2142_v59  ;;  %v2162_v56 = vld [vmem:[%s2771_s1 + $0x1b0] sm:$0xff] }
  0x31   : > { %549 = vmatpush.bf16.msrb.mxu2 %v2122_v58  ;;  %1351 = vmatpush.bf16.msrb.mxu3 %v2170_v62  ;;  %v653_v58 = vrot.slane %v2497_v53, 1  ;;  %v2178_v59 = vld [vmem:[%s2771_s1 + $0x230] sm:$0xff]  ;;  %v799_v62 = vshll.u32 %v2431_v8, 16 }
  0x33   : > { %v654_v1 = vsel %vm483_vm1, %v651_v19, %v653_v58 }
  0x34   : > { %430 = vmatpush.bf16.msrb.mxu1 %v2105_v61  ;;  %886 = vmatpush.bf16.msrb.mxu0 %v2141_v0  ;;  %v796_v61 = vshrl.u32 %v2431_v8, 16  ;;  %v2149_v0 = vld [vmem:[%s2771_s1 + $0x168] sm:$0xff] }
  0x35   : > { %550 = vmatpush.bf16.msrb.mxu2 %v2121_v63  ;;  %1352 = vmatpush.bf16.msrb.mxu3 %v2169_v28  ;;  %v2161_v63 = vld [vmem:[%s2771_s1 + $0x1a8] sm:$0xff]  ;;  %v805_v28 = vshrl.u32 %v2497_v53, 16 }
  0x38   : > { %431 = vmatpush.bf16.msrb.mxu1 %v2104_v3  ;;  %887 = vmatpush.bf16.msrb.mxu0 %v2140_v5  ;;  %v798_v3 = vrot.slane %v796_v61, 1  ;;  %v2160_v5 = vld [vmem:[%s2771_s1 + $0x1a0] sm:$0xff] }
  0x39   : > { %551 = vmatpush.bf16.msrb.mxu2 %v2120_v4  ;;  %1353 = vmatpush.bf16.msrb.mxu3 %v2168_v60  ;;  %v801_v4 = vrot.slane %v799_v62, 2  ;;  %v756_v60 = vld [vmem:[%s2306_s4 + $0x2c] sm:$0x3] }
  0x3b   : > { %354 = vmatmul.bf16.gmra.mxu0 %v263_v16  ;;  %364 = vmatmul.bf16.gmra.mxu1 %v279_v17  ;;  %v2546_v16 = vld [vmem:[%s2306_s4 + $0x24] sm:$0xff]  ;;  %v2147_v17 = vld [vmem:[%s2771_s1 + $0x158] sm:$0xff] }
  0x3c   : > { %432 = vmatpush.bf16.msrb.mxu1 %v2103_v9  ;;  %888 = vmatpush.bf16.msrb.mxu0 %v2139_v14  ;;  %v487_v9 = vrot.slane %v2319_v11, 1  ;;  %v2159_v14 = vld [vmem:[%s2771_s1 + $0x198] sm:$0xff]  ;;  %v817_v50 = vshll.u32 %v2546_v16, 16 }
  0x3d   : > { %552 = vmatpush.bf16.msrb.mxu2 %v2119_v13  ;;  %1354 = vmatpush.bf16.msrb.mxu3 %v2167_v2  ;;  %v802_v13 = vor.u32 %v801_v4, %v798_v3  ;;  %v775_v2 = vunpack.c.l.b16 %v756_v60 }
  0x3e   : > { %725 = vmatmul.bf16.gmra.mxu3 %v652_v32  ;;  %v488_v19 = vsel %vm483_vm1, %v485_v46, %v487_v9  ;;  %v602_v32 = vld [vmem:[%s2306_s4 + $0x2c] sm:$0x1]  ;;  %v490_v41 = vsel %vm483_vm1, %v487_v9, %v489_v38  ;;  %v2172_v9 = vld [vmem:[%s2771_s1 + $0x200] sm:$0xff] }
  0x3f   : > { %v641_v37 = vunpack.c.l.b16 %v602_v32 }
  0x40   : > { %433 = vmatpush.bf16.msrb.mxu1 %v2102_v21  ;;  %889 = vmatpush.bf16.msrb.mxu0 %v2138_v24  ;;  %v803_v21 = vsel %vm777_vm2, %v793_v51, %v802_v13  ;;  %v2158_v24 = vld [vmem:[%s2771_s1 + $0x190] sm:$0xff]  ;;  %v2156_v51 = vld [vmem:[%s2771_s1 + $0x180] sm:$0xff] }
  0x41   : > { %553 = vmatpush.bf16.msrb.mxu2 %v2118_v22  ;;  %v655_v22 = vrot.slane %v2546_v16, 1  ;;  %1355 = vmatpush.bf16.msrb.mxu3 %v2166_v26  ;;  %v647_v40 = vpack.c.b16 %v641_v37, %v641_v37  ;;  %v1394_v37 = vld [vmem:[%s2306_s4 + $0x8] sm:$0x8] }
  0x43   : > { %v656_v30 = vsel %vm483_vm1, %v653_v58, %v655_v22  ;;  %v657_v45 = vrot.slane %v647_v40, 1 }
  0x44   : > { %434 = vmatpush.bf16.msrb.mxu1 %v2101_v34  ;;  %890 = vmatpush.bf16.msrb.mxu0 %v2137_v36  ;;  %v2165_v34 = vld [vmem:[%s2771_s1 + $0x1c8] sm:$0xff]  ;;  %v810_v36 = vrot.slane %v808_v29, 2 }
  0x45   : > { %554 = vmatpush.bf16.msrb.mxu2 %v2117_v35  ;;  %v807_v35 = vrot.slane %v805_v28, 1  ;;  %1356 = vmatpush.bf16.msrb.mxu3 %v2165_v34 }
  0x47   : > { %v811_v39 = vor.u32 %v810_v36, %v807_v35  ;;  %v928_v35 = vld [vmem:[%s2306_s4 + $0x4] sm:$0xc] }
  0x48   : > { %435 = vmatpush.bf16.msrb.mxu1 %v2100_v42  ;;  %891 = vmatpush.bf16.msrb.mxu0 %v2136_v47  ;;  %v1058_v42 = vld [vmem:[%s2306_s4 + $0x8] sm:$0xc]  ;;  %v1098_v47 = vunpack.c.h.b16 %v2343_v23 }
  0x49   : > { %555 = vmatpush.bf16.msrb.mxu2 %v2116_v44  ;;  %v812_v44 = vsel %vm777_vm2, %v802_v13, %v811_v39  ;;  %v1097_v46 = vunpack.c.l.b16 %v1058_v42 }
  0x4b   : > { %436 = vmatmul.bf16.vlgmr.msrb.gmra.mxu1 %v2316_v10  ;;  %892 = vmatmul.bf16.vlgmr.msrb.gmra.mxu0 %v794_v55  ;;  %v2177_v10 = vld [vmem:[%s2771_s1 + $0x228] sm:$0xff]  ;;  %v2144_v55 = vld [vmem:[%s2771_s1 + $0x140] sm:$0xff] }
  0x4c   : > { %1014 = vmatpush.bf16.msra.mxu1 %v2151_v49  ;;  %1480 = vmatpush.bf16.msra.mxu0 %v2179_v52  ;;  %v814_v49 = vshrl.u32 %v2546_v16, 16  ;;  %v2173_v52 = vld [vmem:[%s2771_s1 + $0x208] sm:$0xff] }
  0x4d   : > { %1178 = vmatpush.bf16.msra.mxu2 %v2163_v48  ;;  %v2145_v48 = vld [vmem:[%s2771_s1 + $0x148] sm:$0xff] }
  0x4e   : > { %556 = vmatmul.bf16.vlgmr.msrb.gmra.mxu2 %v486_v54  ;;  %730 = vmatmul.bf16.gmra.mxu3 %v654_v1  ;;  %v2164_v54 = vld [vmem:[%s2771_s1 + $0x1c0] sm:$0xff]  ;;  %v816_v58 = vrot.slane %v814_v49, 1  ;;  %v491_v1 = vrot.slane %v2322_v12, 1  ;;  %v951_v49 = vrot.slane %v2370_v43, 2  ;;  %v2658_v43 = vld [vmem:[%s2306_s4 + $0x28] sm:$0xff] }
  0x4f   : > { %1357 = vmatpush.bf16.msrb.mxu3 %v2164_v54 }
  0x50   : > { %1015 = vmatpush.bf16.msra.mxu1 %v2150_v57  ;;  %1481 = vmatpush.bf16.msra.mxu0 %v2178_v59  ;;  %v2609_v57 = vpack.c.b16 %v1098_v47, %v1097_v46  ;;  %v819_v59 = vrot.slane %v817_v50, 2 }
  0x51   : > { %1179 = vmatpush.bf16.msra.mxu2 %v2162_v56  ;;  %v2605_v56 = vld [vmem:[%s2306_s4 + $0x10] sm:$0xff] }
  0x52   : > { %v1245_v61 = vshrl.u32 %v2609_v57, 16  ;;  %v1248_v62 = vshll.u32 %v2609_v57, 16  ;;  %v1115_v46 = vrot.slane %v2605_v56, 2 }
  0x54   : > { %1016 = vmatpush.bf16.msra.mxu1 %v2149_v0  ;;  %1482 = vmatpush.bf16.msra.mxu0 %v2177_v10  ;;  %v1256_v0 = vshll.u32 %v2605_v56, 16  ;;  %v820_v10 = vor.u32 %v819_v59, %v816_v58  ;;  %v1247_v3 = vrot.slane %v1245_v61, 2  ;;  %v1250_v4 = vrot.slane %v1248_v62, 3 }
  0x55   : > { %1180 = vmatpush.bf16.msra.mxu2 %v2161_v63  ;;  %v1253_v63 = vshrl.u32 %v2605_v56, 16  ;;  %v953_v59 = vrot.slane %v2431_v8, 2 }
  0x56   : > { %v821_v13 = vsel %vm777_vm2, %v811_v39, %v820_v10  ;;  %v1413_v39 = vunpack.c.l.b16 %v1394_v37 }
  0x58   : > { %1017 = vmatpush.bf16.msra.mxu1 %v2148_v6  ;;  %1483 = vmatpush.bf16.msra.mxu0 %v2176_v7  ;;  %v1258_v6 = vrot.slane %v1256_v0, 3  ;;  %v492_v7 = vsel %vm483_vm1, %v489_v38, %v491_v1  ;;  %v947_v38 = vunpack.c.l.b16 %v928_v35  ;;  %v1414_v42 = vpack.c.b16 %v1098_v47, %v1413_v39  ;;  %v1222_v0 = vld [vmem:[%s2306_s4 + $0x30] sm:$0x7] }
  0x59   : > { %1181 = vmatpush.bf16.msra.mxu2 %v2160_v5  ;;  %v1255_v5 = vrot.slane %v1253_v63, 2  ;;  %v957_v39 = vrot.slane %v2546_v16, 2 }
  0x5a   : > { %v1416_v50 = vrot.slane %v1414_v42, 3 }
  0x5b   : > { %441 = vmatmul.bf16.gmra.mxu1 %v2328_v15  ;;  %897 = vmatmul.bf16.gmra.mxu0 %v803_v21  ;;  %v2157_v15 = vld [vmem:[%s2771_s1 + $0x188] sm:$0xff] }
  0x5c   : > { %1018 = vmatpush.bf16.msra.mxu1 %v2147_v17  ;;  %1484 = vmatpush.bf16.msra.mxu0 %v2175_v25  ;;  %v1251_v17 = vor.u32 %v1250_v4, %v1247_v3  ;;  %v2629_v25 = vld [vmem:[%s2306_s4 + $0x18] sm:$0xff] }
  0x5d   : > { %1182 = vmatpush.bf16.msra.mxu2 %v2159_v14  ;;  %v2622_v14 = vpack.c.b16 %v775_v2, %v775_v2  ;;  %v1262_v28 = vshrl.u32 %v2629_v25, 16  ;;  %v1265_v29 = vshll.u32 %v2629_v25, 16  ;;  %v1117_v58 = vrot.slane %v2629_v25, 2 }
  0x5e   : > { %561 = vmatmul.bf16.gmra.mxu2 %v488_v19  ;;  %735 = vmatmul.bf16.gmra.mxu3 %v656_v30  ;;  %v1259_v19 = vor.u32 %v1258_v6, %v1255_v5  ;;  %v1419_v60 = vrot.slane %v2629_v25, 3  ;;  %v954_v2 = vsel %vm949_vm4, %v951_v49, %v953_v59  ;;  %v1241_v5 = vunpack.c.l.b16 %v1222_v0 }
  0x5f   : > { %v823_v21 = vshrl.u32 %v2622_v14, 16  ;;  %v1118_v63 = vsel %vm949_vm4, %v1115_v46, %v1117_v58 }
  0x60   : > { %1019 = vmatpush.bf16.msra.mxu1 %v2146_v27  ;;  %1485 = vmatpush.bf16.msra.mxu0 %v2174_v31  ;;  %v1267_v31 = vrot.slane %v1265_v29, 3  ;;  %v2672_v6 = vpack.c.b16 %v1241_v5, %v1241_v5 }
  0x61   : > { %1183 = vmatpush.bf16.msra.mxu2 %v2158_v24  ;;  %v1260_v24 = vsel %vm1243_vm3, %v1251_v17, %v1259_v19  ;;  %v825_v26 = vrot.slane %v823_v21, 1 }
  0x62   : > { %v1292_v17 = vshll.u32 %v2672_v6, 16 }
  0x64   : > { %1020 = vmatpush.bf16.msra.mxu1 %v2145_v48  ;;  %1486 = vmatpush.bf16.msra.mxu0 %v2173_v52 }
  0x65   : > { %1184 = vmatpush.bf16.msra.mxu2 %v2157_v15  ;;  %v1264_v15 = vrot.slane %v1262_v28, 2 }
  0x67   : > { %v1268_v36 = vor.u32 %v1267_v31, %v1264_v15 }
  0x68   : > { %1021 = vmatpush.bf16.msra.mxu1 %v2144_v55  ;;  %1487 = vmatpush.bf16.msra.mxu0 %v2172_v9 }
  0x69   : > { %1185 = vmatpush.bf16.msra.mxu2 %v2156_v51  ;;  %v1269_v40 = vsel %vm1243_vm3, %v1259_v19, %v1268_v36 }
  0x6b   : > { %446 = vmatmul.bf16.gmra.mxu1 %v2319_v11  ;;  %902 = vmatmul.bf16.gmra.mxu0 %v812_v44  ;;  %v658_v11 = vsel %vm483_vm1, %v655_v22, %v657_v45  ;;  %v826_v22 = vshll.u32 %v2622_v14, 16 }
  0x6d   : > { %v828_v27 = vrot.slane %v826_v22, 2  ;;  %v955_v22 = vrot.slane %v2497_v53, 2 }
  0x6e   : > { %566 = vmatmul.bf16.gmra.mxu2 %v490_v41  ;;  %740 = vmatmul.bf16.gmra.mxu3 %v658_v11  ;;  %v2641_v41 = vld [vmem:[%s2306_s4 + $0x20] sm:$0xff] }
  0x6f   : > { %v829_v30 = vor.u32 %v828_v27, %v825_v26  ;;  %v1271_v44 = vshrl.u32 %v2641_v41, 16  ;;  %v1274_v45 = vshll.u32 %v2641_v41, 16  ;;  %v1119_v19 = vrot.slane %v2641_v41, 2 }
  0x70   : > { %v1294_v26 = vrot.slane %v1292_v17, 3 }
  0x71   : > { %v830_v34 = vsel %vm777_vm2, %v820_v10, %v829_v30  ;;  %v1273_v51 = vrot.slane %v1271_v44, 2  ;;  %v1276_v52 = vrot.slane %v1274_v45, 3  ;;  %v1120_v27 = vsel %vm949_vm4, %v1117_v58, %v1119_v19 }
  0x72   : > { %v958_v45 = vsel %vm949_vm4, %v955_v22, %v957_v39 }
  0x73   : > { %v1277_v11 = vor.u32 %v1276_v52, %v1273_v51 }
  0x75   : > { %v1278_v55 = vsel %vm1243_vm3, %v1268_v36, %v1277_v11  ;;  %v1121_v36 = vrot.slane %v2658_v43, 2 }
  0x7b   : > { %451 = vmatmul.bf16.gmra.mxu1 %v2335_v18  ;;  %907 = vmatmul.bf16.gmra.mxu0 %v821_v13  ;;  %v493_v18 = vrot.slane %v2338_v20, 1  ;;  %v948_v20 = vpack.c.b16 %v632_v33, %v947_v38  ;;  %v1417_v33 = vrot.slane %v2605_v56, 3  ;;  %v1280_v56 = vshrl.u32 %v2658_v43, 16 }
  0x7c   : > { %v1289_v13 = vshrl.u32 %v2672_v6, 16 }
  0x7d   : > { %v494_v32 = vsel %vm483_vm1, %v491_v1, %v493_v18  ;;  %v950_v48 = vrot.slane %v948_v20, 2  ;;  %v1418_v54 = vsel %vm1415_vm5, %v1416_v50, %v1417_v33  ;;  %v1282_v61 = vrot.slane %v1280_v56, 2  ;;  %v1068_v20 = vld [vmem:[%s2306_s4 + $0x30] sm:$0x3] }
  0x7e   : > { %571 = vmatmul.bf16.gmra.mxu2 %v492_v7  ;;  %1358 = vmatmul.bf16.vlgmr.msrb.gmra.mxu3 %v1260_v24  ;;  %v1420_v3 = vsel %vm1415_vm5, %v1417_v33, %v1419_v60  ;;  %v1421_v24 = vrot.slane %v2641_v41, 3  ;;  %v1291_v25 = vrot.slane %v1289_v13, 2  ;;  %v956_v18 = vsel %vm949_vm4, %v953_v59, %v955_v22 }
  0x7f   : > { %v952_v47 = vsel %vm949_vm4, %v950_v48, %v951_v49  ;;  %v1122_v41 = vsel %vm949_vm4, %v1119_v19, %v1121_v36  ;;  %v1107_v48 = vunpack.c.l.b16 %v1068_v20  ;;  %v959_v56 = vrot.slane %v2622_v14, 2 }
  0x80   : > { %v1422_v30 = vsel %vm1415_vm5, %v1419_v60, %v1421_v24  ;;  %v1295_v15 = vor.u32 %v1294_v26, %v1291_v25 }
  0x81   : > { %v1113_v16 = vpack.c.b16 %v1107_v48, %v1107_v48 }
  0x8b   : > { %456 = vmatmul.bf16.gmra.mxu1 %v2322_v12  ;;  %912 = vmatmul.bf16.gmra.mxu0 %v830_v34  ;;  %v1114_v12 = vrot.slane %v2609_v57, 2  ;;  %v1283_v57 = vshll.u32 %v2658_v43, 16 }
  0x8d   : > { %v1116_v23 = vsel %vm949_vm4, %v1114_v12, %v1115_v46  ;;  %v1285_v62 = vrot.slane %v1283_v57, 3  ;;  %v1425_v57 = vrot.slane %v2672_v6, 3 }
  0x8e   : > { %576 = vmatmul.bf16.gmra.mxu2 %v494_v32  ;;  %1363 = vmatmul.bf16.gmra.mxu3 %v1269_v40  ;;  %v1423_v40 = vrot.slane %v2658_v43, 3 }
  0x8f   : > { %v1286_v4 = vor.u32 %v1285_v62, %v1282_v61 }
  0x90   : > { %v1424_v12 = vsel %vm1415_vm5, %v1421_v24, %v1423_v40  ;;  %v1426_v0 = vsel %vm1415_vm5, %v1423_v40, %v1425_v57 }
  0x91   : > { %v1287_v8 = vsel %vm1243_vm3, %v1277_v11, %v1286_v4  ;;  %v1296_v53 = vsel %vm1243_vm3, %v1286_v4, %v1295_v15  ;;  %v1123_v11 = vrot.slane %v1113_v16, 2 }
  0x93   : > { %v1124_v59 = vsel %vm949_vm4, %v1121_v36, %v1123_v11 }
  0x9b   : > { %1022 = vmatmul.bf16.vlgmr.msra.gmra.mxu1 %v952_v47  ;;  %1488 = vmatmul.bf16.vlgmr.msra.gmra.mxu0 %v1418_v54 }
  0x9e   : > { %1186 = vmatmul.bf16.vlgmr.msra.gmra.mxu2 %v1116_v23  ;;  %1368 = vmatmul.bf16.gmra.mxu3 %v1278_v55 }
  0xa8   : > { %v350_v1 = vpop.f32.mrf.mxu0  ;;  %v2667_v10 = vpop.f32.mrf.mxu1 }
  0xab   : > { %1027 = vmatmul.bf16.gmra.mxu1 %v954_v2  ;;  %1493 = vmatmul.bf16.gmra.mxu0 %v1420_v3 }
  0xae   : > { %1191 = vmatmul.bf16.gmra.mxu2 %v1118_v63  ;;  %1373 = vmatmul.bf16.gmra.mxu3 %v1287_v8  ;;  %v960_v63 = vsel %vm949_vm4, %v957_v39, %v959_v56 }
  0xb0   : > { %v352_v7 = vpop.f32.mrf.mxu0  ;;  %v2674_v9 = vpop.f32.mrf.mxu1 }
  0xb1   : > { %v721_v21 = vpop.f32.mrf.mxu3  ;;  %v2686_v31 = vpop.f32.mrf.mxu2 }
  0xb8   : > { %v355_v28 = vpop.f32.mrf.mxu0  ;;  %v2682_v29 = vpop.f32.mrf.mxu1 }
  0xb9   : > { %v723_v32 = vpop.f32.mrf.mxu3  ;;  %v2692_v38 = vpop.f32.mrf.mxu2 }
  0xbb   : > { %1032 = vmatmul.bf16.gmra.mxu1 %v956_v18  ;;  %1498 = vmatmul.bf16.gmra.mxu0 %v1422_v30 }
  0xbe   : > { %1196 = vmatmul.bf16.gmra.mxu2 %v1120_v27  ;;  %1378 = vmatmul.bf16.gmra.mxu3 %v1296_v53 }
  0xc0   : > { %v357_v34 = vpop.f32.mrf.mxu0  ;;  %v2689_v35 = vpop.f32.mrf.mxu1 }
  0xc1   : > { %v726_v37 = vpop.f32.mrf.mxu3 }
  0xc8   : > { %v437_v42 = vpop.f32.mrf.mxu1  ;;  %v893_v44 = vpop.f32.mrf.mxu0 }
  0xc9   : > { %v438_v46 = vadd.f32 %v437_v42, %v350_v1  ;;  %v728_v49 = vpop.f32.mrf.mxu3 }
  0xcb   : > { %1037 = vmatmul.bf16.gmra.mxu1 %v958_v45  ;;  %1503 = vmatmul.bf16.gmra.mxu0 %v1424_v12 }
  0xce   : > { %1201 = vmatmul.bf16.gmra.mxu2 %v1122_v41 }
  0xd0   : > { %v439_v52 = vpop.f32.mrf.mxu1  ;;  %v895_v23 = vpop.f32.mrf.mxu0 }
  0xd1   : > { %v557_v50 = vpop.f32.mrf.mxu2  ;;  %v440_v47 = vadd.f32 %v439_v52, %v352_v7  ;;  %v731_v55 = vpop.f32.mrf.mxu3 }
  0xd2   : > { %v582_v33 = vadd.f32 %v557_v50, %v438_v46 }
  0xd4   : > { %v746_v51 = vadd.f32 %v721_v21, %v582_v33 }
  0xd6   : > { %v2700_v54 = vadd.f32 %v893_v44, %v746_v51 }
  0xd8   : > { %v442_v61 = vpop.f32.mrf.mxu1  ;;  %v898_v62 = vpop.f32.mrf.mxu0 }
  0xd9   : > { %v559_v43 = vpop.f32.mrf.mxu2  ;;  %v443_v1 = vadd.f32 %v442_v61, %v355_v28  ;;  %v733_v3 = vpop.f32.mrf.mxu3 }
  0xda   : > { %v583_v58 = vadd.f32 %v559_v43, %v440_v47 }
  0xdb   : > { %1042 = vmatmul.bf16.gmra.mxu1 %v960_v63  ;;  %1508 = vmatmul.bf16.gmra.mxu0 %v1426_v0 }
  0xdc   : > { %v747_v60 = vadd.f32 %v723_v32, %v583_v58 }
  0xde   : > { %1206 = vmatmul.bf16.gmra.mxu2 %v1124_v59  ;;  %v2707_v2 = vadd.f32 %v895_v23, %v747_v60 }
  0xe0   : > { %v444_v8 = vpop.f32.mrf.mxu1  ;;  %v900_v6 = vpop.f32.mrf.mxu0 }
  0xe1   : > { %v562_v14 = vpop.f32.mrf.mxu2  ;;  %v445_v7 = vadd.f32 %v444_v8, %v357_v34  ;;  %v736_v17 = vpop.f32.mrf.mxu3 }
  0xe2   : > { %v584_v4 = vadd.f32 %v562_v14, %v443_v1 }
  0xe4   : > { %v748_v5 = vadd.f32 %v726_v37, %v584_v4 }
  0xe6   : > { %v2709_v13 = vadd.f32 %v898_v62, %v748_v5 }
  0xe8   : > { %v447_v24 = vpop.f32.mrf.mxu1  ;;  %v903_v25 = vpop.f32.mrf.mxu0 }
  0xe9   : > { %v564_v19 = vpop.f32.mrf.mxu2  ;;  %v448_v26 = vadd.f32 %v447_v24, %v2667_v10  ;;  %v738_v30 = vpop.f32.mrf.mxu3 }
  0xea   : > { %v585_v21 = vadd.f32 %v564_v19, %v445_v7 }
  0xec   : > { %v749_v22 = vadd.f32 %v728_v49, %v585_v21 }
  0xee   : > { %v2712_v27 = vadd.f32 %v900_v6, %v749_v22  ;;  %v2736_v22 = vld [vmem:[%s2772_s2] ss:$0 sm:$0xff] }
  0xf0   : > { %v449_v32 = vpop.f32.mrf.mxu1  ;;  %v905_v53 = vpop.f32.mrf.mxu0 }
  0xf1   : > { %v567_v28 = vpop.f32.mrf.mxu2  ;;  %v450_v34 = vadd.f32 %v449_v32, %v2674_v9  ;;  %v741_v41 = vpop.f32.mrf.mxu3 }
  0xf2   : > { %v586_v18 = vadd.f32 %v567_v28, %v448_v26 }
  0xf4   : > { %v750_v15 = vadd.f32 %v731_v55, %v586_v18 }
  0xf6   : > { %v2715_v36 = vadd.f32 %v903_v25, %v750_v15 }
  0xf8   : > { %v452_v20 = vpop.f32.mrf.mxu1  ;;  %v908_v42 = vpop.f32.mrf.mxu0 }
  0xf9   : > { %v569_v37 = vpop.f32.mrf.mxu2  ;;  %v453_v10 = vadd.f32 %v452_v20, %v2682_v29  ;;  %v743_v9 = vpop.f32.mrf.mxu3 }
  0xfa   : > { %v587_v39 = vadd.f32 %v569_v37, %v450_v34 }
  0xfc   : > { %v751_v40 = vadd.f32 %v733_v3, %v587_v39 }
  0xfe   : > { %v2718_v44 = vadd.f32 %v905_v53, %v751_v40 }
 0x100   : > { %v454_v48 = vpop.f32.mrf.mxu1  ;;  %v910_v49 = vpop.f32.mrf.mxu0 }
 0x101   : > { %v572_v45 = vpop.f32.mrf.mxu2  ;;  %v455_v50 = vadd.f32 %v454_v48, %v2689_v35  ;;  %v1359_v55 = vpop.f32.mrf.mxu3 }
 0x102   : > { %v588_v12 = vadd.f32 %v572_v45, %v453_v10 }
 0x104   : > { %v752_v46 = vadd.f32 %v736_v17, %v588_v12 }
 0x106   : > { %v2721_v33 = vadd.f32 %v908_v42, %v752_v46 }
 0x108   : > { %v457_v23 = vpop.f32.mrf.mxu1  ;;  %v913_v47 = vpop.f32.mrf.mxu0 }
 0x109   : > { %v574_v16 = vpop.f32.mrf.mxu2  ;;  %v458_v11 = vadd.f32 %v457_v23, %v2686_v31  ;;  %v1361_v63 = vpop.f32.mrf.mxu3 }
 0x10a   : > { %v589_v51 = vadd.f32 %v574_v16, %v455_v50 }
 0x10c   : > { %v753_v52 = vadd.f32 %v738_v30, %v589_v51 }
 0x10e   : > { %v2724_v29 = vadd.f32 %v910_v49, %v753_v52 }
 0x110   : > { %v459_v58 = vpop.f32.mrf.mxu1  ;;  %v915_v59 = vpop.f32.mrf.mxu0 }
 0x111   : > { %v577_v43 = vpop.f32.mrf.mxu2  ;;  %v460_v35 = vadd.f32 %v459_v58, %v2692_v38  ;;  %v1364_v8 = vpop.f32.mrf.mxu3 }
 0x112   : > { %v590_v56 = vadd.f32 %v577_v43, %v458_v11 }
 0x114   : > { %v754_v57 = vadd.f32 %v741_v41, %v590_v56 }
 0x116   : > { %v2727_v60 = vadd.f32 %v913_v47, %v754_v57 }
 0x118   : > { %v1023_v1 = vpop.f32.mrf.mxu1  ;;  %v1489_v3 = vpop.f32.mrf.mxu0 }
 0x119   : > { %v579_v61 = vpop.f32.mrf.mxu2  ;;  %v1048_v31 = vadd.f32 %v1023_v1, %v2700_v54  ;;  %v1366_v15 = vpop.f32.mrf.mxu3 }
 0x11a   : > { %v591_v62 = vadd.f32 %v579_v61, %v460_v35 }
 0x11c   : > { %v755_v0 = vadd.f32 %v743_v9, %v591_v62 }
 0x11e   : > { %v2730_v14 = vadd.f32 %v915_v59, %v755_v0 }
 0x120   : > { %v1025_v6 = vpop.f32.mrf.mxu1  ;;  %v1491_v7 = vpop.f32.mrf.mxu0 }
 0x121   : > { %v1187_v4 = vpop.f32.mrf.mxu2  ;;  %v1049_v38 = vadd.f32 %v1025_v6, %v2707_v2  ;;  %v1369_v10 = vpop.f32.mrf.mxu3 }
 0x122   : > { %v1212_v5 = vadd.f32 %v1187_v4, %v1048_v31 }
 0x124   : > { %v1384_v17 = vadd.f32 %v1359_v55, %v1212_v5 }
 0x126   : > { %v1514_v21 = vadd.f32 %v1489_v3, %v1384_v17 }
 0x128   : > { %v1028_v25 = vpop.f32.mrf.mxu1  ;;  %v1494_v26 = vpop.f32.mrf.mxu0  ;;  %v1528_v28 = vadd.f32 %v2736_v22, %v1514_v21 }
 0x129   : > { %v1189_v19 = vpop.f32.mrf.mxu2  ;;  %v1050_v30 = vadd.f32 %v1028_v25, %v2709_v13 }
 0x12a   : > { %v1213_v24 = vadd.f32 %v1189_v19, %v1049_v38  ;;  %v1538_v53 = vmax.f32 %v1528_v28, 0.0 }
 0x12c   : > { %v1385_v54 = vadd.f32 %v1361_v63, %v1213_v24 }
 0x12e   : > { %v1515_v18 = vadd.f32 %v1491_v7, %v1385_v54 }
 0x130   : > { %v1529_v2 = vadd.f32 %v2736_v22, %v1515_v18  ;;  %v1030_v40 = vpop.f32.mrf.mxu1  ;;  %v1496_v41 = vpop.f32.mrf.mxu0 }
 0x131   : > { %v1192_v32 = vpop.f32.mrf.mxu2  ;;  %v1051_v13 = vadd.f32 %v1030_v40, %v2712_v27  ;;  %v1371_v27 = vpop.f32.mrf.mxu3 }
 0x132   : > { %v1539_v34 = vmax.f32 %v1529_v2, 0.0  ;;  %v1214_v37 = vadd.f32 %v1192_v32, %v1050_v30 }
 0x134   : > { %v2187_v39 = vpack.c.bf16 %v1539_v34, %v1538_v53  ;;  %v1386_v20 = vadd.f32 %v1364_v8, %v1214_v37 }
 0x136   : > { %2188 = vst [vmem:[%s2745_s21] sm:$0xff] %v2187_v39   ;;  %v1516_v45 = vadd.f32 %v1494_v26, %v1386_v20 }
 0x138   : > { %v1033_v48 = vpop.f32.mrf.mxu1  ;;  %v1499_v49 = vpop.f32.mrf.mxu0  ;;  %v1530_v50 = vadd.f32 %v2736_v22, %v1516_v45 }
 0x139   : > { %v1194_v42 = vpop.f32.mrf.mxu2  ;;  %v1052_v16 = vadd.f32 %v1033_v48, %v2715_v36  ;;  %v1374_v36 = vpop.f32.mrf.mxu3 }
 0x13a   : > { %v1215_v12 = vadd.f32 %v1194_v42, %v1051_v13  ;;  %v1540_v23 = vmax.f32 %v1530_v50, 0.0 }
 0x13c   : > { %v1387_v46 = vadd.f32 %v1366_v15, %v1215_v12 }
 0x13e   : > { %v1517_v9 = vadd.f32 %v1496_v41, %v1387_v46 }
 0x140   : > { %v1531_v51 = vadd.f32 %v2736_v22, %v1517_v9  ;;  %v1035_v43 = vpop.f32.mrf.mxu1  ;;  %v1501_v56 = vpop.f32.mrf.mxu0 }
 0x141   : > { %v1197_v52 = vpop.f32.mrf.mxu2  ;;  %v1053_v58 = vadd.f32 %v1035_v43, %v2718_v44  ;;  %v1376_v21 = vpop.f32.mrf.mxu3 }
 0x142   : > { %v1541_v47 = vmax.f32 %v1531_v51, 0.0  ;;  %v1216_v11 = vadd.f32 %v1197_v52, %v1052_v16 }
 0x144   : > { %v2192_v55 = vpack.c.bf16 %v1541_v47, %v1540_v23  ;;  %v1388_v57 = vadd.f32 %v1369_v10, %v1216_v11 }
 0x146   : > { %2212 = vst [vmem:[%s2745_s21 + $0x8] sm:$0xff] %v2192_v55   ;;  %v1518_v35 = vadd.f32 %v1499_v49, %v1388_v57 }
 0x148   : > { %v1038_v63 = vpop.f32.mrf.mxu1  ;;  %v1532_v0 = vadd.f32 %v2736_v22, %v1518_v35  ;;  %v1504_v31 = vpop.f32.mrf.mxu0 }
 0x149   : > { %v1199_v59 = vpop.f32.mrf.mxu2  ;;  %v1054_v3 = vadd.f32 %v1038_v63, %v2721_v33  ;;  %v1379_v32 = vpop.f32.mrf.mxu3 }
 0x14a   : > { %v1217_v61 = vadd.f32 %v1199_v59, %v1053_v58  ;;  %v1542_v8 = vmax.f32 %v1532_v0, 0.0 }
 0x14c   : > { %v1389_v62 = vadd.f32 %v1371_v27, %v1217_v61 }
 0x14e   : > { %v1519_v1 = vadd.f32 %v1501_v56, %v1389_v62 }
 0x150   : > { %v1533_v4 = vadd.f32 %v2736_v22, %v1519_v1  ;;  %v1040_v17 = vpop.f32.mrf.mxu1  ;;  %v1506_v24 = vpop.f32.mrf.mxu0 }
 0x151   : > { %v1202_v5 = vpop.f32.mrf.mxu2  ;;  %v1055_v19 = vadd.f32 %v1040_v17, %v2724_v29  ;;  %v1381_v12 = vpop.f32.mrf.mxu3 }
 0x152   : > { %v1543_v6 = vmax.f32 %v1533_v4, 0.0  ;;  %v1218_v7 = vadd.f32 %v1202_v5, %v1054_v3 }
 0x154   : > { %v2197_v44 = vpack.c.bf16 %v1543_v6, %v1542_v8  ;;  %v1390_v38 = vadd.f32 %v1374_v36, %v1218_v7 }
 0x156   : > { %2213 = vst [vmem:[%s2745_s21 + $0x10] sm:$0xff] %v2197_v44   ;;  %v1520_v25 = vadd.f32 %v1504_v31, %v1390_v38 }
 0x158   : > { %v1043_v28 = vpop.f32.mrf.mxu1  ;;  %v1534_v18 = vadd.f32 %v2736_v22, %v1520_v25  ;;  %v1509_v39 = vpop.f32.mrf.mxu0 }
 0x159   : > { %v1204_v54 = vpop.f32.mrf.mxu2  ;;  %v1056_v15 = vadd.f32 %v1043_v28, %v2727_v60 }
 0x15a   : > { %v1219_v26 = vadd.f32 %v1204_v54, %v1055_v19  ;;  %v1544_v34 = vmax.f32 %v1534_v18, 0.0 }
 0x15c   : > { %v1391_v33 = vadd.f32 %v1376_v21, %v1219_v26 }
 0x15e   : > { %v1521_v30 = vadd.f32 %v1506_v24, %v1391_v33 }
 0x160   : > { %v1535_v2 = vadd.f32 %v2736_v22, %v1521_v30  ;;  %v1045_v20 = vpop.f32.mrf.mxu1  ;;  %v1511_v48 = vpop.f32.mrf.mxu0 }
 0x161   : > { %v1207_v53 = vpop.f32.mrf.mxu2  ;;  %v1057_v42 = vadd.f32 %v1045_v20, %v2730_v14 }
 0x162   : > { %v1545_v37 = vmax.f32 %v1535_v2, 0.0  ;;  %v1220_v29 = vadd.f32 %v1207_v53, %v1056_v15 }
 0x164   : > { %v2202_v40 = vpack.c.bf16 %v1545_v37, %v1544_v34  ;;  %v1392_v41 = vadd.f32 %v1379_v32, %v1220_v29 }
 0x166   : > { %2214 = vst [vmem:[%s2745_s21 + $0x18] sm:$0xff] %v2202_v40   ;;  %v1522_v13 = vadd.f32 %v1509_v39, %v1392_v41 }
 0x168   : > { %v1536_v10 = vadd.f32 %v2736_v22, %v1522_v13 }
 0x169   : > { %v1209_v45 = vpop.f32.mrf.mxu2 }
 0x16a   : > { %v1221_v60 = vadd.f32 %v1209_v45, %v1057_v42  ;;  %v1546_v9 = vmax.f32 %v1536_v10, 0.0 }
 0x16c   : > { %v1393_v46 = vadd.f32 %v1381_v12, %v1221_v60 }
 0x16e   : > { %v1523_v49 = vadd.f32 %v1511_v48, %v1393_v46 }
 0x170   : > { %v1537_v50 = vadd.f32 %v2736_v22, %v1523_v49 }
 0x172   : > { %v1547_v16 = vmax.f32 %v1537_v50, 0.0 }
 0x174   : > { %v2207_v51 = vpack.c.bf16 %v1547_v16, %v1546_v9 }
 0x176   : > { %2215 = vst [vmem:[%s2745_s21 + $0x20] sm:$0xff] %v2207_v51  }
 0x177 PF: > { %s13_s12 = sadd.s32 1, %s2249_s12  }
 0x178   : > { %p10_p4 = scmp.ge.s32.totalorder %s13_s12, 4  }
 0x17a   :  { %12 = sbr.rel (!%p10_p4) target bundleno = 1 (0x1), region = 70 }

// kernel: basic_ag_forward.11
= control target key start
LH: loop header
LB: loop body
LE: loop exit
PB: predicated region body
PF: predicated region fallthrough
CT: control target
= control target key end

     0   :  { %s4538_s18 = smov 0   ;;  %s5645_s0 = inlined_call_operand.vmem [shape: bf16[2,342,128], index: 0, kind: input, shape index: {}]   ;;  %s5646_s1 = inlined_call_operand.vmem [shape: bf16[9,128,128], index: 1, kind: input, shape index: {}]   ;;  %s5647_s2 = inlined_call_operand.vmem [shape: f32[1,128], index: 2, kind: input, shape index: {}]   ;;  %s5648_s3 = inlined_call_operand.vmem [shape: bf16[128,128], index: 3, kind: input, shape index: {}]   ;;  %s5649_s4 = inlined_call_operand.vmem [shape: f32[1,128], index: 4, kind: input, shape index: {}]   ;;  %s5650_s5 = inlined_call_operand.vmem [shape: f32[2,288,128], index: 5, kind: output, shape index: {}]  }
   0x1 LB: > { %s3591_s19 = sadd.s32 4294967295, %s4506_s18   ;;  %p3595_p0 = scmp.ge.s32.totalorder %s4506_s18, 1  ;;  %s4506_s18 = sphi %s4538_s18, %s15_s18  }
   0x2   : > { %p187_p1 = scmp.lt.s32.totalorder %s4506_s18, 3 }
   0x4   : > { %p188_p2 = pnand %p3595_p0, %p187_p1 }
   0x6   : > { %191 = sbr.rel (%p188_p2) target bundleno = 1043 (0x413), region = 40 }
   0xb   : > { %v4284_v0 = vld [vmem:[%s5646_s1 + $0x78] sm:$0xff]  ;;  %p215_p3 = scmp.lt.s32.totalorder %s3591_s19, 1  ;;  %v4283_v2 = vld [vmem:[%s5646_s1 + $0x70] sm:$0xff]  ;;  %v4282_v4 = vld [vmem:[%s5646_s1 + $0x68] sm:$0xff]  ;;  %vm388_vm0 = vsmask.f32 7424 }
   0xc   : > { %v4276_v1 = vld [vmem:[%s5646_s1 + $0x38] sm:$0xff]  ;;  %4390 = vmatpush.bf16.msra.mxu2 %v4284_v0  ;;  %v4275_v3 = vld [vmem:[%s5646_s1 + $0x30] sm:$0xff]  ;;  %603 = vmatpush.bf16.msra.mxu0 %v4284_v0  ;;  %v4274_v5 = vld [vmem:[%s5646_s1 + $0x28] sm:$0xff]  ;;  %vm888_vm1 = vcmask 1046528   ;;  %vm1533_vm2 = vsmask.f32 6400 }
   0xd   : > { %4398 = vmatpush.bf16.msra.mxu3 %v4276_v1  ;;  %768 = vmatpush.bf16.msra.mxu1 %v4276_v1  ;;  %s5666_s19 = smov (!%p215_p3, %s3591_s19), 1  ;;  %v4281_v6 = vld [vmem:[%s5646_s1 + $0x60] sm:$0xff]  ;;  %v4280_v8 = vld [vmem:[%s5646_s1 + $0x58] sm:$0xff]  ;;  %v4279_v12 = vld [vmem:[%s5646_s1 + $0x50] sm:$0xff]  ;;  %vm1926_vm3 = vcmask 1045504   ;;  %vm2964_vm5 = vcmask 1044480  }
   0xe   : > { %s4406_s7 = smul.u32 172, %s5666_s19  ;;  %v4273_v7 = vld [vmem:[%s5646_s1 + $0x20] sm:$0xff]  ;;  %v4272_v9 = vld [vmem:[%s5646_s1 + $0x18] sm:$0xff]  ;;  %v4271_v13 = vld [vmem:[%s5646_s1 + $0x10] sm:$0xff]  ;;  %vm2571_vm4 = vsmask.f32 5376 }
   0xf   : > { %v4278_v18 = vld [vmem:[%s5646_s1 + $0x48] sm:$0xff]  ;;  %v4277_v26 = vld [vmem:[%s5646_s1 + $0x40] sm:$0xff]  ;;  %v4292_v32 = vld [vmem:[%s5646_s1 + $0xb8] sm:$0xff] }
  0x10   : > { %4391 = vmatpush.bf16.msra.mxu2 %v4283_v2  ;;  %604 = vmatpush.bf16.msra.mxu0 %v4283_v2  ;;  %s4576_s14 = scalar_lea.vmem %s5645_s0, %s4406_s7  ;;  %v4270_v19 = vld [vmem:[%s5646_s1 + $0x8] sm:$0xff]  ;;  %v4269_v27 = vld [vmem:[%s5646_s1] sm:$0xff]  ;;  %v4317_v33 = vld [vmem:[%s5646_s1 + $0xf8] sm:$0xff]  ;;  %s4407_s7 = smul.u32 288, %s5666_s19 }
  0x11   : > { %4399 = vmatpush.bf16.msra.mxu3 %v4275_v3  ;;  %769 = vmatpush.bf16.msra.mxu1 %v4275_v3  ;;  %v4260_v10 = vld [vmem:[%s4576_s14 + $0x48] sm:$0xff]  ;;  %v4384_v11 = vld [vmem:[%s4576_s14] sm:$0xff]   ;;  %v4593_v14 = vld [vmem:[%s4576_s14 + $0x50] sm:$0xff] }
  0x12   : > { %v461_v15 = vshll.u32 %v4260_v10, 16  ;;  %v4596_v16 = vld [vmem:[%s4576_s14 + $0x8] sm:$0xff]  ;;  %v392_v17 = vshll.u32 %v4384_v11, 16  ;;  %v465_v21 = vshrl.u32 %v4260_v10, 16  ;;  %v469_v22 = vshll.u32 %v4593_v14, 16  ;;  %v4325_v36 = vld [vmem:[%s5646_s1 + $0x138] sm:$0xff]  ;;  %s5526_s10 = scalar_lea.vmem %s5650_s5, %s4407_s7 }
  0x13   : > { %v390_v23 = vshrl.u32 %v4384_v11, 16  ;;  %v397_v25 = vshll.u32 %v4596_v16, 16  ;;  %v4291_v37 = vld [vmem:[%s5646_s1 + $0xb0] sm:$0xff]  ;;  %v4262_v39 = vld [vmem:[%s4576_s14 + $0x58] sm:$0xff]  ;;  %v4290_v42 = vld [vmem:[%s5646_s1 + $0xa8] sm:$0xff]  ;;  %v473_v44 = vshrl.u32 %v4593_v14, 16 }
  0x14   : > { %4392 = vmatpush.bf16.msra.mxu2 %v4282_v4  ;;  %605 = vmatpush.bf16.msra.mxu0 %v4282_v4  ;;  %v4604_v20 = vrot.slane %v461_v15, 1  ;;  %v394_v24 = vrot.slane %v392_v17, 1  ;;  %v471_v29 = vrot.slane %v469_v22, 1  ;;  %v4316_v38 = vld [vmem:[%s5646_s1 + $0xf0] sm:$0xff]  ;;  %v4315_v43 = vld [vmem:[%s5646_s1 + $0xe8] sm:$0xff]  ;;  %v477_v45 = vshll.u32 %v4262_v39, 16 }
  0x15   : > { %4400 = vmatpush.bf16.msra.mxu3 %v4274_v5  ;;  %770 = vmatpush.bf16.msra.mxu1 %v4274_v5  ;;  %v399_v31 = vrot.slane %v397_v25, 1  ;;  %v4634_v40 = vld [vmem:[%s4576_s14 + $0x10] sm:$0xff]  ;;  %v401_v46 = vshrl.u32 %v4596_v16, 16  ;;  %v4323_v48 = vld [vmem:[%s5646_s1 + $0x128] sm:$0xff]  ;;  %v4263_v55 = vld [vmem:[%s4576_s14 + $0x60] sm:$0xff]  ;;  %v481_v59 = vshrl.u32 %v4262_v39, 16 }
  0x16   : > { %v467_v28 = vor.u32 %v465_v21, %v4604_v20  ;;  %v395_v30 = vor.u32 %v394_v24, %v390_v23  ;;  %v4324_v41 = vld [vmem:[%s5646_s1 + $0x130] sm:$0xff]  ;;  %v405_v47 = vshll.u32 %v4634_v40, 16  ;;  %v475_v49 = vor.u32 %v473_v44, %v471_v29  ;;  %v4289_v56 = vld [vmem:[%s5646_s1 + $0xa0] sm:$0xff]  ;;  %v4663_v58 = vld [vmem:[%s4576_s14 + $0x18] sm:$0xff] }
  0x17   : > { %v479_v50 = vrot.slane %v477_v45, 1  ;;  %v403_v51 = vor.u32 %v401_v46, %v399_v31  ;;  %v4314_v57 = vld [vmem:[%s5646_s1 + $0xe0] sm:$0xff]  ;;  %v485_v60 = vshll.u32 %v4263_v55, 16  ;;  %v409_v61 = vshrl.u32 %v4634_v40, 16  ;;  %v4265_v22 = vld [vmem:[%s4576_s14 + $0x70] sm:$0xff]  ;;  %v4321_v23 = vld [vmem:[%s5646_s1 + $0x118] sm:$0xff] }
  0x18   : > { %4393 = vmatpush.bf16.msra.mxu2 %v4281_v6  ;;  %606 = vmatpush.bf16.msra.mxu0 %v4281_v6  ;;  %v472_v34 = vsel %vm388_vm0, %v467_v28, %v471_v29  ;;  %v400_v35 = vsel %vm388_vm0, %v395_v30, %v399_v31  ;;  %v407_v52 = vrot.slane %v405_v47, 1  ;;  %v413_v62 = vshll.u32 %v4663_v58, 16  ;;  %v4322_v5 = vld [vmem:[%s5646_s1 + $0x120] sm:$0xff]  ;;  %v4264_v6 = vld [vmem:[%s4576_s14 + $0x68] sm:$0xff]  ;;  %v4287_v24 = vld [vmem:[%s5646_s1 + $0x90] sm:$0xff] }
  0x19   : > { %4401 = vmatpush.bf16.msra.mxu3 %v4273_v7  ;;  %771 = vmatpush.bf16.msra.mxu1 %v4273_v7  ;;  %v480_v53 = vsel %vm388_vm0, %v475_v49, %v479_v50  ;;  %v483_v63 = vor.u32 %v481_v59, %v479_v50  ;;  %v487_v0 = vrot.slane %v485_v60, 1  ;;  %v4288_v7 = vld [vmem:[%s5646_s1 + $0x98] sm:$0xff]  ;;  %v4312_v25 = vld [vmem:[%s5646_s1 + $0xd0] sm:$0xff]  ;;  %v501_v28 = vshll.u32 %v4265_v22, 16 }
  0x1a   : > { %v408_v54 = vsel %vm388_vm0, %v403_v51, %v407_v52  ;;  %v411_v1 = vor.u32 %v409_v61, %v407_v52  ;;  %v415_v2 = vrot.slane %v413_v62, 1 }
  0x1b   : > { %v488_v3 = vsel %vm388_vm0, %v483_v63, %v487_v0 }
  0x1c   : > { %4394 = vmatpush.bf16.msra.mxu2 %v4280_v8  ;;  %607 = vmatpush.bf16.msra.mxu0 %v4280_v8  ;;  %v416_v4 = vsel %vm388_vm0, %v411_v1, %v415_v2  ;;  %v4313_v8 = vld [vmem:[%s5646_s1 + $0xd8] sm:$0xff] }
  0x1d   : > { %4402 = vmatpush.bf16.msra.mxu3 %v4272_v9  ;;  %772 = vmatpush.bf16.msra.mxu1 %v4272_v9  ;;  %v4681_v9 = vld [vmem:[%s4576_s14 + $0x20] sm:$0xff] }
  0x1e   : > { %v425_v29 = vshrl.u32 %v4681_v9, 16 }
  0x20   : > { %4395 = vmatpush.bf16.msra.mxu2 %v4279_v12  ;;  %608 = vmatpush.bf16.msra.mxu0 %v4279_v12  ;;  %v417_v12 = vshrl.u32 %v4663_v58, 16 }
  0x21   : > { %4403 = vmatpush.bf16.msra.mxu3 %v4271_v13  ;;  %773 = vmatpush.bf16.msra.mxu1 %v4271_v13  ;;  %v421_v13 = vshll.u32 %v4681_v9, 16 }
  0x22   : > { %v419_v17 = vor.u32 %v417_v12, %v415_v2 }
  0x24   : > { %4396 = vmatpush.bf16.msra.mxu2 %v4278_v18  ;;  %609 = vmatpush.bf16.msra.mxu0 %v4278_v18  ;;  %v423_v18 = vrot.slane %v421_v13, 1 }
  0x25   : > { %4404 = vmatpush.bf16.msra.mxu3 %v4270_v19  ;;  %774 = vmatpush.bf16.msra.mxu1 %v4270_v19 }
  0x26   : > { %v424_v21 = vsel %vm388_vm0, %v419_v17, %v423_v18  ;;  %v4330_v17 = vld [vmem:[%s5646_s1 + $0x160] sm:$0xff] }
  0x28   : > { %4397 = vmatpush.bf16.msra.mxu2 %v4277_v26  ;;  %610 = vmatpush.bf16.msra.mxu0 %v4277_v26  ;;  %v4699_v26 = vld [vmem:[%s4576_s14 + $0x28] sm:$0xff] }
  0x29   : > { %4405 = vmatpush.bf16.msra.mxu3 %v4269_v27  ;;  %775 = vmatpush.bf16.msra.mxu1 %v4269_v27  ;;  %v497_v27 = vshrl.u32 %v4264_v6, 16  ;;  %v429_v30 = vshll.u32 %v4699_v26, 16  ;;  %v433_v45 = vshrl.u32 %v4699_v26, 16 }
  0x2b   : > { %656 = vmatmul.bf16.vlgmr.msra.gmra.mxu2 %v472_v34  ;;  %611 = vmatmul.bf16.vlgmr.msra.gmra.mxu0 %v400_v35  ;;  %v431_v34 = vrot.slane %v429_v30, 1  ;;  %v4358_v30 = vld [vmem:[%s5646_s1 + $0x1b8] sm:$0xff] }
  0x2c   : > { %992 = vmatpush.bf16.msrb.mxu2 %v4292_v32  ;;  %821 = vmatmul.bf16.vlgmr.msra.gmra.mxu3 %v4260_v10  ;;  %v489_v10 = vshrl.u32 %v4263_v55, 16  ;;  %v503_v32 = vrot.slane %v501_v28, 1 }
  0x2d   : > { %1377 = vmatpush.bf16.msrb.mxu3 %v4317_v33  ;;  %776 = vmatmul.bf16.vlgmr.msra.gmra.mxu1 %v4384_v11  ;;  %v493_v11 = vshll.u32 %v4264_v6, 16  ;;  %v427_v33 = vor.u32 %v425_v29, %v423_v18  ;;  %v435_v49 = vor.u32 %v433_v45, %v431_v34  ;;  %v4328_v29 = vld [vmem:[%s5646_s1 + $0x150] sm:$0xff] }
  0x2e   : > { %1770 = vmatpush.bf16.msrb.mxu0 %v4325_v36 }
  0x2f   : > { %v495_v15 = vrot.slane %v493_v11, 1  ;;  %v432_v36 = vsel %vm388_vm0, %v427_v33, %v431_v34  ;;  %v4327_v33 = vld [vmem:[%s5646_s1 + $0x148] sm:$0xff] }
  0x30   : > { %993 = vmatpush.bf16.msrb.mxu2 %v4291_v37  ;;  %v4266_v37 = vld [vmem:[%s4576_s14 + $0x78] sm:$0xff] }
  0x31   : > { %1378 = vmatpush.bf16.msrb.mxu3 %v4316_v38  ;;  %v499_v31 = vor.u32 %v497_v27, %v495_v15  ;;  %v4320_v38 = vld [vmem:[%s5646_s1 + $0x110] sm:$0xff]  ;;  %v509_v44 = vshll.u32 %v4266_v37, 16  ;;  %v513_v59 = vshrl.u32 %v4266_v37, 16 }
  0x32   : > { %1771 = vmatpush.bf16.msrb.mxu0 %v4324_v41  ;;  %v4311_v41 = vld [vmem:[%s5646_s1 + $0xc8] sm:$0xff] }
  0x33   : > { %v504_v35 = vsel %vm388_vm0, %v499_v31, %v503_v32 }
  0x34   : > { %994 = vmatpush.bf16.msrb.mxu2 %v4290_v42  ;;  %v4717_v42 = vld [vmem:[%s4576_s14 + $0x30] sm:$0xff] }
  0x35   : > { %1379 = vmatpush.bf16.msrb.mxu3 %v4315_v43  ;;  %v505_v43 = vshrl.u32 %v4265_v22, 16  ;;  %v437_v46 = vshll.u32 %v4717_v42, 16  ;;  %v441_v61 = vshrl.u32 %v4717_v42, 16 }
  0x36   : > { %1772 = vmatpush.bf16.msrb.mxu0 %v4323_v48  ;;  %v511_v48 = vrot.slane %v509_v44, 1 }
  0x37   : > { %v507_v47 = vor.u32 %v505_v43, %v503_v32  ;;  %v439_v50 = vrot.slane %v437_v46, 1  ;;  %v4366_v32 = vld [vmem:[%s5646_s1 + $0x1f8] sm:$0xff] }
  0x38   : > { %995 = vmatpush.bf16.msrb.mxu2 %v4289_v56  ;;  %v4285_v56 = vld [vmem:[%s5646_s1 + $0x80] sm:$0xff]  ;;  %v515_v63 = vor.u32 %v513_v59, %v511_v48 }
  0x39   : > { %1380 = vmatpush.bf16.msrb.mxu3 %v4314_v57  ;;  %v512_v51 = vsel %vm388_vm0, %v507_v47, %v511_v48  ;;  %v440_v52 = vsel %vm388_vm0, %v435_v49, %v439_v50  ;;  %v4735_v57 = vld [vmem:[%s4576_s14 + $0x38] sm:$0xff]  ;;  %v443_v1 = vor.u32 %v441_v61, %v439_v50  ;;  %v4388_v59 = vld [vmem:[%s4576_s14] sm:$0xe] }
  0x3a   : > { %1773 = vmatpush.bf16.msrb.mxu0 %v4322_v5  ;;  %v445_v62 = vshll.u32 %v4735_v57, 16  ;;  %v4332_v5 = vld [vmem:[%s5646_s1 + $0x170] sm:$0xff]  ;;  %v449_v13 = vshrl.u32 %v4735_v57, 16 }
  0x3b   : > { %661 = vmatmul.bf16.gmra.mxu2 %v480_v53  ;;  %616 = vmatmul.bf16.gmra.mxu0 %v408_v54  ;;  %v4267_v53 = vld [vmem:[%s4576_s14 + $0x80] sm:$0xff]  ;;  %v4319_v54 = vld [vmem:[%s5646_s1 + $0x108] sm:$0xff] }
  0x3c   : > { %826 = vmatmul.bf16.gmra.mxu3 %v4593_v14  ;;  %996 = vmatpush.bf16.msrb.mxu2 %v4288_v7  ;;  %v491_v14 = vor.u32 %v489_v10, %v487_v0  ;;  %v517_v60 = vshll.u32 %v4267_v53, 16  ;;  %v447_v2 = vrot.slane %v445_v62, 1  ;;  %v4268_v7 = vld [vmem:[%s4576_s14 + $0x88] sm:$0xff]  ;;  %v521_v11 = vshrl.u32 %v4267_v53, 16 }
  0x3d   : > { %781 = vmatmul.bf16.gmra.mxu1 %v4596_v16  ;;  %1381 = vmatpush.bf16.msrb.mxu3 %v4313_v8  ;;  %v4750_v8 = vld [vmem:[%s4576_s14 + $0x40] sm:$0xff]  ;;  %v4331_v10 = vld [vmem:[%s5646_s1 + $0x168] sm:$0xff]  ;;  %v525_v12 = vshll.u32 %v4268_v7, 16  ;;  %v529_v34 = vshrl.u32 %v4268_v7, 16 }
  0x3e   : > { %v496_v19 = vsel %vm388_vm0, %v491_v14, %v495_v15  ;;  %1774 = vmatpush.bf16.msrb.mxu0 %v4321_v23  ;;  %v519_v0 = vrot.slane %v517_v60, 1  ;;  %v453_v14 = vshll.u32 %v4750_v8, 16  ;;  %v4318_v15 = vld [vmem:[%s5646_s1 + $0x100] sm:$0xff]  ;;  %v277_v23 = vld [vmem:[%s4576_s14 + $0x90] sm:$0x1] }
  0x3f   : > { %v368_v27 = vunpack.c.l.b16 %v277_v23 }
  0x40   : > { %997 = vmatpush.bf16.msrb.mxu2 %v4287_v24  ;;  %v523_v18 = vor.u32 %v521_v11, %v519_v0  ;;  %v4329_v24 = vld [vmem:[%s5646_s1 + $0x158] sm:$0xff] }
  0x41   : > { %1382 = vmatpush.bf16.msrb.mxu3 %v4312_v25  ;;  %v4776_v31 = vpack.c.b16 %v368_v27, %v368_v27 }
  0x42   : > { %1775 = vmatpush.bf16.msrb.mxu0 %v4320_v38  ;;  %v1128_v38 = vld [vmem:[%s4576_s14 + $0xc] sm:$0xf] }
  0x43   : > { %v1219_v46 = vunpack.c.l.b16 %v1128_v38 }
  0x45   : > { %1383 = vmatpush.bf16.msrb.mxu3 %v4311_v41  ;;  %v4374_v41 = vld [vmem:[%s5646_s1 + $0x238] sm:$0xff] }
  0x46   : > { %1776 = vmatpush.bf16.msrb.mxu0 %v4319_v54 }
  0x4a   : > { %1777 = vmatpush.bf16.msrb.mxu0 %v4318_v15  ;;  %v890_v15 = vrot.slane %v4596_v16, 1 }
  0x4b   : > { %666 = vmatmul.bf16.gmra.mxu2 %v488_v3  ;;  %621 = vmatmul.bf16.gmra.mxu0 %v416_v4  ;;  %v520_v3 = vsel %vm388_vm0, %v515_v63, %v519_v0  ;;  %v448_v4 = vsel %vm388_vm0, %v443_v1, %v447_v2 }
  0x4c   : > { %831 = vmatmul.bf16.gmra.mxu3 %v4262_v39  ;;  %v4286_v39 = vld [vmem:[%s5646_s1 + $0x88] sm:$0xff] }
  0x4d   : > { %786 = vmatmul.bf16.gmra.mxu1 %v4634_v40  ;;  %998 = vmatpush.bf16.msrb.mxu2 %v4286_v39  ;;  %v4326_v39 = vld [vmem:[%s5646_s1 + $0x140] sm:$0xff] }
  0x4e   : > { %3068 = vmatpush.bf16.msra.mxu0 %v4374_v41 }
  0x51   : > { %999 = vmatpush.bf16.msrb.mxu2 %v4285_v56  ;;  %v4387_v56 = vld [vmem:[%s4576_s14] sm:$0xf0] }
  0x55   : > { %2415 = vmatpush.bf16.msra.mxu2 %v4358_v30 }
  0x5b   : > { %671 = vmatmul.bf16.gmra.mxu2 %v496_v19  ;;  %626 = vmatmul.bf16.gmra.mxu0 %v424_v21  ;;  %v527_v19 = vrot.slane %v525_v12, 1  ;;  %v451_v21 = vor.u32 %v449_v13, %v447_v2 }
  0x5c   : > { %836 = vmatmul.bf16.gmra.mxu3 %v4263_v55  ;;  %v4333_v55 = vld [vmem:[%s5646_s1 + $0x178] sm:$0xff] }
  0x5d   : > { %791 = vmatmul.bf16.gmra.mxu1 %v4663_v58  ;;  %v528_v25 = vsel %vm388_vm0, %v523_v18, %v527_v19  ;;  %v531_v43 = vor.u32 %v529_v34, %v527_v19  ;;  %v4822_v34 = vld [vmem:[%s4576_s14 + $0x18] sm:$0xff] }
  0x5e   : > { %2030 = vmatpush.bf16.msrb.mxu1 %v4333_v55  ;;  %v1905_v55 = vld [vmem:[%s4576_s14 + $0x8] sm:$0xc] }
  0x5f   : > { %v1924_v0 = vunpack.c.l.b16 %v1905_v55 }
  0x61   : > { %v1925_v12 = vpack.c.b16 %v1219_v46, %v1924_v0 }
  0x62   : > { %2031 = vmatpush.bf16.msrb.mxu1 %v4332_v5 }
  0x66   : > { %2032 = vmatpush.bf16.msrb.mxu1 %v4331_v10 }
  0x6a   : > { %2033 = vmatpush.bf16.msrb.mxu1 %v4330_v17 }
  0x6b   : > { %676 = vmatmul.bf16.gmra.mxu2 %v504_v35  ;;  %631 = vmatmul.bf16.gmra.mxu0 %v432_v36  ;;  %v533_v35 = vshll.u32 %v4776_v31, 16  ;;  %v457_v36 = vshrl.u32 %v4750_v8, 16 }
  0x6c   : > { %841 = vmatmul.bf16.gmra.mxu3 %v4264_v6  ;;  %v4310_v6 = vld [vmem:[%s5646_s1 + $0xc0] sm:$0xff] }
  0x6d   : > { %796 = vmatmul.bf16.gmra.mxu1 %v4681_v9  ;;  %1384 = vmatpush.bf16.msrb.mxu3 %v4310_v6  ;;  %v535_v44 = vrot.slane %v533_v35, 1 }
  0x6e   : > { %2034 = vmatpush.bf16.msrb.mxu1 %v4329_v24 }
  0x6f   : > { %v536_v48 = vsel %vm388_vm0, %v531_v43, %v535_v44  ;;  %v4357_v43 = vld [vmem:[%s5646_s1 + $0x1b0] sm:$0xff] }
  0x70   : > { %v4365_v44 = vld [vmem:[%s5646_s1 + $0x1f0] sm:$0xff]  ;;  %2416 = vmatpush.bf16.msra.mxu2 %v4357_v43 }
  0x71   : > { %2808 = vmatpush.bf16.msra.mxu3 %v4366_v32 }
  0x72   : > { %2035 = vmatpush.bf16.msrb.mxu1 %v4328_v29 }
  0x75   : > { %2809 = vmatpush.bf16.msra.mxu3 %v4365_v44 }
  0x76   : > { %2036 = vmatpush.bf16.msrb.mxu1 %v4327_v33 }
  0x7a   : > { %2037 = vmatpush.bf16.msrb.mxu1 %v4326_v39 }
  0x7b   : > { %681 = vmatmul.bf16.gmra.mxu2 %v512_v51  ;;  %636 = vmatmul.bf16.gmra.mxu0 %v440_v52 }
  0x7c   : > { %846 = vmatmul.bf16.gmra.mxu3 %v4265_v22  ;;  %v455_v22 = vrot.slane %v453_v14, 1 }
  0x7d   : > { %801 = vmatmul.bf16.gmra.mxu1 %v4699_v26 }
  0x7e   : > { %v456_v28 = vsel %vm388_vm0, %v451_v21, %v455_v22  ;;  %v459_v47 = vor.u32 %v457_v36, %v455_v22  ;;  %v1927_v22 = vrot.slane %v1925_v12, 2  ;;  %v1552_v36 = vshrl.u32 %v4822_v34, 16 }
  0x80   : > { %v464_v52 = vsel %vm388_vm0, %v459_v47, %v4604_v20  ;;  %v1554_v47 = vrot.slane %v1552_v36, 1 }
  0x8b   : > { %686 = vmatmul.bf16.gmra.mxu2 %v520_v3  ;;  %641 = vmatmul.bf16.gmra.mxu0 %v448_v4  ;;  %v4389_v3 = vor.u32 %v4388_v59, %v4387_v56 }
  0x8c   : > { %851 = vmatmul.bf16.gmra.mxu3 %v4266_v37  ;;  %v1127_v37 = vld [vmem:[%s4576_s14 + $0x8] sm:$0xe] }
  0x8d   : > { %806 = vmatmul.bf16.gmra.mxu1 %v4717_v42  ;;  %v1218_v45 = vunpack.c.l.b16 %v1127_v37  ;;  %v889_v14 = vrot.slane %v4389_v3, 1  ;;  %v1555_v37 = vshll.u32 %v4822_v34, 16 }
  0x8f   : > { %v1255_v49 = vpack.c.b16 %v1219_v46, %v1218_v45 }
  0x91   : > { %v1535_v60 = vshrl.u32 %v1255_v49, 16  ;;  %v1538_v61 = vshll.u32 %v1255_v49, 16  ;;  %v1274_v17 = vrot.slane %v1255_v49, 1 }
  0x93   : > { %v1537_v4 = vrot.slane %v1535_v60, 1  ;;  %v4373_v60 = vld [vmem:[%s5646_s1 + $0x230] sm:$0xff] }
  0x94   : > { %3069 = vmatpush.bf16.msra.mxu0 %v4373_v60 }
  0x9b   : > { %691 = vmatmul.bf16.gmra.mxu2 %v528_v25  ;;  %646 = vmatmul.bf16.gmra.mxu0 %v456_v28  ;;  %v891_v28 = vsel %vm888_vm1, %v889_v14, %v890_v15 }
  0x9c   : > { %856 = vmatmul.bf16.gmra.mxu3 %v4267_v53  ;;  %v4798_v53 = vld [vmem:[%s4576_s14 + $0x10] sm:$0xff] }
  0x9d   : > { %811 = vmatmul.bf16.gmra.mxu1 %v4735_v57  ;;  %v1543_v62 = vshrl.u32 %v4798_v53, 16  ;;  %v1546_v63 = vshll.u32 %v4798_v53, 16  ;;  %v1275_v18 = vrot.slane %v4798_v53, 1  ;;  %v1928_v23 = vrot.slane %v4798_v53, 2 }
  0x9e   : > { %v1930_v53 = vrot.slane %v4822_v34, 2 }
  0x9f   : > { %v1545_v10 = vrot.slane %v1543_v62, 1  ;;  %v1548_v11 = vrot.slane %v1546_v63, 2  ;;  %v1276_v29 = vsel %vm888_vm1, %v1274_v17, %v1275_v18  ;;  %v1929_v33 = vsel %vm1926_vm3, %v1927_v22, %v1928_v23 }
  0xa1   : > { %v1549_v21 = vor.u32 %v1548_v11, %v1545_v10 }
  0xa8   : > { %v612_v50 = vpop.f32.mrf.mxu0 }
  0xaa   : > { %v777_v51 = vpop.f32.mrf.mxu1 }
  0xab   : > { %v4800_v54 = vadd.f32 %v777_v51, %v612_v50  ;;  %696 = vmatmul.bf16.gmra.mxu2 %v536_v48  ;;  %651 = vmatmul.bf16.gmra.mxu0 %v464_v52  ;;  %v1557_v48 = vrot.slane %v1555_v37, 2  ;;  %v892_v50 = vrot.slane %v4634_v40, 1  ;;  %v1277_v51 = vrot.slane %v4822_v34, 1 }
  0xac   : > { %861 = vmatmul.bf16.gmra.mxu3 %v4268_v7  ;;  %v1540_v7 = vrot.slane %v1538_v61, 2 }
  0xad   : > { %816 = vmatmul.bf16.gmra.mxu1 %v4750_v8  ;;  %v1558_v52 = vor.u32 %v1557_v48, %v1554_v47  ;;  %v893_v61 = vsel %vm888_vm1, %v890_v15, %v892_v50  ;;  %v1278_v62 = vsel %vm888_vm1, %v1275_v18, %v1277_v51  ;;  %v894_v18 = vrot.slane %v4663_v58, 1  ;;  %v4871_v58 = vld [vmem:[%s4576_s14 + $0x28] sm:$0xff] }
  0xae   : > { %v657_v20 = vpop.f32.mrf.mxu2  ;;  %v1541_v19 = vor.u32 %v1540_v7, %v1537_v4  ;;  %v1570_v36 = vshrl.u32 %v4871_v58, 16  ;;  %v1573_v37 = vshll.u32 %v4871_v58, 16 }
  0xaf   : > { %v822_v1 = vpop.f32.mrf.mxu3  ;;  %v1559_v40 = vsel %vm1533_vm2, %v1549_v21, %v1558_v52 }
  0xb0   : > { %v4808_v2 = vadd.f32 %v822_v1, %v657_v20  ;;  %v614_v5 = vpop.f32.mrf.mxu0  ;;  %v1550_v32 = vsel %vm1533_vm2, %v1541_v19, %v1549_v21  ;;  %v1931_v20 = vsel %vm1926_vm3, %v1928_v23, %v1930_v53  ;;  %v4851_v1 = vld [vmem:[%s4576_s14 + $0x20] sm:$0xff]  ;;  %v1575_v47 = vrot.slane %v1573_v37, 2 }
  0xb1   : > { %v1561_v4 = vshrl.u32 %v4851_v1, 16  ;;  %v1279_v19 = vrot.slane %v4851_v1, 1  ;;  %v1932_v22 = vrot.slane %v4851_v1, 2 }
  0xb2   : > { %v779_v6 = vpop.f32.mrf.mxu1 }
  0xb3   : > { %v4810_v13 = vadd.f32 %v779_v6, %v614_v5  ;;  %v1564_v5 = vshll.u32 %v4851_v1, 16  ;;  %v1563_v14 = vrot.slane %v1561_v4, 1  ;;  %v4897_v4 = vld [vmem:[%s4576_s14 + $0x30] sm:$0xff] }
  0xb5   : > { %v1566_v15 = vrot.slane %v1564_v5, 2 }
  0xb6   : > { %v659_v24 = vpop.f32.mrf.mxu2 }
  0xb7   : > { %v824_v25 = vpop.f32.mrf.mxu3  ;;  %v1567_v21 = vor.u32 %v1566_v15, %v1563_v14 }
  0xb8   : > { %v4815_v27 = vadd.f32 %v824_v25, %v659_v24  ;;  %v617_v16 = vpop.f32.mrf.mxu0 }
  0xba   : > { %v782_v30 = vpop.f32.mrf.mxu1 }
  0xbb   : > { %v4824_v35 = vadd.f32 %v782_v30, %v617_v16  ;;  %1000 = vmatmul.bf16.vlgmr.msrb.gmra.mxu2 %v891_v28  ;;  %1778 = vmatmul.bf16.vlgmr.msrb.gmra.mxu0 %v1550_v32  ;;  %v895_v28 = vsel %vm888_vm1, %v892_v50, %v894_v18  ;;  %v1568_v32 = vsel %vm1533_vm2, %v1558_v52, %v1567_v21  ;;  %v4356_v50 = vld [vmem:[%s5646_s1 + $0x1a8] sm:$0xff]  ;;  %v896_v52 = vrot.slane %v4681_v9, 1 }
  0xbc   : > { %1385 = vmatmul.bf16.vlgmr.msrb.gmra.mxu3 %v1276_v29  ;;  %v1280_v29 = vsel %vm888_vm1, %v1277_v51, %v1279_v19  ;;  %v4364_v51 = vld [vmem:[%s5646_s1 + $0x1e8] sm:$0xff]  ;;  %2417 = vmatpush.bf16.msra.mxu2 %v4356_v50 }
  0xbd   : > { %2038 = vmatmul.bf16.vlgmr.msrb.gmra.mxu1 %v1929_v33  ;;  %v1933_v33 = vsel %vm1926_vm3, %v1930_v53, %v1932_v22  ;;  %v1281_v53 = vrot.slane %v4871_v58, 1  ;;  %2810 = vmatpush.bf16.msra.mxu3 %v4364_v51 }
  0xbe   : > { %v662_v38 = vpop.f32.mrf.mxu2 }
  0xbf   : > { %v827_v39 = vpop.f32.mrf.mxu3 }
  0xc0   : > { %v4828_v41 = vadd.f32 %v827_v39, %v662_v38  ;;  %v619_v45 = vpop.f32.mrf.mxu0 }
  0xc2   : > { %v784_v46 = vpop.f32.mrf.mxu1 }
  0xc3   : > { %v4836_v49 = vadd.f32 %v784_v46, %v619_v45  ;;  %v1572_v46 = vrot.slane %v1570_v36, 1 }
  0xc6   : > { %v664_v55 = vpop.f32.mrf.mxu2 }
  0xc7   : > { %v829_v56 = vpop.f32.mrf.mxu3 }
  0xc8   : > { %v4841_v59 = vadd.f32 %v829_v56, %v664_v55  ;;  %v622_v63 = vpop.f32.mrf.mxu0  ;;  %v1576_v55 = vor.u32 %v1575_v47, %v1572_v46  ;;  %v1934_v56 = vrot.slane %v4871_v58, 2 }
  0xca   : > { %v787_v0 = vpop.f32.mrf.mxu1  ;;  %v1577_v1 = vsel %vm1533_vm2, %v1567_v21, %v1576_v55  ;;  %v1935_v9 = vsel %vm1926_vm3, %v1932_v22, %v1934_v56 }
  0xcb   : > { %v4853_v3 = vadd.f32 %v787_v0, %v622_v63  ;;  %1005 = vmatmul.bf16.gmra.mxu2 %v893_v61  ;;  %1783 = vmatmul.bf16.gmra.mxu0 %v1559_v40  ;;  %v897_v63 = vsel %vm888_vm1, %v894_v18, %v896_v52  ;;  %v1282_v0 = vsel %vm888_vm1, %v1279_v19, %v1281_v53 }
  0xcc   : > { %1390 = vmatmul.bf16.gmra.mxu3 %v1278_v62 }
  0xcd   : > { %2043 = vmatmul.bf16.gmra.mxu1 %v1931_v20 }
  0xce   : > { %v667_v6 = vpop.f32.mrf.mxu2 }
  0xcf   : > { %v832_v7 = vpop.f32.mrf.mxu3 }
  0xd0   : > { %v4857_v10 = vadd.f32 %v832_v7, %v667_v6  ;;  %v624_v11 = vpop.f32.mrf.mxu0  ;;  %v4372_v6 = vld [vmem:[%s5646_s1 + $0x228] sm:$0xff]  ;;  %v1579_v7 = vshrl.u32 %v4897_v4, 16 }
  0xd1   : > { %3070 = vmatpush.bf16.msra.mxu0 %v4372_v6  ;;  %v4355_v6 = vld [vmem:[%s5646_s1 + $0x1a0] sm:$0xff] }
  0xd2   : > { %v789_v12 = vpop.f32.mrf.mxu1  ;;  %v1581_v21 = vrot.slane %v1579_v7, 1  ;;  %v4363_v7 = vld [vmem:[%s5646_s1 + $0x1e0] sm:$0xff]  ;;  %2418 = vmatpush.bf16.msra.mxu2 %v4355_v6 }
  0xd3   : > { %v4859_v17 = vadd.f32 %v789_v12, %v624_v11  ;;  %v1582_v11 = vshll.u32 %v4897_v4, 16  ;;  %2811 = vmatpush.bf16.msra.mxu3 %v4363_v7 }
  0xd5   : > { %v1584_v22 = vrot.slane %v1582_v11, 2 }
  0xd6   : > { %v669_v23 = vpop.f32.mrf.mxu2 }
  0xd7   : > { %v834_v24 = vpop.f32.mrf.mxu3 }
  0xd8   : > { %v4864_v25 = vadd.f32 %v834_v24, %v669_v23  ;;  %v627_v16 = vpop.f32.mrf.mxu0  ;;  %v898_v24 = vrot.slane %v4699_v26, 1  ;;  %v4920_v26 = vld [vmem:[%s4576_s14 + $0x38] sm:$0xff] }
  0xd9   : > { %v1588_v46 = vshrl.u32 %v4920_v26, 16  ;;  %v1591_v47 = vshll.u32 %v4920_v26, 16 }
  0xda   : > { %v792_v30 = vpop.f32.mrf.mxu1  ;;  %v899_v58 = vsel %vm888_vm1, %v896_v52, %v898_v24 }
  0xdb   : > { %v4873_v34 = vadd.f32 %v792_v30, %v627_v16  ;;  %1010 = vmatmul.bf16.gmra.mxu2 %v895_v28  ;;  %1788 = vmatmul.bf16.gmra.mxu0 %v1568_v32  ;;  %v1283_v28 = vrot.slane %v4897_v4, 1  ;;  %v1936_v16 = vrot.slane %v4897_v4, 2 }
  0xdc   : > { %1395 = vmatmul.bf16.gmra.mxu3 %v1280_v29  ;;  %v1585_v29 = vor.u32 %v1584_v22, %v1581_v21  ;;  %v4946_v21 = vld [vmem:[%s4576_s14 + $0x40] sm:$0xff] }
  0xdd   : > { %2048 = vmatmul.bf16.gmra.mxu1 %v1933_v33  ;;  %v1284_v36 = vsel %vm888_vm1, %v1281_v53, %v1283_v28 }
  0xde   : > { %v672_v38 = vpop.f32.mrf.mxu2 }
  0xdf   : > { %v837_v39 = vpop.f32.mrf.mxu3 }
  0xe0   : > { %v4877_v43 = vadd.f32 %v837_v39, %v672_v38  ;;  %v629_v44 = vpop.f32.mrf.mxu0  ;;  %v1586_v39 = vsel %vm1533_vm2, %v1576_v55, %v1585_v29 }
  0xe2   : > { %v794_v45 = vpop.f32.mrf.mxu1 }
  0xe3   : > { %v4879_v48 = vadd.f32 %v794_v45, %v629_v44  ;;  %v1937_v44 = vsel %vm1926_vm3, %v1934_v56, %v1936_v16  ;;  %v1593_v56 = vrot.slane %v1591_v47, 2  ;;  %v1940_v47 = vrot.slane %v4946_v21, 2 }
  0xe6   : > { %v674_v60 = vpop.f32.mrf.mxu2 }
  0xe7   : > { %v839_v61 = vpop.f32.mrf.mxu3 }
  0xe8   : > { %v4890_v62 = vadd.f32 %v839_v61, %v674_v60  ;;  %v632_v40 = vpop.f32.mrf.mxu0  ;;  %v1590_v60 = vrot.slane %v1588_v46, 1 }
  0xea   : > { %v797_v20 = vpop.f32.mrf.mxu1 }
  0xeb   : > { %v4899_v5 = vadd.f32 %v797_v20, %v632_v40  ;;  %1015 = vmatmul.bf16.gmra.mxu2 %v897_v63  ;;  %1793 = vmatmul.bf16.gmra.mxu0 %v1577_v1  ;;  %v900_v63 = vrot.slane %v4717_v42, 1  ;;  %v1594_v40 = vor.u32 %v1593_v56, %v1590_v60  ;;  %v1938_v20 = vrot.slane %v4920_v26, 2 }
  0xec   : > { %1400 = vmatmul.bf16.gmra.mxu3 %v1282_v0  ;;  %v1285_v0 = vrot.slane %v4920_v26, 1  ;;  %v1287_v26 = vrot.slane %v4946_v21, 1 }
  0xed   : > { %2053 = vmatmul.bf16.gmra.mxu1 %v1935_v9  ;;  %v901_v11 = vsel %vm888_vm1, %v898_v24, %v900_v63  ;;  %v1597_v24 = vshrl.u32 %v4946_v21, 16  ;;  %v1941_v6 = vsel %vm1926_vm3, %v1938_v20, %v1940_v47 }
  0xee   : > { %v677_v12 = vpop.f32.mrf.mxu2  ;;  %v1286_v42 = vsel %vm888_vm1, %v1283_v28, %v1285_v0  ;;  %v1600_v28 = vshll.u32 %v4946_v21, 16  ;;  %v1288_v60 = vsel %vm888_vm1, %v1285_v0, %v1287_v26  ;;  %v904_v21 = vrot.slane %v4750_v8, 1  ;;  %v4989_v8 = vld [vmem:[%s4576_s14 + $0x50] sm:$0xff] }
  0xef   : > { %v842_v14 = vpop.f32.mrf.mxu3 }
  0xf0   : > { %v4906_v15 = vadd.f32 %v842_v14, %v677_v12  ;;  %v634_v18 = vpop.f32.mrf.mxu0 }
  0xf2   : > { %v799_v19 = vpop.f32.mrf.mxu1 }
  0xf3   : > { %v4908_v23 = vadd.f32 %v799_v19, %v634_v18  ;;  %v1595_v18 = vsel %vm1533_vm2, %v1585_v29, %v1594_v40  ;;  %v1939_v19 = vsel %vm1926_vm3, %v1936_v16, %v1938_v20  ;;  %v4371_v29 = vld [vmem:[%s5646_s1 + $0x220] sm:$0xff] }
  0xf4   : > { %3071 = vmatpush.bf16.msra.mxu0 %v4371_v29 }
  0xf6   : > { %v679_v30 = vpop.f32.mrf.mxu2 }
  0xf7   : > { %v844_v32 = vpop.f32.mrf.mxu3 }
  0xf8   : > { %v4913_v33 = vadd.f32 %v844_v32, %v679_v30  ;;  %v637_v37 = vpop.f32.mrf.mxu0 }
  0xfa   : > { %v802_v38 = vpop.f32.mrf.mxu1 }
  0xfb   : > { %v4922_v45 = vadd.f32 %v802_v38, %v637_v37  ;;  %1020 = vmatmul.bf16.gmra.mxu2 %v899_v58  ;;  %1798 = vmatmul.bf16.gmra.mxu0 %v1586_v39  ;;  %v1599_v37 = vrot.slane %v1597_v24, 1  ;;  %v1602_v38 = vrot.slane %v1600_v28, 2 }
  0xfc   : > { %1405 = vmatmul.bf16.gmra.mxu3 %v1284_v36 }
  0xfd   : > { %2058 = vmatmul.bf16.gmra.mxu1 %v1937_v44  ;;  %v902_v44 = vrot.slane %v4735_v57, 1  ;;  %v1603_v46 = vor.u32 %v1602_v38, %v1599_v37  ;;  %v4969_v57 = vld [vmem:[%s4576_s14 + $0x48] sm:$0xff] }
  0xfe   : > { %v682_v50 = vpop.f32.mrf.mxu2  ;;  %v1289_v24 = vrot.slane %v4969_v57, 1 }
  0xff   : > { %v847_v51 = vpop.f32.mrf.mxu3 }
 0x100   : > { %v4926_v52 = vadd.f32 %v847_v51, %v682_v50  ;;  %v639_v53 = vpop.f32.mrf.mxu0  ;;  %v1290_v37 = vsel %vm888_vm1, %v1287_v26, %v1289_v24  ;;  %v1618_v26 = vshll.u32 %v4989_v8, 16 }
 0x102   : > { %v804_v55 = vpop.f32.mrf.mxu1 }
 0x103   : > { %v4928_v61 = vadd.f32 %v804_v55, %v639_v53  ;;  %v903_v55 = vsel %vm888_vm1, %v900_v63, %v902_v44  ;;  %v1609_v63 = vshll.u32 %v4969_v57, 16 }
 0x105   : > { %v1611_v20 = vrot.slane %v1609_v63, 2  ;;  %v1620_v63 = vrot.slane %v1618_v26, 2 }
 0x106   : > { %v684_v1 = vpop.f32.mrf.mxu2 }
 0x107   : > { %v849_v9 = vpop.f32.mrf.mxu3 }
 0x108   : > { %v4933_v4 = vadd.f32 %v849_v9, %v684_v1  ;;  %v642_v12 = vpop.f32.mrf.mxu0  ;;  %v1604_v9 = vsel %vm1533_vm2, %v1594_v40, %v1603_v46 }
 0x10a   : > { %v807_v14 = vpop.f32.mrf.mxu1 }
 0x10b   : > { %v4948_v22 = vadd.f32 %v807_v14, %v642_v12  ;;  %1025 = vmatmul.bf16.gmra.mxu2 %v901_v11  ;;  %1803 = vmatmul.bf16.gmra.mxu0 %v1595_v18  ;;  %v1606_v11 = vshrl.u32 %v4969_v57, 16 }
 0x10c   : > { %1410 = vmatmul.bf16.gmra.mxu3 %v1286_v42 }
 0x10d   : > { %2063 = vmatmul.bf16.gmra.mxu1 %v1939_v19  ;;  %v1608_v18 = vrot.slane %v1606_v11, 1 }
 0x10e   : > { %v687_v30 = vpop.f32.mrf.mxu2 }
 0x10f   : > { %v852_v32 = vpop.f32.mrf.mxu3  ;;  %v1612_v28 = vor.u32 %v1611_v20, %v1608_v18  ;;  %v1291_v18 = vrot.slane %v4989_v8, 1 }
 0x110   : > { %v4952_v58 = vadd.f32 %v852_v32, %v687_v30  ;;  %v644_v16 = vpop.f32.mrf.mxu0  ;;  %v1942_v30 = vrot.slane %v4969_v57, 2 }
 0x112   : > { %v809_v36 = vpop.f32.mrf.mxu1 }
 0x113   : > { %v4957_v39 = vadd.f32 %v809_v36, %v644_v16  ;;  %v905_v36 = vsel %vm888_vm1, %v902_v44, %v904_v21  ;;  %v1615_v44 = vshrl.u32 %v4989_v8, 16 }
 0x115   : > { %v1617_v11 = vrot.slane %v1615_v44, 1 }
 0x116   : > { %v689_v50 = vpop.f32.mrf.mxu2 }
 0x117   : > { %v854_v51 = vpop.f32.mrf.mxu3  ;;  %v1621_v20 = vor.u32 %v1620_v63, %v1617_v11 }
 0x118   : > { %v4962_v53 = vadd.f32 %v854_v51, %v689_v50  ;;  %v647_v56 = vpop.f32.mrf.mxu0  ;;  %v1613_v51 = vsel %vm1533_vm2, %v1603_v46, %v1612_v28  ;;  %v4362_v46 = vld [vmem:[%s5646_s1 + $0x1d8] sm:$0xff] }
 0x119   : > { %2812 = vmatpush.bf16.msra.mxu3 %v4362_v46 }
 0x11a   : > { %v812_v1 = vpop.f32.mrf.mxu1 }
 0x11b   : > { %v4971_v7 = vadd.f32 %v812_v1, %v647_v56  ;;  %1030 = vmatmul.bf16.gmra.mxu2 %v903_v55  ;;  %1808 = vmatmul.bf16.gmra.mxu0 %v1604_v9  ;;  %v1943_v55 = vsel %vm1926_vm3, %v1940_v47, %v1942_v30  ;;  %v4354_v56 = vld [vmem:[%s5646_s1 + $0x198] sm:$0xff] }
 0x11c   : > { %1415 = vmatmul.bf16.gmra.mxu3 %v1288_v60  ;;  %2419 = vmatpush.bf16.msra.mxu2 %v4354_v56  ;;  %v1622_v56 = vsel %vm1533_vm2, %v1612_v28, %v1621_v20 }
 0x11d   : > { %2068 = vmatmul.bf16.gmra.mxu1 %v1941_v6 }
 0x11e   : > { %v692_v42 = vpop.f32.mrf.mxu2 }
 0x11f   : > { %v857_v0 = vpop.f32.mrf.mxu3 }
 0x120   : > { %v4975_v12 = vadd.f32 %v857_v0, %v692_v42  ;;  %v649_v14 = vpop.f32.mrf.mxu0  ;;  %v4382_v42 = vld [vmem:[%s5648_s3 + $0x38] sm:$0xff] }
 0x121   : > { %3365 = vmatpush.bf16.msra.mxu1 %v4382_v42  ;;  %v4491_v42 = vld [vmem:[%s4576_s14 + $0x50] sm:$0xff] }
 0x122   : > { %v814_v40 = vpop.f32.mrf.mxu1 }
 0x123   : > { %v4977_v19 = vadd.f32 %v814_v40, %v649_v14  ;;  %v4490_v14 = vld [vmem:[%s4576_s14 + $0x48] sm:$0xff] }
 0x124   : > { %v906_v40 = vrot.slane %v4490_v14, 1  ;;  %v908_v14 = vrot.slane %v4491_v42, 1 }
 0x126   : > { %v694_v32 = vpop.f32.mrf.mxu2 }
 0x127   : > { %v859_v29 = vpop.f32.mrf.mxu3 }
 0x128   : > { %v4982_v16 = vadd.f32 %v859_v29, %v694_v32  ;;  %v652_v38 = vpop.f32.mrf.mxu0  ;;  %v1944_v32 = vrot.slane %v4989_v8, 2  ;;  %v4370_v29 = vld [vmem:[%s5646_s1 + $0x218] sm:$0xff] }
 0x129   : > { %3072 = vmatpush.bf16.msra.mxu0 %v4370_v29  ;;  %v5021_v8 = vld [vmem:[%s4576_s14 + $0x58] sm:$0xff] }
 0x12a   : > { %v817_v50 = vpop.f32.mrf.mxu1  ;;  %v1945_v26 = vsel %vm1926_vm3, %v1942_v30, %v1944_v32  ;;  %v1624_v46 = vshrl.u32 %v5021_v8, 16  ;;  %v1293_v29 = vrot.slane %v5021_v8, 1 }
 0x12b   : > { %v4991_v60 = vadd.f32 %v817_v50, %v652_v38  ;;  %1035 = vmatmul.bf16.gmra.mxu2 %v905_v36  ;;  %1813 = vmatmul.bf16.gmra.mxu0 %v1613_v51  ;;  %v907_v50 = vsel %vm888_vm1, %v904_v21, %v906_v40  ;;  %v1292_v51 = vsel %vm888_vm1, %v1289_v24, %v1291_v18 }
 0x12c   : > { %1420 = vmatmul.bf16.gmra.mxu3 %v1290_v37  ;;  %v1626_v11 = vrot.slane %v1624_v46, 1  ;;  %v1294_v46 = vsel %vm888_vm1, %v1291_v18, %v1293_v29 }
 0x12d   : > { %2073 = vmatmul.bf16.gmra.mxu1 %v1943_v55 }
 0x12e   : > { %v697_v47 = vpop.f32.mrf.mxu2 }
 0x12f   : > { %v862_v1 = vpop.f32.mrf.mxu3 }
 0x130   : > { %v5001_v9 = vadd.f32 %v862_v1, %v697_v47  ;;  %v654_v6 = vpop.f32.mrf.mxu0  ;;  %v1627_v47 = vshll.u32 %v5021_v8, 16 }
 0x132   : > { %v819_v57 = vpop.f32.mrf.mxu1  ;;  %v1629_v30 = vrot.slane %v1627_v47, 2 }
 0x133   : > { %v5006_v0 = vadd.f32 %v819_v57, %v654_v6 }
 0x136   : > { %v699_v36 = vpop.f32.mrf.mxu2 }
 0x137   : > { %v864_v37 = vpop.f32.mrf.mxu3 }
 0x138   : > { %v5014_v38 = vadd.f32 %v864_v37, %v699_v36  ;;  %v1779_v55 = vpop.f32.mrf.mxu0  ;;  %v1630_v37 = vor.u32 %v1629_v30, %v1626_v11 }
 0x13a   : > { %v2039_v44 = vpop.f32.mrf.mxu1 }
 0x13b   : > { %1040 = vmatmul.bf16.gmra.mxu2 %v907_v50  ;;  %1818 = vmatmul.bf16.gmra.mxu0 %v1622_v56  ;;  %v1946_v50 = vrot.slane %v5021_v8, 2 }
 0x13c   : > { %1425 = vmatmul.bf16.gmra.mxu3 %v1292_v51 }
 0x13d   : > { %2078 = vmatmul.bf16.gmra.mxu1 %v1945_v26  ;;  %v909_v26 = vsel %vm888_vm1, %v906_v40, %v908_v14 }
 0x13e   : > { %v1001_v21 = vpop.f32.mrf.mxu2 }
 0x13f   : > { %v1386_v1 = vpop.f32.mrf.mxu3  ;;  %v1091_v24 = vadd.f32 %v1001_v21, %v4800_v54  ;;  %v1631_v21 = vsel %vm1533_vm2, %v1621_v20, %v1630_v37 }
 0x140   : > { %v1781_v28 = vpop.f32.mrf.mxu0 }
 0x141   : > { %v1476_v6 = vadd.f32 %v1386_v1, %v1091_v24  ;;  %v1947_v24 = vsel %vm1926_vm3, %v1944_v32, %v1946_v50 }
 0x142   : > { %v2041_v57 = vpop.f32.mrf.mxu1 }
 0x143   : > { %v1869_v63 = vadd.f32 %v1779_v55, %v1476_v6 }
 0x145   : > { %v5028_v36 = vadd.f32 %v2039_v44, %v1869_v63  ;;  %v5037_v44 = vld [vmem:[%s4576_s14 + $0x60] sm:$0xff] }
 0x146   : > { %v1003_v51 = vpop.f32.mrf.mxu2  ;;  %v1636_v40 = vshll.u32 %v5037_v44, 16 }
 0x147   : > { %v1388_v56 = vpop.f32.mrf.mxu3  ;;  %v1092_v54 = vadd.f32 %v1003_v51, %v4810_v13  ;;  %v1633_v13 = vshrl.u32 %v5037_v44, 16 }
 0x148   : > { %v1784_v55 = vpop.f32.mrf.mxu0  ;;  %v1638_v51 = vrot.slane %v1636_v40, 2 }
 0x149   : > { %v1477_v47 = vadd.f32 %v1388_v56, %v1092_v54  ;;  %v1635_v42 = vrot.slane %v1633_v13, 1  ;;  %v4492_v54 = vld [vmem:[%s4576_s14 + $0x58] sm:$0xff] }
 0x14a   : > { %v2044_v1 = vpop.f32.mrf.mxu1 }
 0x14b   : > { %1045 = vmatmul.bf16.gmra.mxu2 %v909_v26  ;;  %v1870_v8 = vadd.f32 %v1781_v28, %v1477_v47  ;;  %1823 = vmatmul.bf16.gmra.mxu0 %v1631_v21  ;;  %v4353_v28 = vld [vmem:[%s5646_s1 + $0x190] sm:$0xff]  ;;  %v910_v26 = vrot.slane %v4492_v54, 1  ;;  %v1639_v47 = vor.u32 %v1638_v51, %v1635_v42  ;;  %v1948_v21 = vrot.slane %v5037_v44, 2 }
 0x14c   : > { %1430 = vmatmul.bf16.gmra.mxu3 %v1294_v46  ;;  %2420 = vmatpush.bf16.msra.mxu2 %v4353_v28 }
 0x14d   : > { %2083 = vmatmul.bf16.gmra.mxu1 %v1947_v24  ;;  %v5039_v6 = vadd.f32 %v2041_v57, %v1870_v8  ;;  %v4361_v57 = vld [vmem:[%s5646_s1 + $0x1d0] sm:$0xff]  ;;  %v911_v40 = vsel %vm888_vm1, %v908_v14, %v910_v26  ;;  %v1949_v28 = vsel %vm1926_vm3, %v1946_v50, %v1948_v21 }
 0x14e   : > { %v1006_v18 = vpop.f32.mrf.mxu2  ;;  %2813 = vmatpush.bf16.msra.mxu3 %v4361_v57 }
 0x14f   : > { %v1391_v11 = vpop.f32.mrf.mxu3  ;;  %v1093_v20 = vadd.f32 %v1006_v18, %v4824_v35  ;;  %v1295_v35 = vrot.slane %v5037_v44, 1  ;;  %v4381_v44 = vld [vmem:[%s5648_s3 + $0x30] sm:$0xff] }
 0x150   : > { %v1786_v32 = vpop.f32.mrf.mxu0  ;;  %3366 = vmatpush.bf16.msra.mxu1 %v4381_v44 }
 0x151   : > { %v1478_v30 = vadd.f32 %v1391_v11, %v1093_v20  ;;  %v1640_v20 = vsel %vm1533_vm2, %v1630_v37, %v1639_v47 }
 0x152   : > { %v2046_v63 = vpop.f32.mrf.mxu1 }
 0x153   : > { %v1871_v56 = vadd.f32 %v1784_v55, %v1478_v30  ;;  %v1296_v55 = vsel %vm888_vm1, %v1293_v29, %v1295_v35 }
 0x155   : > { %v5052_v46 = vadd.f32 %v2044_v1, %v1871_v56  ;;  %v5061_v1 = vld [vmem:[%s4576_s14 + $0x68] sm:$0xff] }
 0x156   : > { %v1008_v24 = vpop.f32.mrf.mxu2  ;;  %v1642_v37 = vshrl.u32 %v5061_v1, 16  ;;  %v1645_v50 = vshll.u32 %v5061_v1, 16 }
 0x157   : > { %v1393_v8 = vpop.f32.mrf.mxu3  ;;  %v1094_v13 = vadd.f32 %v1008_v24, %v4836_v49  ;;  %v4369_v49 = vld [vmem:[%s5646_s1 + $0x210] sm:$0xff] }
 0x158   : > { %v1789_v11 = vpop.f32.mrf.mxu0  ;;  %3073 = vmatpush.bf16.msra.mxu0 %v4369_v49 }
 0x159   : > { %v1479_v18 = vadd.f32 %v1393_v8, %v1094_v13  ;;  %v1644_v8 = vrot.slane %v1642_v37, 1 }
 0x15a   : > { %v2049_v30 = vpop.f32.mrf.mxu1 }
 0x15b   : > { %1050 = vmatmul.bf16.gmra.mxu2 %v911_v40  ;;  %v1872_v14 = vadd.f32 %v1786_v32, %v1479_v18  ;;  %1828 = vmatmul.bf16.gmra.mxu0 %v1640_v20  ;;  %v1647_v32 = vrot.slane %v1645_v50, 2  ;;  %v4493_v40 = vld [vmem:[%s4576_s14 + $0x60] sm:$0xff] }
 0x15c   : > { %1435 = vmatmul.bf16.gmra.mxu3 %v1296_v55  ;;  %v1297_v55 = vrot.slane %v5061_v1, 1 }
 0x15d   : > { %2088 = vmatmul.bf16.gmra.mxu1 %v1949_v28  ;;  %v5069_v29 = vadd.f32 %v2046_v63, %v1872_v14  ;;  %v912_v63 = vrot.slane %v4493_v40, 1  ;;  %v1648_v20 = vor.u32 %v1647_v32, %v1644_v8  ;;  %v1950_v28 = vrot.slane %v5061_v1, 2 }
 0x15e   : > { %v1011_v42 = vpop.f32.mrf.mxu2  ;;  %v1298_v37 = vsel %vm888_vm1, %v1295_v35, %v1297_v55 }
 0x15f   : > { %v1396_v51 = vpop.f32.mrf.mxu3  ;;  %v1095_v57 = vadd.f32 %v1011_v42, %v4853_v3  ;;  %v913_v14 = vsel %vm888_vm1, %v910_v26, %v912_v63  ;;  %v1649_v42 = vsel %vm1533_vm2, %v1639_v47, %v1648_v20 }
 0x160   : > { %v1791_v54 = vpop.f32.mrf.mxu0 }
 0x161   : > { %v1480_v56 = vadd.f32 %v1396_v51, %v1095_v57  ;;  %v1951_v57 = vsel %vm1926_vm3, %v1948_v21, %v1950_v28 }
 0x162   : > { %v2051_v24 = vpop.f32.mrf.mxu1 }
 0x163   : > { %v1873_v13 = vadd.f32 %v1789_v11, %v1480_v56 }
 0x165   : > { %v5076_v18 = vadd.f32 %v2049_v30, %v1873_v13  ;;  %v5085_v30 = vld [vmem:[%s4576_s14 + $0x70] sm:$0xff] }
 0x166   : > { %v1013_v44 = vpop.f32.mrf.mxu2  ;;  %v1651_v26 = vshrl.u32 %v5085_v30, 16  ;;  %v1654_v35 = vshll.u32 %v5085_v30, 16 }
 0x167   : > { %v1398_v49 = vpop.f32.mrf.mxu3  ;;  %v1096_v3 = vadd.f32 %v1013_v44, %v4859_v17 }
 0x168   : > { %v1794_v11 = vpop.f32.mrf.mxu0  ;;  %v1653_v40 = vrot.slane %v1651_v26, 1  ;;  %v1656_v44 = vrot.slane %v1654_v35, 2 }
 0x169   : > { %v1481_v50 = vadd.f32 %v1398_v49, %v1096_v3 }
 0x16a   : > { %v2054_v51 = vpop.f32.mrf.mxu1 }
 0x16b   : > { %1055 = vmatmul.bf16.gmra.mxu2 %v913_v14  ;;  %v1874_v1 = vadd.f32 %v1791_v54, %v1481_v50  ;;  %1833 = vmatmul.bf16.gmra.mxu0 %v1649_v42  ;;  %v4352_v54 = vld [vmem:[%s5646_s1 + $0x188] sm:$0xff]  ;;  %v1299_v14 = vrot.slane %v5085_v30, 1  ;;  %v1657_v50 = vor.u32 %v1656_v44, %v1653_v40 }
 0x16c   : > { %1440 = vmatmul.bf16.gmra.mxu3 %v1298_v37  ;;  %2421 = vmatpush.bf16.msra.mxu2 %v4352_v54  ;;  %v4360_v42 = vld [vmem:[%s5646_s1 + $0x1c8] sm:$0xff] }
 0x16d   : > { %2093 = vmatmul.bf16.gmra.mxu1 %v1951_v57  ;;  %v5087_v17 = vadd.f32 %v2051_v24, %v1874_v1  ;;  %v4494_v24 = vld [vmem:[%s4576_s14 + $0x68] sm:$0xff]  ;;  %2814 = vmatpush.bf16.msra.mxu3 %v4360_v42  ;;  %v1300_v35 = vsel %vm888_vm1, %v1297_v55, %v1299_v14 }
 0x16e   : > { %v1016_v56 = vpop.f32.mrf.mxu2  ;;  %v914_v3 = vrot.slane %v4494_v24, 1 }
 0x16f   : > { %v1401_v8 = vpop.f32.mrf.mxu3  ;;  %v1097_v47 = vadd.f32 %v1016_v56, %v4873_v34  ;;  %v1952_v34 = vrot.slane %v5085_v30, 2 }
 0x170   : > { %v1796_v21 = vpop.f32.mrf.mxu0 }
 0x171   : > { %v1482_v32 = vadd.f32 %v1401_v8, %v1097_v47  ;;  %v1953_v30 = vsel %vm1926_vm3, %v1950_v28, %v1952_v34  ;;  %v4368_v28 = vld [vmem:[%s5646_s1 + $0x208] sm:$0xff] }
 0x172   : > { %v2056_v13 = vpop.f32.mrf.mxu1  ;;  %3074 = vmatpush.bf16.msra.mxu0 %v4368_v28 }
 0x173   : > { %v1875_v49 = vadd.f32 %v1794_v11, %v1482_v32  ;;  %v915_v11 = vsel %vm888_vm1, %v912_v63, %v914_v3  ;;  %v5109_v32 = vld [vmem:[%s4576_s14 + $0x78] sm:$0xff] }
 0x174   : > { %v1660_v55 = vshrl.u32 %v5109_v32, 16 }
 0x175   : > { %v5097_v37 = vadd.f32 %v2054_v51, %v1875_v49  ;;  %v1658_v51 = vsel %vm1533_vm2, %v1648_v20, %v1657_v50  ;;  %v1663_v20 = vshll.u32 %v5109_v32, 16 }
 0x176   : > { %v1018_v57 = vpop.f32.mrf.mxu2 }
 0x177   : > { %v1403_v1 = vpop.f32.mrf.mxu3  ;;  %v1098_v26 = vadd.f32 %v1018_v57, %v4879_v48  ;;  %v4380_v48 = vld [vmem:[%s5648_s3 + $0x28] sm:$0xff]  ;;  %v1662_v57 = vrot.slane %v1660_v55, 1 }
 0x178   : > { %v1799_v8 = vpop.f32.mrf.mxu0  ;;  %3367 = vmatpush.bf16.msra.mxu1 %v4380_v48 }
 0x179   : > { %v1483_v56 = vadd.f32 %v1403_v1, %v1098_v26  ;;  %v4495_v26 = vld [vmem:[%s4576_s14 + $0x70] sm:$0xff] }
 0x17a   : > { %v2059_v47 = vpop.f32.mrf.mxu1 }
 0x17b   : > { %1060 = vmatmul.bf16.gmra.mxu2 %v915_v11  ;;  %v1876_v40 = vadd.f32 %v1796_v21, %v1483_v56  ;;  %1838 = vmatmul.bf16.gmra.mxu0 %v1658_v51  ;;  %v916_v11 = vrot.slane %v4495_v26, 1 }
 0x17c   : > { %1445 = vmatmul.bf16.gmra.mxu3 %v1300_v35  ;;  %v1301_v35 = vrot.slane %v5109_v32, 1 }
 0x17d   : > { %2098 = vmatmul.bf16.gmra.mxu1 %v1953_v30  ;;  %v5114_v63 = vadd.f32 %v2056_v13, %v1876_v40  ;;  %v1665_v13 = vrot.slane %v1663_v20, 2  ;;  %v1954_v30 = vrot.slane %v5109_v32, 2  ;;  %v917_v28 = vsel %vm888_vm1, %v914_v3, %v916_v11 }
 0x17e   : > { %v1021_v44 = vpop.f32.mrf.mxu2  ;;  %v1302_v55 = vsel %vm888_vm1, %v1299_v14, %v1301_v35 }
 0x17f   : > { %v1406_v21 = vpop.f32.mrf.mxu3  ;;  %v1099_v54 = vadd.f32 %v1021_v44, %v4899_v5  ;;  %v1666_v51 = vor.u32 %v1665_v13, %v1662_v57 }
 0x180   : > { %v1801_v24 = vpop.f32.mrf.mxu0 }
 0x181   : > { %v1484_v49 = vadd.f32 %v1406_v21, %v1099_v54  ;;  %v1667_v44 = vsel %vm1533_vm2, %v1657_v50, %v1666_v51  ;;  %v1955_v54 = vsel %vm1926_vm3, %v1952_v34, %v1954_v30 }
 0x182   : > { %v2061_v42 = vpop.f32.mrf.mxu1 }
 0x183   : > { %v1877_v1 = vadd.f32 %v1799_v8, %v1484_v49 }
 0x185   : > { %v5124_v56 = vadd.f32 %v2059_v47, %v1877_v1  ;;  %v5133_v47 = vld [vmem:[%s4576_s14 + $0x80] sm:$0xff] }
 0x186   : > { %v1023_v40 = vpop.f32.mrf.mxu2  ;;  %v1669_v3 = vshrl.u32 %v5133_v47, 16  ;;  %v1672_v14 = vshll.u32 %v5133_v47, 16 }
 0x187   : > { %v1408_v48 = vpop.f32.mrf.mxu3  ;;  %v1100_v5 = vadd.f32 %v1023_v40, %v4908_v23 }
 0x188   : > { %v1804_v8 = vpop.f32.mrf.mxu0  ;;  %v1671_v26 = vrot.slane %v1669_v3, 1  ;;  %v1674_v40 = vrot.slane %v1672_v14, 2 }
 0x189   : > { %v1485_v20 = vadd.f32 %v1408_v48, %v1100_v5  ;;  %v4496_v5 = vld [vmem:[%s4576_s14 + $0x78] sm:$0xff] }
 0x18a   : > { %v2064_v21 = vpop.f32.mrf.mxu1 }
 0x18b   : > { %1065 = vmatmul.bf16.gmra.mxu2 %v917_v28  ;;  %v1878_v32 = vadd.f32 %v1801_v24, %v1485_v20  ;;  %1843 = vmatmul.bf16.gmra.mxu0 %v1667_v44  ;;  %v918_v24 = vrot.slane %v4496_v5, 1  ;;  %v1956_v20 = vrot.slane %v5133_v47, 2 }
 0x18c   : > { %1450 = vmatmul.bf16.gmra.mxu3 %v1302_v55  ;;  %v1675_v55 = vor.u32 %v1674_v40, %v1671_v26 }
 0x18d   : > { %2103 = vmatmul.bf16.gmra.mxu1 %v1955_v54  ;;  %v5135_v23 = vadd.f32 %v2061_v42, %v1878_v32  ;;  %v1303_v42 = vrot.slane %v5133_v47, 1  ;;  %v919_v32 = vsel %vm888_vm1, %v916_v11, %v918_v24  ;;  %v4351_v47 = vld [vmem:[%s5646_s1 + $0x180] sm:$0xff] }
 0x18e   : > { %v1026_v49 = vpop.f32.mrf.mxu2  ;;  %2422 = vmatpush.bf16.msra.mxu2 %v4351_v47 }
 0x18f   : > { %v1411_v57 = vpop.f32.mrf.mxu3  ;;  %v1101_v50 = vadd.f32 %v1026_v49, %v4922_v45  ;;  %v1304_v3 = vsel %vm888_vm1, %v1301_v35, %v1303_v42  ;;  %v1676_v49 = vsel %vm1533_vm2, %v1666_v51, %v1675_v55 }
 0x190   : > { %v1806_v34 = vpop.f32.mrf.mxu0 }
 0x191   : > { %v1486_v13 = vadd.f32 %v1411_v57, %v1101_v50  ;;  %v1957_v50 = vsel %vm1926_vm3, %v1954_v30, %v1956_v20 }
 0x192   : > { %v2066_v1 = vpop.f32.mrf.mxu1 }
 0x193   : > { %v1879_v48 = vadd.f32 %v1804_v8, %v1486_v13 }
 0x195   : > { %v5142_v28 = vadd.f32 %v2064_v21, %v1879_v48  ;;  %v5151_v21 = vld [vmem:[%s4576_s14 + $0x88] sm:$0xff] }
 0x196   : > { %v1028_v44 = vpop.f32.mrf.mxu2  ;;  %v1678_v51 = vshrl.u32 %v5151_v21, 16  ;;  %v1681_v30 = vshll.u32 %v5151_v21, 16  ;;  %v1958_v47 = vrot.slane %v5151_v21, 2 }
 0x197   : > { %v1413_v54 = vpop.f32.mrf.mxu3  ;;  %v1102_v45 = vadd.f32 %v1028_v44, %v4928_v61  ;;  %v4359_v61 = vld [vmem:[%s5646_s1 + $0x1c0] sm:$0xff] }
 0x198   : > { %v1809_v8 = vpop.f32.mrf.mxu0  ;;  %2815 = vmatpush.bf16.msra.mxu3 %v4359_v61 }
 0x199   : > { %v1487_v14 = vadd.f32 %v1413_v54, %v1102_v45  ;;  %v1683_v54 = vrot.slane %v1681_v30, 2  ;;  %v4367_v45 = vld [vmem:[%s5646_s1 + $0x200] sm:$0xff] }
 0x19a   : > { %v2069_v57 = vpop.f32.mrf.mxu1  ;;  %3075 = vmatpush.bf16.msra.mxu0 %v4367_v45 }
 0x19b   : > { %1070 = vmatmul.bf16.gmra.mxu2 %v919_v32  ;;  %v1880_v11 = vadd.f32 %v1806_v34, %v1487_v14  ;;  %1848 = vmatmul.bf16.gmra.mxu0 %v1676_v49  ;;  %v1680_v34 = vrot.slane %v1678_v51, 1  ;;  %v1305_v14 = vrot.slane %v5151_v21, 1 }
 0x19c   : > { %1455 = vmatmul.bf16.gmra.mxu3 %v1304_v3  ;;  %v4497_v3 = vld [vmem:[%s4576_s14 + $0x80] sm:$0xff] }
 0x19d   : > { %2108 = vmatmul.bf16.gmra.mxu1 %v1957_v50  ;;  %v5159_v35 = vadd.f32 %v2066_v1, %v1880_v11  ;;  %v4379_v1 = vld [vmem:[%s5648_s3 + $0x20] sm:$0xff]  ;;  %v1684_v50 = vor.u32 %v1683_v54, %v1680_v34 }
 0x19e   : > { %v1031_v13 = vpop.f32.mrf.mxu2  ;;  %3368 = vmatpush.bf16.msra.mxu1 %v4379_v1  ;;  %v1959_v1 = vsel %vm1926_vm3, %v1956_v20, %v1958_v47 }
 0x19f   : > { %v1416_v26 = vpop.f32.mrf.mxu3  ;;  %v1103_v40 = vadd.f32 %v1031_v13, %v4948_v22  ;;  %v920_v22 = vrot.slane %v4497_v3, 1 }
 0x1a0   : > { %v1811_v5 = vpop.f32.mrf.mxu0 }
 0x1a1   : > { %v1488_v48 = vadd.f32 %v1416_v26, %v1103_v40  ;;  %v921_v30 = vsel %vm888_vm1, %v918_v24, %v920_v22  ;;  %v1685_v40 = vsel %vm1533_vm2, %v1675_v55, %v1684_v50 }
 0x1a2   : > { %v5164_v44 = vpop.f32.mrf.mxu1 }
 0x1a3   : > { %v1881_v32 = vadd.f32 %v1809_v8, %v1488_v48  ;;  %v1306_v8 = vsel %vm888_vm1, %v1303_v42, %v1305_v14 }
 0x1a5   : > { %v5174_v49 = vadd.f32 %v2069_v57, %v1881_v32  ;;  %v5183_v57 = vld [vmem:[%s4576_s14 + $0x90] sm:$0xff] }
 0x1a6   : > { %v1033_v61 = vpop.f32.mrf.mxu2  ;;  %v1690_v24 = vshll.u32 %v5183_v57, 16 }
 0x1a7   : > { %v1418_v11 = vpop.f32.mrf.mxu3  ;;  %v1104_v51 = vadd.f32 %v1033_v61, %v4957_v39  ;;  %v1687_v39 = vshrl.u32 %v5183_v57, 16  ;;  %v1512_v61 = vld [vmem:[%s4576_s14 + $0x98] sm:$0x3] }
 0x1a8   : > { %v1814_v26 = vpop.f32.mrf.mxu0  ;;  %v1692_v3 = vrot.slane %v1690_v24, 2 }
 0x1a9   : > { %v1489_v13 = vadd.f32 %v1418_v11, %v1104_v51  ;;  %v1689_v32 = vrot.slane %v1687_v39, 1 }
 0x1aa   : > { %v2074_v48 = vpop.f32.mrf.mxu1 }
 0x1ab   : > { %1075 = vmatmul.bf16.gmra.mxu2 %v921_v30  ;;  %v5185_v21 = vadd.f32 %v1811_v5, %v1489_v13  ;;  %1853 = vmatmul.bf16.gmra.mxu0 %v1685_v40  ;;  %v4498_v5 = vld [vmem:[%s4576_s14 + $0x88] sm:$0xff]  ;;  %v1307_v30 = vrot.slane %v5183_v57, 1  ;;  %v1693_v40 = vor.u32 %v1692_v3, %v1689_v32 }
 0x1ac   : > { %1460 = vmatmul.bf16.gmra.mxu3 %v1306_v8  ;;  %v922_v51 = vrot.slane %v4498_v5, 1  ;;  %v1531_v8 = vunpack.c.l.b16 %v1512_v61  ;;  %v1163_v61 = vld [vmem:[%s4576_s14 + $0x98] sm:$0x1] }
 0x1ad   : > { %2113 = vmatmul.bf16.gmra.mxu1 %v1959_v1  ;;  %v1960_v1 = vrot.slane %v5183_v57, 2  ;;  %v1308_v24 = vsel %vm888_vm1, %v1305_v14, %v1307_v30  ;;  %v1694_v5 = vsel %vm1533_vm2, %v1684_v50, %v1693_v40 }
 0x1ae   : > { %v1036_v42 = vpop.f32.mrf.mxu2  ;;  %v923_v39 = vsel %vm888_vm1, %v920_v22, %v922_v51 }
 0x1af   : > { %v1421_v34 = vpop.f32.mrf.mxu3  ;;  %v1105_v55 = vadd.f32 %v1036_v42, %v4971_v7 }
 0x1b0   : > { %v1816_v20 = vpop.f32.mrf.mxu0 }
 0x1b1   : > { %v1490_v54 = vadd.f32 %v1421_v34, %v1105_v55 }
 0x1b2   : > { %v5190_v45 = vpop.f32.mrf.mxu1 }
 0x1b3   : > { %5651 = vst [vmem:[#allocation2_spill] sm:$0xff] %v5190_v45  ;;  %v1883_v11 = vadd.f32 %v1814_v26, %v1490_v54  ;;  %v1532_v26 = vpack.c.b16 %v1531_v8, %v1531_v8 }
 0x1b5   : > { %v5195_v13 = vadd.f32 %v2074_v48, %v1883_v11  ;;  %v1961_v48 = vsel %vm1926_vm3, %v1958_v47, %v1960_v1  ;;  %v1696_v22 = vshrl.u32 %v1532_v26, 16  ;;  %v1699_v14 = vshll.u32 %v1532_v26, 16 }
 0x1b6   : > { %v1038_v7 = vpop.f32.mrf.mxu2 }
 0x1b7   : > { %v1423_v42 = vpop.f32.mrf.mxu3  ;;  %v1106_v34 = vadd.f32 %v1038_v7, %v4977_v19  ;;  %v1254_v19 = vunpack.c.l.b16 %v1163_v61  ;;  %v1698_v8 = vrot.slane %v1696_v22, 1 }
 0x1b8   : > { %v1819_v54 = vpop.f32.mrf.mxu0 }
 0x1b9   : > { %v1491_v55 = vadd.f32 %v1423_v42, %v1106_v34  ;;  %v1273_v50 = vpack.c.b16 %v1254_v19, %v1254_v19  ;;  %v1701_v34 = vrot.slane %v1699_v14, 2 }
 0x1ba   : > { %v2079_v45 = vpop.f32.mrf.mxu1 }
 0x1bb   : > { %1080 = vmatmul.bf16.gmra.mxu2 %v923_v39  ;;  %v5204_v57 = vadd.f32 %v1816_v20, %v1491_v55  ;;  %1858 = vmatmul.bf16.gmra.mxu0 %v1694_v5  ;;  %v2165_v39 = vld [vmem:[%s4576_s14 + $0x10] sm:$0xc]  ;;  %v2166_v20 = vld [vmem:[%s4576_s14 + $0x14] sm:$0xf]  ;;  %v924_v5 = vrot.slane %v4776_v31, 1  ;;  %v1702_v22 = vor.u32 %v1701_v34, %v1698_v8 }
 0x1bc   : > { %1465 = vmatmul.bf16.gmra.mxu3 %v1308_v24  ;;  %v4378_v24 = vld [vmem:[%s5648_s3 + $0x18] sm:$0xff]  ;;  %v2257_v61 = vunpack.c.l.b16 %v2166_v20  ;;  %v2943_v8 = vld [vmem:[%s4576_s14 + $0x10] sm:$0x8] }
 0x1bd   : > { %5652 = vst [vmem:[#allocation3_spill] sm:$0xff] %v5204_v57  ;;  %2118 = vmatmul.bf16.gmra.mxu1 %v1961_v48  ;;  %v1309_v48 = vrot.slane %v1273_v50, 1 }
 0x1be   : > { %v1041_v32 = vpop.f32.mrf.mxu2  ;;  %3369 = vmatpush.bf16.msra.mxu1 %v4378_v24  ;;  %v2962_v24 = vunpack.c.l.b16 %v2943_v8 }
 0x1bf   : > { %v1426_v3 = vpop.f32.mrf.mxu3  ;;  %v1107_v11 = vadd.f32 %v1041_v32, %v4991_v60  ;;  %v2256_v60 = vunpack.c.l.b16 %v2165_v39  ;;  %v1962_v32 = vrot.slane %v1532_v26, 2  ;;  %v1310_v57 = vsel %vm888_vm1, %v1307_v30, %v1309_v48 }
 0x1c0   : > { %v1821_v47 = vpop.f32.mrf.mxu0  ;;  %v1703_v39 = vsel %vm1533_vm2, %v1693_v40, %v1702_v22 }
 0x1c1   : > { %v1492_v7 = vadd.f32 %v1426_v3, %v1107_v11 }
 0x1c2   : > { %v5207_v42 = vpop.f32.mrf.mxu1 }
 0x1c3   : > { %5653 = vst [vmem:[#allocation4_spill] sm:$0xff] %v5207_v42  ;;  %v1885_v55 = vadd.f32 %v1819_v54, %v1492_v7  ;;  %v925_v42 = vsel %vm888_vm1, %v922_v51, %v924_v5  ;;  %v5221_v54 = vld [vmem:[%s4576_s14 + $0x18] sm:$0xff]  ;;  %v2293_v7 = vpack.c.b16 %v2257_v61, %v2256_v60 }
 0x1c4   : > { %v2581_v30 = vshrl.u32 %v5221_v54, 16  ;;  %v2584_v34 = vshll.u32 %v5221_v54, 16  ;;  %v2966_v8 = vrot.slane %v5221_v54, 3 }
 0x1c5   : > { %v5215_v19 = vadd.f32 %v2079_v45, %v1885_v55  ;;  %v1963_v45 = vsel %vm1926_vm3, %v1960_v1, %v1962_v32  ;;  %v2576_v51 = vshll.u32 %v2293_v7, 16  ;;  %v2963_v32 = vpack.c.b16 %v2257_v61, %v2962_v24 }
 0x1c6   : > { %v1043_v14 = vpop.f32.mrf.mxu2  ;;  %v2583_v60 = vrot.slane %v2581_v30, 2 }
 0x1c7   : > { %v1428_v3 = vpop.f32.mrf.mxu3  ;;  %v1108_v11 = vadd.f32 %v1043_v14, %v5006_v0  ;;  %v2573_v0 = vshrl.u32 %v2293_v7, 16  ;;  %v2578_v1 = vrot.slane %v2576_v51, 3 }
 0x1c8   : > { %v1824_v50 = vpop.f32.mrf.mxu0 }
 0x1c9   : > { %v1493_v31 = vadd.f32 %v1428_v3, %v1108_v11  ;;  %v2575_v48 = vrot.slane %v2573_v0, 2  ;;  %v2312_v3 = vrot.slane %v2293_v7, 2  ;;  %v2313_v11 = vrot.slane %v5221_v54, 2  ;;  %v5241_v7 = vld [vmem:[%s4576_s14 + $0x20] sm:$0xff] }
 0x1ca   : > { %v2084_v20 = vpop.f32.mrf.mxu1  ;;  %v2590_v54 = vshrl.u32 %v5241_v7, 16 }
 0x1cb   : > { %1085 = vmatmul.bf16.gmra.mxu2 %v925_v42  ;;  %v5226_v26 = vadd.f32 %v1821_v47, %v1493_v31  ;;  %1863 = vmatmul.bf16.gmra.mxu0 %v1703_v39  ;;  %v2586_v42 = vrot.slane %v2584_v34, 3  ;;  %v2579_v31 = vor.u32 %v2578_v1, %v2575_v48  ;;  %v2314_v61 = vsel %vm1926_vm3, %v2312_v3, %v2313_v11 }
 0x1cc   : > { %1470 = vmatmul.bf16.gmra.mxu3 %v1310_v57 }
 0x1cd   : > { %2123 = vmatmul.bf16.gmra.mxu1 %v1963_v45  ;;  %v2587_v39 = vor.u32 %v2586_v42, %v2583_v60  ;;  %v2592_v60 = vrot.slane %v2590_v54, 2 }
 0x1ce   : > { %v1046_v55 = vpop.f32.mrf.mxu2 }
 0x1cf   : > { %v1431_v5 = vpop.f32.mrf.mxu3  ;;  %v1109_v40 = vadd.f32 %v1046_v55, %v4808_v2  ;;  %v2965_v2 = vrot.slane %v2963_v32, 3 }
 0x1d0   : > { %v1826_v47 = vpop.f32.mrf.mxu0 }
 0x1d1   : > { %v1494_v57 = vadd.f32 %v1431_v5, %v1109_v40 }
 0x1d2   : > { %v5231_v22 = vpop.f32.mrf.mxu1 }
 0x1d3   : > { %v1887_v14 = vadd.f32 %v1824_v50, %v1494_v57  ;;  %v2588_v50 = vsel %vm2571_vm4, %v2579_v31, %v2587_v39 }
 0x1d5   : > { %v5234_v45 = vadd.f32 %v2084_v20, %v1887_v14  ;;  %v2967_v20 = vsel %vm2964_vm5, %v2965_v2, %v2966_v8 }
 0x1d6   : > { %v1048_v0 = vpop.f32.mrf.mxu2 }
 0x1d7   : > { %v1433_v51 = vpop.f32.mrf.mxu3  ;;  %v1110_v30 = vadd.f32 %v1048_v0, %v4815_v27  ;;  %v2593_v27 = vshll.u32 %v5241_v7, 16  ;;  %v2968_v0 = vrot.slane %v5241_v7, 3 }
 0x1d8   : > { %v1829_v24 = vpop.f32.mrf.mxu0 }
 0x1d9   : > { %v1495_v34 = vadd.f32 %v1433_v51, %v1110_v30  ;;  %v2595_v42 = vrot.slane %v2593_v27, 3 }
 0x1da   : > { %v2089_v55 = vpop.f32.mrf.mxu1 }
 0x1db   : > { %2423 = vmatmul.bf16.vlgmr.msra.gmra.mxu2 %v2314_v61  ;;  %v5244_v5 = vadd.f32 %v1826_v47, %v1495_v34  ;;  %3076 = vmatmul.bf16.vlgmr.msra.gmra.mxu0 %v2967_v20  ;;  %v2315_v47 = vrot.slane %v5241_v7, 2  ;;  %v2596_v31 = vor.u32 %v2595_v42, %v2592_v60  ;;  %v5259_v34 = vld [vmem:[%s4576_s14 + $0x28] sm:$0xff] }
 0x1dc   : > { %2816 = vmatmul.bf16.vlgmr.msra.gmra.mxu3 %v2588_v50 }
 0x1dd   : > { %v2597_v50 = vsel %vm2571_vm4, %v2587_v39, %v2596_v31 }
 0x1de   : > { %v1051_v40 = vpop.f32.mrf.mxu2 }
 0x1df   : > { %v1436_v48 = vpop.f32.mrf.mxu3  ;;  %v1111_v1 = vadd.f32 %v1051_v40, %v4828_v41  ;;  %v2316_v41 = vsel %vm1926_vm3, %v2313_v11, %v2315_v47  ;;  %v2602_v11 = vshll.u32 %v5259_v34, 16 }
 0x1e0   : > { %v1831_v32 = vpop.f32.mrf.mxu0 }
 0x1e1   : > { %v1496_v57 = vadd.f32 %v1436_v48, %v1111_v1  ;;  %v2604_v1 = vrot.slane %v2602_v11, 3 }
 0x1e2   : > { %v5249_v14 = vpop.f32.mrf.mxu1 }
 0x1e3   : > { %v1889_v3 = vadd.f32 %v1829_v24, %v1496_v57  ;;  %v2969_v24 = vsel %vm2964_vm5, %v2966_v8, %v2968_v0 }
 0x1e5   : > { %v5252_v2 = vadd.f32 %v2089_v55, %v1889_v3  ;;  %v4377_v55 = vld [vmem:[%s5648_s3 + $0x10] sm:$0xff] }
 0x1e6   : > { %v1053_v51 = vpop.f32.mrf.mxu2  ;;  %3370 = vmatpush.bf16.msra.mxu1 %v4377_v55  ;;  %v5280_v55 = vld [vmem:[%s4576_s14 + $0x30] sm:$0xff] }
 0x1e7   : > { %v1438_v30 = vpop.f32.mrf.mxu3  ;;  %v1112_v61 = vadd.f32 %v1053_v51, %v4841_v59  ;;  %v2599_v59 = vshrl.u32 %v5259_v34, 16 }
 0x1e8   : > { %v1834_v54 = vpop.f32.mrf.mxu0 }
 0x1e9   : > { %v1497_v20 = vadd.f32 %v1438_v30, %v1112_v61  ;;  %v2601_v8 = vrot.slane %v2599_v59, 2  ;;  %v2970_v61 = vrot.slane %v5259_v34, 3 }
 0x1ea   : > { %v2094_v27 = vpop.f32.mrf.mxu1 }
 0x1eb   : > { %2428 = vmatmul.bf16.gmra.mxu2 %v2316_v41  ;;  %v5265_v7 = vadd.f32 %v1831_v32, %v1497_v20  ;;  %3081 = vmatmul.bf16.gmra.mxu0 %v2969_v24  ;;  %v2317_v32 = vrot.slane %v5259_v34, 2  ;;  %v2605_v51 = vor.u32 %v2604_v1, %v2601_v8  ;;  %v2608_v34 = vshrl.u32 %v5280_v55, 16 }
 0x1ec   : > { %2821 = vmatmul.bf16.gmra.mxu3 %v2597_v50 }
 0x1ed   : > { %v2606_v24 = vsel %vm2571_vm4, %v2596_v31, %v2605_v51 }
 0x1ee   : > { %v1056_v39 = vpop.f32.mrf.mxu2 }
 0x1ef   : > { %v1441_v40 = vpop.f32.mrf.mxu3  ;;  %v1113_v48 = vadd.f32 %v1056_v39, %v4857_v10  ;;  %v2318_v10 = vsel %vm1926_vm3, %v2315_v47, %v2317_v32 }
 0x1f0   : > { %v1836_v42 = vpop.f32.mrf.mxu0 }
 0x1f1   : > { %v1498_v60 = vadd.f32 %v1441_v40, %v1113_v48  ;;  %v2610_v48 = vrot.slane %v2608_v34, 2  ;;  %v5298_v34 = vld [vmem:[%s4576_s14 + $0x38] sm:$0xff] }
 0x1f2   : > { %v5270_v57 = vpop.f32.mrf.mxu1 }
 0x1f3   : > { %v1891_v3 = vadd.f32 %v1834_v54, %v1498_v60  ;;  %v2971_v54 = vsel %vm2964_vm5, %v2968_v0, %v2970_v61 }
 0x1f5   : > { %v5273_v30 = vadd.f32 %v2094_v27, %v1891_v3 }
 0x1f6   : > { %v1058_v41 = vpop.f32.mrf.mxu2 }
 0x1f7   : > { %v1443_v50 = vpop.f32.mrf.mxu3  ;;  %v1114_v20 = vadd.f32 %v1058_v41, %v4864_v25  ;;  %v2611_v25 = vshll.u32 %v5280_v55, 16 }
 0x1f8   : > { %v1839_v11 = vpop.f32.mrf.mxu0 }
 0x1f9   : > { %v1499_v59 = vadd.f32 %v1443_v50, %v1114_v20  ;;  %v2613_v8 = vrot.slane %v2611_v25, 3  ;;  %v2972_v20 = vrot.slane %v5280_v55, 3 }
 0x1fa   : > { %v2099_v39 = vpop.f32.mrf.mxu1 }
 0x1fb   : > { %2433 = vmatmul.bf16.gmra.mxu2 %v2318_v10  ;;  %v5283_v27 = vadd.f32 %v1836_v42, %v1499_v59  ;;  %3086 = vmatmul.bf16.gmra.mxu0 %v2971_v54  ;;  %v2319_v42 = vrot.slane %v5280_v55, 2  ;;  %v2614_v41 = vor.u32 %v2613_v8, %v2610_v48  ;;  %v4376_v55 = vld [vmem:[%s5648_s3 + $0x8] sm:$0xff] }
 0x1fc   : > { %2826 = vmatmul.bf16.gmra.mxu3 %v2606_v24  ;;  %3371 = vmatpush.bf16.msra.mxu1 %v4376_v55 }
 0x1fd   : > { %v2615_v54 = vsel %vm2571_vm4, %v2605_v51, %v2614_v41 }
 0x1fe   : > { %v1061_v40 = vpop.f32.mrf.mxu2 }
 0x1ff   : > { %v1446_v47 = vpop.f32.mrf.mxu3  ;;  %v1115_v31 = vadd.f32 %v1061_v40, %v4877_v43  ;;  %v2320_v43 = vsel %vm1926_vm3, %v2317_v32, %v2319_v42  ;;  %v2620_v32 = vshll.u32 %v5298_v34, 16 }
 0x200   : > { %v1841_v60 = vpop.f32.mrf.mxu0 }
 0x201   : > { %v1500_v1 = vadd.f32 %v1446_v47, %v1115_v31  ;;  %v2622_v8 = vrot.slane %v2620_v32, 3  ;;  %v5319_v32 = vld [vmem:[%s4576_s14 + $0x40] sm:$0xff] }
 0x202   : > { %v5288_v0 = vpop.f32.mrf.mxu1 }
 0x203   : > { %v1893_v3 = vadd.f32 %v1839_v11, %v1500_v1  ;;  %v2973_v11 = vsel %vm2964_vm5, %v2970_v61, %v2972_v20 }
 0x205   : > { %v5291_v50 = vadd.f32 %v2099_v39, %v1893_v3 }
 0x206   : > { %v1063_v10 = vpop.f32.mrf.mxu2 }
 0x207   : > { %v1448_v24 = vpop.f32.mrf.mxu3  ;;  %v1116_v59 = vadd.f32 %v1063_v10, %v4890_v62  ;;  %v2617_v62 = vshrl.u32 %v5298_v34, 16 }
 0x208   : > { %v1844_v40 = vpop.f32.mrf.mxu0 }
 0x209   : > { %v1501_v25 = vadd.f32 %v1448_v24, %v1116_v59  ;;  %v2619_v61 = vrot.slane %v2617_v62, 2  ;;  %v2321_v24 = vrot.slane %v5298_v34, 2 }
 0x20a   : > { %v2104_v47 = vpop.f32.mrf.mxu1 }
 0x20b   : > { %2438 = vmatmul.bf16.gmra.mxu2 %v2320_v43  ;;  %v5301_v39 = vadd.f32 %v1841_v60, %v1501_v25  ;;  %3091 = vmatmul.bf16.gmra.mxu0 %v2973_v11  ;;  %v2623_v59 = vor.u32 %v2622_v8, %v2619_v61 }
 0x20c   : > { %2831 = vmatmul.bf16.gmra.mxu3 %v2615_v54  ;;  %v2974_v54 = vrot.slane %v5298_v34, 3  ;;  %v2626_v34 = vshrl.u32 %v5319_v32, 16 }
 0x20d   : > { %v2624_v62 = vsel %vm2571_vm4, %v2614_v41, %v2623_v59 }
 0x20e   : > { %v1066_v51 = vpop.f32.mrf.mxu2  ;;  %v2628_v8 = vrot.slane %v2626_v34, 2 }
 0x20f   : > { %v1451_v31 = vpop.f32.mrf.mxu3  ;;  %v1117_v48 = vadd.f32 %v1066_v51, %v4906_v15  ;;  %v2322_v15 = vsel %vm1926_vm3, %v2319_v42, %v2321_v24 }
 0x210   : > { %v1846_v60 = vpop.f32.mrf.mxu0 }
 0x211   : > { %v1502_v1 = vadd.f32 %v1451_v31, %v1117_v48 }
 0x212   : > { %v5309_v3 = vpop.f32.mrf.mxu1 }
 0x213   : > { %5654 = vst [vmem:[#allocation5_spill] sm:$0xff] %v5309_v3  ;;  %v1895_v10 = vadd.f32 %v1844_v40, %v1502_v1  ;;  %v2975_v40 = vsel %vm2964_vm5, %v2972_v20, %v2974_v54 }
 0x215   : > { %v5312_v43 = vadd.f32 %v2104_v47, %v1895_v10 }
 0x216   : > { %v1068_v25 = vpop.f32.mrf.mxu2 }
 0x217   : > { %v1453_v11 = vpop.f32.mrf.mxu3  ;;  %v1118_v55 = vadd.f32 %v1068_v25, %v4913_v33  ;;  %v2629_v33 = vshll.u32 %v5319_v32, 16 }
 0x218   : > { %v1849_v31 = vpop.f32.mrf.mxu0 }
 0x219   : > { %v1503_v51 = vadd.f32 %v1453_v11, %v1118_v55  ;;  %v2631_v1 = vrot.slane %v2629_v33, 3  ;;  %v5337_v33 = vld [vmem:[%s4576_s14 + $0x48] sm:$0xff] }
 0x21a   : > { %v2109_v48 = vpop.f32.mrf.mxu1 }
 0x21b   : > { %2443 = vmatmul.bf16.gmra.mxu2 %v2322_v15  ;;  %v5322_v47 = vadd.f32 %v1846_v60, %v1503_v51  ;;  %3096 = vmatmul.bf16.gmra.mxu0 %v2975_v40  ;;  %v2323_v60 = vrot.slane %v5319_v32, 2  ;;  %v2632_v55 = vor.u32 %v2631_v1, %v2628_v8 }
 0x21c   : > { %2836 = vmatmul.bf16.gmra.mxu3 %v2624_v62  ;;  %v2976_v62 = vrot.slane %v5319_v32, 3  ;;  %v2635_v32 = vshrl.u32 %v5337_v33, 16 }
 0x21d   : > { %v2633_v34 = vsel %vm2571_vm4, %v2623_v59, %v2632_v55 }
 0x21e   : > { %v1071_v61 = vpop.f32.mrf.mxu2  ;;  %v2637_v1 = vrot.slane %v2635_v32, 2 }
 0x21f   : > { %v1456_v42 = vpop.f32.mrf.mxu3  ;;  %v1119_v41 = vadd.f32 %v1071_v61, %v4926_v52  ;;  %v2324_v52 = vsel %vm1926_vm3, %v2321_v24, %v2323_v60 }
 0x220   : > { %v1851_v25 = vpop.f32.mrf.mxu0 }
 0x221   : > { %v1504_v10 = vadd.f32 %v1456_v42, %v1119_v41 }
 0x222   : > { %v5327_v20 = vpop.f32.mrf.mxu1 }
 0x223   : > { %v1897_v11 = vadd.f32 %v1849_v31, %v1504_v10  ;;  %v2977_v31 = vsel %vm2964_vm5, %v2974_v54, %v2976_v62  ;;  %v4375_v54 = vld [vmem:[%s5648_s3] sm:$0xff] }
 0x224   : > { %3372 = vmatpush.bf16.msra.mxu1 %v4375_v54 }
 0x225   : > { %v5330_v15 = vadd.f32 %v2109_v48, %v1897_v11 }
 0x226   : > { %v1073_v51 = vpop.f32.mrf.mxu2 }
 0x227   : > { %v1458_v40 = vpop.f32.mrf.mxu3  ;;  %v1120_v3 = vadd.f32 %v1073_v51, %v4933_v4  ;;  %v2638_v4 = vshll.u32 %v5337_v33, 16 }
 0x228   : > { %v1854_v42 = vpop.f32.mrf.mxu0 }
 0x229   : > { %v1505_v61 = vadd.f32 %v1458_v40, %v1120_v3  ;;  %v2640_v10 = vrot.slane %v2638_v4, 3  ;;  %v2325_v40 = vrot.slane %v5337_v33, 2 }
 0x22a   : > { %v2114_v41 = vpop.f32.mrf.mxu1 }
 0x22b   : > { %2448 = vmatmul.bf16.gmra.mxu2 %v2324_v52  ;;  %v5340_v48 = vadd.f32 %v1851_v25, %v1505_v61  ;;  %3101 = vmatmul.bf16.gmra.mxu0 %v2977_v31  ;;  %v2641_v52 = vor.u32 %v2640_v10, %v2637_v1  ;;  %v2326_v4 = vsel %vm1926_vm3, %v2323_v60, %v2325_v40 }
 0x22c   : > { %2841 = vmatmul.bf16.gmra.mxu3 %v2633_v34 }
 0x22e   : > { %v1076_v8 = vpop.f32.mrf.mxu2 }
 0x22f   : > { %v1461_v24 = vpop.f32.mrf.mxu3  ;;  %v1121_v59 = vadd.f32 %v1076_v8, %v4952_v58  ;;  %v2978_v58 = vrot.slane %v5337_v33, 3  ;;  %v2642_v8 = vsel %vm2571_vm4, %v2632_v55, %v2641_v52 }
 0x230   : > { %v1856_v11 = vpop.f32.mrf.mxu0 }
 0x231   : > { %v1506_v3 = vadd.f32 %v1461_v24, %v1121_v59  ;;  %v4341_v24 = vld [vmem:[%s4576_s14 + $0x50] sm:$0xff] }
 0x232   : > { %v5348_v51 = vpop.f32.mrf.mxu1  ;;  %v2647_v33 = vshll.u32 %v4341_v24, 16 }
 0x233   : > { %v1899_v25 = vadd.f32 %v1854_v42, %v1506_v3  ;;  %5655 = vst [vmem:[#allocation6_spill] sm:$0xff] %v5348_v51  ;;  %v2979_v3 = vsel %vm2964_vm5, %v2976_v62, %v2978_v58  ;;  %v2327_v51 = vrot.slane %v4341_v24, 2 }
 0x234   : > { %v2649_v55 = vrot.slane %v2647_v33, 3 }
 0x235   : > { %v5351_v34 = vadd.f32 %v2114_v41, %v1899_v25  ;;  %v2644_v41 = vshrl.u32 %v4341_v24, 16 }
 0x236   : > { %v1078_v61 = vpop.f32.mrf.mxu2 }
 0x237   : > { %5656 = vst [vmem:[#allocation7_spill] sm:$0xff] %v5351_v34  ;;  %v1463_v31 = vpop.f32.mrf.mxu3  ;;  %v1122_v32 = vadd.f32 %v1078_v61, %v4962_v53  ;;  %v2646_v60 = vrot.slane %v2644_v41, 2  ;;  %v4342_v41 = vld [vmem:[%s4576_s14 + $0x58] sm:$0xff] }
 0x238   : > { %v1859_v59 = vpop.f32.mrf.mxu0 }
 0x239   : > { %v1507_v42 = vadd.f32 %v1463_v31, %v1122_v32  ;;  %v2650_v62 = vor.u32 %v2649_v55, %v2646_v60 }
 0x23a   : > { %v2119_v10 = vpop.f32.mrf.mxu1 }
 0x23b   : > { %2453 = vmatmul.bf16.gmra.mxu2 %v2326_v4  ;;  %v5359_v1 = vadd.f32 %v1856_v11, %v1507_v42  ;;  %3106 = vmatmul.bf16.gmra.mxu0 %v2979_v3  ;;  %v2980_v11 = vrot.slane %v4341_v24, 3  ;;  %v2651_v34 = vsel %vm2571_vm4, %v2641_v52, %v2650_v62  ;;  %v2653_v24 = vshrl.u32 %v4342_v41, 16 }
 0x23c   : > { %2846 = vmatmul.bf16.gmra.mxu3 %v2642_v8 }
 0x23d   : > { %5657 = vst [vmem:[#allocation8_spill] sm:$0xff] %v5359_v1  ;;  %v2328_v1 = vsel %vm1926_vm3, %v2325_v40, %v2327_v51  ;;  %v2655_v52 = vrot.slane %v2653_v24, 2 }
 0x23e   : > { %v1081_v54 = vpop.f32.mrf.mxu2 }
 0x23f   : > { %v1466_v25 = vpop.f32.mrf.mxu3  ;;  %v1123_v53 = vadd.f32 %v1081_v54, %v4975_v12 }
 0x240   : > { %v1861_v31 = vpop.f32.mrf.mxu0 }
 0x241   : > { %v1508_v61 = vadd.f32 %v1466_v25, %v1123_v53  ;;  %v2656_v25 = vshll.u32 %v4342_v41, 16 }
 0x242   : > { %v5367_v12 = vpop.f32.mrf.mxu1 }
 0x243   : > { %v1901_v32 = vadd.f32 %v1859_v59, %v1508_v61  ;;  %v2981_v59 = vsel %vm2964_vm5, %v2978_v58, %v2980_v11  ;;  %v2658_v60 = vrot.slane %v2656_v25, 3 }
 0x245   : > { %v5362_v4 = vadd.f32 %v2119_v10, %v1901_v32  ;;  %v2659_v58 = vor.u32 %v2658_v60, %v2655_v52 }
 0x246   : > { %v1083_v8 = vpop.f32.mrf.mxu2 }
 0x247   : > { %v1468_v42 = vpop.f32.mrf.mxu3  ;;  %v1124_v3 = vadd.f32 %v1083_v8, %v4982_v16 }
 0x248   : > { %v1864_v54 = vpop.f32.mrf.mxu0 }
 0x249   : > { %v1509_v33 = vadd.f32 %v1468_v42, %v1124_v3  ;;  %v2329_v42 = vrot.slane %v4342_v41, 2 }
 0x24a   : > { %v2124_v32 = vpop.f32.mrf.mxu1 }
 0x24b   : > { %2458 = vmatmul.bf16.gmra.mxu2 %v2328_v1  ;;  %v5371_v10 = vadd.f32 %v1861_v31, %v1509_v33  ;;  %3111 = vmatmul.bf16.gmra.mxu0 %v2981_v59  ;;  %v2330_v59 = vsel %vm1926_vm3, %v2327_v51, %v2329_v42 }
 0x24c   : > { %2851 = vmatmul.bf16.gmra.mxu3 %v2651_v34  ;;  %v2982_v34 = vrot.slane %v4342_v41, 3 }
 0x24e   : > { %v1086_v53 = vpop.f32.mrf.mxu2 }
 0x24f   : > { %v1471_v16 = vpop.f32.mrf.mxu3  ;;  %v1125_v40 = vadd.f32 %v1086_v53, %v5001_v9  ;;  %v2660_v9 = vsel %vm2571_vm4, %v2650_v62, %v2659_v58  ;;  %v5380_v53 = vld [vmem:[%s4576_s14 + $0x60] sm:$0xff] }
 0x250   : > { %v1866_v61 = vpop.f32.mrf.mxu0  ;;  %v2662_v41 = vshrl.u32 %v5380_v53, 16 }
 0x251   : > { %v1510_v55 = vadd.f32 %v1471_v16, %v1125_v40  ;;  %v2983_v16 = vsel %vm2964_vm5, %v2980_v11, %v2982_v34  ;;  %v2665_v40 = vshll.u32 %v5380_v53, 16  ;;  %v2331_v11 = vrot.slane %v5380_v53, 2 }
 0x252   : > { %v2664_v62 = vrot.slane %v2662_v41, 2 }
 0x253   : > { %v1903_v8 = vadd.f32 %v1864_v54, %v1510_v55  ;;  %v2667_v60 = vrot.slane %v2665_v40, 3 }
 0x255   : > { %v5374_v1 = vadd.f32 %v2124_v32, %v1903_v8  ;;  %v2668_v8 = vor.u32 %v2667_v60, %v2664_v62 }
 0x256   : > { %v1088_v31 = vpop.f32.mrf.mxu2 }
 0x257   : > { %v1473_v3 = vpop.f32.mrf.mxu3  ;;  %v1126_v33 = vadd.f32 %v1088_v31, %v5014_v38 }
 0x258   : > { %v3077_v25 = vpop.f32.mrf.mxu0 }
 0x259   : > { %v1511_v24 = vadd.f32 %v1473_v3, %v1126_v33 }
 0x25b   : > { %2463 = vmatmul.bf16.gmra.mxu2 %v2330_v59  ;;  %v5383_v54 = vadd.f32 %v1866_v61, %v1511_v24  ;;  %3116 = vmatmul.bf16.gmra.mxu0 %v2983_v16  ;;  %v2984_v61 = vrot.slane %v5380_v53, 3  ;;  %v5393_v59 = vld [vmem:[%s5647_s2] ss:$0 sm:$0xff]  ;;  %v2669_v24 = vsel %vm2571_vm4, %v2659_v58, %v2668_v8  ;;  %v5399_v16 = vld [vmem:[%s4576_s14 + $0x68] sm:$0xff] }
 0x25c   : > { %2856 = vmatmul.bf16.gmra.mxu3 %v2660_v9 }
 0x25d   : > { %v2985_v53 = vsel %vm2964_vm5, %v2982_v34, %v2984_v61 }
 0x25e   : > { %v2424_v38 = vpop.f32.mrf.mxu2 }
 0x25f   : > { %v2817_v52 = vpop.f32.mrf.mxu3  ;;  %v2514_v51 = vadd.f32 %v2424_v38, %v5028_v36  ;;  %v2332_v36 = vsel %vm1926_vm3, %v2329_v42, %v2331_v11 }
 0x260   : > { %v3079_v55 = vpop.f32.mrf.mxu0 }
 0x261   : > { %v2907_v32 = vadd.f32 %v2817_v52, %v2514_v51  ;;  %v2671_v52 = vshrl.u32 %v5399_v16, 16 }
 0x263   : > { %v3167_v33 = vadd.f32 %v3077_v25, %v2907_v32  ;;  %v2673_v34 = vrot.slane %v2671_v52, 2  ;;  %v5413_v52 = vld [vmem:[%s4576_s14 + $0x70] sm:$0xff] }
 0x265   : > { %v3207_v38 = vadd.f32 %v5393_v59, %v3167_v33 }
 0x266   : > { %v2426_v31 = vpop.f32.mrf.mxu2 }
 0x267   : > { %v2819_v3 = vpop.f32.mrf.mxu3  ;;  %v2515_v9 = vadd.f32 %v2426_v31, %v5039_v6  ;;  %v2674_v6 = vshll.u32 %v5399_v16, 16  ;;  %v3243_v62 = vmax.f32 %v3207_v38, 0.0 }
 0x268   : > { %v3082_v40 = vpop.f32.mrf.mxu0 }
 0x269   : > { %v2908_v41 = vadd.f32 %v2819_v3, %v2515_v9  ;;  %v2676_v31 = vrot.slane %v2674_v6, 3  ;;  %v2333_v9 = vrot.slane %v5399_v16, 2 }
 0x26b   : > { %v3168_v25 = vadd.f32 %v3079_v55, %v2908_v41  ;;  %2468 = vmatmul.bf16.gmra.mxu2 %v2332_v36  ;;  %3121 = vmatmul.bf16.gmra.mxu0 %v2985_v53  ;;  %v2677_v36 = vor.u32 %v2676_v31, %v2673_v34 }
 0x26c   : > { %2861 = vmatmul.bf16.gmra.mxu3 %v2669_v24  ;;  %v2986_v24 = vrot.slane %v5399_v16, 3  ;;  %v2680_v16 = vshrl.u32 %v5413_v52, 16 }
 0x26d   : > { %v3208_v42 = vadd.f32 %v5393_v59, %v3168_v25 }
 0x26e   : > { %v2429_v51 = vpop.f32.mrf.mxu2 }
 0x26f   : > { %v2822_v58 = vpop.f32.mrf.mxu3  ;;  %v3244_v60 = vmax.f32 %v3208_v42, 0.0  ;;  %v2516_v32 = vadd.f32 %v2429_v51, %v5052_v46  ;;  %v2334_v42 = vsel %vm1926_vm3, %v2331_v11, %v2333_v9  ;;  %v2678_v46 = vsel %vm2571_vm4, %v2668_v8, %v2677_v36 }
 0x270   : > { %v3084_v55 = vpop.f32.mrf.mxu0 }
 0x271   : > { %v3279_v3 = vpack.c.bf16 %v3244_v60, %v3243_v62  ;;  %v2909_v33 = vadd.f32 %v2822_v58, %v2516_v32  ;;  %v2987_v58 = vsel %vm2964_vm5, %v2984_v61, %v2986_v24  ;;  %v2682_v61 = vrot.slane %v2680_v16, 2 }
 0x273   : > { %3373 = vmatmul.bf16.vlgmr.msra.gmra.mxu1 %v3279_v3  ;;  %v3169_v25 = vadd.f32 %v3082_v40, %v2909_v33 }
 0x275   : > { %v3209_v62 = vadd.f32 %v5393_v59, %v3169_v25 }
 0x276   : > { %v2431_v41 = vpop.f32.mrf.mxu2 }
 0x277   : > { %v2824_v53 = vpop.f32.mrf.mxu3  ;;  %v2517_v38 = vadd.f32 %v2431_v41, %v5069_v29  ;;  %v2683_v29 = vshll.u32 %v5413_v52, 16  ;;  %v3245_v32 = vmax.f32 %v3209_v62, 0.0 }
 0x278   : > { %v3087_v51 = vpop.f32.mrf.mxu0 }
 0x279   : > { %v2910_v6 = vadd.f32 %v2824_v53, %v2517_v38  ;;  %v2685_v3 = vrot.slane %v2683_v29, 3  ;;  %v2335_v53 = vrot.slane %v5413_v52, 2  ;;  %v2988_v38 = vrot.slane %v5413_v52, 3 }
 0x27b   : > { %v3170_v60 = vadd.f32 %v3084_v55, %v2910_v6  ;;  %2473 = vmatmul.bf16.gmra.mxu2 %v2334_v42  ;;  %3126 = vmatmul.bf16.gmra.mxu0 %v2987_v58  ;;  %v2686_v25 = vor.u32 %v2685_v3, %v2682_v61 }
 0x27c   : > { %2866 = vmatmul.bf16.gmra.mxu3 %v2678_v46 }
 0x27d   : > { %v3210_v11 = vadd.f32 %v5393_v59, %v3170_v60  ;;  %v2687_v62 = vsel %vm2571_vm4, %v2677_v36, %v2686_v25  ;;  %v5427_v60 = vld [vmem:[%s4576_s14 + $0x78] sm:$0xff] }
 0x27e   : > { %v2434_v40 = vpop.f32.mrf.mxu2  ;;  %v2689_v52 = vshrl.u32 %v5427_v60, 16 }
 0x27f   : > { %v2827_v8 = vpop.f32.mrf.mxu3  ;;  %v2518_v34 = vadd.f32 %v2434_v40, %v5076_v18  ;;  %v3246_v31 = vmax.f32 %v3210_v11, 0.0  ;;  %v2336_v18 = vsel %vm1926_vm3, %v2333_v9, %v2335_v53  ;;  %v2989_v11 = vsel %vm2964_vm5, %v2986_v24, %v2988_v38 }
 0x280   : > { %v3089_v33 = vpop.f32.mrf.mxu0  ;;  %v2691_v24 = vrot.slane %v2689_v52, 2 }
 0x281   : > { %v3280_v55 = vpack.c.bf16 %v3246_v31, %v3245_v32  ;;  %v2911_v41 = vadd.f32 %v2827_v8, %v2518_v34 }
 0x283   : > { %3378 = vmatmul.bf16.gmra.mxu1 %v3280_v55  ;;  %v3171_v6 = vadd.f32 %v3087_v51, %v2911_v41  ;;  %v2337_v41 = vrot.slane %v5427_v60, 2 }
 0x285   : > { %v3211_v40 = vadd.f32 %v5393_v59, %v3171_v6 }
 0x286   : > { %v2436_v42 = vpop.f32.mrf.mxu2 }
 0x287   : > { %v2829_v46 = vpop.f32.mrf.mxu3  ;;  %v2519_v58 = vadd.f32 %v2436_v42, %v5087_v17  ;;  %v2692_v17 = vshll.u32 %v5427_v60, 16  ;;  %v3247_v32 = vmax.f32 %v3211_v40, 0.0 }
 0x288   : > { %v3092_v29 = vpop.f32.mrf.mxu0 }
 0x289   : > { %v2912_v16 = vadd.f32 %v2829_v46, %v2519_v58  ;;  %v2694_v61 = vrot.slane %v2692_v17, 3  ;;  %v2990_v46 = vrot.slane %v5427_v60, 3 }
 0x28b   : > { %v3172_v8 = vadd.f32 %v3089_v33, %v2912_v16  ;;  %2478 = vmatmul.bf16.gmra.mxu2 %v2336_v18  ;;  %3131 = vmatmul.bf16.gmra.mxu0 %v2989_v11  ;;  %v2695_v42 = vor.u32 %v2694_v61, %v2691_v24  ;;  %v5441_v11 = vld [vmem:[%s4576_s14 + $0x80] sm:$0xff]  ;;  %v2991_v52 = vsel %vm2964_vm5, %v2988_v38, %v2990_v46 }
 0x28c   : > { %2871 = vmatmul.bf16.gmra.mxu3 %v2687_v62  ;;  %v2698_v60 = vshrl.u32 %v5441_v11, 16 }
 0x28d   : > { %v3212_v9 = vadd.f32 %v5393_v59, %v3172_v8  ;;  %v2696_v16 = vsel %vm2571_vm4, %v2686_v25, %v2695_v42 }
 0x28e   : > { %v2439_v51 = vpop.f32.mrf.mxu2  ;;  %v2700_v38 = vrot.slane %v2698_v60, 2 }
 0x28f   : > { %v2832_v36 = vpop.f32.mrf.mxu3  ;;  %v2520_v34 = vadd.f32 %v2439_v51, %v5097_v37  ;;  %v3248_v31 = vmax.f32 %v3212_v9, 0.0  ;;  %v2338_v37 = vsel %vm1926_vm3, %v2335_v53, %v2337_v41 }
 0x290   : > { %v3094_v3 = vpop.f32.mrf.mxu0 }
 0x291   : > { %v3281_v33 = vpack.c.bf16 %v3248_v31, %v3247_v32  ;;  %v2913_v55 = vadd.f32 %v2832_v36, %v2520_v34 }
 0x293   : > { %3383 = vmatmul.bf16.gmra.mxu1 %v3281_v33  ;;  %v3173_v18 = vadd.f32 %v3092_v29, %v2913_v55  ;;  %v2992_v55 = vrot.slane %v5441_v11, 3 }
 0x295   : > { %v3213_v17 = vadd.f32 %v5393_v59, %v3173_v18 }
 0x296   : > { %v2441_v6 = vpop.f32.mrf.mxu2 }
 0x297   : > { %v2834_v58 = vpop.f32.mrf.mxu3  ;;  %v2521_v62 = vadd.f32 %v2441_v6, %v5114_v63  ;;  %v2701_v63 = vshll.u32 %v5441_v11, 16  ;;  %v3249_v51 = vmax.f32 %v3213_v17, 0.0  ;;  %v2993_v17 = vsel %vm2964_vm5, %v2990_v46, %v2992_v55 }
 0x298   : > { %v3097_v8 = vpop.f32.mrf.mxu0 }
 0x299   : > { %v2914_v40 = vadd.f32 %v2834_v58, %v2521_v62  ;;  %v2703_v34 = vrot.slane %v2701_v63, 3 }
 0x29b   : > { %v3174_v9 = vadd.f32 %v3094_v3, %v2914_v40  ;;  %2483 = vmatmul.bf16.gmra.mxu2 %v2338_v37  ;;  %3136 = vmatmul.bf16.gmra.mxu0 %v2991_v52  ;;  %v2339_v3 = vrot.slane %v5441_v11, 2  ;;  %v2704_v33 = vor.u32 %v2703_v34, %v2700_v38 }
 0x29c   : > { %2876 = vmatmul.bf16.gmra.mxu3 %v2696_v16  ;;  %v5455_v16 = vld [vmem:[%s4576_s14 + $0x88] sm:$0xff] }
 0x29d   : > { %v3214_v53 = vadd.f32 %v5393_v59, %v3174_v9  ;;  %v2705_v37 = vsel %vm2571_vm4, %v2695_v42, %v2704_v33  ;;  %v2707_v11 = vshrl.u32 %v5455_v16, 16  ;;  %v2341_v38 = vrot.slane %v5455_v16, 2 }
 0x29e   : > { %v2444_v29 = vpop.f32.mrf.mxu2 }
 0x29f   : > { %v2837_v25 = vpop.f32.mrf.mxu3  ;;  %v2522_v36 = vadd.f32 %v2444_v29, %v5124_v56  ;;  %v3250_v32 = vmax.f32 %v3214_v53, 0.0  ;;  %v2340_v56 = vsel %vm1926_vm3, %v2337_v41, %v2339_v3  ;;  %v2709_v46 = vrot.slane %v2707_v11, 2 }
 0x2a0   : > { %v3099_v31 = vpop.f32.mrf.mxu0 }
 0x2a1   : > { %v3282_v24 = vpack.c.bf16 %v3250_v32, %v3249_v51  ;;  %v2915_v61 = vadd.f32 %v2837_v25, %v2522_v36 }
 0x2a3   : > { %3388 = vmatmul.bf16.gmra.mxu1 %v3282_v24  ;;  %v3175_v18 = vadd.f32 %v3097_v8, %v2915_v61 }
 0x2a5   : > { %v3215_v9 = vadd.f32 %v5393_v59, %v3175_v18 }
 0x2a6   : > { %v2446_v6 = vpop.f32.mrf.mxu2 }
 0x2a7   : > { %v2839_v58 = vpop.f32.mrf.mxu3  ;;  %v2523_v62 = vadd.f32 %v2446_v6, %v5135_v23  ;;  %v2710_v23 = vshll.u32 %v5455_v16, 16  ;;  %v3251_v63 = vmax.f32 %v3215_v9, 0.0 }
 0x2a8   : > { %v3102_v52 = vpop.f32.mrf.mxu0 }
 0x2a9   : > { %v2916_v40 = vadd.f32 %v2839_v58, %v2523_v62  ;;  %v2712_v25 = vrot.slane %v2710_v23, 3  ;;  %v5469_v62 = vld [vmem:[%s4576_s14 + $0x90] sm:$0xff] }
 0x2ab   : > { %v3176_v60 = vadd.f32 %v3099_v31, %v2916_v40  ;;  %2488 = vmatmul.bf16.gmra.mxu2 %v2340_v56  ;;  %3141 = vmatmul.bf16.gmra.mxu0 %v2993_v17  ;;  %v2713_v34 = vor.u32 %v2712_v25, %v2709_v46  ;;  %v2994_v31 = vrot.slane %v5455_v16, 3  ;;  %v2716_v16 = vshrl.u32 %v5469_v62, 16 }
 0x2ac   : > { %2881 = vmatmul.bf16.gmra.mxu3 %v2705_v37  ;;  %v2142_v46 = vadd.f32 %v5164_v44, %v5185_v21  ;;  %v2996_v25 = vrot.slane %v5469_v62, 3 }
 0x2ad   : > { %v3216_v41 = vadd.f32 %v5393_v59, %v3176_v60  ;;  %v2714_v18 = vsel %vm2571_vm4, %v2704_v33, %v2713_v34  ;;  %v2995_v40 = vsel %vm2964_vm5, %v2992_v55, %v2994_v31 }
 0x2ae   : > { %v2449_v8 = vpop.f32.mrf.mxu2 }
 0x2af   : > { %v2842_v42 = vpop.f32.mrf.mxu3  ;;  %v2524_v53 = vadd.f32 %v2449_v8, %v5142_v28  ;;  %v3252_v29 = vmax.f32 %v3216_v41, 0.0  ;;  %v2342_v28 = vsel %vm1926_vm3, %v2339_v3, %v2341_v38  ;;  %v2718_v41 = vrot.slane %v2716_v16, 2 }
 0x2b0   : > { %v3104_v51 = vpop.f32.mrf.mxu0 }
 0x2b1   : > { %v3283_v36 = vpack.c.bf16 %v3252_v29, %v3251_v63  ;;  %v2917_v32 = vadd.f32 %v2842_v42, %v2524_v53  ;;  %v2343_v53 = vrot.slane %v5469_v62, 2 }
 0x2b3   : > { %3393 = vmatmul.bf16.gmra.mxu1 %v3283_v36  ;;  %v3177_v6 = vadd.f32 %v3102_v52, %v2917_v32 }
 0x2b5   : > { %v3217_v17 = vadd.f32 %v5393_v59, %v3177_v6  ;;  %v5484_v6 = vld [vmem:[%s4576_s14 + $0x98] sm:$0xff] }
 0x2b6   : > { %v2451_v24 = vpop.f32.mrf.mxu2  ;;  %v2725_v44 = vshrl.u32 %v5484_v6, 16  ;;  %v2728_v21 = vshll.u32 %v5484_v6, 16 }
 0x2b7   : > { %v2844_v61 = vpop.f32.mrf.mxu3  ;;  %v2525_v58 = vadd.f32 %v2451_v24, %v5159_v35  ;;  %v2719_v35 = vshll.u32 %v5469_v62, 16  ;;  %v3253_v60 = vmax.f32 %v3217_v17, 0.0  ;;  %v2344_v24 = vsel %vm1926_vm3, %v2341_v38, %v2343_v53 }
 0x2b8   : > { %v3107_v37 = vpop.f32.mrf.mxu0  ;;  %v2730_v16 = vrot.slane %v2728_v21, 3 }
 0x2b9   : > { %v2918_v56 = vadd.f32 %v2844_v61, %v2525_v58  ;;  %v2721_v55 = vrot.slane %v2719_v35, 3 }
 0x2bb   : > { %v3178_v9 = vadd.f32 %v3104_v51, %v2918_v56  ;;  %2493 = vmatmul.bf16.gmra.mxu2 %v2342_v28  ;;  %3146 = vmatmul.bf16.gmra.mxu0 %v2995_v40  ;;  %v2722_v29 = vor.u32 %v2721_v55, %v2718_v41  ;;  %v5658_v41 = vld [vmem:[#allocation3_spill] sm:$0xff]  ;;  %v5659_v55 = vld [vmem:[#allocation2_spill] sm:$0xff] }
 0x2bc   : > { %2886 = vmatmul.bf16.gmra.mxu3 %v2714_v18  ;;  %v2997_v18 = vsel %vm2964_vm5, %v2994_v31, %v2996_v25  ;;  %v2727_v31 = vrot.slane %v2725_v44, 2 }
 0x2bd   : > { %v3218_v3 = vadd.f32 %v5393_v59, %v3178_v9  ;;  %v2723_v61 = vsel %vm2571_vm4, %v2713_v34, %v2722_v29 }
 0x2be   : > { %v2454_v52 = vpop.f32.mrf.mxu2 }
 0x2bf   : > { %v2847_v33 = vpop.f32.mrf.mxu3  ;;  %v2526_v11 = vadd.f32 %v2454_v52, %v5174_v49  ;;  %v3254_v23 = vmax.f32 %v3218_v3, 0.0  ;;  %v2550_v52 = vld [vmem:[%s4576_s14 + $0xa0] sm:$0x7] }
 0x2c0   : > { %v3109_v8 = vpop.f32.mrf.mxu0 }
 0x2c1   : > { %v3284_v42 = vpack.c.bf16 %v3254_v23, %v3253_v60  ;;  %v2919_v63 = vadd.f32 %v2847_v33, %v2526_v11  ;;  %v2345_v60 = vrot.slane %v5484_v6, 2  ;;  %v2731_v11 = vor.u32 %v2730_v16, %v2727_v31 }
 0x2c2   : > { %v2569_v23 = vunpack.c.l.b16 %v2550_v52  ;;  %v5660_v52 = vld [vmem:[#allocation4_spill] sm:$0xff] }
 0x2c3   : > { %3398 = vmatmul.bf16.gmra.mxu1 %v3284_v42  ;;  %v3179_v32 = vadd.f32 %v3107_v37, %v2919_v63  ;;  %v2998_v42 = vrot.slane %v5484_v6, 3 }
 0x2c5   : > { %v3219_v56 = vadd.f32 %v5393_v59, %v3179_v32  ;;  %v2732_v32 = vsel %vm2571_vm4, %v2722_v29, %v2731_v11 }
 0x2c6   : > { %v2456_v51 = vpop.f32.mrf.mxu2 }
 0x2c7   : > { %v2849_v36 = vpop.f32.mrf.mxu3  ;;  %v2527_v49 = vadd.f32 %v2456_v51, %v2142_v46  ;;  %v3255_v37 = vmax.f32 %v3219_v56, 0.0 }
 0x2c8   : > { %v3112_v28 = vpop.f32.mrf.mxu0 }
 0x2c9   : > { %v2920_v58 = vadd.f32 %v2849_v36, %v2527_v49  ;;  %v2346_v36 = vsel %vm1926_vm3, %v2343_v53, %v2345_v60  ;;  %v2570_v49 = vpack.c.b16 %v2569_v23, %v2569_v23 }
 0x2cb   : > { %v3180_v40 = vadd.f32 %v3109_v8, %v2920_v58  ;;  %2498 = vmatmul.bf16.gmra.mxu2 %v2344_v24  ;;  %3151 = vmatmul.bf16.gmra.mxu0 %v2997_v18  ;;  %v2144_v8 = vadd.f32 %v5659_v55, %v5658_v41  ;;  %v2999_v58 = vsel %vm2964_vm5, %v2996_v25, %v2998_v42  ;;  %v2201_v18 = vld [vmem:[%s4576_s14 + $0xa0] sm:$0x3]  ;;  %v2734_v44 = vshrl.u32 %v2570_v49, 16 }
 0x2cc   : > { %2891 = vmatmul.bf16.gmra.mxu3 %v2723_v61  ;;  %v2292_v6 = vunpack.c.l.b16 %v2201_v18  ;;  %v3000_v23 = vrot.slane %v2570_v49, 3 }
 0x2cd   : > { %v3220_v38 = vadd.f32 %v5393_v59, %v3180_v40  ;;  %v2736_v25 = vrot.slane %v2734_v44, 2 }
 0x2ce   : > { %v2459_v34 = vpop.f32.mrf.mxu2 }
 0x2cf   : > { %v2852_v62 = vpop.f32.mrf.mxu3  ;;  %v3256_v17 = vmax.f32 %v3220_v38, 0.0  ;;  %v2528_v9 = vadd.f32 %v2459_v34, %v5195_v13 }
 0x2d0   : > { %v3114_v35 = vpop.f32.mrf.mxu0 }
 0x2d1   : > { %v3285_v3 = vpack.c.bf16 %v3256_v17, %v3255_v37  ;;  %v2921_v33 = vadd.f32 %v2852_v62, %v2528_v9  ;;  %v2311_v37 = vpack.c.b16 %v2292_v6, %v2292_v6 }
 0x2d3   : > { %3403 = vmatmul.bf16.gmra.mxu1 %v3285_v3  ;;  %v3181_v13 = vadd.f32 %v3112_v28, %v2921_v33  ;;  %v2737_v28 = vshll.u32 %v2570_v49, 16  ;;  %v2146_v33 = vadd.f32 %v5660_v52, %v5226_v26  ;;  %v5516_v49 = vld [vmem:[%s5649_s4] ss:$0 sm:$0xff] }
 0x2d5   : > { %v3221_v56 = vadd.f32 %v5393_v59, %v3181_v13  ;;  %v2739_v17 = vrot.slane %v2737_v28, 3 }
 0x2d6   : > { %v2461_v63 = vpop.f32.mrf.mxu2 }
 0x2d7   : > { %v2854_v46 = vpop.f32.mrf.mxu3  ;;  %v2529_v51 = vadd.f32 %v2461_v63, %v2144_v8  ;;  %v3257_v29 = vmax.f32 %v3221_v56, 0.0  ;;  %v2740_v3 = vor.u32 %v2739_v17, %v2736_v25 }
 0x2d8   : > { %v3117_v61 = vpop.f32.mrf.mxu0 }
 0x2d9   : > { %v2922_v24 = vadd.f32 %v2854_v46, %v2529_v51  ;;  %v5506_v46 = vpop.f32.mrf.mxu1  ;;  %v2741_v13 = vsel %vm2571_vm4, %v2731_v11, %v2740_v3 }
 0x2db   : > { %v3182_v40 = vadd.f32 %v3114_v35, %v2922_v24  ;;  %2503 = vmatmul.bf16.gmra.mxu2 %v2346_v36  ;;  %3156 = vmatmul.bf16.gmra.mxu0 %v2999_v58  ;;  %v2347_v35 = vrot.slane %v2311_v37, 2 }
 0x2dc   : > { %2896 = vmatmul.bf16.gmra.mxu3 %v2732_v32  ;;  %v3001_v32 = vsel %vm2964_vm5, %v2998_v42, %v3000_v23 }
 0x2dd   : > { %v3222_v21 = vadd.f32 %v5393_v59, %v3182_v40 }
 0x2de   : > { %v2464_v53 = vpop.f32.mrf.mxu2 }
 0x2df   : > { %v2857_v38 = vpop.f32.mrf.mxu3  ;;  %v3258_v34 = vmax.f32 %v3222_v21, 0.0  ;;  %v2530_v62 = vadd.f32 %v2464_v53, %v5215_v19  ;;  %v2348_v19 = vsel %vm1926_vm3, %v2345_v60, %v2347_v35  ;;  %v2148_v21 = vadd.f32 %v5231_v22, %v5244_v5 }
 0x2e0   : > { %v3119_v9 = vpop.f32.mrf.mxu0 }
 0x2e1   : > { %v3286_v31 = vpack.c.bf16 %v3258_v34, %v3257_v29  ;;  %v2923_v16 = vadd.f32 %v2857_v38, %v2530_v62 }
 0x2e3   : > { %3408 = vmatmul.bf16.gmra.mxu1 %v3286_v31  ;;  %v3183_v8 = vadd.f32 %v3117_v61, %v2923_v16 }
 0x2e5   : > { %v3223_v24 = vadd.f32 %v5393_v59, %v3183_v8 }
 0x2e6   : > { %v2466_v41 = vpop.f32.mrf.mxu2 }
 0x2e7   : > { %v2859_v55 = vpop.f32.mrf.mxu3  ;;  %v2531_v63 = vadd.f32 %v2466_v41, %v2146_v33  ;;  %v3259_v61 = vmax.f32 %v3223_v24, 0.0 }
 0x2e8   : > { %v3122_v36 = vpop.f32.mrf.mxu0 }
 0x2e9   : > { %v2924_v51 = vadd.f32 %v2859_v55, %v2531_v63 }
 0x2eb   : > { %v3184_v58 = vadd.f32 %v3119_v9, %v2924_v51  ;;  %2508 = vmatmul.bf16.gmra.mxu2 %v2348_v19  ;;  %3161 = vmatmul.bf16.gmra.mxu0 %v3001_v32  ;;  %v2150_v19 = vadd.f32 %v5249_v14, %v5265_v7 }
 0x2ec   : > { %2901 = vmatmul.bf16.gmra.mxu3 %v2741_v13 }
 0x2ed   : > { %v3224_v26 = vadd.f32 %v5393_v59, %v3184_v58 }
 0x2ee   : > { %v2469_v60 = vpop.f32.mrf.mxu2 }
 0x2ef   : > { %v2862_v11 = vpop.f32.mrf.mxu3  ;;  %v3260_v18 = vmax.f32 %v3224_v26, 0.0  ;;  %v2532_v42 = vadd.f32 %v2469_v60, %v5234_v45 }
 0x2f0   : > { %v3374_v56 = vpop.f32.mrf.mxu1  ;;  %v3124_v6 = vpop.f32.mrf.mxu0 }
 0x2f1   : > { %v3375_v40 = vadd.f32 %v5516_v49, %v3374_v56  ;;  %v3287_v44 = vpack.c.bf16 %v3260_v18, %v3259_v61  ;;  %v2925_v28 = vadd.f32 %v2862_v11, %v2532_v42 }
 0x2f3   : > { %4418 = vtanh.f32 %v3375_v40  ;;  %3413 = vmatmul.bf16.gmra.mxu1 %v3287_v44  ;;  %v3185_v29 = vadd.f32 %v3122_v36, %v2925_v28 }
 0x2f5   : > { %v3225_v22 = vadd.f32 %v5393_v59, %v3185_v29  ;;  %v2152_v29 = vadd.f32 %v5270_v57, %v5283_v27 }
 0x2f6   : > { %v2471_v53 = vpop.f32.mrf.mxu2 }
 0x2f7   : > { %v2864_v38 = vpop.f32.mrf.mxu3  ;;  %v2533_v45 = vadd.f32 %v2471_v53, %v2148_v21  ;;  %v3261_v35 = vmax.f32 %v3225_v22, 0.0 }
 0x2f8   : > { %v3376_v34 = vpop.f32.mrf.mxu1  ;;  %v3127_v17 = vpop.f32.mrf.mxu0 }
 0x2f9   : > { %v4419_v62 = vpop.eup %4418  ;;  %v2926_v37 = vadd.f32 %v2864_v38, %v2533_v45  ;;  %v3377_v25 = vadd.f32 %v5516_v49, %v3376_v34 }
 0x2fa   : > { %3500 = vst [vmem:[%s5526_s10] sm:$0xff] %v4419_v62 }
 0x2fb   : > { %v3186_v5 = vadd.f32 %v3124_v6, %v2926_v37  ;;  %4420 = vtanh.f32 %v3377_v25 }
 0x2fd   : > { %v3226_v9 = vadd.f32 %v5393_v59, %v3186_v5 }
 0x2fe   : > { %v2474_v31 = vpop.f32.mrf.mxu2 }
 0x2ff   : > { %v2867_v16 = vpop.f32.mrf.mxu3  ;;  %v3262_v3 = vmax.f32 %v3226_v9, 0.0  ;;  %v2534_v52 = vadd.f32 %v2474_v31, %v5252_v2 }
 0x300   : > { %v3379_v33 = vpop.f32.mrf.mxu1  ;;  %v3129_v55 = vpop.f32.mrf.mxu0 }
 0x301   : > { %v4421_v23 = vpop.eup %4420  ;;  %v3380_v41 = vadd.f32 %v5516_v49, %v3379_v33  ;;  %v3288_v8 = vpack.c.bf16 %v3262_v3, %v3261_v35  ;;  %v2927_v63 = vadd.f32 %v2867_v16, %v2534_v52 }
 0x302   : > { %3501 = vst [vmem:[%s5526_s10 + $0x8] sm:$0xff] %v4421_v23 }
 0x303   : > { %4422 = vtanh.f32 %v3380_v41  ;;  %3418 = vmatmul.bf16.gmra.mxu1 %v3288_v8  ;;  %v3187_v36 = vadd.f32 %v3127_v17, %v2927_v63 }
 0x305   : > { %v3227_v11 = vadd.f32 %v5393_v59, %v3187_v36 }
 0x306   : > { %v2476_v13 = vpop.f32.mrf.mxu2 }
 0x307   : > { %v2869_v51 = vpop.f32.mrf.mxu3  ;;  %v2535_v32 = vadd.f32 %v2476_v13, %v2150_v19  ;;  %v3263_v7 = vmax.f32 %v3227_v11, 0.0  ;;  %v2154_v19 = vadd.f32 %v5288_v0, %v5301_v39 }
 0x308   : > { %v3381_v24 = vpop.f32.mrf.mxu1  ;;  %v3132_v60 = vpop.f32.mrf.mxu0 }
 0x309   : > { %v4423_v2 = vpop.eup %4422  ;;  %v2928_v58 = vadd.f32 %v2869_v51, %v2535_v32  ;;  %v3382_v26 = vadd.f32 %v5516_v49, %v3381_v24 }
 0x30a   : > { %3502 = vst [vmem:[%s5526_s10 + $0x10] sm:$0xff] %v4423_v2 }
 0x30b   : > { %v3188_v61 = vadd.f32 %v3129_v55, %v2928_v58  ;;  %4424 = vtanh.f32 %v3382_v26 }
 0x30d   : > { %v3228_v18 = vadd.f32 %v5393_v59, %v3188_v61 }
 0x30e   : > { %v2479_v42 = vpop.f32.mrf.mxu2 }
 0x30f   : > { %v2872_v14 = vpop.f32.mrf.mxu3  ;;  %v3264_v56 = vmax.f32 %v3228_v18, 0.0  ;;  %v2536_v40 = vadd.f32 %v2479_v42, %v5273_v30 }
 0x310   : > { %v3384_v6 = vpop.f32.mrf.mxu1  ;;  %v3134_v21 = vpop.f32.mrf.mxu0 }
 0x311   : > { %v4425_v44 = vpop.eup %4424  ;;  %v3385_v28 = vadd.f32 %v5516_v49, %v3384_v6  ;;  %v3289_v53 = vpack.c.bf16 %v3264_v56, %v3263_v7  ;;  %v2929_v38 = vadd.f32 %v2872_v14, %v2536_v40 }
 0x312   : > { %3503 = vst [vmem:[%s5526_s10 + $0x18] sm:$0xff] %v4425_v44 }
 0x313   : > { %4426 = vtanh.f32 %v3385_v28  ;;  %3423 = vmatmul.bf16.gmra.mxu1 %v3289_v53  ;;  %v3189_v62 = vadd.f32 %v3132_v60, %v2929_v38 }
 0x315   : > { %v3229_v9 = vadd.f32 %v5393_v59, %v3189_v62 }
 0x316   : > { %v2481_v45 = vpop.f32.mrf.mxu2 }
 0x317   : > { %v2874_v34 = vpop.f32.mrf.mxu3  ;;  %v2537_v37 = vadd.f32 %v2481_v45, %v2152_v29  ;;  %v3265_v27 = vmax.f32 %v3229_v9, 0.0 }
 0x318   : > { %v3386_v25 = vpop.f32.mrf.mxu1  ;;  %v3137_v5 = vpop.f32.mrf.mxu0 }
 0x319   : > { %v4427_v30 = vpop.eup %4426  ;;  %v2930_v17 = vadd.f32 %v2874_v34, %v2537_v37  ;;  %v3387_v22 = vadd.f32 %v5516_v49, %v3386_v25 }
 0x31a   : > { %3504 = vst [vmem:[%s5526_s10 + $0x20] sm:$0xff] %v4427_v30 }
 0x31b   : > { %v3190_v31 = vadd.f32 %v3134_v21, %v2930_v17  ;;  %4428 = vtanh.f32 %v3387_v22  ;;  %v5661_v21 = vld [vmem:[#allocation5_spill] sm:$0xff] }
 0x31c   : > { %v2156_v53 = vadd.f32 %v5661_v21, %v5322_v47 }
 0x31d   : > { %v3230_v16 = vadd.f32 %v5393_v59, %v3190_v31 }
 0x31e   : > { %v2484_v35 = vpop.f32.mrf.mxu2 }
 0x31f   : > { %v2877_v57 = vpop.f32.mrf.mxu3  ;;  %v3266_v3 = vmax.f32 %v3230_v16, 0.0  ;;  %v2538_v52 = vadd.f32 %v2484_v35, %v5291_v50 }
 0x320   : > { %v3389_v33 = vpop.f32.mrf.mxu1  ;;  %v3139_v55 = vpop.f32.mrf.mxu0 }
 0x321   : > { %v4429_v23 = vpop.eup %4428  ;;  %v3390_v41 = vadd.f32 %v5516_v49, %v3389_v33  ;;  %v3290_v8 = vpack.c.bf16 %v3266_v3, %v3265_v27  ;;  %v2931_v63 = vadd.f32 %v2877_v57, %v2538_v52 }
 0x322   : > { %3505 = vst [vmem:[%s5526_s10 + $0x28] sm:$0xff] %v4429_v23 }
 0x323   : > { %4430 = vtanh.f32 %v3390_v41  ;;  %3428 = vmatmul.bf16.gmra.mxu1 %v3290_v8  ;;  %v3191_v36 = vadd.f32 %v3137_v5, %v2931_v63  ;;  %v2158_v41 = vadd.f32 %v5327_v20, %v5340_v48 }
 0x325   : > { %v3231_v60 = vadd.f32 %v5393_v59, %v3191_v36 }
 0x326   : > { %v2486_v13 = vpop.f32.mrf.mxu2 }
 0x327   : > { %v2879_v51 = vpop.f32.mrf.mxu3  ;;  %v2539_v32 = vadd.f32 %v2486_v13, %v2154_v19  ;;  %v3267_v39 = vmax.f32 %v3231_v60, 0.0  ;;  %v5662_v60 = vld [vmem:[#allocation7_spill] sm:$0xff] }
 0x328   : > { %v3391_v24 = vpop.f32.mrf.mxu1  ;;  %v3142_v26 = vpop.f32.mrf.mxu0 }
 0x329   : > { %v4431_v50 = vpop.eup %4430  ;;  %v2932_v2 = vadd.f32 %v2879_v51, %v2539_v32  ;;  %v3392_v58 = vadd.f32 %v5516_v49, %v3391_v24 }
 0x32a   : > { %3506 = vst [vmem:[%s5526_s10 + $0x30] sm:$0xff] %v4431_v50 }
 0x32b   : > { %v3192_v11 = vadd.f32 %v3139_v55, %v2932_v2  ;;  %4432 = vtanh.f32 %v3392_v58 }
 0x32d   : > { %v3232_v61 = vadd.f32 %v5393_v59, %v3192_v11 }
 0x32e   : > { %v2489_v18 = vpop.f32.mrf.mxu2 }
 0x32f   : > { %v2882_v0 = vpop.f32.mrf.mxu3  ;;  %v3268_v42 = vmax.f32 %v3232_v61, 0.0  ;;  %v2540_v14 = vadd.f32 %v2489_v18, %v5312_v43 }
 0x330   : > { %v3394_v7 = vpop.f32.mrf.mxu1  ;;  %v3144_v6 = vpop.f32.mrf.mxu0 }
 0x331   : > { %v4433_v56 = vpop.eup %4432  ;;  %v3395_v40 = vadd.f32 %v5516_v49, %v3394_v7  ;;  %v3291_v44 = vpack.c.bf16 %v3268_v42, %v3267_v39  ;;  %v2933_v28 = vadd.f32 %v2882_v0, %v2540_v14  ;;  %v5663_v7 = vld [vmem:[#allocation8_spill] sm:$0xff] }
 0x332   : > { %3507 = vst [vmem:[%s5526_s10 + $0x38] sm:$0xff] %v4433_v56  ;;  %v5664_v56 = vld [vmem:[#allocation6_spill] sm:$0xff] }
 0x333   : > { %4434 = vtanh.f32 %v3395_v40  ;;  %3433 = vmatmul.bf16.gmra.mxu1 %v3291_v44  ;;  %v3193_v45 = vadd.f32 %v3142_v26, %v2933_v28  ;;  %v2160_v40 = vadd.f32 %v5664_v56, %v5663_v7 }
 0x335   : > { %v3233_v17 = vadd.f32 %v5393_v59, %v3193_v45 }
 0x336   : > { %v2491_v38 = vpop.f32.mrf.mxu2 }
 0x337   : > { %v2884_v29 = vpop.f32.mrf.mxu3  ;;  %v2541_v34 = vadd.f32 %v2491_v38, %v2156_v53  ;;  %v3269_v31 = vmax.f32 %v3233_v17, 0.0 }
 0x338   : > { %v3396_v62 = vpop.f32.mrf.mxu1  ;;  %v3147_v30 = vpop.f32.mrf.mxu0 }
 0x339   : > { %v4435_v43 = vpop.eup %4434  ;;  %v2934_v37 = vadd.f32 %v2884_v29, %v2541_v34  ;;  %v3397_v25 = vadd.f32 %v5516_v49, %v3396_v62 }
 0x33a   : > { %3508 = vst [vmem:[%s5526_s10 + $0x40] sm:$0xff] %v4435_v43 }
 0x33b   : > { %v3194_v22 = vadd.f32 %v3144_v6, %v2934_v37  ;;  %4436 = vtanh.f32 %v3397_v25 }
 0x33d   : > { %v3234_v5 = vadd.f32 %v5393_v59, %v3194_v22 }
 0x33e   : > { %v2494_v9 = vpop.f32.mrf.mxu2 }
 0x33f   : > { %v2887_v47 = vpop.f32.mrf.mxu3  ;;  %v3270_v16 = vmax.f32 %v3234_v5, 0.0  ;;  %v2542_v35 = vadd.f32 %v2494_v9, %v5330_v15 }
 0x340   : > { %v3399_v57 = vpop.f32.mrf.mxu1  ;;  %v3149_v52 = vpop.f32.mrf.mxu0 }
 0x341   : > { %v4437_v27 = vpop.eup %4436  ;;  %v3400_v3 = vadd.f32 %v5516_v49, %v3399_v57  ;;  %v3292_v33 = vpack.c.bf16 %v3270_v16, %v3269_v31  ;;  %v2935_v23 = vadd.f32 %v2887_v47, %v2542_v35  ;;  %v2162_v57 = vadd.f32 %v5367_v12, %v5371_v10 }
 0x342   : > { %3509 = vst [vmem:[%s5526_s10 + $0x48] sm:$0xff] %v4437_v27 }
 0x343   : > { %4438 = vtanh.f32 %v3400_v3  ;;  %3438 = vmatmul.bf16.gmra.mxu1 %v3292_v33  ;;  %v3195_v63 = vadd.f32 %v3147_v30, %v2935_v23 }
 0x345   : > { %v3235_v24 = vadd.f32 %v5393_v59, %v3195_v63 }
 0x346   : > { %v2496_v55 = vpop.f32.mrf.mxu2 }
 0x347   : > { %v2889_v8 = vpop.f32.mrf.mxu3  ;;  %v2543_v19 = vadd.f32 %v2496_v55, %v2158_v41  ;;  %v3271_v48 = vmax.f32 %v3235_v24, 0.0 }
 0x348   : > { %v3401_v13 = vpop.f32.mrf.mxu1  ;;  %v3152_v32 = vpop.f32.mrf.mxu0 }
 0x349   : > { %v4439_v15 = vpop.eup %4438  ;;  %v2936_v51 = vadd.f32 %v2889_v8, %v2543_v19  ;;  %v3402_v36 = vadd.f32 %v5516_v49, %v3401_v13 }
 0x34a   : > { %3510 = vst [vmem:[%s5526_s10 + $0x50] sm:$0xff] %v4439_v15 }
 0x34b   : > { %v3196_v50 = vadd.f32 %v3149_v52, %v2936_v51  ;;  %4440 = vtanh.f32 %v3402_v36 }
 0x34d   : > { %v3236_v2 = vadd.f32 %v5393_v59, %v3196_v50 }
 0x34e   : > { %v2499_v58 = vpop.f32.mrf.mxu2 }
 0x34f   : > { %v2892_v20 = vpop.f32.mrf.mxu3  ;;  %v3272_v26 = vmax.f32 %v3236_v2, 0.0  ;;  %v2544_v11 = vadd.f32 %v2499_v58, %v5662_v60 }
 0x350   : > { %v3404_v61 = vpop.f32.mrf.mxu1  ;;  %v3154_v39 = vpop.f32.mrf.mxu0 }
 0x351   : > { %v4441_v18 = vpop.eup %4440  ;;  %v3405_v0 = vadd.f32 %v5516_v49, %v3404_v61  ;;  %v3293_v42 = vpack.c.bf16 %v3272_v26, %v3271_v48  ;;  %v2937_v14 = vadd.f32 %v2892_v20, %v2544_v11 }
 0x352   : > { %3511 = vst [vmem:[%s5526_s10 + $0x58] sm:$0xff] %v4441_v18 }
 0x353   : > { %4442 = vtanh.f32 %v3405_v0  ;;  %3443 = vmatmul.bf16.gmra.mxu1 %v3293_v42  ;;  %v3197_v28 = vadd.f32 %v3152_v32, %v2937_v14  ;;  %v4499_v42 = vld [vmem:[%s5647_s2] ss:$0 sm:$0xff] }
 0x355   : > { %v3237_v34 = vadd.f32 %v5393_v59, %v3197_v28 }
 0x356   : > { %v2501_v6 = vpop.f32.mrf.mxu2 }
 0x357   : > { %v2894_v44 = vpop.f32.mrf.mxu3  ;;  %v2545_v21 = vadd.f32 %v2501_v6, %v2160_v40  ;;  %v3273_v17 = vmax.f32 %v3237_v34, 0.0 }
 0x358   : > { %v3406_v53 = vpop.f32.mrf.mxu1  ;;  %v3157_v43 = vpop.f32.mrf.mxu0 }
 0x359   : > { %v4443_v38 = vpop.eup %4442  ;;  %v2938_v29 = vadd.f32 %v2894_v44, %v2545_v21  ;;  %v3407_v45 = vadd.f32 %v5516_v49, %v3406_v53 }
 0x35a   : > { %3512 = vst [vmem:[%s5526_s10 + $0x60] sm:$0xff] %v4443_v38 }
 0x35b   : > { %v3198_v62 = vadd.f32 %v3154_v39, %v2938_v29  ;;  %4444 = vtanh.f32 %v3407_v45 }
 0x35d   : > { %v3238_v37 = vadd.f32 %v5393_v59, %v3198_v62 }
 0x35e   : > { %v2504_v25 = vpop.f32.mrf.mxu2 }
 0x35f   : > { %v2897_v30 = vpop.f32.mrf.mxu3  ;;  %v3274_v22 = vmax.f32 %v3238_v37, 0.0  ;;  %v2546_v5 = vadd.f32 %v2504_v25, %v5362_v4 }
 0x360   : > { %v3409_v9 = vpop.f32.mrf.mxu1  ;;  %v3159_v27 = vpop.f32.mrf.mxu0 }
 0x361   : > { %v4445_v47 = vpop.eup %4444  ;;  %v3410_v31 = vadd.f32 %v5516_v49, %v3409_v9  ;;  %v3294_v16 = vpack.c.bf16 %v3274_v22, %v3273_v17  ;;  %v2939_v35 = vadd.f32 %v2897_v30, %v2546_v5 }
 0x362   : > { %3513 = vst [vmem:[%s5526_s10 + $0x68] sm:$0xff] %v4445_v47 }
 0x363   : > { %4446 = vtanh.f32 %v3410_v31  ;;  %3448 = vmatmul.bf16.gmra.mxu1 %v3294_v16  ;;  %v3199_v33 = vadd.f32 %v3157_v43, %v2939_v35 }
 0x365   : > { %v3239_v63 = vadd.f32 %v5393_v59, %v3199_v33 }
 0x366   : > { %v2506_v3 = vpop.f32.mrf.mxu2 }
 0x367   : > { %v2899_v52 = vpop.f32.mrf.mxu3  ;;  %v2547_v23 = vadd.f32 %v2506_v3, %v2162_v57  ;;  %v3275_v10 = vmax.f32 %v3239_v63, 0.0 }
 0x368   : > { %v3411_v41 = vpop.f32.mrf.mxu1  ;;  %v3162_v32 = vpop.f32.mrf.mxu0 }
 0x369   : > { %v4447_v4 = vpop.eup %4446  ;;  %v2940_v55 = vadd.f32 %v2899_v52, %v2547_v23  ;;  %v3412_v8 = vadd.f32 %v5516_v49, %v3411_v41 }
 0x36a   : > { %3514 = vst [vmem:[%s5526_s10 + $0x70] sm:$0xff] %v4447_v4 }
 0x36b   : > { %v3200_v19 = vadd.f32 %v3159_v27, %v2940_v55  ;;  %4448 = vtanh.f32 %v3412_v8 }
 0x36d   : > { %v3240_v13 = vadd.f32 %v5393_v59, %v3200_v19  ;;  %v2164_v59 = vadd.f32 %v5506_v46, %v5383_v54 }
 0x36e   : > { %v2509_v15 = vpop.f32.mrf.mxu2 }
 0x36f   : > { %v2902_v12 = vpop.f32.mrf.mxu3  ;;  %v3276_v51 = vmax.f32 %v3240_v13, 0.0  ;;  %v2548_v36 = vadd.f32 %v2509_v15, %v5374_v1 }
 0x370   : > { %v3414_v24 = vpop.f32.mrf.mxu1  ;;  %v3164_v39 = vpop.f32.mrf.mxu0 }
 0x371   : > { %v4449_v50 = vpop.eup %4448  ;;  %v3415_v2 = vadd.f32 %v5516_v49, %v3414_v24  ;;  %v3295_v58 = vpack.c.bf16 %v3276_v51, %v3275_v10  ;;  %v2941_v20 = vadd.f32 %v2902_v12, %v2548_v36 }
 0x372   : > { %3515 = vst [vmem:[%s5526_s10 + $0x78] sm:$0xff] %v4449_v50 }
 0x373   : > { %4450 = vtanh.f32 %v3415_v2  ;;  %3453 = vmatmul.bf16.gmra.mxu1 %v3295_v58  ;;  %v3201_v26 = vadd.f32 %v3162_v32, %v2941_v20 }
 0x375   : > { %v3241_v14 = vadd.f32 %v4499_v42, %v3201_v26 }
 0x376   : > { %v2511_v48 = vpop.f32.mrf.mxu2 }
 0x377   : > { %v2549_v60 = vadd.f32 %v2511_v48, %v2164_v59  ;;  %v2904_v11 = vpop.f32.mrf.mxu3  ;;  %v3277_v46 = vmax.f32 %v3241_v14, 0.0 }
 0x378   : > { %v3416_v61 = vpop.f32.mrf.mxu1 }
 0x379   : > { %v4451_v1 = vpop.eup %4450  ;;  %v2942_v18 = vadd.f32 %v2904_v11, %v2549_v60  ;;  %v3417_v0 = vadd.f32 %v5516_v49, %v3416_v61 }
 0x37a   : > { %3516 = vst [vmem:[%s5526_s10 + $0x80] sm:$0xff] %v4451_v1 }
 0x37b   : > { %v3202_v7 = vadd.f32 %v3164_v39, %v2942_v18  ;;  %4452 = vtanh.f32 %v3417_v0 }
 0x37d   : > { %v3242_v54 = vadd.f32 %v4499_v42, %v3202_v7 }
 0x37f   : > { %v3278_v56 = vmax.f32 %v3242_v54, 0.0 }
 0x380   : > { %v3419_v40 = vpop.f32.mrf.mxu1 }
 0x381   : > { %v4453_v6 = vpop.eup %4452  ;;  %v3420_v44 = vadd.f32 %v5516_v49, %v3419_v40  ;;  %v3296_v28 = vpack.c.bf16 %v3278_v56, %v3277_v46 }
 0x382   : > { %3517 = vst [vmem:[%s5526_s10 + $0x88] sm:$0xff] %v4453_v6 }
 0x383   : > { %4454 = vtanh.f32 %v3420_v44  ;;  %3458 = vmatmul.bf16.gmra.mxu1 %v3296_v28 }
 0x388   : > { %v3421_v21 = vpop.f32.mrf.mxu1 }
 0x389   : > { %v4455_v53 = vpop.eup %4454  ;;  %v3422_v38 = vadd.f32 %v5516_v49, %v3421_v21 }
 0x38a   : > { %3518 = vst [vmem:[%s5526_s10 + $0x90] sm:$0xff] %v4455_v53 }
 0x38b   : > { %4456 = vtanh.f32 %v3422_v38 }
 0x390   : > { %v3424_v29 = vpop.f32.mrf.mxu1 }
 0x391   : > { %v4457_v45 = vpop.eup %4456  ;;  %v3425_v34 = vadd.f32 %v5516_v49, %v3424_v29 }
 0x392   : > { %3519 = vst [vmem:[%s5526_s10 + $0x98] sm:$0xff] %v4457_v45 }
 0x393   : > { %4458 = vtanh.f32 %v3425_v34 }
 0x398   : > { %v3426_v62 = vpop.f32.mrf.mxu1 }
 0x399   : > { %v4459_v43 = vpop.eup %4458  ;;  %v3427_v37 = vadd.f32 %v5516_v49, %v3426_v62 }
 0x39a   : > { %3520 = vst [vmem:[%s5526_s10 + $0xa0] sm:$0xff] %v4459_v43 }
 0x39b   : > { %4460 = vtanh.f32 %v3427_v37 }
 0x3a0   : > { %v3429_v25 = vpop.f32.mrf.mxu1 }
 0x3a1   : > { %v4461_v30 = vpop.eup %4460  ;;  %v3430_v17 = vadd.f32 %v5516_v49, %v3429_v25 }
 0x3a2   : > { %3521 = vst [vmem:[%s5526_s10 + $0xa8] sm:$0xff] %v4461_v30 }
 0x3a3   : > { %4462 = vtanh.f32 %v3430_v17 }
 0x3a8   : > { %v3431_v22 = vpop.f32.mrf.mxu1 }
 0x3a9   : > { %v4463_v5 = vpop.eup %4462  ;;  %v3432_v9 = vadd.f32 %v5516_v49, %v3431_v22 }
 0x3aa   : > { %3522 = vst [vmem:[%s5526_s10 + $0xb0] sm:$0xff] %v4463_v5 }
 0x3ab   : > { %4464 = vtanh.f32 %v3432_v9 }
 0x3b0   : > { %v3434_v47 = vpop.f32.mrf.mxu1 }
 0x3b1   : > { %v4465_v31 = vpop.eup %4464  ;;  %v3435_v16 = vadd.f32 %v5516_v49, %v3434_v47 }
 0x3b2   : > { %3523 = vst [vmem:[%s5526_s10 + $0xb8] sm:$0xff] %v4465_v31 }
 0x3b3   : > { %4466 = vtanh.f32 %v3435_v16 }
 0x3b8   : > { %v3436_v35 = vpop.f32.mrf.mxu1 }
 0x3b9   : > { %v4467_v57 = vpop.eup %4466  ;;  %v3437_v27 = vadd.f32 %v5516_v49, %v3436_v35 }
 0x3ba   : > { %3524 = vst [vmem:[%s5526_s10 + $0xc0] sm:$0xff] %v4467_v57 }
 0x3bb   : > { %4468 = vtanh.f32 %v3437_v27 }
 0x3c0   : > { %v3439_v3 = vpop.f32.mrf.mxu1 }
 0x3c1   : > { %v4469_v52 = vpop.eup %4468  ;;  %v3440_v33 = vadd.f32 %v5516_v49, %v3439_v3 }
 0x3c2   : > { %3525 = vst [vmem:[%s5526_s10 + $0xc8] sm:$0xff] %v4469_v52 }
 0x3c3   : > { %4470 = vtanh.f32 %v3440_v33 }
 0x3c8   : > { %v3441_v23 = vpop.f32.mrf.mxu1 }
 0x3c9   : > { %v4471_v41 = vpop.eup %4470  ;;  %v3442_v4 = vadd.f32 %v5516_v49, %v3441_v23 }
 0x3ca   : > { %3526 = vst [vmem:[%s5526_s10 + $0xd0] sm:$0xff] %v4471_v41 }
 0x3cb   : > { %4472 = vtanh.f32 %v3442_v4 }
 0x3d0   : > { %v3444_v55 = vpop.f32.mrf.mxu1 }
 0x3d1   : > { %v4473_v8 = vpop.eup %4472  ;;  %v3445_v63 = vadd.f32 %v5516_v49, %v3444_v55 }
 0x3d2   : > { %3527 = vst [vmem:[%s5526_s10 + $0xd8] sm:$0xff] %v4473_v8 }
 0x3d3   : > { %4474 = vtanh.f32 %v3445_v63 }
 0x3d8   : > { %v3446_v19 = vpop.f32.mrf.mxu1 }
 0x3d9   : > { %v4475_v13 = vpop.eup %4474  ;;  %v3447_v15 = vadd.f32 %v5516_v49, %v3446_v19 }
 0x3da   : > { %3528 = vst [vmem:[%s5526_s10 + $0xe0] sm:$0xff] %v4475_v13 }
 0x3db   : > { %4476 = vtanh.f32 %v3447_v15 }
 0x3e0   : > { %v3449_v12 = vpop.f32.mrf.mxu1 }
 0x3e1   : > { %v4477_v10 = vpop.eup %4476  ;;  %v3450_v51 = vadd.f32 %v5516_v49, %v3449_v12 }
 0x3e2   : > { %3529 = vst [vmem:[%s5526_s10 + $0xe8] sm:$0xff] %v4477_v10 }
 0x3e3   : > { %4478 = vtanh.f32 %v3450_v51 }
 0x3e8   : > { %v3451_v36 = vpop.f32.mrf.mxu1 }
 0x3e9   : > { %v4479_v32 = vpop.eup %4478  ;;  %v3452_v24 = vadd.f32 %v5516_v49, %v3451_v36 }
 0x3ea   : > { %3530 = vst [vmem:[%s5526_s10 + $0xf0] sm:$0xff] %v4479_v32 }
 0x3eb   : > { %4480 = vtanh.f32 %v3452_v24 }
 0x3f0   : > { %v3454_v50 = vpop.f32.mrf.mxu1 }
 0x3f1   : > { %v4481_v2 = vpop.eup %4480  ;;  %v3455_v58 = vadd.f32 %v5516_v49, %v3454_v50 }
 0x3f2   : > { %3531 = vst [vmem:[%s5526_s10 + $0xf8] sm:$0xff] %v4481_v2 }
 0x3f3   : > { %4482 = vtanh.f32 %v3455_v58 }
 0x3f8   : > { %v3456_v20 = vpop.f32.mrf.mxu1 }
 0x3f9   : > { %v4483_v59 = vpop.eup %4482  ;;  %v3457_v48 = vadd.f32 %v5516_v49, %v3456_v20 }
 0x3fa   : > { %3532 = vst [vmem:[%s5526_s10 + $0x100] sm:$0xff] %v4483_v59 }
 0x3fb   : > { %4484 = vtanh.f32 %v3457_v48 }
 0x400   : > { %v3459_v26 = vpop.f32.mrf.mxu1 }
 0x401   : > { %v4485_v60 = vpop.eup %4484  ;;  %v3460_v11 = vadd.f32 %v5516_v49, %v3459_v26 }
 0x402   : > { %3533 = vst [vmem:[%s5526_s10 + $0x108] sm:$0xff] %v4485_v60 }
 0x403   : > { %4486 = vtanh.f32 %v3460_v11 }
 0x408   : > { %v3461_v61 = vpop.f32.mrf.mxu1 }
 0x409   : > { %v4487_v1 = vpop.eup %4486  ;;  %v3462_v18 = vadd.f32 %v5516_v49, %v3461_v61 }
 0x40a   : > { %3534 = vst [vmem:[%s5526_s10 + $0x110] sm:$0xff] %v4487_v1 }
 0x40b   : > { %4488 = vtanh.f32 %v3462_v18 }
 0x411   : > { %v4489_v0 = vpop.eup %4488 }
 0x412   : > { %3535 = vst [vmem:[%s5526_s10 + $0x118] sm:$0xff] %v4489_v0 }
 0x413 PF: > { %s15_s18 = sadd.s32 1, %s4506_s18  }
 0x414   : > { %p12_p4 = scmp.ge.s32.totalorder %s15_s18, 4  }
 0x416   :  { %14 = sbr.rel (!%p12_p4) target bundleno = 1 (0x1), region = 78 }

</bundles_post_ra>
